<compile_context>
chip_gen: v7x
topology: tpu7x:2x2x1
jax: 0.10.0
libtpu: 0.0.40
codegen_flags: <defaults>
</compile_context>

<pallas_src>
import jax
import jax.numpy as jnp
from jax import lax
from jax.experimental import pallas as pl
from jax.experimental.pallas import tpu as pltpu

_LPAD = 8  # left pad of the scratch W axis -> sublane-aligned interior stores


# ----------------------------------------------------------------------------
# Kernel
# ----------------------------------------------------------------------------
def _make_kernel(H, W, out_stride, conv_shortcut, lpad):
    """Per-batch-element kernel body.  `out_stride` is the stride applied
    in-kernel; the output tile is (Ho, Wo, D) with Ho = (H-1)//out_stride + 1."""
    Ho = (H - 1) // out_stride + 1
    Wo = (W - 1) // out_stride + 1

    def _conv3x3(src_ref, w_ref, rows_out, cols_out, s):
        """3x3 conv of a zero-padded (H+2, lpad+W+1, C) f32 scratch against
        (3, 3*C, D) bf16 weights, evaluated at stride-`s` output positions.
        Three K=3*C matmuls (one per kernel row), f32 accumulation."""
        c = src_ref.shape[-1]
        d = w_ref.shape[-1]
        span_r = s * (rows_out - 1) + 1
        span_c = s * (cols_out - 1) + 1
        acc = jnp.zeros((rows_out * cols_out, d), jnp.float32)
        for dy in range(3):                         # static -> unrolled
            rows = src_ref[dy:dy + span_r]                      # (span_r, Wp, C)
            if s > 1:
                rows = rows[::s]                                # (rows_out, Wp, C)
            taps = []
            for dx in range(3):
                t = rows[:, lpad - 1 + dx:lpad - 1 + dx + span_c, :]
                if s > 1:
                    t = t[:, ::s, :]                            # (rows_out, cols_out, C)
                taps.append(t)
            patch = jnp.concatenate(taps, axis=-1)              # (rows_out, cols_out, 3C)
            patch = patch.reshape(rows_out * cols_out, 3 * c).astype(jnp.bfloat16)
            acc = acc + jnp.dot(patch, w_ref[dy],
                                preferred_element_type=jnp.float32)
        return acc

    def _zero_border(ref):
        # Only the thin conv borders must be zero; the interior is fully
        # overwritten every step.  Zeroed every step (cheap: O(H*C + W*C))
        # because a pl.when(program_id==0) one-time init would never run on a
        # second megacore TensorCore under "parallel" grid splitting.
        wp, c = ref.shape[1], ref.shape[2]
        zrow = jnp.zeros((1, wp, c), ref.dtype)
        ref[0:1] = zrow
        ref[H + 1:H + 2] = zrow
        zcol = jnp.zeros((H, 1, c), ref.dtype)
        ref[1:H + 1, lpad - 1:lpad, :] = zcol
        ref[1:H + 1, lpad + W:lpad + W + 1, :] = zcol

    def _body(x_ref, scale1_ref, bias1_ref, w1_ref, alpha_ref, w2_ref,
              scale2_ref, bias2_ref, sc_refs, o_ref, xbn_ref, hpad_ref):
        d = o_ref.shape[-1]
        cin = x_ref.shape[-1]

        _zero_border(xbn_ref)
        _zero_border(hpad_ref)

        # Single f32 materialization of the input tile.
        xf = x_ref[...].astype(jnp.float32)                     # (H, W, Cin)

        # BN1 (folded scale/bias) -> sublane-aligned interior of padded scratch.
        xbn_ref[1:H + 1, lpad:lpad + W, :] = xf * scale1_ref[...] + bias1_ref[...]

        # Conv1 3x3, stride 1, pad 1  ->  PReLU (per-channel alpha) in f32.
        h = _conv3x3(xbn_ref, w1_ref, H, W, 1)                  # (H*W, D) f32
        h = jnp.where(h > 0, h, alpha_ref[...] * h)
        hpad_ref[1:H + 1, lpad:lpad + W, :] = h.reshape(H, W, d)

        # Conv2 3x3 (stride folded into the tap gathers) + BN2, computed only
        # at the Ho x Wo output positions.
        res = _conv3x3(hpad_ref, w2_ref, Ho, Wo, out_stride)    # (Ho*Wo, D) f32
        res = res * scale2_ref[...] + bias2_ref[...]

        # Shortcut branch at the strided positions.
        xs = xf[::out_stride, ::out_stride, :] if out_stride > 1 else xf
        if conv_shortcut:
            wsc_ref, ssc_ref, bsc_ref = sc_refs
            sc = jnp.dot(xs.reshape(Ho * Wo, cin).astype(jnp.bfloat16),
                         wsc_ref[...], preferred_element_type=jnp.float32)
            sc = sc * ssc_ref[...] + bsc_ref[...]
        else:
            # MaxPool2d(kernel=1, stride) is pure subsampling.
            sc = xs.reshape(Ho * Wo, d)

        o_ref[...] = (res + sc).reshape(Ho, Wo, d).astype(o_ref.dtype)

    if conv_shortcut:
        def kernel(x_ref, s1, b1, w1, a, w2, s2, b2, wsc, ssc, bsc,
                   o_ref, xbn_ref, hpad_ref):
            _body(x_ref, s1, b1, w1, a, w2, s2, b2, (wsc, ssc, bsc),
                  o_ref, xbn_ref, hpad_ref)
    else:
        def kernel(x_ref, s1, b1, w1, a, w2, s2, b2,
                   o_ref, xbn_ref, hpad_ref):
            _body(x_ref, s1, b1, w1, a, w2, s2, b2, None,
                  o_ref, xbn_ref, hpad_ref)
    return kernel


# ----------------------------------------------------------------------------
# Wrapper
# ----------------------------------------------------------------------------
def _bn_fold(gamma, beta, mean, var, eps=1e-5):
    # TODO(synk): BatchNorm is implemented in inference mode (folded running
    # stats); training-mode batch statistics are not computed in-kernel.
    scale = gamma * lax.rsqrt(var + eps)
    return scale, beta - mean * scale


def bottleneck_ir(x_nchw, params, stride):
    """bottleneck_IR forward.  x_nchw: (N, Cin, H, W).  Params use PyTorch
    layouts: conv weights OIHW, BN params (gamma, beta, mean, var), PReLU
    weight 'alpha' of shape (depth,)."""
    N, Cin, H, W = x_nchw.shape
    D = params["w1"].shape[0]
    conv_shortcut = (Cin != D)            # mirrors the PyTorch module's choice

    # NHWC internally: channels on the 128-lane axis (lane-dense I/O).
    # TODO(synk): pad the 64-channel IR stages to 128 lanes (or fold 2 batch
    # elems onto the lane axis) for fully lane-dense stores.
    x = jnp.transpose(x_nchw, (0, 2, 3, 1))

    s1, b1 = _bn_fold(*params["bn1"])
    s2, b2 = _bn_fold(*params["bn2"])
    scale1, bias1 = s1.reshape(1, Cin), b1.reshape(1, Cin)
    scale2, bias2 = s2.reshape(1, D), b2.reshape(1, D)
    alpha = params["alpha"].reshape(1, D).astype(jnp.float32)

    # OIHW -> (ky, kx, ci, co) -> (3, 3*Cin, D): one K=3*Cin matmul RHS per
    # kernel row; bf16 MXU operands (accumulation stays f32).
    w1 = jnp.transpose(params["w1"], (2, 3, 1, 0)).reshape(3, 3 * Cin, D)
    w2 = jnp.transpose(params["w2"], (2, 3, 1, 0)).reshape(3, 3 * D, D)
    w1, w2 = w1.astype(jnp.bfloat16), w2.astype(jnp.bfloat16)

    args = [x, scale1, bias1, w1, alpha, w2, scale2, bias2]
    if conv_shortcut:
        wsc = jnp.transpose(params["wsc"].reshape(D, Cin), (1, 0)).astype(jnp.bfloat16)
        ssc, bsc = _bn_fold(*params["bnsc"])
        args += [wsc, ssc.reshape(1, D), bsc.reshape(1, D)]

    # Generation-aware VMEM budget: 48 MiB where physical VMEM is 128 MiB
    # (v5e/v6e); ~40 MiB on 64 MiB parts (v7x).
    try:
        phys = int(getattr(pltpu.get_tpu_info(), "vmem_capacity_bytes",
                           128 * 1024 * 1024))
    except Exception:
        phys = 128 * 1024 * 1024
    vmem_limit = int(min(48 * 1024 * 1024, (phys * 5) // 8))

    def run(in_kernel_stride, single_buffer_consts):
        s_k = stride if in_kernel_stride else 1
        Ho = (H - 1) // s_k + 1
        Wo = (W - 1) // s_k + 1

        def cspec(shape):
            # Constant-index operands: single-buffered so Pallas does not
            # waste VMEM double-buffering blocks whose index never changes.
            if single_buffer_consts:
                return pl.BlockSpec(shape, lambda n: (0,) * len(shape),
                                    pipeline_mode=pl.Buffered(1))
            return pl.BlockSpec(shape, lambda n: (0,) * len(shape))

        in_specs = [
            pl.BlockSpec((pl.Squeezed(), H, W, Cin), lambda n: (n, 0, 0, 0)),
            cspec((1, Cin)), cspec((1, Cin)),
            cspec((3, 3 * Cin, D)),
            cspec((1, D)),
            cspec((3, 3 * D, D)),
            cspec((1, D)), cspec((1, D)),
        ]
        if conv_shortcut:
            in_specs += [cspec((Cin, D)), cspec((1, D)), cspec((1, D))]

        itemsize = jnp.dtype(x.dtype).itemsize
        flops = 2 * N * (H * W * 9 * Cin * D + Ho * Wo * 9 * D * D
                         + (Ho * Wo * Cin * D if conv_shortcut else 0))
        weight_bytes = 2 * (9 * Cin * D + 9 * D * D
                            + (Cin * D if conv_shortcut else 0))
        cost = pl.CostEstimate(
            flops=flops, transcendentals=0,
            bytes_accessed=N * (H * W * Cin + Ho * Wo * D) * itemsize
                           + weight_bytes)

        return pl.pallas_call(
            _make_kernel(H, W, s_k, conv_shortcut, _LPAD),
            out_shape=jax.ShapeDtypeStruct((N, Ho, Wo, D), x.dtype),
            grid_spec=pltpu.PrefetchScalarGridSpec(
                num_scalar_prefetch=0,
                grid=(N,),
                in_specs=in_specs,
                out_specs=pl.BlockSpec((pl.Squeezed(), Ho, Wo, D),
                                       lambda n: (n, 0, 0, 0)),
                scratch_shapes=[
                    pltpu.VMEM((H + 2, _LPAD + W + 1, Cin), jnp.float32),  # padded BN1(x)
                    pltpu.VMEM((H + 2, _LPAD + W + 1, D), jnp.float32),    # padded PReLU(h)
                ]),
            compiler_params=pltpu.CompilerParams(
                dimension_semantics=("parallel",),
                vmem_limit_bytes=vmem_limit),
            cost_estimate=cost,
        )(*args)

    # TODO(synk): add a spatial row-tile grid axis (with halo) for the large
    # 112x112 stages so the working set comfortably fits v7x's 64 MiB VMEM.
    try:
        out = run(True, True)                 # fully optimized path
    except Exception:
        # Conservative fallback (older jaxlib without pl.Buffered(1) or strided
        # value slicing): full-resolution compute + wrapper-side subsample.
        out = run(False, False)
        if stride > 1:
            out = out[:, ::stride, ::stride, :]

    return jnp.transpose(out, (0, 3, 1, 2))   # back to NCHW


# ----------------------------------------------------------------------------
# Pure-JAX reference (matches the PyTorch forward, eval-mode BN)
# ----------------------------------------------------------------------------
def bottleneck_ir_ref(x, params, stride):
    cin = x.shape[1]
    depth = params["w1"].shape[0]
    conv_shortcut = (cin != depth)
    dn = ("NCHW", "OIHW", "NCHW")

    s1, b1 = _bn_fold(*params["bn1"])
    y = x * s1[None, :, None, None] + b1[None, :, None, None]
    y = lax.conv_general_dilated(y, params["w1"], (1, 1), ((1, 1), (1, 1)),
                                 dimension_numbers=dn)
    a = params["alpha"][None, :, None, None]
    y = jnp.where(y > 0, y, a * y)
    y = lax.conv_general_dilated(y, params["w2"], (stride, stride),
                                 ((1, 1), (1, 1)), dimension_numbers=dn)
    s2, b2 = _bn_fold(*params["bn2"])
    y = y * s2[None, :, None, None] + b2[None, :, None, None]

    if conv_shortcut:
        sc = lax.conv_general_dilated(x, params["wsc"], (stride, stride),
                                      ((0, 0), (0, 0)), dimension_numbers=dn)
        ssc, bsc = _bn_fold(*params["bnsc"])
        sc = sc * ssc[None, :, None, None] + bsc[None, :, None, None]
    else:
        sc = x[:, :, ::stride, ::stride]
    return y + sc


# ----------------------------------------------------------------------------
# Demo / self-test
# ----------------------------------------------------------------------------
def _make_params(key, cin, depth):
    ks = jax.random.split(key, 8)

    def bn(k, c):
        k1, k2, k3, k4 = jax.random.split(k, 4)
        gamma = jax.random.uniform(k1, (c,), jnp.float32, 0.5, 1.5)
        beta = 0.1 * jax.random.normal(k2, (c,), jnp.float32)
        mean = 0.1 * jax.random.normal(k3, (c,), jnp.float32)
        var = jax.random.uniform(k4, (c,), jnp.float32, 0.5, 1.5)
        return (gamma, beta, mean, var)

    params = {
        "bn1": bn(ks[0], cin),
        "w1": 0.2 * jax.random.normal(ks[1], (depth, cin, 3, 3), jnp.float32),
        "alpha": jax.random.uniform(ks[2], (depth,), jnp.float32, 0.05, 0.5),
        "w2": 0.2 * jax.random.normal(ks[3], (depth, depth, 3, 3), jnp.float32),
        "bn2": bn(ks[4], depth),
    }
    if cin != depth:
        params["wsc"] = 0.2 * jax.random.normal(ks[5], (depth, cin, 1, 1),
                                                jnp.float32)
        params["bnsc"] = bn(ks[6], depth)
    return params


if __name__ == "__main__":
    key = jax.random.PRNGKey(0)
    kx1, kp1, kx2, kp2 = jax.random.split(key, 4)

    # bf16 MXU operands => compare against the f32 reference with a tolerance
    # that comfortably covers bf16 operand rounding but catches structural bugs.
    TOL = 5e-2

    # Config A: in_channel != depth -> Conv1x1+BN shortcut, stride 2.
    N, Cin, D, H, W, stride = 2, 4, 8, 16, 16, 2
    x = jax.random.normal(kx1, (N, Cin, H, W), jnp.float32)
    params = _make_params(kp1, Cin, D)
    out = bottleneck_ir(x, params, stride)
    jax.block_until_ready(out)
    ref = bottleneck_ir_ref(x, params, stride)
    assert out.shape == ref.shape, (out.shape, ref.shape)
    assert jnp.allclose(out, ref, atol=TOL, rtol=TOL), (
        "conv-shortcut mismatch", float(jnp.max(jnp.abs(out - ref))))

    # Config B: in_channel == depth -> MaxPool2d(1, stride) shortcut, stride 1.
    Cin2 = D2 = 8
    x2 = jax.random.normal(kx2, (N, Cin2, H, W), jnp.float32)
    params2 = _make_params(kp2, Cin2, D2)
    out2 = bottleneck_ir(x2, params2, 1)
    jax.block_until_ready(out2)
    ref2 = bottleneck_ir_ref(x2, params2, 1)
    assert out2.shape == ref2.shape, (out2.shape, ref2.shape)
    assert jnp.allclose(out2, ref2, atol=TOL, rtol=TOL), (
        "identity-shortcut mismatch", float(jnp.max(jnp.abs(out2 - ref2))))

    print("KERNEL_OK")
</pallas_src>

<mosaic_0001>
module attributes {stable_mosaic.version = 11 : i64} {
  func.func @kernel(%arg0: i32, %arg1: memref<1x16x16x4xf32, #tpu.memory_space<vmem>>, %arg2: memref<1x4xf32, #tpu.memory_space<vmem>>, %arg3: memref<1x4xf32, #tpu.memory_space<vmem>>, %arg4: memref<3x12x8xbf16, #tpu.memory_space<vmem>>, %arg5: memref<1x8xf32, #tpu.memory_space<vmem>>, %arg6: memref<3x24x8xbf16, #tpu.memory_space<vmem>>, %arg7: memref<1x8xf32, #tpu.memory_space<vmem>>, %arg8: memref<1x8xf32, #tpu.memory_space<vmem>>, %arg9: memref<4x8xbf16, #tpu.memory_space<vmem>>, %arg10: memref<1x8xf32, #tpu.memory_space<vmem>>, %arg11: memref<1x8xf32, #tpu.memory_space<vmem>>, %arg12: memref<1x16x16x8xf32, #tpu.memory_space<vmem>>, %arg13: memref<18x25x4xf32, #tpu.memory_space<vmem>>, %arg14: memref<18x25x8xf32, #tpu.memory_space<vmem>>) attributes {dimension_semantics = [#tpu.dimension_semantics<parallel>], iteration_bounds = array<i64: 2>, scalar_prefetch = 0 : i64, scratch_operands = 2 : i64, tpu.core_type = #tpu.core_type<tc>, window_params = [{transform_indices = @transform_0, window_bounds = array<i64: 1, 16, 16, 4>}, {pipeline_mode = #tpu.pipeline_mode<synchronous>, transform_indices = @transform_1, window_bounds = array<i64: 1, 4>}, {pipeline_mode = #tpu.pipeline_mode<synchronous>, transform_indices = @transform_2, window_bounds = array<i64: 1, 4>}, {pipeline_mode = #tpu.pipeline_mode<synchronous>, transform_indices = @transform_3, window_bounds = array<i64: 3, 12, 8>}, {pipeline_mode = #tpu.pipeline_mode<synchronous>, transform_indices = @transform_4, window_bounds = array<i64: 1, 8>}, {pipeline_mode = #tpu.pipeline_mode<synchronous>, transform_indices = @transform_5, window_bounds = array<i64: 3, 24, 8>}, {pipeline_mode = #tpu.pipeline_mode<synchronous>, transform_indices = @transform_6, window_bounds = array<i64: 1, 8>}, {pipeline_mode = #tpu.pipeline_mode<synchronous>, transform_indices = @transform_7, window_bounds = array<i64: 1, 8>}, {pipeline_mode = #tpu.pipeline_mode<synchronous>, transform_indices = @transform_8, window_bounds = array<i64: 4, 8>}, {pipeline_mode = #tpu.pipeline_mode<synchronous>, transform_indices = @transform_9, window_bounds = array<i64: 1, 8>}, {pipeline_mode = #tpu.pipeline_mode<synchronous>, transform_indices = @transform_10, window_bounds = array<i64: 1, 8>}, {transform_indices = @transform_11, window_bounds = array<i64: 1, 16, 16, 8>}]} {
    %cst = arith.constant 0.000000e+00 : f32
    %0 = vector.broadcast %cst : f32 to vector<1x25x4xf32>
    %c0 = arith.constant 0 : index
    %c0_0 = arith.constant 0 : index
    %c0_1 = arith.constant 0 : index
    %1 = vector.load %arg13[%c0, %c0_0, %c0_1] : memref<18x25x4xf32, #tpu.memory_space<vmem>>, vector<1x25x4xf32>
    tpu.vector_store %arg13[%c0, %c0_0, %c0_1], %0 {strides = array<i32>} : memref<18x25x4xf32, #tpu.memory_space<vmem>>, vector<1x25x4xf32>,
    %c17 = arith.constant 17 : index
    %c0_2 = arith.constant 0 : index
    %c0_3 = arith.constant 0 : index
    %2 = vector.load %arg13[%c17, %c0_2, %c0_3] : memref<18x25x4xf32, #tpu.memory_space<vmem>>, vector<1x25x4xf32>
    tpu.vector_store %arg13[%c17, %c0_2, %c0_3], %0 {strides = array<i32>} : memref<18x25x4xf32, #tpu.memory_space<vmem>>, vector<1x25x4xf32>,
    %cst_4 = arith.constant 0.000000e+00 : f32
    %3 = vector.broadcast %cst_4 : f32 to vector<16x1x4xf32>
    %c1 = arith.constant 1 : index
    %c7 = arith.constant 7 : index
    %c0_5 = arith.constant 0 : index
    %4 = vector.load %arg13[%c1, %c7, %c0_5] : memref<18x25x4xf32, #tpu.memory_space<vmem>>, vector<16x1x4xf32>
    tpu.vector_store %arg13[%c1, %c7, %c0_5], %3 {strides = array<i32>} : memref<18x25x4xf32, #tpu.memory_space<vmem>>, vector<16x1x4xf32>,
    %c1_6 = arith.constant 1 : index
    %c24 = arith.constant 24 : index
    %c0_7 = arith.constant 0 : index
    %5 = vector.load %arg13[%c1_6, %c24, %c0_7] : memref<18x25x4xf32, #tpu.memory_space<vmem>>, vector<16x1x4xf32>
    tpu.vector_store %arg13[%c1_6, %c24, %c0_7], %3 {strides = array<i32>} : memref<18x25x4xf32, #tpu.memory_space<vmem>>, vector<16x1x4xf32>,
    %cst_8 = arith.constant 0.000000e+00 : f32
    %6 = vector.broadcast %cst_8 : f32 to vector<1x25x8xf32>
    %c0_9 = arith.constant 0 : index
    %c0_10 = arith.constant 0 : index
    %c0_11 = arith.constant 0 : index
    %7 = vector.load %arg14[%c0_9, %c0_10, %c0_11] : memref<18x25x8xf32, #tpu.memory_space<vmem>>, vector<1x25x8xf32>
    tpu.vector_store %arg14[%c0_9, %c0_10, %c0_11], %6 {strides = array<i32>} : memref<18x25x8xf32, #tpu.memory_space<vmem>>, vector<1x25x8xf32>,
    %c17_12 = arith.constant 17 : index
    %c0_13 = arith.constant 0 : index
    %c0_14 = arith.constant 0 : index
    %8 = vector.load %arg14[%c17_12, %c0_13, %c0_14] : memref<18x25x8xf32, #tpu.memory_space<vmem>>, vector<1x25x8xf32>
    tpu.vector_store %arg14[%c17_12, %c0_13, %c0_14], %6 {strides = array<i32>} : memref<18x25x8xf32, #tpu.memory_space<vmem>>, vector<1x25x8xf32>,
    %cst_15 = arith.constant 0.000000e+00 : f32
    %9 = vector.broadcast %cst_15 : f32 to vector<16x1x8xf32>
    %c1_16 = arith.constant 1 : index
    %c7_17 = arith.constant 7 : index
    %c0_18 = arith.constant 0 : index
    %10 = vector.load %arg14[%c1_16, %c7_17, %c0_18] : memref<18x25x8xf32, #tpu.memory_space<vmem>>, vector<16x1x8xf32>
    tpu.vector_store %arg14[%c1_16, %c7_17, %c0_18], %9 {strides = array<i32>} : memref<18x25x8xf32, #tpu.memory_space<vmem>>, vector<16x1x8xf32>,
    %c1_19 = arith.constant 1 : index
    %c24_20 = arith.constant 24 : index
    %c0_21 = arith.constant 0 : index
    %11 = vector.load %arg14[%c1_19, %c24_20, %c0_21] : memref<18x25x8xf32, #tpu.memory_space<vmem>>, vector<16x1x8xf32>
    tpu.vector_store %arg14[%c1_19, %c24_20, %c0_21], %9 {strides = array<i32>} : memref<18x25x8xf32, #tpu.memory_space<vmem>>, vector<16x1x8xf32>,
    %c0_22 = arith.constant 0 : index
    %c0_23 = arith.constant 0 : index
    %c0_24 = arith.constant 0 : index
    %c0_25 = arith.constant 0 : index
    %12 = vector.load %arg1[%c0_22, %c0_23, %c0_24, %c0_25] : memref<1x16x16x4xf32, #tpu.memory_space<vmem>>, vector<1x16x16x4xf32>
    %13 = vector.shape_cast %12 : vector<1x16x16x4xf32> to vector<16x16x4xf32>
    %c0_26 = arith.constant 0 : index
    %c0_27 = arith.constant 0 : index
    %14 = vector.load %arg2[%c0_26, %c0_27] : memref<1x4xf32, #tpu.memory_space<vmem>>, vector<1x4xf32>
    %15 = vector.shape_cast %14 : vector<1x4xf32> to vector<1x1x4xf32>
    %16 = vector.broadcast %15 : vector<1x1x4xf32> to vector<16x16x4xf32>
    %17 = arith.mulf %13, %16 : vector<16x16x4xf32>
    %c0_28 = arith.constant 0 : index
    %c0_29 = arith.constant 0 : index
    %18 = vector.load %arg3[%c0_28, %c0_29] : memref<1x4xf32, #tpu.memory_space<vmem>>, vector<1x4xf32>
    %19 = vector.shape_cast %18 : vector<1x4xf32> to vector<1x1x4xf32>
    %20 = vector.broadcast %19 : vector<1x1x4xf32> to vector<16x16x4xf32>
    %21 = arith.addf %17, %20 : vector<16x16x4xf32>
    %c1_30 = arith.constant 1 : index
    %c8 = arith.constant 8 : index
    %c0_31 = arith.constant 0 : index
    %22 = vector.load %arg13[%c1_30, %c8, %c0_31] : memref<18x25x4xf32, #tpu.memory_space<vmem>>, vector<16x16x4xf32>
    tpu.vector_store %arg13[%c1_30, %c8, %c0_31], %21 {strides = array<i32>} : memref<18x25x4xf32, #tpu.memory_space<vmem>>, vector<16x16x4xf32>,
    %cst_32 = arith.constant 0.000000e+00 : f32
    %23 = vector.broadcast %cst_32 : f32 to vector<256x8xf32>
    %c0_33 = arith.constant 0 : index
    %c0_34 = arith.constant 0 : index
    %c0_35 = arith.constant 0 : index
    %24 = vector.load %arg13[%c0_33, %c0_34, %c0_35] : memref<18x25x4xf32, #tpu.memory_space<vmem>>, vector<16x25x4xf32>
    %25 = vector.extract_strided_slice %24 {offsets = [0, 7, 0], sizes = [16, 16, 4], strides = [1, 1, 1]} : vector<16x25x4xf32> to vector<16x16x4xf32>
    %26 = vector.extract_strided_slice %24 {offsets = [0, 8, 0], sizes = [16, 16, 4], strides = [1, 1, 1]} : vector<16x25x4xf32> to vector<16x16x4xf32>
    %27 = vector.extract_strided_slice %24 {offsets = [0, 9, 0], sizes = [16, 16, 4], strides = [1, 1, 1]} : vector<16x25x4xf32> to vector<16x16x4xf32>
    %28 = tpu.concatenate %25, %26, %27 in 2 : vector<16x16x4xf32>, vector<16x16x4xf32>, vector<16x16x4xf32> -> vector<16x16x12xf32>
    %29 = vector.shape_cast %28 : vector<16x16x12xf32> to vector<256x12xf32>
    %30 = arith.truncf %29 : vector<256x12xf32> to vector<256x12xbf16>
    %c0_36 = arith.constant 0 : index
    %c0_37 = arith.constant 0 : index
    %c0_38 = arith.constant 0 : index
    %31 = vector.load %arg4[%c0_36, %c0_37, %c0_38] : memref<3x12x8xbf16, #tpu.memory_space<vmem>>, vector<1x12x8xbf16>
    %32 = vector.shape_cast %31 : vector<1x12x8xbf16> to vector<12x8xbf16>
    %cst_39 = arith.constant dense<0.000000e+00> : vector<256x8xf32>
    %33 = tpu.matmul %30, %32, %cst_39 {dimension_numbers = #tpu.dot_dimension_numbers<[1], [0], [0], [1], [0, 0, 1, 1], [], []>} : vector<256x12xbf16>, vector<12x8xbf16>, vector<256x8xf32> -> vector<256x8xf32>
    %34 = arith.addf %23, %33 : vector<256x8xf32>
    %c1_40 = arith.constant 1 : index
    %c0_41 = arith.constant 0 : index
    %c0_42 = arith.constant 0 : index
    %35 = vector.load %arg13[%c1_40, %c0_41, %c0_42] : memref<18x25x4xf32, #tpu.memory_space<vmem>>, vector<16x25x4xf32>
    %36 = vector.extract_strided_slice %35 {offsets = [0, 7, 0], sizes = [16, 16, 4], strides = [1, 1, 1]} : vector<16x25x4xf32> to vector<16x16x4xf32>
    %37 = vector.extract_strided_slice %35 {offsets = [0, 8, 0], sizes = [16, 16, 4], strides = [1, 1, 1]} : vector<16x25x4xf32> to vector<16x16x4xf32>
    %38 = vector.extract_strided_slice %35 {offsets = [0, 9, 0], sizes = [16, 16, 4], strides = [1, 1, 1]} : vector<16x25x4xf32> to vector<16x16x4xf32>
    %39 = tpu.concatenate %36, %37, %38 in 2 : vector<16x16x4xf32>, vector<16x16x4xf32>, vector<16x16x4xf32> -> vector<16x16x12xf32>
    %40 = vector.shape_cast %39 : vector<16x16x12xf32> to vector<256x12xf32>
    %41 = arith.truncf %40 : vector<256x12xf32> to vector<256x12xbf16>
    %c1_43 = arith.constant 1 : index
    %c0_44 = arith.constant 0 : index
    %c0_45 = arith.constant 0 : index
    %42 = vector.load %arg4[%c1_43, %c0_44, %c0_45] : memref<3x12x8xbf16, #tpu.memory_space<vmem>>, vector<1x12x8xbf16>
    %43 = vector.shape_cast %42 : vector<1x12x8xbf16> to vector<12x8xbf16>
    %cst_46 = arith.constant dense<0.000000e+00> : vector<256x8xf32>
    %44 = tpu.matmul %41, %43, %cst_46 {dimension_numbers = #tpu.dot_dimension_numbers<[1], [0], [0], [1], [0, 0, 1, 1], [], []>} : vector<256x12xbf16>, vector<12x8xbf16>, vector<256x8xf32> -> vector<256x8xf32>
    %45 = arith.addf %34, %44 : vector<256x8xf32>
    %c2 = arith.constant 2 : index
    %c0_47 = arith.constant 0 : index
    %c0_48 = arith.constant 0 : index
    %46 = vector.load %arg13[%c2, %c0_47, %c0_48] : memref<18x25x4xf32, #tpu.memory_space<vmem>>, vector<16x25x4xf32>
    %47 = vector.extract_strided_slice %46 {offsets = [0, 7, 0], sizes = [16, 16, 4], strides = [1, 1, 1]} : vector<16x25x4xf32> to vector<16x16x4xf32>
    %48 = vector.extract_strided_slice %46 {offsets = [0, 8, 0], sizes = [16, 16, 4], strides = [1, 1, 1]} : vector<16x25x4xf32> to vector<16x16x4xf32>
    %49 = vector.extract_strided_slice %46 {offsets = [0, 9, 0], sizes = [16, 16, 4], strides = [1, 1, 1]} : vector<16x25x4xf32> to vector<16x16x4xf32>
    %50 = tpu.concatenate %47, %48, %49 in 2 : vector<16x16x4xf32>, vector<16x16x4xf32>, vector<16x16x4xf32> -> vector<16x16x12xf32>
    %51 = vector.shape_cast %50 : vector<16x16x12xf32> to vector<256x12xf32>
    %52 = arith.truncf %51 : vector<256x12xf32> to vector<256x12xbf16>
    %c2_49 = arith.constant 2 : index
    %c0_50 = arith.constant 0 : index
    %c0_51 = arith.constant 0 : index
    %53 = vector.load %arg4[%c2_49, %c0_50, %c0_51] : memref<3x12x8xbf16, #tpu.memory_space<vmem>>, vector<1x12x8xbf16>
    %54 = vector.shape_cast %53 : vector<1x12x8xbf16> to vector<12x8xbf16>
    %cst_52 = arith.constant dense<0.000000e+00> : vector<256x8xf32>
    %55 = tpu.matmul %52, %54, %cst_52 {dimension_numbers = #tpu.dot_dimension_numbers<[1], [0], [0], [1], [0, 0, 1, 1], [], []>} : vector<256x12xbf16>, vector<12x8xbf16>, vector<256x8xf32> -> vector<256x8xf32>
    %56 = arith.addf %45, %55 : vector<256x8xf32>
    %cst_53 = arith.constant 0.000000e+00 : f32
    %57 = vector.broadcast %cst_53 : f32 to vector<256x8xf32>
    %58 = arith.cmpf ogt, %56, %57 : vector<256x8xf32>
    %c0_54 = arith.constant 0 : index
    %c0_55 = arith.constant 0 : index
    %59 = vector.load %arg5[%c0_54, %c0_55] : memref<1x8xf32, #tpu.memory_space<vmem>>, vector<1x8xf32>
    %60 = vector.broadcast %59 : vector<1x8xf32> to vector<256x8xf32>
    %61 = arith.mulf %60, %56 : vector<256x8xf32>
    %62 = arith.select %58, %56, %61 : vector<256x8xi1>, vector<256x8xf32>
    %63 = vector.shape_cast %62 : vector<256x8xf32> to vector<16x16x8xf32>
    %c1_56 = arith.constant 1 : index
    %c8_57 = arith.constant 8 : index
    %c0_58 = arith.constant 0 : index
    %64 = vector.load %arg14[%c1_56, %c8_57, %c0_58] : memref<18x25x8xf32, #tpu.memory_space<vmem>>, vector<16x16x8xf32>
    tpu.vector_store %arg14[%c1_56, %c8_57, %c0_58], %63 {strides = array<i32>} : memref<18x25x8xf32, #tpu.memory_space<vmem>>, vector<16x16x8xf32>,
    %cst_59 = arith.constant 0.000000e+00 : f32
    %65 = vector.broadcast %cst_59 : f32 to vector<256x8xf32>
    %c0_60 = arith.constant 0 : index
    %c0_61 = arith.constant 0 : index
    %c0_62 = arith.constant 0 : index
    %66 = vector.load %arg14[%c0_60, %c0_61, %c0_62] : memref<18x25x8xf32, #tpu.memory_space<vmem>>, vector<16x25x8xf32>
    %67 = vector.extract_strided_slice %66 {offsets = [0, 7, 0], sizes = [16, 16, 8], strides = [1, 1, 1]} : vector<16x25x8xf32> to vector<16x16x8xf32>
    %68 = vector.extract_strided_slice %66 {offsets = [0, 8, 0], sizes = [16, 16, 8], strides = [1, 1, 1]} : vector<16x25x8xf32> to vector<16x16x8xf32>
    %69 = vector.extract_strided_slice %66 {offsets = [0, 9, 0], sizes = [16, 16, 8], strides = [1, 1, 1]} : vector<16x25x8xf32> to vector<16x16x8xf32>
    %70 = tpu.concatenate %67, %68, %69 in 2 : vector<16x16x8xf32>, vector<16x16x8xf32>, vector<16x16x8xf32> -> vector<16x16x24xf32>
    %71 = vector.shape_cast %70 : vector<16x16x24xf32> to vector<256x24xf32>
    %72 = arith.truncf %71 : vector<256x24xf32> to vector<256x24xbf16>
    %c0_63 = arith.constant 0 : index
    %c0_64 = arith.constant 0 : index
    %c0_65 = arith.constant 0 : index
    %73 = vector.load %arg6[%c0_63, %c0_64, %c0_65] : memref<3x24x8xbf16, #tpu.memory_space<vmem>>, vector<1x24x8xbf16>
    %74 = vector.shape_cast %73 : vector<1x24x8xbf16> to vector<24x8xbf16>
    %cst_66 = arith.constant dense<0.000000e+00> : vector<256x8xf32>
    %75 = tpu.matmul %72, %74, %cst_66 {dimension_numbers = #tpu.dot_dimension_numbers<[1], [0], [0], [1], [0, 0, 1, 1], [], []>} : vector<256x24xbf16>, vector<24x8xbf16>, vector<256x8xf32> -> vector<256x8xf32>
    %76 = arith.addf %65, %75 : vector<256x8xf32>
    %c1_67 = arith.constant 1 : index
    %c0_68 = arith.constant 0 : index
    %c0_69 = arith.constant 0 : index
    %77 = vector.load %arg14[%c1_67, %c0_68, %c0_69] : memref<18x25x8xf32, #tpu.memory_space<vmem>>, vector<16x25x8xf32>
    %78 = vector.extract_strided_slice %77 {offsets = [0, 7, 0], sizes = [16, 16, 8], strides = [1, 1, 1]} : vector<16x25x8xf32> to vector<16x16x8xf32>
    %79 = vector.extract_strided_slice %77 {offsets = [0, 8, 0], sizes = [16, 16, 8], strides = [1, 1, 1]} : vector<16x25x8xf32> to vector<16x16x8xf32>
    %80 = vector.extract_strided_slice %77 {offsets = [0, 9, 0], sizes = [16, 16, 8], strides = [1, 1, 1]} : vector<16x25x8xf32> to vector<16x16x8xf32>
    %81 = tpu.concatenate %78, %79, %80 in 2 : vector<16x16x8xf32>, vector<16x16x8xf32>, vector<16x16x8xf32> -> vector<16x16x24xf32>
    %82 = vector.shape_cast %81 : vector<16x16x24xf32> to vector<256x24xf32>
    %83 = arith.truncf %82 : vector<256x24xf32> to vector<256x24xbf16>
    %c1_70 = arith.constant 1 : index
    %c0_71 = arith.constant 0 : index
    %c0_72 = arith.constant 0 : index
    %84 = vector.load %arg6[%c1_70, %c0_71, %c0_72] : memref<3x24x8xbf16, #tpu.memory_space<vmem>>, vector<1x24x8xbf16>
    %85 = vector.shape_cast %84 : vector<1x24x8xbf16> to vector<24x8xbf16>
    %cst_73 = arith.constant dense<0.000000e+00> : vector<256x8xf32>
    %86 = tpu.matmul %83, %85, %cst_73 {dimension_numbers = #tpu.dot_dimension_numbers<[1], [0], [0], [1], [0, 0, 1, 1], [], []>} : vector<256x24xbf16>, vector<24x8xbf16>, vector<256x8xf32> -> vector<256x8xf32>
    %87 = arith.addf %76, %86 : vector<256x8xf32>
    %c2_74 = arith.constant 2 : index
    %c0_75 = arith.constant 0 : index
    %c0_76 = arith.constant 0 : index
    %88 = vector.load %arg14[%c2_74, %c0_75, %c0_76] : memref<18x25x8xf32, #tpu.memory_space<vmem>>, vector<16x25x8xf32>
    %89 = vector.extract_strided_slice %88 {offsets = [0, 7, 0], sizes = [16, 16, 8], strides = [1, 1, 1]} : vector<16x25x8xf32> to vector<16x16x8xf32>
    %90 = vector.extract_strided_slice %88 {offsets = [0, 8, 0], sizes = [16, 16, 8], strides = [1, 1, 1]} : vector<16x25x8xf32> to vector<16x16x8xf32>
    %91 = vector.extract_strided_slice %88 {offsets = [0, 9, 0], sizes = [16, 16, 8], strides = [1, 1, 1]} : vector<16x25x8xf32> to vector<16x16x8xf32>
    %92 = tpu.concatenate %89, %90, %91 in 2 : vector<16x16x8xf32>, vector<16x16x8xf32>, vector<16x16x8xf32> -> vector<16x16x24xf32>
    %93 = vector.shape_cast %92 : vector<16x16x24xf32> to vector<256x24xf32>
    %94 = arith.truncf %93 : vector<256x24xf32> to vector<256x24xbf16>
    %c2_77 = arith.constant 2 : index
    %c0_78 = arith.constant 0 : index
    %c0_79 = arith.constant 0 : index
    %95 = vector.load %arg6[%c2_77, %c0_78, %c0_79] : memref<3x24x8xbf16, #tpu.memory_space<vmem>>, vector<1x24x8xbf16>
    %96 = vector.shape_cast %95 : vector<1x24x8xbf16> to vector<24x8xbf16>
    %cst_80 = arith.constant dense<0.000000e+00> : vector<256x8xf32>
    %97 = tpu.matmul %94, %96, %cst_80 {dimension_numbers = #tpu.dot_dimension_numbers<[1], [0], [0], [1], [0, 0, 1, 1], [], []>} : vector<256x24xbf16>, vector<24x8xbf16>, vector<256x8xf32> -> vector<256x8xf32>
    %98 = arith.addf %87, %97 : vector<256x8xf32>
    %c0_81 = arith.constant 0 : index
    %c0_82 = arith.constant 0 : index
    %99 = vector.load %arg7[%c0_81, %c0_82] : memref<1x8xf32, #tpu.memory_space<vmem>>, vector<1x8xf32>
    %100 = vector.broadcast %99 : vector<1x8xf32> to vector<256x8xf32>
    %101 = arith.mulf %98, %100 : vector<256x8xf32>
    %c0_83 = arith.constant 0 : index
    %c0_84 = arith.constant 0 : index
    %102 = vector.load %arg8[%c0_83, %c0_84] : memref<1x8xf32, #tpu.memory_space<vmem>>, vector<1x8xf32>
    %103 = vector.broadcast %102 : vector<1x8xf32> to vector<256x8xf32>
    %104 = arith.addf %101, %103 : vector<256x8xf32>
    %105 = vector.shape_cast %13 : vector<16x16x4xf32> to vector<256x4xf32>
    %106 = arith.truncf %105 : vector<256x4xf32> to vector<256x4xbf16>
    %c0_85 = arith.constant 0 : index
    %c0_86 = arith.constant 0 : index
    %107 = vector.load %arg9[%c0_85, %c0_86] : memref<4x8xbf16, #tpu.memory_space<vmem>>, vector<4x8xbf16>
    %cst_87 = arith.constant dense<0.000000e+00> : vector<256x8xf32>
    %108 = tpu.matmul %106, %107, %cst_87 {dimension_numbers = #tpu.dot_dimension_numbers<[1], [0], [0], [1], [0, 0, 1, 1], [], []>} : vector<256x4xbf16>, vector<4x8xbf16>, vector<256x8xf32> -> vector<256x8xf32>
    %c0_88 = arith.constant 0 : index
    %c0_89 = arith.constant 0 : index
    %109 = vector.load %arg10[%c0_88, %c0_89] : memref<1x8xf32, #tpu.memory_space<vmem>>, vector<1x8xf32>
    %110 = vector.broadcast %109 : vector<1x8xf32> to vector<256x8xf32>
    %111 = arith.mulf %108, %110 : vector<256x8xf32>
    %c0_90 = arith.constant 0 : index
    %c0_91 = arith.constant 0 : index
    %112 = vector.load %arg11[%c0_90, %c0_91] : memref<1x8xf32, #tpu.memory_space<vmem>>, vector<1x8xf32>
    %113 = vector.broadcast %112 : vector<1x8xf32> to vector<256x8xf32>
    %114 = arith.addf %111, %113 : vector<256x8xf32>
    %115 = arith.addf %104, %114 : vector<256x8xf32>
    %116 = vector.shape_cast %115 : vector<256x8xf32> to vector<16x16x8xf32>
    %c0_92 = arith.constant 0 : index
    %c0_93 = arith.constant 0 : index
    %c0_94 = arith.constant 0 : index
    %c0_95 = arith.constant 0 : index
    %117 = vector.load %arg12[%c0_92, %c0_93, %c0_94, %c0_95] : memref<1x16x16x8xf32, #tpu.memory_space<vmem>>, vector<1x16x16x8xf32>
    %118 = vector.shape_cast %117 : vector<1x16x16x8xf32> to vector<16x16x8xf32>
    %119 = vector.shape_cast %116 : vector<16x16x8xf32> to vector<1x16x16x8xf32>
    tpu.vector_store %arg12[%c0_92, %c0_93, %c0_94, %c0_95], %119 {strides = array<i32>} : memref<1x16x16x8xf32, #tpu.memory_space<vmem>>, vector<1x16x16x8xf32>,
    return
  }
  func.func @transform_0(%arg0: i32) -> (i32, i32, i32, i32) {
    %c0_i32 = arith.constant 0 : i32
    %c0_i32_0 = arith.constant 0 : i32
    %c0_i32_1 = arith.constant 0 : i32
    %c0_i32_2 = arith.constant 0 : i32
    return %arg0, %c0_i32, %c0_i32_0, %c0_i32_1 : i32, i32, i32, i32
  }
  func.func @transform_1(%arg0: i32) -> (i32, i32) {
    %c0_i32 = arith.constant 0 : i32
    %c0_i32_0 = arith.constant 0 : i32
    %c0_i32_1 = arith.constant 0 : i32
    return %c0_i32, %c0_i32_0 : i32, i32
  }
  func.func @transform_2(%arg0: i32) -> (i32, i32) {
    %c0_i32 = arith.constant 0 : i32
    %c0_i32_0 = arith.constant 0 : i32
    %c0_i32_1 = arith.constant 0 : i32
    return %c0_i32, %c0_i32_0 : i32, i32
  }
  func.func @transform_3(%arg0: i32) -> (i32, i32, i32) {
    %c0_i32 = arith.constant 0 : i32
    %c0_i32_0 = arith.constant 0 : i32
    %c0_i32_1 = arith.constant 0 : i32
    %c0_i32_2 = arith.constant 0 : i32
    return %c0_i32, %c0_i32_0, %c0_i32_1 : i32, i32, i32
  }
  func.func @transform_4(%arg0: i32) -> (i32, i32) {
    %c0_i32 = arith.constant 0 : i32
    %c0_i32_0 = arith.constant 0 : i32
    %c0_i32_1 = arith.constant 0 : i32
    return %c0_i32, %c0_i32_0 : i32, i32
  }
  func.func @transform_5(%arg0: i32) -> (i32, i32, i32) {
    %c0_i32 = arith.constant 0 : i32
    %c0_i32_0 = arith.constant 0 : i32
    %c0_i32_1 = arith.constant 0 : i32
    %c0_i32_2 = arith.constant 0 : i32
    return %c0_i32, %c0_i32_0, %c0_i32_1 : i32, i32, i32
  }
  func.func @transform_6(%arg0: i32) -> (i32, i32) {
    %c0_i32 = arith.constant 0 : i32
    %c0_i32_0 = arith.constant 0 : i32
    %c0_i32_1 = arith.constant 0 : i32
    return %c0_i32, %c0_i32_0 : i32, i32
  }
  func.func @transform_7(%arg0: i32) -> (i32, i32) {
    %c0_i32 = arith.constant 0 : i32
    %c0_i32_0 = arith.constant 0 : i32
    %c0_i32_1 = arith.constant 0 : i32
    return %c0_i32, %c0_i32_0 : i32, i32
  }
  func.func @transform_8(%arg0: i32) -> (i32, i32) {
    %c0_i32 = arith.constant 0 : i32
    %c0_i32_0 = arith.constant 0 : i32
    %c0_i32_1 = arith.constant 0 : i32
    return %c0_i32, %c0_i32_0 : i32, i32
  }
  func.func @transform_9(%arg0: i32) -> (i32, i32) {
    %c0_i32 = arith.constant 0 : i32
    %c0_i32_0 = arith.constant 0 : i32
    %c0_i32_1 = arith.constant 0 : i32
    return %c0_i32, %c0_i32_0 : i32, i32
  }
  func.func @transform_10(%arg0: i32) -> (i32, i32) {
    %c0_i32 = arith.constant 0 : i32
    %c0_i32_0 = arith.constant 0 : i32
    %c0_i32_1 = arith.constant 0 : i32
    return %c0_i32, %c0_i32_0 : i32, i32
  }
  func.func @transform_11(%arg0: i32) -> (i32, i32, i32, i32) {
    %c0_i32 = arith.constant 0 : i32
    %c0_i32_0 = arith.constant 0 : i32
    %c0_i32_1 = arith.constant 0 : i32
    %c0_i32_2 = arith.constant 0 : i32
    return %arg0, %c0_i32, %c0_i32_0, %c0_i32_1 : i32, i32, i32, i32
  }
}

</mosaic_0001>

<bundles_post_ra>
// kernel: tpu_custom_call.1
= control target key start
LH: loop header
LB: loop body
LE: loop exit
PB: predicated region body
PF: predicated region fallthrough
CT: control target
= control target key end

     0   :  { %s9817_s17 = smov 0   ;;  %s16004_s0 = inlined_call_operand.vmem [shape: f32[2,16,16,4], index: 0, kind: input, shape index: {}]   ;;  %s16005_s1 = inlined_call_operand.vmem [shape: f32[1,4], index: 1, kind: input, shape index: {}]   ;;  %s16006_s2 = inlined_call_operand.vmem [shape: f32[1,4], index: 2, kind: input, shape index: {}]   ;;  %s16007_s3 = inlined_call_operand.vmem [shape: bf16[3,12,8], index: 3, kind: input, shape index: {}]   ;;  %s16008_s4 = inlined_call_operand.vmem [shape: f32[1,8], index: 4, kind: input, shape index: {}]   ;;  %s16009_s5 = inlined_call_operand.vmem [shape: bf16[3,24,8], index: 5, kind: input, shape index: {}]   ;;  %s16010_s6 = inlined_call_operand.vmem [shape: f32[1,8], index: 6, kind: input, shape index: {}]   ;;  %s16011_s7 = inlined_call_operand.vmem [shape: f32[1,8], index: 7, kind: input, shape index: {}]   ;;  %s16012_s8 = inlined_call_operand.vmem [shape: bf16[4,8], index: 8, kind: input, shape index: {}]   ;;  %s16013_s9 = inlined_call_operand.vmem [shape: f32[1,8], index: 9, kind: input, shape index: {}]   ;;  %s16014_s10 = inlined_call_operand.vmem [shape: f32[1,8], index: 10, kind: input, shape index: {}]   ;;  %s16015_s11 = inlined_call_operand.vmem [shape: f32[2,16,16,8], index: 11, kind: output, shape index: {}]  }
   0x1 LB: > { %s7464_s18 = sadd.s32 4294967295, %s9751_s17   ;;  %p7468_p0 = scmp.ge.s32.totalorder %s9751_s17, 1  ;;  %s9751_s17 = sphi %s9817_s17, %s21_s17  }
   0x2   : > { %p337_p1 = scmp.lt.s32.totalorder %s9751_s17, 3 }
   0x4   : > { %p338_p2 = pnand %p7468_p0, %p337_p1 }
   0x6   : > { %341 = sbr.rel (%p338_p2) target bundleno = 1295 (0x50f), region = 64 }
   0xd   : > { %vm388_vm0 = vcmask 31744   ;;  %p377_p3 = scmp.lt.s32.totalorder %s7464_s18, 1  ;;  %v16016_v0 = vmov 0.0   ;;  %vm392_vm1 = vcmask 24576   ;;  %v9842_v1 = vld [vmem:[%s16005_s1] ss:$0 sm:$0xff] }
   0xe   : > { %390 = vst.msk [vmem:[#allocation2 + $0x8] sm:$0xff] %vm388_vm0, %v16016_v0  ;;  %391 = vst.msk [vmem:[#allocation2 + $0x10] sm:$0xff] %vm388_vm0, %v16016_v0  ;;  %v9916_v2 = vld [vmem:[%s16006_s2] ss:$0 sm:$0xff]  ;;  %vm714_vm2 = vcmask 1046528   ;;  %s9754_s27 = smov 4  }
   0xf   : > { %389 = vst.msk [vmem:[#allocation2] sm:$0xff] %vm388_vm0, %v16016_v0  ;;  %395 = vst.msk [vmem:[#allocation2 + $0x220] sm:$0xff] %vm388_vm0, %v16016_v0  ;;  %s17162_s18 = smov (!%p377_p3, %s7464_s18), 1  ;;  %vm923_vm3 = vcmask 1045504   ;;  %s9755_s28 = smov 8   ;;  %vm432_vm4 = vcmask 64512  }
  0x10   : > { %396 = vst.msk [vmem:[#allocation2 + $0x228] sm:$0xff] %vm388_vm0, %v16016_v0  ;;  %397 = vst.msk [vmem:[#allocation2 + $0x230] sm:$0xff] %vm388_vm0, %v16016_v0  ;;  %s7613_s21 = sshll.u32 %s17162_s18, 8  ;;  %vm1292_vm5 = vcmask 1040384   ;;  %vm2231_vm6 = vcmask 97280   ;;  %vm436_vm7 = vcmask 57344  }
  0x11   : > { %16284 = vst [vmem:[#allocation4_spill] sm:$0xff] %v9842_v1  ;;  %416 = vst.msk [vmem:[#allocation2 + $0x38] sm:$0x1] %vm392_vm1, %v16016_v0  ;;  %s9923_s26 = scalar_lea.vmem %s16004_s0, %s7613_s21  ;;  %s9756_s16 = smov 16  }
  0x12   : > { %393 = vst.msk [vmem:[#allocation2 + $0x18] sm:$0x1] %vm392_vm1, %v16016_v0  ;;  %398 = vst.msk [vmem:[#allocation2 + $0x238] sm:$0x1] %vm392_vm1, %v16016_v0  ;;  %v483_v3 = vld [vmem:[%s9923_s26 + $0x38] sm:$0xff]  ;;  %v484_v4 = vld [vmem:[%s9923_s26 + $0x40] sm:$0xff]  ;;  %s15792_s15 = scalar_lea.vmem %s16015_s11, %s7613_s21 }
  0x13   : > { %400 = vst.msk [vmem:[#allocation2 + $0x27] sm:$0x1] %vm392_vm1, %v16016_v0  ;;  %401 = vst.msk [vmem:[#allocation2 + $0x47] sm:$0x1] %vm392_vm1, %v16016_v0  ;;  %v476_v5 = vld [vmem:[%s9923_s26] sm:$0xff]  ;;  %v522_v6 = vmul.f32 %v9842_v1, %v483_v3  ;;  %v523_v7 = vmul.f32 %v9842_v1, %v484_v4  ;;  %v479_v9 = vld [vmem:[%s9923_s26 + $0x18] sm:$0xff] }
  0x14   : > { %402 = vst.msk [vmem:[#allocation2 + $0x67] sm:$0x1] %vm392_vm1, %v16016_v0  ;;  %403 = vst.msk [vmem:[#allocation2 + $0x87] sm:$0x1] %vm392_vm1, %v16016_v0  ;;  %v515_v8 = vmul.f32 %v9842_v1, %v476_v5  ;;  %v480_v10 = vld [vmem:[%s9923_s26 + $0x20] sm:$0xff]  ;;  %v477_v11 = vld [vmem:[%s9923_s26 + $0x8] sm:$0xff]  ;;  %v518_v14 = vmul.f32 %v9842_v1, %v479_v9 }
  0x15   : > { %404 = vst.msk [vmem:[#allocation2 + $0xa7] sm:$0x1] %vm392_vm1, %v16016_v0  ;;  %405 = vst.msk [vmem:[#allocation2 + $0xc7] sm:$0x1] %vm392_vm1, %v16016_v0  ;;  %v9934_v12 = vld [vmem:[#allocation2 + $0x8] sm:$0xff]  ;;  %v9936_v13 = vld [vmem:[#allocation2 + $0x10] sm:$0xff]  ;;  %v519_v15 = vmul.f32 %v9842_v1, %v480_v10  ;;  %v516_v16 = vmul.f32 %v9842_v1, %v477_v11  ;;  %v561_v20 = vadd.f32 %v9916_v2, %v522_v6 }
  0x16   : > { %406 = vst.msk [vmem:[#allocation2 + $0xe7] sm:$0x1] %vm392_vm1, %v16016_v0  ;;  %407 = vst.msk [vmem:[#allocation2 + $0x107] sm:$0x1] %vm392_vm1, %v16016_v0  ;;  %v487_v17 = vld [vmem:[%s9923_s26 + $0x58] sm:$0xff]  ;;  %v715_v18 = vrot.slane %v9934_v12, 1  ;;  %v562_v21 = vadd.f32 %v9916_v2, %v523_v7  ;;  %v554_v25 = vadd.f32 %v9916_v2, %v515_v8  ;;  %v557_v26 = vadd.f32 %v9916_v2, %v518_v14 }
  0x17   : > { %408 = vst.msk [vmem:[#allocation2 + $0x127] sm:$0x1] %vm392_vm1, %v16016_v0  ;;  %409 = vst.msk [vmem:[#allocation2 + $0x147] sm:$0x1] %vm392_vm1, %v16016_v0  ;;  %v716_v19 = vrot.slane %v9936_v13, 1  ;;  %v488_v22 = vld [vmem:[%s9923_s26 + $0x60] sm:$0xff]  ;;  %v558_v27 = vadd.f32 %v9916_v2, %v519_v15  ;;  %v555_v28 = vadd.f32 %v9916_v2, %v516_v16  ;;  %v526_v33 = vmul.f32 %v9842_v1, %v487_v17 }
  0x18   : > { %410 = vst.msk [vmem:[#allocation2 + $0x167] sm:$0x1] %vm392_vm1, %v16016_v0  ;;  %411 = vst.msk [vmem:[#allocation2 + $0x187] sm:$0x1] %vm392_vm1, %v16016_v0  ;;  %v478_v23 = vld [vmem:[%s9923_s26 + $0x10] sm:$0xff]  ;;  %v481_v29 = vld [vmem:[%s9923_s26 + $0x28] sm:$0xff]  ;;  %v527_v34 = vmul.f32 %v9842_v1, %v488_v22 }
  0x19   : > { %412 = vst.msk [vmem:[#allocation2 + $0x1a7] sm:$0x1] %vm392_vm1, %v16016_v0  ;;  %413 = vst.msk [vmem:[#allocation2 + $0x1c7] sm:$0x1] %vm392_vm1, %v16016_v0  ;;  %v482_v24 = vld [vmem:[%s9923_s26 + $0x30] sm:$0xff]  ;;  %v485_v30 = vld [vmem:[%s9923_s26 + $0x48] sm:$0xff]  ;;  %v717_v32 = vsel %vm714_vm2, %v715_v18, %v716_v19  ;;  %v517_v35 = vmul.f32 %v9842_v1, %v478_v23  ;;  %v520_v39 = vmul.f32 %v9842_v1, %v481_v29 }
  0x1a   : > { %414 = vst.msk [vmem:[#allocation2 + $0x1e7] sm:$0x1] %vm392_vm1, %v16016_v0  ;;  %415 = vst.msk [vmem:[#allocation2 + $0x207] sm:$0x1] %vm392_vm1, %v16016_v0  ;;  %v486_v31 = vld [vmem:[%s9923_s26 + $0x50] sm:$0xff]  ;;  %v8131_v37 = vpack.i.bf16 %v717_v32, %v715_v18  ;;  %v521_v38 = vmul.f32 %v9842_v1, %v482_v24  ;;  %v524_v40 = vmul.f32 %v9842_v1, %v485_v30  ;;  %v491_v41 = vld [vmem:[%s9923_s26 + $0x78] sm:$0xff] }
  0x1b   : > { %417 = vst.msk [vmem:[#allocation2 + $0x58] sm:$0x1] %vm392_vm1, %v16016_v0  ;;  %418 = vst.msk [vmem:[#allocation2 + $0x78] sm:$0x1] %vm392_vm1, %v16016_v0  ;;  %v490_v36 = vld [vmem:[%s9923_s26 + $0x70] sm:$0xff]  ;;  %v489_v42 = vld [vmem:[%s9923_s26 + $0x68] sm:$0xff]  ;;  %v565_v44 = vadd.f32 %v9916_v2, %v526_v33  ;;  %v566_v45 = vadd.f32 %v9916_v2, %v527_v34  ;;  %v556_v46 = vadd.f32 %v9916_v2, %v517_v35 }
  0x1c   : > { %419 = vst.msk [vmem:[#allocation2 + $0x98] sm:$0x1] %vm392_vm1, %v16016_v0  ;;  %420 = vst.msk [vmem:[#allocation2 + $0xb8] sm:$0x1] %vm392_vm1, %v16016_v0  ;;  %v492_v43 = vld [vmem:[%s9923_s26 + $0x80] sm:$0xff]  ;;  %v525_v47 = vmul.f32 %v9842_v1, %v486_v31  ;;  %v493_v48 = vld [vmem:[%s9923_s26 + $0x88] sm:$0xff]  ;;  %8132 = vrot.lane.b32.xlu0 %v8131_v37, %s9754_s27  ;;  %v560_v51 = vadd.f32 %v9916_v2, %v521_v38  ;;  %v559_v52 = vadd.f32 %v9916_v2, %v520_v39 }
  0x1d   : > { %421 = vst.msk [vmem:[#allocation2 + $0xd8] sm:$0x1] %vm392_vm1, %v16016_v0  ;;  %422 = vst.msk [vmem:[#allocation2 + $0xf8] sm:$0x1] %vm392_vm1, %v16016_v0  ;;  %v495_v49 = vld [vmem:[%s9923_s26 + $0x98] sm:$0xff]  ;;  %v496_v50 = vld [vmem:[%s9923_s26 + $0xa0] sm:$0xff]  ;;  %v563_v53 = vadd.f32 %v9916_v2, %v524_v40  ;;  %v529_v54 = vmul.f32 %v9842_v1, %v490_v36  ;;  %v530_v57 = vmul.f32 %v9842_v1, %v491_v41 }
  0x1e   : > { %423 = vst.msk [vmem:[#allocation2 + $0x118] sm:$0x1] %vm392_vm1, %v16016_v0  ;;  %424 = vst.msk [vmem:[#allocation2 + $0x138] sm:$0x1] %vm392_vm1, %v16016_v0  ;;  %v494_v55 = vld [vmem:[%s9923_s26 + $0x90] sm:$0xff]  ;;  %v564_v56 = vadd.f32 %v9916_v2, %v525_v47  ;;  %v528_v58 = vmul.f32 %v9842_v1, %v489_v42  ;;  %v531_v59 = vmul.f32 %v9842_v1, %v492_v43  ;;  %v499_v8 = vld [vmem:[%s9923_s26 + $0xb8] sm:$0xff] }
  0x1f   : > { %425 = vst.msk [vmem:[#allocation2 + $0x158] sm:$0x1] %vm392_vm1, %v16016_v0  ;;  %426 = vst.msk [vmem:[#allocation2 + $0x178] sm:$0x1] %vm392_vm1, %v16016_v0  ;;  %v498_v60 = vld [vmem:[%s9923_s26 + $0xb0] sm:$0xff]  ;;  %v568_v61 = vadd.f32 %v9916_v2, %v529_v54  ;;  %v532_v62 = vmul.f32 %v9842_v1, %v493_v48  ;;  %v534_v63 = vmul.f32 %v9842_v1, %v495_v49  ;;  %v497_v22 = vld [vmem:[%s9923_s26 + $0xa8] sm:$0xff] }
  0x20   : > { %427 = vst.msk [vmem:[#allocation2 + $0x198] sm:$0x1] %vm392_vm1, %v16016_v0  ;;  %428 = vst.msk [vmem:[#allocation2 + $0x1b8] sm:$0x1] %vm392_vm1, %v16016_v0  ;;  %v535_v3 = vmul.f32 %v9842_v1, %v496_v50  ;;  %v569_v4 = vadd.f32 %v9916_v2, %v530_v57  ;;  %v567_v5 = vadd.f32 %v9916_v2, %v528_v58 }
  0x21   : > { %429 = vst.msk [vmem:[#allocation2 + $0x1d8] sm:$0x1] %vm392_vm1, %v16016_v0  ;;  %430 = vst.msk [vmem:[#allocation2 + $0x1f8] sm:$0x1] %vm392_vm1, %v16016_v0  ;;  %v570_v6 = vadd.f32 %v9916_v2, %v531_v59  ;;  %v533_v7 = vmul.f32 %v9842_v1, %v494_v55  ;;  %v571_v11 = vadd.f32 %v9916_v2, %v532_v62 }
  0x22   : > { %431 = vst.msk [vmem:[#allocation2 + $0x218] sm:$0x1] %vm392_vm1, %v16016_v0  ;;  %16285 = vst [vmem:[#allocation5_spill] sm:$0xff] %v9916_v2  ;;  %v573_v14 = vadd.f32 %v9916_v2, %v534_v63  ;;  %v574_v15 = vadd.f32 %v9916_v2, %v535_v3  ;;  %v537_v16 = vmul.f32 %v9842_v1, %v498_v60  ;;  %v501_v63 = vld [vmem:[%s9923_s26 + $0xc8] sm:$0xff] }
  0x23   : > { %593 = vst.msk [vmem:[#allocation2 + $0x90] sm:$0xff] %vm388_vm0, %v561_v20  ;;  %594 = vst.msk [vmem:[#allocation2 + $0xa8] sm:$0xff] %vm388_vm0, %v562_v21  ;;  %v536_v38 = vmul.f32 %v9842_v1, %v497_v22 }
  0x24   : > { %586 = vst.msk [vmem:[#allocation2 + $0x28] sm:$0xff] %vm388_vm0, %v554_v25  ;;  %589 = vst.msk [vmem:[#allocation2 + $0x50] sm:$0xff] %vm388_vm0, %v557_v26  ;;  %v576_v32 = vadd.f32 %v9916_v2, %v537_v16 }
  0x25   : > { %590 = vst.msk [vmem:[#allocation2 + $0x68] sm:$0xff] %vm388_vm0, %v558_v27  ;;  %587 = vst.msk [vmem:[#allocation2 + $0x30] sm:$0xff] %vm388_vm0, %v555_v28  ;;  %v572_v27 = vadd.f32 %v9916_v2, %v533_v7  ;;  %v538_v28 = vmul.f32 %v9842_v1, %v499_v8  ;;  %v575_v50 = vadd.f32 %v9916_v2, %v536_v38  ;;  %v502_v7 = vld [vmem:[%s9923_s26 + $0xd0] sm:$0xff] }
  0x26   : > { %597 = vst.msk [vmem:[#allocation2 + $0xd0] sm:$0xff] %vm388_vm0, %v565_v44  ;;  %598 = vst.msk [vmem:[#allocation2 + $0xe8] sm:$0xff] %vm388_vm0, %v566_v45  ;;  %v541_v38 = vmul.f32 %v9842_v1, %v502_v7 }
  0x27   : > { %588 = vst.msk [vmem:[#allocation2 + $0x48] sm:$0xff] %vm388_vm0, %v556_v46  ;;  %592 = vst.msk [vmem:[#allocation2 + $0x88] sm:$0xff] %vm388_vm0, %v560_v51  ;;  %v577_v37 = vadd.f32 %v9916_v2, %v538_v28  ;;  %v540_v28 = vmul.f32 %v9842_v1, %v501_v63 }
  0x28   : > { %591 = vst.msk [vmem:[#allocation2 + $0x70] sm:$0xff] %vm388_vm0, %v559_v52  ;;  %595 = vst.msk [vmem:[#allocation2 + $0xb0] sm:$0xff] %vm388_vm0, %v563_v53  ;;  %v500_v52 = vld [vmem:[%s9923_s26 + $0xc0] sm:$0xff] }
  0x29   : > { %596 = vst.msk [vmem:[#allocation2 + $0xc8] sm:$0xff] %vm388_vm0, %v564_v56  ;;  %600 = vst.msk [vmem:[#allocation2 + $0x108] sm:$0xff] %vm388_vm0, %v568_v61  ;;  %v539_v60 = vmul.f32 %v9842_v1, %v500_v52 }
  0x2a   : > { %v10009_v9 = vld [vmem:[#allocation2 + $0x90] sm:$0xff]  ;;  %v10011_v10 = vld [vmem:[#allocation2 + $0xa8] sm:$0xff]  ;;  %601 = vst.msk [vmem:[#allocation2 + $0x110] sm:$0xff] %vm388_vm0, %v569_v4  ;;  %599 = vst.msk [vmem:[#allocation2 + $0xf0] sm:$0xff] %vm388_vm0, %v567_v5 }
  0x2b   : > { %v10019_v17 = vrot.slane %v10009_v9, 1  ;;  %v10022_v18 = vrot.slane %v10011_v10, 1  ;;  %v10024_v20 = vld [vmem:[#allocation2 + $0x28] sm:$0xff]  ;;  %v10026_v21 = vld [vmem:[#allocation2 + $0x50] sm:$0xff]  ;;  %602 = vst.msk [vmem:[#allocation2 + $0x128] sm:$0xff] %vm388_vm0, %v570_v6  ;;  %603 = vst.msk [vmem:[#allocation2 + $0x130] sm:$0xff] %vm388_vm0, %v571_v11 }
  0x2c   : > { %v10033_v23 = vrot.slane %v10024_v20, 1  ;;  %v10035_v24 = vld [vmem:[#allocation2 + $0x68] sm:$0xff]  ;;  %v10038_v25 = vrot.slane %v10026_v21, 1  ;;  %v10040_v26 = vld [vmem:[#allocation2 + $0x30] sm:$0xff]  ;;  %605 = vst.msk [vmem:[#allocation2 + $0x150] sm:$0xff] %vm388_vm0, %v573_v14  ;;  %606 = vst.msk [vmem:[#allocation2 + $0x168] sm:$0xff] %vm388_vm0, %v574_v15 }
  0x2d   : > { %16286 = vst [vmem:[#allocation6_spill] sm:$0xff] %v10019_v17  ;;  %16287 = vst [vmem:[#allocation7_spill] sm:$0xff] %v10022_v18  ;;  %v8146_v29 = vpack.i.bf16 %v10022_v18, %v10019_v17  ;;  %v10050_v30 = vrot.slane %v10035_v24, 1  ;;  %v10053_v31 = vrot.slane %v10040_v26, 1  ;;  %v10059_v34 = vld [vmem:[#allocation2 + $0xd0] sm:$0xff]  ;;  %v10061_v35 = vld [vmem:[#allocation2 + $0xe8] sm:$0xff] }
  0x2e   : > { %16288 = vst [vmem:[#allocation8_spill] sm:$0xff] %v10038_v25  ;;  %v8136_v33 = vpack.i.bf16 %v10033_v23, %v716_v19  ;;  %v10063_v36 = vld [vmem:[#allocation2 + $0x48] sm:$0xff]  ;;  %604 = vst.msk [vmem:[#allocation2 + $0x148] sm:$0xff] %vm388_vm0, %v572_v27  ;;  %v10077_v40 = vrot.slane %v10059_v34, 1  ;;  %v10088_v44 = vrot.slane %v10061_v35, 1  ;;  %v503_v5 = vld [vmem:[%s9923_s26 + $0xd8] sm:$0xff] }
  0x2f   : > { %16289 = vst [vmem:[#allocation9_spill] sm:$0xff] %v10050_v30  ;;  %16290 = vst [vmem:[#allocation10_spill] sm:$0xff] %v10053_v31  ;;  %8147 = vrot.lane.b32.xlu1 %v8146_v29, %s9754_s27  ;;  %v8141_v39 = vpack.i.bf16 %v10050_v30, %v10038_v25  ;;  %v10074_v19 = vsel %vm714_vm2, %v10033_v23, %v10053_v31  ;;  %v10079_v41 = vld [vmem:[#allocation2 + $0x88] sm:$0xff]  ;;  %v10081_v42 = vld [vmem:[#allocation2 + $0x70] sm:$0xff]  ;;  %v10091_v45 = vrot.slane %v10063_v36, 1 }
  0x30   : > { %16291 = vst [vmem:[#allocation11_spill] sm:$0xff] %v10077_v40  ;;  %608 = vst.msk [vmem:[#allocation2 + $0x188] sm:$0xff] %vm388_vm0, %v576_v32  ;;  %8137 = vrot.lane.b32.xlu0 %v8136_v33, %s9754_s27  ;;  %v8156_v43 = vpack.i.bf16 %v10053_v31, %v10074_v19  ;;  %v10094_v46 = vrot.slane %v10081_v42, 1  ;;  %v10096_v47 = vld [vmem:[#allocation2 + $0xb0] sm:$0xff]  ;;  %v10100_v48 = vrot.slane %v10079_v41, 1  ;;  %v10102_v49 = vld [vmem:[#allocation2 + $0xc8] sm:$0xff]  ;;  %v8151_v55 = vpack.i.bf16 %v10088_v44, %v10077_v40 }
  0x31   : > { %16292 = vst [vmem:[#allocation12_spill] sm:$0xff] %v10088_v44  ;;  %16293 = vst [vmem:[#allocation13_spill] sm:$0xff] %v10091_v45  ;;  %v10108_v51 = vsel %vm714_vm2, %v10091_v45, %v10038_v25  ;;  %v10115_v54 = vrot.slane %v10096_v47, 1  ;;  %v10127_v57 = vrot.slane %v10102_v49, 1  ;;  %v10134_v59 = vld [vmem:[#allocation2 + $0xf0] sm:$0xff]  ;;  %v10137_v61 = vld [vmem:[#allocation2 + $0x108] sm:$0xff]  ;;  %v578_v29 = vadd.f32 %v9916_v2, %v539_v60 }
  0x32   : > { %16294 = vst [vmem:[#allocation14_spill] sm:$0xff] %v10094_v46  ;;  %609 = vst.msk [vmem:[#allocation2 + $0x190] sm:$0xff] %vm388_vm0, %v577_v37  ;;  %v8161_v53 = vpack.i.bf16 %v10108_v51, %v10091_v45  ;;  %v10124_v56 = vsel %vm714_vm2, %v10050_v30, %v10094_v46  ;;  %v10132_v58 = vsel %vm714_vm2, %v10100_v48, %v10019_v17  ;;  %v10139_v62 = vld [vmem:[#allocation2 + $0x110] sm:$0xff]  ;;  %v504_v6 = vld [vmem:[%s9923_s26 + $0xe0] sm:$0xff]  ;;  %v10162_v14 = vrot.slane %v10134_v59, 1 }
  0x33   : > { %16295 = vst [vmem:[#allocation15_spill] sm:$0xff] %v10100_v48  ;;  %16296 = vst [vmem:[#allocation16_spill] sm:$0xff] %v10108_v51  ;;  %8157 = vrot.lane.b32.xlu1 %v8156_v43, %s9754_s27  ;;  %v8166_v3 = vpack.i.bf16 %v10094_v46, %v10124_v56  ;;  %v10148_v4 = vsel %vm714_vm2, %v10022_v18, %v10115_v54  ;;  %v8171_v8 = vpack.i.bf16 %v10132_v58, %v10100_v48  ;;  %v10164_v15 = vld [vmem:[#allocation2 + $0x128] sm:$0xff]  ;;  %v10166_v16 = vld [vmem:[#allocation2 + $0x130] sm:$0xff] }
  0x34   : > { %16297 = vst [vmem:[#allocation17_spill] sm:$0xff] %v10115_v54  ;;  %607 = vst.msk [vmem:[#allocation2 + $0x170] sm:$0xff] %vm388_vm0, %v575_v50  ;;  %8142 = vrot.lane.b32.xlu0 %v8141_v39, %s9754_s27  ;;  %v10159_v11 = vsel %vm714_vm2, %v10127_v57, %v10077_v40  ;;  %v10169_v22 = vrot.slane %v10137_v61, 1  ;;  %v10172_v27 = vrot.slane %v10139_v62, 1  ;;  %v8176_v32 = vpack.i.bf16 %v10115_v54, %v10148_v4  ;;  %v505_v39 = vld [vmem:[%s9923_s26 + $0xe8] sm:$0xff]  ;;  %v10199_v60 = vld [vmem:[#allocation2 + $0x150] sm:$0xff] }
  0x35   : > { %16298 = vst [vmem:[#allocation18_spill] sm:$0xff] %v10124_v56  ;;  %16299 = vst [vmem:[#allocation19_spill] sm:$0xff] %v10127_v57  ;;  %v542_v33 = vmul.f32 %v9842_v1, %v503_v5  ;;  %v543_v37 = vmul.f32 %v9842_v1, %v504_v6  ;;  %v8181_v43 = vpack.i.bf16 %v10159_v11, %v10127_v57  ;;  %v10186_v50 = vrot.slane %v10164_v15, 1  ;;  %v10201_v63 = vld [vmem:[#allocation2 + $0x148] sm:$0xff]  ;;  %v637_v57 = vld [vmem:[#allocation2 + $0x98] sm:$0x1] }
  0x36   : > { %16300 = vst [vmem:[#allocation20_spill] sm:$0xff] %v10132_v58  ;;  %16301 = vst [vmem:[#allocation21_spill] sm:$0xff] %v10148_v4  ;;  %v10189_v52 = vrot.slane %v10166_v16, 1  ;;  %v580_v6 = vadd.f32 %v9916_v2, %v541_v38  ;;  %v10209_v7 = vsel %vm714_vm2, %v10169_v22, %v10172_v27  ;;  %v1426_v18 = vld [vmem:[#allocation2 + $0x38] sm:$0x1]  ;;  %v16367_v46 = vld [vmem:[#allocation4_spill] sm:$0xff] }
  0x37   : > { %8162 = vrot.lane.b32.xlu1 %v8161_v53, %s9754_s27  ;;  %16302 = vst [vmem:[#allocation22_spill] sm:$0xff] %v10159_v11  ;;  %16303 = vst [vmem:[#allocation23_spill] sm:$0xff] %v10162_v14  ;;  %v579_v53 = vadd.f32 %v9916_v2, %v540_v28  ;;  %v582_v5 = vadd.f32 %v9916_v2, %v543_v37  ;;  %v10225_v37 = vrot.slane %v10201_v63, 1  ;;  %v1430_v11 = vld [vmem:[#allocation2 + $0x58] sm:$0x1]  ;;  %v16370_v54 = vld [vmem:[#allocation5_spill] sm:$0xff] }
  0x38   : > { %8152 = vrot.lane.b32.xlu0 %v8151_v55, %s9754_s27  ;;  %16304 = vst [vmem:[#allocation24_spill] sm:$0xff] %v10169_v22  ;;  %16305 = vst [vmem:[#allocation25_spill] sm:$0xff] %v10172_v27  ;;  %v10197_v55 = vsel %vm714_vm2, %v10088_v44, %v10162_v14  ;;  %v10309_v44 = vrot.slane %v10009_v9, 2  ;;  %v16352_v30 = vld [vmem:[#allocation12_spill] sm:$0xff]  ;;  %v1434_v4 = vld [vmem:[#allocation2 + $0x78] sm:$0x1] }
  0x39   : > { %16306 = vst [vmem:[#allocation26_spill] sm:$0xff] %v10186_v50  ;;  %16307 = vst [vmem:[#allocation27_spill] sm:$0xff] %v10189_v52  ;;  %v8186_v28 = vpack.i.bf16 %v10162_v14, %v10197_v55  ;;  %v641_v14 = vld [vmem:[#allocation2 + $0xb8] sm:$0x1] }
  0x3a   : > { %610 = vst.msk [vmem:[#allocation2 + $0x1a8] sm:$0xff] %vm388_vm0, %v578_v29  ;;  %16308 = vst [vmem:[#allocation28_spill] sm:$0xff] %v10197_v55  ;;  %v10219_v29 = vld [vmem:[#allocation2 + $0x168] sm:$0xff] }
  0x3b   : > { %8167 = vrot.lane.b32.xlu1 %v8166_v3, %s9754_s27  ;;  %v581_v3 = vadd.f32 %v9916_v2, %v542_v33  ;;  %16309 = vst [vmem:[#allocation29_spill] sm:$0xff] %v10209_v7  ;;  %611 = vst.msk [vmem:[#allocation2 + $0x1b0] sm:$0xff] %vm388_vm0, %v579_v53  ;;  %v10222_v33 = vrot.slane %v10199_v60, 1  ;;  %v10236_v53 = vld [vmem:[#allocation2 + $0x188] sm:$0xff] }
  0x3c   : > { %8172 = vrot.lane.b32.xlu0 %v8171_v8, %s9754_s27  ;;  %v544_v8 = vmul.f32 %v9842_v1, %v505_v39  ;;  %614 = vst.msk [vmem:[#allocation2 + $0x1e8] sm:$0xff] %vm388_vm0, %v582_v5  ;;  %612 = vst.msk [vmem:[#allocation2 + $0x1c8] sm:$0xff] %vm388_vm0, %v580_v6  ;;  %v8191_v39 = vpack.i.bf16 %v10209_v7, %v10169_v22  ;;  %v10240_v5 = vld [vmem:[#allocation2 + $0x170] sm:$0xff]  ;;  %v10244_v6 = vrot.slane %v10219_v29, 1  ;;  %v924_v1 = vrot.slane %v9934_v12, 2 }
  0x3d   : > { %613 = vst.msk [vmem:[#allocation2 + $0x1d0] sm:$0xff] %vm388_vm0, %v581_v3  ;;  %16310 = vst [vmem:[#allocation30_spill] sm:$0xff] %v10219_v29  ;;  %v10238_v3 = vld [vmem:[#allocation2 + $0x190] sm:$0xff]  ;;  %v10254_v0 = vsel %vm714_vm2, %v10225_v37, %v10222_v33  ;;  %v629_v7 = vld [vmem:[#allocation2 + $0x58] sm:$0x1] }
  0x3e   : > { %16311 = vst [vmem:[#allocation31_spill] sm:$0xff] %v10222_v33  ;;  %16312 = vst [vmem:[#allocation32_spill] sm:$0xff] %v10225_v37  ;;  %v583_v38 = vadd.f32 %v9916_v2, %v544_v8  ;;  %v8196_v8 = vpack.i.bf16 %v10186_v50, %v10172_v27  ;;  %v10257_v2 = vrot.slane %v10236_v53, 1  ;;  %v10261_v29 = vrot.slane %v10238_v3, 1  ;;  %v621_v27 = vld [vmem:[#allocation2 + $0x18] sm:$0x1] }
  0x3f   : > { %8182 = vrot.lane.b32.xlu1 %v8181_v43, %s9754_s27  ;;  %v10234_v43 = vsel %vm714_vm2, %v10186_v50, %v10189_v52  ;;  %16314 = vst [vmem:[#allocation34_spill] sm:$0xff] %v10236_v53  ;;  %16315 = vst [vmem:[#allocation35_spill] sm:$0xff] %v10238_v3  ;;  %v10273_v50 = vrot.slane %v10024_v20, 2  ;;  %v8206_v12 = vpack.i.bf16 %v10254_v0, %v10225_v37  ;;  %v633_v22 = vld [vmem:[#allocation2 + $0x78] sm:$0x1]  ;;  %v16357_v31 = vld [vmem:[#allocation25_spill] sm:$0xff] }
  0x40   : > { %8177 = vrot.lane.b32.xlu0 %v8176_v32, %s9754_s27  ;;  %16313 = vst [vmem:[#allocation33_spill] sm:$0xff] %v10234_v43  ;;  %615 = vst.msk [vmem:[#allocation2 + $0x1f0] sm:$0xff] %vm388_vm0, %v583_v38  ;;  %v8201_v32 = vpack.i.bf16 %v10189_v52, %v10234_v43  ;;  %v625_v38 = vld [vmem:[#allocation2 + $0x38] sm:$0x1]  ;;  %v925_v52 = vrot.slane %v9936_v13, 2  ;;  %v927_v13 = vrot.slane %v621_v27, 2  ;;  %v8211_v55 = vpack.i.bf16 %v10244_v6, %v10222_v33 }
  0x41   : > { %16316 = vst [vmem:[#allocation36_spill] sm:$0xff] %v10244_v6  ;;  %16317 = vst [vmem:[#allocation37_spill] sm:$0xff] %v10254_v0  ;;  %v10268_v43 = vld [vmem:[#allocation2 + $0x1a8] sm:$0xff]  ;;  %v932_v3 = vrot.slane %v625_v38, 2  ;;  %v10287_v20 = vsel %vm714_vm2, %v10257_v2, %v10261_v29  ;;  %v10306_v33 = vrot.slane %v10026_v21, 2  ;;  %v937_v0 = vrot.slane %v629_v7, 2 }
  0x42   : > { %16318 = vst [vmem:[#allocation38_spill] sm:$0xff] %v10257_v2  ;;  %16320 = vst [vmem:[#allocation40_spill] sm:$0xff] %v10268_v43  ;;  %v10270_v53 = vld [vmem:[#allocation2 + $0x1b0] sm:$0xff]  ;;  %v10296_v38 = vrot.slane %v10268_v43, 1  ;;  %v8221_v21 = vpack.i.bf16 %v10287_v20, %v10257_v2  ;;  %v645_v2 = vld [vmem:[#allocation2 + $0xd8] sm:$0x1] }
  0x43   : > { %8187 = vrot.lane.b32.xlu1 %v8186_v28, %s9754_s27  ;;  %v10264_v28 = vrot.slane %v10240_v5, 1  ;;  %16321 = vst [vmem:[#allocation41_spill] sm:$0xff] %v10270_v53  ;;  %16322 = vst [vmem:[#allocation42_spill] sm:$0xff] %v10273_v50  ;;  %v10299_v27 = vrot.slane %v10270_v53, 1  ;;  %v10303_v37 = vld [vmem:[#allocation2 + $0x1c8] sm:$0xff]  ;;  %v16353_v56 = vld [vmem:[#allocation28_spill] sm:$0xff] }
  0x44   : > { %8192 = vrot.lane.b32.xlu0 %v8191_v39, %s9754_s27  ;;  %v10276_v39 = vrot.slane %v10040_v26, 2  ;;  %16324 = vst [vmem:[#allocation44_spill] sm:$0xff] %v10287_v20  ;;  %16326 = vst [vmem:[#allocation46_spill] sm:$0xff] %v10296_v38  ;;  %v10343_v20 = vrot.slane %v10035_v24, 2  ;;  %v10362_v24 = vrot.slane %v10079_v41, 2  ;;  %v952_v41 = vrot.slane %v641_v14, 2 }
  0x45   : > { %16319 = vst [vmem:[#allocation39_spill] sm:$0xff] %v10264_v28  ;;  %v10292_v26 = vsel %vm714_vm2, %v10244_v6, %v10264_v28  ;;  %16327 = vst [vmem:[#allocation47_spill] sm:$0xff] %v10299_v27  ;;  %v10312_v6 = vrot.slane %v10011_v10, 2  ;;  %v10331_v10 = vsel %vm923_vm3, %v925_v52, %v927_v13  ;;  %v10397_v14 = vrot.slane %v10059_v34, 2  ;;  %v16359_v58 = vld [vmem:[#allocation31_spill] sm:$0xff] }
  0x46   : > { %16323 = vst [vmem:[#allocation43_spill] sm:$0xff] %v10276_v39  ;;  %16325 = vst [vmem:[#allocation45_spill] sm:$0xff] %v10292_v26  ;;  %v10317_v43 = vsel %vm923_vm3, %v10273_v50, %v10276_v39  ;;  %v10321_v53 = vsel %vm923_vm3, %v10276_v39, %v932_v3  ;;  %v8216_v9 = vpack.i.bf16 %v10264_v28, %v10292_v26  ;;  %v10334_v3 = vld [vmem:[#allocation2 + $0x1e8] sm:$0xff]  ;;  %v10340_v39 = vrot.slane %v10303_v37, 1  ;;  %v16360_v40 = vld [vmem:[#allocation27_spill] sm:$0xff] }
  0x47   : > { %8197 = vrot.lane.b32.xlu1 %v8196_v8, %s9754_s27  ;;  %v926_v8 = vsel %vm923_vm3, %v924_v1, %v925_v52  ;;  %16329 = vst [vmem:[#allocation49_spill] sm:$0xff] %v10303_v37  ;;  %16330 = vst [vmem:[#allocation50_spill] sm:$0xff] %v10306_v33  ;;  %v10351_v52 = vsel %vm714_vm2, %v10296_v38, %v10299_v27  ;;  %v10367_v37 = vrot.slane %v10081_v42, 2  ;;  %v10370_v26 = vrot.slane %v10096_v47, 2 }
  0x48   : > { %8202 = vrot.lane.b32.xlu0 %v8201_v32, %s9754_s27  ;;  %v10301_v32 = vld [vmem:[#allocation2 + $0x1d0] sm:$0xff]  ;;  %16331 = vst [vmem:[#allocation51_spill] sm:$0xff] %v10309_v44  ;;  %16332 = vst [vmem:[#allocation52_spill] sm:$0xff] %v10317_v43  ;;  %v10328_v7 = vpack.i.bf16 %v926_v8, %v924_v1  ;;  %v10346_v1 = vrot.slane %v10063_v36, 2  ;;  %v10359_v8 = vsel %vm923_vm3, %v10306_v33, %v937_v0  ;;  %v10376_v13 = vrot.slane %v10334_v3, 1  ;;  %v16363_v48 = vld [vmem:[#allocation36_spill] sm:$0xff] }
  0x49   : > { %16328 = vst [vmem:[#allocation48_spill] sm:$0xff] %v10301_v32  ;;  %16333 = vst [vmem:[#allocation53_spill] sm:$0xff] %v10334_v3  ;;  %v8226_v0 = vpack.i.bf16 %v10296_v38, %v10261_v29  ;;  %v947_v43 = vrot.slane %v637_v57, 2  ;;  %v8231_v42 = vpack.i.bf16 %v10299_v27, %v10351_v52  ;;  %v10400_v36 = vrot.slane %v10102_v49, 2  ;;  %v16362_v51 = vld [vmem:[#allocation38_spill] sm:$0xff] }
  0x4a   : > { %16335 = vst [vmem:[#allocation55_spill] sm:$0xff] %v10340_v39  ;;  %16336 = vst [vmem:[#allocation56_spill] sm:$0xff] %v10343_v20  ;;  %v10394_v57 = vsel %vm923_vm3, %v10346_v1, %v10306_v33  ;;  %v10441_v33 = vrot.slane %v10061_v35, 2  ;;  %v10461_v35 = vrot.slane %v10134_v59, 2  ;;  %v16365_v17 = vpack.i.bf16 %v10273_v50, %v10331_v10 }
  0x4b   : > { %8207 = vrot.lane.b32.xlu1 %v8206_v12, %s9754_s27  ;;  %v10337_v12 = vrot.slane %v10301_v32, 1  ;;  %16337 = vst [vmem:[#allocation57_spill] sm:$0xff] %v10346_v1  ;;  %16338 = vst [vmem:[#allocation58_spill] sm:$0xff] %v10351_v52  ;;  %v942_v32 = vrot.slane %v633_v22, 2  ;;  %v1735_v52 = vrot.slane %v1430_v11, 2 }
  0x4c   : > { %8212 = vrot.lane.b32.xlu0 %v8211_v55, %s9754_s27  ;;  %v10353_v55 = vld [vmem:[#allocation2 + $0x1f0] sm:$0xff]  ;;  %16340 = vst [vmem:[#allocation60_spill] sm:$0xff] %v10359_v8  ;;  %16341 = vst [vmem:[#allocation61_spill] sm:$0xff] %v10367_v37  ;;  %v10428_v8 = vsel %vm923_vm3, %v10370_v26, %v952_v41  ;;  %v10447_v41 = vrot.slane %v10139_v62, 2  ;;  %v1442_v11 = vld [vmem:[#allocation2 + $0xb8] sm:$0x1] }
  0x4d   : > { %16334 = vst [vmem:[#allocation54_spill] sm:$0xff] %v10337_v12  ;;  %16339 = vst [vmem:[#allocation59_spill] sm:$0xff] %v10353_v55  ;;  %v10384_v47 = vsel %vm714_vm2, %v10340_v39, %v10337_v12  ;;  %v10387_v22 = vrot.slane %v10353_v55, 1  ;;  %v10405_v55 = vsel %vm923_vm3, %v10362_v24, %v10309_v44  ;;  %v10414_v3 = vsel %vm923_vm3, %v10367_v37, %v942_v32 }
  0x4e   : > { %16342 = vst [vmem:[#allocation62_spill] sm:$0xff] %v10370_v26  ;;  %16343 = vst [vmem:[#allocation63_spill] sm:$0xff] %v10376_v13  ;;  %v8241_v34 = vpack.i.bf16 %v10376_v13, %v10337_v12  ;;  %v8236_v49 = vpack.i.bf16 %v10384_v47, %v10340_v39  ;;  %v10432_v32 = vsel %vm923_vm3, %v10309_v44, %v947_v43  ;;  %v10469_v43 = vrot.slane %v10166_v16, 2  ;;  %v16372_v39 = vld [vmem:[#allocation30_spill] sm:$0xff] }
  0x4f   : > { %8217 = vrot.lane.b32.xlu1 %v8216_v9, %s9754_s27  ;;  %16344 = vst [vmem:[#allocation64_spill] sm:$0xff] %v10384_v47  ;;  %16345 = vst [vmem:[#allocation65_spill] sm:$0xff] %v10387_v22  ;;  %v10410_v9 = vsel %vm923_vm3, %v10343_v20, %v10367_v37  ;;  %v649_v37 = vld [vmem:[#allocation2 + $0xf8] sm:$0x1]  ;;  %v10444_v20 = vrot.slane %v10137_v61, 2  ;;  %v10458_v44 = vsel %vm923_vm3, %v10400_v36, %v10397_v14  ;;  %v10520_v16 = vrot.slane %v10201_v63, 2 }
  0x50   : > { %8222 = vrot.lane.b32.xlu0 %v8221_v21, %s9754_s27  ;;  %16346 = vst [vmem:[#allocation66_spill] sm:$0xff] %v10394_v57  ;;  %16347 = vst [vmem:[#allocation67_spill] sm:$0xff] %v10397_v14  ;;  %v957_v21 = vrot.slane %v645_v2, 2  ;;  %v10419_v2 = vsel %vm923_vm3, %v10312_v6, %v10370_v26  ;;  %v962_v62 = vrot.slane %v649_v37, 2  ;;  %v10466_v26 = vrot.slane %v10164_v15, 2  ;;  %v507_v63 = vld [vmem:[%s9923_s26 + $0xf8] sm:$0xff] }
  0x51   : > { %16348 = vst [vmem:[#allocation68_spill] sm:$0xff] %v10410_v9  ;;  %v10480_v61 = vld [vmem:[#allocation2 + $0x138] sm:$0x1]  ;;  %v10497_v37 = vsel %vm923_vm3, %v10441_v33, %v10461_v35  ;;  %v10523_v15 = vrot.slane %v10240_v5, 2  ;;  %v16361_v5 = vld [vmem:[#allocation32_spill] sm:$0xff]  ;;  %v1730_v12 = vrot.slane %v1426_v18, 2  ;;  %v16377_v18 = vpack.i.bf16 %v10394_v57, %v10346_v1 }
  0x52   : > { %v10512_v59 = vsel %vm923_vm3, %v10466_v26, %v10469_v43  ;;  %v16368_v25 = vld [vmem:[#allocation52_spill] sm:$0xff]  ;;  %v10581_v45 = vrot.slane %v16372_v39, 2  ;;  %v16388_v57 = vpack.i.bf16 %v10414_v3, %v10410_v9  ;;  %v653_v9 = vld [vmem:[#allocation2 + $0x118] sm:$0x1] }
  0x53   : > { %8227 = vrot.lane.b32.xlu1 %v8226_v0, %s9754_s27  ;;  %v10438_v0 = vsel %vm714_vm2, %v10376_v13, %v10387_v22  ;;  %v16369_v38 = vpack.i.bf16 %v10321_v53, %v16368_v25  ;;  %v16371_v27 = vld [vmem:[#allocation56_spill] sm:$0xff]  ;;  %v16375_v13 = vld [vmem:[#allocation50_spill] sm:$0xff] }
  0x54   : > { %8232 = vrot.lane.b32.xlu0 %v8231_v42, %s9754_s27  ;;  %v10453_v42 = vsel %vm923_vm3, %v10397_v14, %v957_v21  ;;  %v8246_v21 = vpack.i.bf16 %v10387_v22, %v10438_v0  ;;  %v10507_v14 = vsel %vm923_vm3, %v10461_v35, %v962_v62  ;;  %v506_v62 = vld [vmem:[%s9923_s26 + $0xf0] sm:$0xff]  ;;  %v1740_v22 = vrot.slane %v1434_v4, 2  ;;  %v16373_v53 = vld [vmem:[#allocation40_spill] sm:$0xff]  ;;  %v16378_v4 = vld [vmem:[#allocation41_spill] sm:$0xff] }
  0x55   : > { %v545_v28 = vmul.f32 %v16367_v46, %v506_v62  ;;  %v16387_v39 = vld [vmem:[#allocation48_spill] sm:$0xff]  ;;  %v8306_v3 = vpack.i.bf16 %v10507_v14, %v10497_v37 }
  0x57   : > { %8237 = vrot.lane.b32.xlu1 %v8236_v49, %s9754_s27  ;;  %v10490_v49 = vsel %vm923_vm3, %v10444_v20, %v10447_v41  ;;  %v584_v47 = vadd.f32 %v16370_v54, %v545_v28  ;;  %v10596_v28 = vrot.slane %v16378_v4, 2  ;;  %v16385_v4 = vld [vmem:[#allocation34_spill] sm:$0xff] }
  0x58   : > { %8242 = vrot.lane.b32.xlu0 %v8241_v34, %s9754_s27  ;;  %v10516_v34 = vrot.slane %v10199_v60, 2  ;;  %v546_v60 = vmul.f32 %v16367_v46, %v507_v63  ;;  %v1446_v46 = vld [vmem:[#allocation2 + $0xd8] sm:$0x1]  ;;  %v10614_v62 = vrot.slane %v16385_v4, 2  ;;  %v1750_v4 = vrot.slane %v1442_v11, 2 }
  0x59   : > { %616 = vst.msk [vmem:[#allocation2 + $0x208] sm:$0xff] %vm388_vm0, %v584_v47  ;;  %v1450_v63 = vld [vmem:[#allocation2 + $0xf8] sm:$0x1] }
  0x5a   : > { %v585_v10 = vadd.f32 %v16370_v54, %v546_v60  ;;  %v16379_v54 = vld [vmem:[#allocation43_spill] sm:$0xff] }
  0x5b   : > { %8247 = vrot.lane.b32.xlu1 %v8246_v21, %s9754_s27  ;;  %v16364_v21 = vld [vmem:[#allocation45_spill] sm:$0xff]  ;;  %v10603_v60 = vsel %vm923_vm3, %v16379_v54, %v1730_v12  ;;  %v16386_v47 = vld [vmem:[#allocation35_spill] sm:$0xff]  ;;  %v10635_v12 = vrot.slane %v16387_v39, 2 }
  0x5c   : > { %8252 = vrot.lane.b32.xlu0 %v10328_v7, %s9755_s28  ;;  %v16356_v7 = vld [vmem:[#allocation29_spill] sm:$0xff]  ;;  %v10617_v50 = vrot.slane %v16386_v47, 2  ;;  %617 = vst.msk [vmem:[#allocation2 + $0x210] sm:$0xff] %vm388_vm0, %v585_v10  ;;  %v1454_v54 = vld [vmem:[#allocation2 + $0x118] sm:$0x1] }
  0x5d   : > { %16380 = vst [vmem:[#allocation29_spill] sm:$0xff] %v10603_v60  ;;  %v1462_v10 = vld [vmem:[#allocation2 + $0x158] sm:$0x1] }
  0x5e   : > { %v1458_v47 = vld [vmem:[#allocation2 + $0x138] sm:$0x1]  ;;  %v1775_v60 = vrot.slane %v1462_v10, 2  ;;  %v16395_v10 = vld [vmem:[#allocation49_spill] sm:$0xff] }
  0x5f   : > { %8257 = vrot.lane.b32.xlu1 %v16365_v17, %s9755_s28  ;;  %v10589_v17 = vsel %vm923_vm3, %v16375_v13, %v1735_v52  ;;  %v16381_v52 = vld [vmem:[#allocation61_spill] sm:$0xff]  ;;  %v16390_v11 = vld [vmem:[#allocation67_spill] sm:$0xff]  ;;  %v1770_v1 = vrot.slane %v1458_v47, 2  ;;  %v10697_v47 = vrot.slane %v16395_v10, 2 }
  0x60   : > { %8262 = vrot.lane.b32.xlu0 %v16369_v38, %s9755_s28  ;;  %v10584_v38 = vrot.slane %v16373_v53, 2  ;;  %16376 = vst [vmem:[#allocation28_spill] sm:$0xff] %v10589_v17  ;;  %v10607_v13 = vsel %vm923_vm3, %v16381_v52, %v1740_v22  ;;  %v16383_v53 = vld [vmem:[#allocation60_spill] sm:$0xff]  ;;  %v10627_v52 = vsel %vm923_vm3, %v10520_v16, %v10516_v34  ;;  %v1760_v22 = vrot.slane %v1450_v63, 2  ;;  %v16391_v17 = vld [vmem:[#allocation62_spill] sm:$0xff] }
  0x61   : > { %16382 = vst [vmem:[#allocation25_spill] sm:$0xff] %v10607_v13  ;;  %v10654_v63 = vsel %vm923_vm3, %v16391_v17, %v1750_v4  ;;  %v16392_v13 = vmov 0.0   ;;  %v16393_v17 = vpack.i.bf16 %v10405_v55, %v10362_v24  ;;  %16396 = vst [vmem:[#allocation27_spill] sm:$0xff] %v10697_v47  ;;  %v10707_v4 = vsel %vm923_vm3, %v10469_v43, %v1770_v1  ;;  %v661_v10 = vld [vmem:[#allocation2 + $0x158] sm:$0x1] }
  0x62   : > { %16374 = vst [vmem:[#allocation12_spill] sm:$0xff] %v10584_v38  ;;  %433 = vst.msk [vmem:[#allocation3] sm:$0xff] %vm432_vm4, %v16392_v13  ;;  %v10724_v1 = vsel %vm923_vm3, %v10614_v62, %v10617_v50 }
  0x63   : > { %8267 = vrot.lane.b32.xlu1 %v16377_v18, %s9755_s28  ;;  %v16384_v18 = vpack.i.bf16 %v16371_v27, %v16383_v53  ;;  %v10632_v53 = vsel %vm923_vm3, %v10581_v45, %v10523_v15  ;;  %v1466_v27 = vld [vmem:[#allocation2 + $0x178] sm:$0x1]  ;;  %434 = vst.msk [vmem:[#allocation3 + $0x8] sm:$0xff] %vm432_vm4, %v16392_v13  ;;  %435 = vst.msk [vmem:[#allocation3 + $0x10] sm:$0xff] %vm432_vm4, %v16392_v13 }
  0x64   : > { %439 = vst.msk [vmem:[#allocation3 + $0x220] sm:$0xff] %vm432_vm4, %v16392_v13  ;;  %440 = vst.msk [vmem:[#allocation3 + $0x228] sm:$0xff] %vm432_vm4, %v16392_v13  ;;  %v1780_v25 = vrot.slane %v1466_v27, 2 }
  0x65   : > { %8272 = vrot.lane.b32.xlu0 %v16384_v18, %s9755_s28  ;;  %v1755_v18 = vrot.slane %v1446_v46, 2  ;;  %v10646_v46 = vsel %vm923_vm3, %v10584_v38, %v10596_v28  ;;  %441 = vst.msk [vmem:[#allocation3 + $0x230] sm:$0xff] %vm432_vm4, %v16392_v13  ;;  %v1765_v13 = vrot.slane %v1454_v54, 2  ;;  %v16394_v54 = vpack.i.bf16 %v10312_v6, %v10432_v32 }
  0x66   : > { %16389 = vst [vmem:[#allocation31_spill] sm:$0xff] %v10646_v46  ;;  %v16397_v32 = vpack.i.bf16 %v10428_v8, %v10419_v2  ;;  %v10743_v8 = vsel %vm923_vm3, %v10697_v47, %v10635_v12 }
  0x67   : > { %8277 = vrot.lane.b32.xlu1 %v16388_v57, %s9755_s28  ;;  %v10650_v39 = vsel %vm923_vm3, %v16390_v11, %v1755_v18  ;;  %v1470_v57 = vld [vmem:[#allocation2 + $0x198] sm:$0x1]  ;;  %v10680_v11 = vsel %vm923_vm3, %v10461_v35, %v1760_v22  ;;  %16401 = vst [vmem:[#allocation36_spill] sm:$0xff] %v10743_v8 }
  0x68   : > { %v1785_v35 = vrot.slane %v1470_v57, 2  ;;  %v1478_v22 = vld [vmem:[#allocation2 + $0x1d8] sm:$0x1] }
  0x69   : > { %8282 = vrot.lane.b32.xlu0 %v16393_v17, %s9755_s28  ;;  %v10686_v17 = vsel %vm923_vm3, %v10447_v41, %v1765_v13  ;;  %v10703_v13 = vsel %vm923_vm3, %v10516_v34, %v1775_v60  ;;  %v1474_v57 = vld [vmem:[#allocation2 + $0x1b8] sm:$0x1]  ;;  %v10719_v60 = vsel %vm923_vm3, %v10523_v15, %v1780_v25  ;;  %v16400_v25 = vpack.i.bf16 %v10458_v44, %v10400_v36 }
  0x6a   : > { %16398 = vst [vmem:[#allocation32_spill] sm:$0xff] %v10719_v60  ;;  %v1790_v27 = vrot.slane %v1474_v57, 2  ;;  %v8311_v57 = vpack.i.bf16 %v10490_v49, %v10444_v20  ;;  %v10963_v60 = vld [vmem:[#allocation2 + $0x70] sm:$0xff] }
  0x6b   : > { %8287 = vrot.lane.b32.xlu1 %v16394_v54, %s9755_s28  ;;  %v967_v54 = vrot.slane %v653_v9, 2  ;;  %v10730_v9 = vsel %vm923_vm3, %v10617_v50, %v1785_v35 }
  0x6c   : > { %16399 = vst [vmem:[#allocation38_spill] sm:$0xff] %v10730_v9  ;;  %v10761_v18 = vsel %vm923_vm3, %v10596_v28, %v1790_v27 }
  0x6d   : > { %8292 = vrot.lane.b32.xlu0 %v16397_v32, %s9755_s28  ;;  %v1795_v32 = vrot.slane %v1478_v22, 2  ;;  %v16403_v22 = vpack.i.bf16 %v10441_v33, %v10453_v42  ;;  %v968_v14 = vsel %vm923_vm3, %v10447_v41, %v967_v54  ;;  %16404 = vst [vmem:[#allocation4_spill] sm:$0xff] %v10761_v18  ;;  %v977_v42 = vrot.slane %v661_v10, 2 }
  0x6e   : > { %v8316_v41 = vpack.i.bf16 %v10466_v26, %v968_v14  ;;  %v677_v14 = vld [vmem:[#allocation2 + $0x1d8] sm:$0x1] }
  0x6f   : > { %8297 = vrot.lane.b32.xlu1 %v16400_v25, %s9755_s28  ;;  %v10747_v35 = vsel %vm923_vm3, %v10635_v12, %v1795_v32  ;;  %v16405_v32 = vrot.slane %v10480_v61, 2  ;;  %v978_v61 = vsel %vm923_vm3, %v10516_v34, %v977_v42  ;;  %v669_v25 = vld [vmem:[#allocation2 + $0x198] sm:$0x1] }
  0x70   : > { %16402 = vst [vmem:[#allocation45_spill] sm:$0xff] %v10747_v35  ;;  %v673_v35 = vld [vmem:[#allocation2 + $0x1b8] sm:$0x1] }
  0x71   : > { %8302 = vrot.lane.b32.xlu0 %v16403_v22, %s9755_s28  ;;  %v973_v9 = vsel %vm923_vm3, %v10469_v43, %v16405_v32  ;;  %v665_v22 = vld [vmem:[#allocation2 + $0x178] sm:$0x1]  ;;  %v8326_v43 = vpack.i.bf16 %v10627_v52, %v10520_v16  ;;  %v8341_v32 = vpack.i.bf16 %v10724_v1, %v10614_v62 }
  0x72   : > { %v8321_v54 = vpack.i.bf16 %v973_v9, %v10512_v59  ;;  %v982_v27 = vrot.slane %v665_v22, 2  ;;  %v992_v9 = vrot.slane %v673_v35, 2 }
  0x73   : > { %8307 = vrot.lane.b32.xlu1 %v8306_v3, %s9755_s28  ;;  %v8331_v3 = vpack.i.bf16 %v10581_v45, %v978_v61  ;;  %v16408_v61 = vld [vmem:[#allocation59_spill] sm:$0xff] }
  0x74   : > { %v983_v10 = vsel %vm923_vm3, %v10523_v15, %v982_v27  ;;  %v993_v22 = vsel %vm923_vm3, %v10596_v28, %v992_v9  ;;  %v681_v15 = vld [vmem:[#allocation2 + $0x1f8] sm:$0x1] }
  0x75   : > { %8312 = vrot.lane.b32.xlu0 %v8311_v57, %s9755_s28  ;;  %v987_v57 = vrot.slane %v669_v25, 2  ;;  %v8336_v34 = vpack.i.bf16 %v983_v10, %v10632_v53  ;;  %v8351_v25 = vpack.i.bf16 %v993_v22, %v10646_v46  ;;  %v16414_v22 = vld [vmem:[#allocation8_spill] sm:$0xff]  ;;  %v11058_v46 = vld [vmem:[#allocation2 + $0xf0] sm:$0xff] }
  0x77   : > { %8317 = vrot.lane.b32.xlu1 %v8316_v41, %s9755_s28  ;;  %v988_v42 = vsel %vm923_vm3, %v10617_v50, %v987_v57  ;;  %v997_v41 = vrot.slane %v677_v14, 2  ;;  %v1002_v50 = vrot.slane %v681_v15, 2  ;;  %v16410_v14 = vpack.i.bf16 %v10074_v19, %v10033_v23  ;;  %v16423_v19 = vld [vmem:[#allocation6_spill] sm:$0xff] }
  0x78   : > { %v8346_v35 = vpack.i.bf16 %v10584_v38, %v988_v42 }
  0x79   : > { %8322 = vrot.lane.b32.xlu0 %v8321_v54, %s9755_s28  ;;  %v16406_v54 = vld [vmem:[#allocation53_spill] sm:$0xff]  ;;  %v998_v28 = vsel %vm923_vm3, %v10635_v12, %v997_v41  ;;  %v16415_v41 = vld [vmem:[#allocation16_spill] sm:$0xff] }
  0x7a   : > { %v10796_v27 = vrot.slane %v16406_v54, 2  ;;  %v16416_v15 = vpack.i.bf16 %v16414_v22, %v16415_v41  ;;  %v16433_v22 = vld [vmem:[#allocation22_spill] sm:$0xff] }
  0x7b   : > { %8327 = vrot.lane.b32.xlu1 %v8326_v43, %s9755_s28  ;;  %v10799_v43 = vrot.slane %v16408_v61, 2  ;;  %v16420_v61 = vld [vmem:[#allocation15_spill] sm:$0xff] }
  0x7c   : > { %16407 = vst [vmem:[#allocation5_spill] sm:$0xff] %v10796_v27  ;;  %v8361_v10 = vpack.i.bf16 %v10796_v27, %v998_v28  ;;  %v16424_v28 = vld [vmem:[#allocation20_spill] sm:$0xff] }
  0x7d   : > { %8332 = vrot.lane.b32.xlu0 %v8331_v3, %s9755_s28  ;;  %v8356_v3 = vpack.i.bf16 %v10743_v8, %v10697_v47  ;;  %v10811_v57 = vsel %vm923_vm3, %v10796_v27, %v10799_v43  ;;  %v1003_v9 = vsel %vm923_vm3, %v10799_v43, %v1002_v50  ;;  %v16421_v50 = vld [vmem:[#allocation14_spill] sm:$0xff]  ;;  %v2972_v27 = vrot.slane %v10963_v60, 2 }
  0x7e   : > { %16409 = vst [vmem:[#allocation30_spill] sm:$0xff] %v10811_v57  ;;  %v8366_v12 = vpack.i.bf16 %v1003_v9, %v10811_v57  ;;  %v16422_v23 = vpack.i.bf16 %v16420_v61, %v16421_v50  ;;  %v16427_v9 = vld [vmem:[#allocation7_spill] sm:$0xff] }
  0x7f   : > { %8337 = vrot.lane.b32.xlu1 %v8336_v34, %s9755_s28  ;;  %v16411_v34 = vld [vmem:[#allocation13_spill] sm:$0xff] }
  0x81   : > { %8342 = vrot.lane.b32.xlu0 %v8341_v32, %s9755_s28  ;;  %v16412_v32 = vld [vmem:[#allocation10_spill] sm:$0xff] }
  0x82   : > { %v16413_v42 = vpack.i.bf16 %v16411_v34, %v16412_v32  ;;  %v16430_v34 = vld [vmem:[#allocation17_spill] sm:$0xff] }
  0x83   : > { %8347 = vrot.lane.b32.xlu1 %v8346_v35, %s9755_s28  ;;  %v16417_v35 = vld [vmem:[#allocation18_spill] sm:$0xff] }
  0x85   : > { %8352 = vrot.lane.b32.xlu0 %v8351_v25, %s9755_s28  ;;  %v16418_v25 = vld [vmem:[#allocation9_spill] sm:$0xff] }
  0x86   : > { %v16419_v54 = vpack.i.bf16 %v16417_v35, %v16418_v25  ;;  %v16435_v35 = vpack.i.bf16 %v16353_v56, %v16352_v30  ;;  %v16436_v25 = vld [vmem:[#allocation24_spill] sm:$0xff] }
  0x87   : > { %8357 = vrot.lane.b32.xlu1 %v8356_v3, %s9755_s28  ;;  %v16425_v3 = vpack.i.bf16 %v16423_v19, %v16424_v28  ;;  %v16439_v19 = vpack.i.bf16 %v16357_v31, %v16356_v7  ;;  %v16440_v28 = vld [vmem:[#allocation33_spill] sm:$0xff] }
  0x89   : > { %8362 = vrot.lane.b32.xlu0 %v8361_v10, %s9755_s28  ;;  %v16426_v10 = vld [vmem:[#allocation21_spill] sm:$0xff] }
  0x8b   : > { %8367 = vrot.lane.b32.xlu1 %v8366_v12, %s9755_s28  ;;  %v16428_v12 = vpack.i.bf16 %v16426_v10, %v16427_v9  ;;  %v16443_v9 = vpack.i.bf16 %v16361_v5, %v16360_v40  ;;  %v10903_v5 = vld [vmem:[#allocation2 + $0x208] sm:$0xff] }
  0x8d   : > { %8372 = vrot.lane.b32.xlu0 %v16410_v14, %s9754_s27  ;;  %v16429_v14 = vld [vmem:[#allocation19_spill] sm:$0xff] }
  0x8e   : > { %v16431_v32 = vpack.i.bf16 %v16429_v14, %v16430_v34  ;;  %v16446_v34 = vpack.i.bf16 %v16364_v21, %v16363_v48  ;;  %v16452_v48 = vld [vmem:[#allocation58_spill] sm:$0xff] }
  0x8f   : > { %8377 = vrot.lane.b32.xlu1 %v16413_v42, %s9754_s27  ;;  %v16432_v42 = vld [vmem:[#allocation11_spill] sm:$0xff]  ;;  %v16453_v21 = vld [vmem:[#allocation46_spill] sm:$0xff] }
  0x90   : > { %v16434_v41 = vpack.i.bf16 %v16432_v42, %v16433_v22 }
  0x91   : > { %8382 = vrot.lane.b32.xlu0 %v16416_v15, %s9754_s27  ;;  %v10855_v15 = vpop.permute.xlu0 %8132 }
  0x93   : > { %8387 = vrot.lane.b32.xlu1 %v16419_v54, %s9754_s27  ;;  %v16437_v54 = vld [vmem:[#allocation23_spill] sm:$0xff] }
  0x94   : > { %v16438_v61 = vpack.i.bf16 %v16436_v25, %v16437_v54  ;;  %v16454_v25 = vpack.i.bf16 %v16452_v48, %v16453_v21  ;;  %v16466_v48 = vld [vmem:[#allocation63_spill] sm:$0xff] }
  0x95   : > { %8392 = vrot.lane.b32.xlu0 %v16422_v23, %s9754_s27  ;;  %v16467_v21 = vpack.i.bf16 %v10438_v0, %v16466_v48  ;;  %v16470_v0 = vld [vmem:[#allocation52_spill] sm:$0xff] }
  0x97   : > { %8397 = vrot.lane.b32.xlu1 %v16425_v3, %s9754_s27  ;;  %v16441_v3 = vld [vmem:[#allocation26_spill] sm:$0xff] }
  0x98   : > { %v16442_v10 = vpack.i.bf16 %v16440_v28, %v16441_v3  ;;  %v16457_v28 = vld [vmem:[#allocation55_spill] sm:$0xff] }
  0x99   : > { %8402 = vrot.lane.b32.xlu0 %v16428_v12, %s9754_s27  ;;  %v16444_v12 = vld [vmem:[#allocation37_spill] sm:$0xff]  ;;  %v16458_v3 = vld [vmem:[#allocation47_spill] sm:$0xff] }
  0x9a   : > { %v16445_v14 = vpack.i.bf16 %v16359_v58, %v16444_v12  ;;  %v10905_v58 = vld [vmem:[#allocation2 + $0x210] sm:$0xff] }
  0x9b   : > { %8407 = vrot.lane.b32.xlu1 %v16431_v32, %s9754_s27  ;;  %v16447_v32 = vld [vmem:[#allocation39_spill] sm:$0xff]  ;;  %v1565_v54 = vrot.slane %v10905_v58, 1 }
  0x9c   : > { %v16448_v42 = vpack.i.bf16 %v16362_v51, %v16447_v32  ;;  %v1564_v51 = vrot.slane %v10903_v5, 1 }
  0x9d   : > { %8412 = vrot.lane.b32.xlu0 %v16434_v41, %s9754_s27  ;;  %v16450_v41 = vld [vmem:[#allocation44_spill] sm:$0xff] }
  0x9e   : > { %v1566_v32 = vsel %vm714_vm2, %v1564_v51, %v1565_v54 }
  0x9f   : > { %8417 = vrot.lane.b32.xlu1 %v16435_v35, %s9754_s27  ;;  %v16451_v35 = vpack.i.bf16 %v10261_v29, %v16450_v41  ;;  %v16460_v29 = vld [vmem:[#allocation54_spill] sm:$0xff] }
  0xa1   : > { %8422 = vrot.lane.b32.xlu0 %v16438_v61, %s9754_s27  ;;  %v10865_v50 = vpop.permute.xlu1 %8147 }
  0xa2   : > { %v10867_v23 = vpop.permute.xlu0 %8137 }
  0xa3   : > { %8427 = vrot.lane.b32.xlu1 %v16439_v19, %s9754_s27 }
  0xa5   : > { %8432 = vrot.lane.b32.xlu0 %v16442_v10, %s9754_s27  ;;  %v10877_v30 = vpop.permute.xlu1 %8157  ;;  %v16459_v10 = vpack.i.bf16 %v16457_v28, %v16458_v3  ;;  %v1438_v28 = vld [vmem:[#allocation2 + $0x98] sm:$0x1] }
  0xa6   : > { %v10879_v56 = vpop.permute.xlu0 %8142  ;;  %v1482_v3 = vld [vmem:[#allocation2 + $0x1f8] sm:$0x1] }
  0xa7   : > { %8437 = vrot.lane.b32.xlu1 %v16443_v9, %s9754_s27  ;;  %v16461_v9 = vld [vmem:[#allocation64_spill] sm:$0xff] }
  0xa8   : > { %v16462_v12 = vpack.i.bf16 %v16460_v29, %v16461_v9  ;;  %v1745_v9 = vrot.slane %v1438_v28, 2 }
  0xa9   : > { %8442 = vrot.lane.b32.xlu0 %v16445_v14, %s9754_s27  ;;  %v10889_v31 = vpop.permute.xlu1 %8162  ;;  %v16463_v14 = vld [vmem:[#allocation65_spill] sm:$0xff] }
  0xaa   : > { %v10891_v7 = vpop.permute.xlu0 %8152 }
  0xab   : > { %8447 = vrot.lane.b32.xlu1 %v16446_v34, %s9754_s27  ;;  %v8481_v34 = vpack.i.bf16 %v1564_v51, %v16463_v14 }
  0xad   : > { %8452 = vrot.lane.b32.xlu0 %v16448_v42, %s9754_s27  ;;  %v10901_v40 = vpop.permute.xlu1 %8167 }
  0xae   : > { %v10907_v22 = vpop.permute.xlu0 %8172 }
  0xaf   : > { %16449 = vst [vmem:[#allocation40_spill] sm:$0xff] %v10907_v22  ;;  %8457 = vrot.lane.b32.xlu1 %v16451_v35, %s9754_s27  ;;  %v9571_v35 = vld [vmem:[%s16007_s3 + $0x8] sm:$0x3f]  }
  0xb0   : > { %8111 = vmatprep.subr.msk.bf16.mxu0 %vm923_vm3, %v9571_v35  ;;  %v2281_v51 = vsel %vm923_vm3, %v9571_v35, 0  ;;  %8112 = vmatprep.subr.msk.bf16.mxu1 %vm923_vm3, %v9571_v35  ;;  %v16475_v35 = vld [vmem:[#allocation51_spill] sm:$0xff] }
  0xb1   : > { %8462 = vrot.lane.b32.xlu0 %v16454_v25, %s9754_s27  ;;  %v10919_v61 = vpop.permute.xlu1 %8182  ;;  %v8486_v25 = vpack.i.bf16 %v1565_v54, %v1566_v32  ;;  %7738 = vmatpush3.bf16.msra.mxu0 %v2281_v51  ;;  %v16471_v54 = vld [vmem:[#allocation42_spill] sm:$0xff]  ;;  %v10957_v32 = vld [vmem:[#allocation2 + $0x48] sm:$0xff] }
  0xb2   : > { %16455 = vst [vmem:[#allocation50_spill] sm:$0xff] %v10919_v61  ;;  %v10921_v19 = vpop.permute.xlu0 %8177  ;;  %7982 = vmatpush3.bf16.msra.mxu1 %v2281_v51  ;;  %v16472_v14 = vpack.i.bf16 %v16470_v0, %v16471_v54  ;;  %v1802_v51 = vrot.slane %v10903_v5, 2  ;;  %v10975_v0 = vld [vmem:[%s16007_s3] sm:$0x3f]   ;;  %v16477_v54 = vld [vmem:[#allocation57_spill] sm:$0xff]  ;;  %v16481_v5 = vld [vmem:[#allocation66_spill] sm:$0xff] }
  0xb3   : > { %16456 = vst [vmem:[#allocation41_spill] sm:$0xff] %v10921_v19  ;;  %8467 = vrot.lane.b32.xlu1 %v16459_v10, %s9754_s27  ;;  %16476 = vst [vmem:[#allocation67_spill] sm:$0xff] %v10975_v0  ;;  %8113 = vmatprep.subr.msk.bf16.mxu0 %vm923_vm3, %v10975_v0  ;;  %v11003_v19 = vld [vmem:[#allocation2 + $0x88] sm:$0xff] }
  0xb5   : > { %8472 = vrot.lane.b32.xlu0 %v16462_v12, %s9754_s27  ;;  %v10933_v42 = vpop.permute.xlu1 %8187  ;;  %v1800_v12 = vrot.slane %v1482_v3, 2 }
  0xb6   : > { %16464 = vst [vmem:[#allocation43_spill] sm:$0xff] %v10933_v42  ;;  %v10935_v41 = vpop.permute.xlu0 %8192  ;;  %v2966_v42 = vrot.slane %v10957_v32, 2 }
  0xb7   : > { %16465 = vst [vmem:[#allocation61_spill] sm:$0xff] %v10935_v41  ;;  %8477 = vrot.lane.b32.xlu1 %v16467_v21, %s9754_s27  ;;  %v10961_v21 = vld [vmem:[#allocation2 + $0x50] sm:$0xff]  ;;  %v1801_v3 = vsel %vm923_vm3, %v10799_v43, %v1800_v12  ;;  %v16480_v43 = vld [vmem:[#allocation28_spill] sm:$0xff]  ;;  %v2762_v41 = vrot.slane %v10963_v60, 1 }
  0xb8   : > { %v16482_v12 = vpack.i.bf16 %v16480_v43, %v16481_v5  ;;  %v11009_v0 = vpack.i.bf16 %v1802_v51, %v1801_v3 }
  0xb9   : > { %8482 = vrot.lane.b32.xlu0 %v8481_v34, %s9754_s27  ;;  %v10947_v10 = vpop.permute.xlu1 %8197  ;;  %v1486_v34 = vld [vmem:[#allocation2 + $0x218] sm:$0x1] }
  0xba   : > { %16468 = vst [vmem:[#allocation60_spill] sm:$0xff] %v10947_v10  ;;  %v10949_v29 = vpop.permute.xlu0 %8202  ;;  %v2759_v10 = vrot.slane %v10961_v21, 1  ;;  %16488 = vst [vmem:[#allocation53_spill] sm:$0xff] %v11009_v0 }
  0xbb   : > { %16469 = vst [vmem:[#allocation34_spill] sm:$0xff] %v10949_v29  ;;  %8487 = vrot.lane.b32.xlu1 %v8486_v25, %s9754_s27  ;;  %v1746_v25 = vsel %vm923_vm3, %v16475_v35, %v1745_v9  ;;  %v1805_v29 = vrot.slane %v1486_v34, 2  ;;  %v2758_v9 = vrot.slane %v10957_v32, 1  ;;  %v10983_v35 = vld [vmem:[#allocation2 + $0x68] sm:$0xff]  ;;  %v2665_v34 = vld [vmem:[#allocation2 + $0x58] sm:$0x1] }
  0xbc   : > { %v8516_v43 = vpack.i.bf16 %v1746_v25, %v10405_v55  ;;  %v2761_v5 = vrot.slane %v10983_v35, 1  ;;  %v16485_v32 = vld [vmem:[#allocation68_spill] sm:$0xff]  ;;  %v11019_v55 = vld [vmem:[#allocation2 + $0x90] sm:$0xff]  ;;  %v16489_v25 = vld [vmem:[#allocation25_spill] sm:$0xff]  ;;  %v2971_v0 = vrot.slane %v10983_v35, 2 }
  0xbd   : > { %8492 = vrot.lane.b32.xlu0 %v16472_v14, %s9755_s28  ;;  %v10959_v48 = vpop.permute.xlu1 %8207  ;;  %v16478_v14 = vld [vmem:[#allocation29_spill] sm:$0xff]  ;;  %v2765_v8 = vrot.slane %v11019_v55, 1  ;;  %v2977_v47 = vrot.slane %v11019_v55, 2 }
  0xbe   : > { %16473 = vst [vmem:[#allocation35_spill] sm:$0xff] %v10959_v48  ;;  %v10965_v28 = vpop.permute.xlu0 %8212  ;;  %v16479_v48 = vpack.i.bf16 %v16477_v54, %v16478_v14  ;;  %v8521_v14 = vpack.i.bf16 %v10419_v2, %v10312_v6  ;;  %v11021_v2 = vld [vmem:[#allocation2 + $0xb0] sm:$0xff]  ;;  %v2763_v3 = vsel %vm714_vm2, %v2761_v5, %v2762_v41  ;;  %v11054_v55 = vld [vmem:[#allocation2 + $0xc8] sm:$0xff] }
  0xbf   : > { %16474 = vst [vmem:[#allocation48_spill] sm:$0xff] %v10965_v28  ;;  %v1803_v28 = vrot.slane %v10905_v58, 2  ;;  %v2768_v18 = vrot.slane %v11021_v2, 1 }
  0xc0   : > { %8497 = vrot.lane.b32.xlu1 %v16479_v48, %s9755_s28  ;;  %v2967_v48 = vrot.slane %v10961_v21, 2  ;;  %v16486_v21 = vld [vmem:[#allocation56_spill] sm:$0xff] }
  0xc1   : > { %8502 = vrot.lane.b32.xlu0 %v16482_v12, %s9755_s28  ;;  %v10995_v58 = vpop.permute.xlu1 %8217  ;;  %v2669_v12 = vld [vmem:[#allocation2 + $0x78] sm:$0x1]  ;;  %v16487_v61 = vpack.i.bf16 %v16485_v32, %v16486_v21  ;;  %v11017_v6 = vsel %vm923_vm3, %v1803_v28, %v1805_v29  ;;  %v16490_v32 = vpack.i.bf16 %v10362_v24, %v16489_v25  ;;  %v2764_v24 = vrot.slane %v11003_v19, 1 }
  0xc2   : > { %16483 = vst [vmem:[#allocation62_spill] sm:$0xff] %v10995_v58  ;;  %v10997_v54 = vpop.permute.xlu0 %8222  ;;  %v11014_v58 = vsel %vm923_vm3, %v1802_v51, %v1803_v28  ;;  %v2968_v21 = vsel %vm923_vm3, %v2966_v42, %v2967_v48  ;;  %v2969_v51 = vrot.slane %v2665_v34, 2  ;;  %v2673_v29 = vld [vmem:[#allocation2 + $0x98] sm:$0x1]  ;;  %v2974_v57 = vrot.slane %v2669_v12, 2 }
  0xc3   : > { %16484 = vst [vmem:[#allocation49_spill] sm:$0xff] %v10997_v54  ;;  %v11030_v54 = vld [vmem:[#allocation2 + $0xa8] sm:$0xff]  ;;  %v2677_v25 = vld [vmem:[#allocation2 + $0xb8] sm:$0x1]  ;;  %v2976_v34 = vrot.slane %v11003_v19, 2  ;;  %v2982_v19 = vrot.slane %v11021_v2, 2  ;;  %v2766_v2 = vsel %vm714_vm2, %v2764_v24, %v2765_v8 }
  0xc4   : > { %8507 = vrot.lane.b32.xlu1 %v16487_v61, %s9755_s28  ;;  %v2760_v61 = vsel %vm714_vm2, %v2758_v9, %v2759_v10  ;;  %v2767_v12 = vrot.slane %v11030_v54, 1  ;;  %v2981_v22 = vrot.slane %v11030_v54, 2  ;;  %v2984_v38 = vrot.slane %v2677_v25, 2 }
  0xc5   : > { %8512 = vrot.lane.b32.xlu0 %v16490_v32, %s9755_s28  ;;  %v11032_v28 = vpop.permute.xlu1 %8227  ;;  %v11046_v60 = vpack.i.bf16 %v2760_v61, %v2758_v9  ;;  %v11062_v61 = vpack.i.bf16 %v2762_v41, %v2763_v3  ;;  %v2978_v35 = vsel %vm923_vm3, %v2976_v34, %v2977_v47  ;;  %v11078_v41 = vld [vmem:[#allocation2 + $0xe8] sm:$0xff]  ;;  %v2770_v3 = vrot.slane %v11054_v55, 1 }
  0xc6   : > { %16491 = vst [vmem:[#allocation59_spill] sm:$0xff] %v11032_v28  ;;  %v11037_v32 = vpop.permute.xlu0 %8232  ;;  %v2979_v28 = vrot.slane %v2673_v29, 2  ;;  %v11064_v29 = vpack.i.bf16 %v2968_v21, %v2966_v42  ;;  %v2769_v25 = vsel %vm714_vm2, %v2767_v12, %v2768_v18  ;;  %v16496_v42 = vpack.i.bf16 %v10400_v36, %v10654_v63  ;;  %v2681_v21 = vld [vmem:[#allocation2 + $0xd8] sm:$0x1] }
  0xc7   : > { %16492 = vst [vmem:[#allocation13_spill] sm:$0xff] %v11037_v32  ;;  %v11050_v32 = vpack.i.bf16 %v2761_v5, %v2759_v10  ;;  %v2970_v10 = vsel %vm923_vm3, %v2967_v48, %v2969_v51  ;;  %v11073_v5 = vsel %vm923_vm3, %v2972_v27, %v2974_v57  ;;  %v2774_v57 = vrot.slane %v11058_v46, 1 }
  0xc8   : > { %8517 = vrot.lane.b32.xlu1 %v8516_v43, %s9755_s28  ;;  %v11056_v43 = vld [vmem:[#allocation2 + $0xd0] sm:$0xff]  ;;  %16494 = vst [vmem:[#allocation8_spill] sm:$0xff] %v11064_v29  ;;  %v2980_v48 = vsel %vm923_vm3, %v2977_v47, %v2979_v28  ;;  %v16497_v51 = vpack.i.bf16 %v10650_v39, %v10458_v44  ;;  %v11096_v36 = vsel %vm923_vm3, %v2982_v19, %v2984_v38  ;;  %v2986_v63 = vrot.slane %v11054_v55, 2  ;;  %v2685_v39 = vld [vmem:[#allocation2 + $0xf8] sm:$0x1] }
  0xc9   : > { %8522 = vrot.lane.b32.xlu0 %v8521_v14, %s9755_s28  ;;  %v11060_v9 = vpop.permute.xlu1 %8237  ;;  %v11068_v14 = vsel %vm923_vm3, %v2971_v0, %v2972_v27  ;;  %v2771_v27 = vrot.slane %v11056_v43, 1  ;;  %16499 = vst [vmem:[#allocation9_spill] sm:$0xff] %v11096_v36  ;;  %v2987_v47 = vrot.slane %v11056_v43, 2  ;;  %v11106_v29 = vpack.i.bf16 %v2766_v2, %v2764_v24 }
  0xca   : > { %16493 = vst [vmem:[#allocation10_spill] sm:$0xff] %v11060_v9  ;;  %v11070_v54 = vpop.permute.xlu0 %8242  ;;  %v2773_v44 = vrot.slane %v11078_v41, 1  ;;  %v11111_v38 = vpack.i.bf16 %v2767_v12, %v2765_v8  ;;  %v11115_v55 = vpack.i.bf16 %v2978_v35, %v2976_v34  ;;  %v2989_v43 = vrot.slane %v2681_v21, 2  ;;  %v11131_v35 = vld [vmem:[#allocation2 + $0x130] sm:$0xff]  ;;  %v11146_v9 = vld [vmem:[#allocation2 + $0x128] sm:$0xff] }
  0xcb   : > { %16495 = vst [vmem:[#allocation16_spill] sm:$0xff] %v11070_v54  ;;  %v11093_v54 = vsel %vm923_vm3, %v2981_v22, %v2982_v19  ;;  %v11113_v19 = vpack.i.bf16 %v2768_v18, %v2769_v25  ;;  %v16503_v24 = vpack.i.bf16 %v10497_v37, %v10441_v33  ;;  %v2772_v18 = vsel %vm714_vm2, %v2770_v3, %v2771_v27 }
  0xcc   : > { %8527 = vrot.lane.b32.xlu1 %v16496_v42, %s9755_s28  ;;  %16498 = vst [vmem:[#allocation18_spill] sm:$0xff] %v11093_v54  ;;  %v11102_v42 = vpack.i.bf16 %v2971_v0, %v2970_v10  ;;  %16502 = vst [vmem:[#allocation6_spill] sm:$0xff] %v11115_v55  ;;  %v11119_v0 = vld [vmem:[#allocation2 + $0x110] sm:$0xff]  ;;  %v11125_v10 = vpack.i.bf16 %v2981_v22, %v2980_v48  ;;  %v2775_v34 = vsel %vm714_vm2, %v2773_v44, %v2774_v57 }
  0xcd   : > { %8532 = vrot.lane.b32.xlu0 %v16497_v51, %s9755_s28  ;;  %v11100_v28 = vpop.permute.xlu1 %8247  ;;  %v16505_v12 = vpack.i.bf16 %v10444_v20, %v10680_v11  ;;  %v2988_v2 = vsel %vm923_vm3, %v2986_v63, %v2987_v47  ;;  %v2991_v33 = vrot.slane %v11078_v41, 2  ;;  %v2992_v37 = vrot.slane %v11058_v46, 2  ;;  %v2689_v20 = vld [vmem:[#allocation2 + $0x118] sm:$0x1]  ;;  %v618_v11 = vld [vmem:[#allocation2] sm:$0xff] }
  0xce   : > { %16500 = vst [vmem:[#allocation15_spill] sm:$0xff] %v11100_v28  ;;  %v11109_v51 = vpop.permute.xlu0 %8252  ;;  %v11117_v28 = vld [vmem:[#allocation2 + $0x108] sm:$0xff]  ;;  %16504 = vst [vmem:[#allocation20_spill] sm:$0xff] %v11125_v10  ;;  %v2994_v22 = vrot.slane %v2685_v39, 2  ;;  %v8135_v25 = vunpack.i.h.bf16 %v10855_v15  ;;  %v8134_v48 = vunpack.i.l.bf16 %v10855_v15  ;;  %v2777_v8 = vrot.slane %v11119_v0, 1 }
  0xcf   : > { %16501 = vst [vmem:[#allocation14_spill] sm:$0xff] %v11109_v51  ;;  %v2990_v41 = vsel %vm923_vm3, %v2987_v47, %v2989_v43  ;;  %v2780_v46 = vrot.slane %v11131_v35, 1  ;;  %v2996_v39 = vrot.slane %v11117_v28, 2  ;;  %v2997_v15 = vrot.slane %v11119_v0, 2 }
  0xd0   : > { %8537 = vrot.lane.b32.xlu1 %v16503_v24, %s9755_s28  ;;  %v2776_v24 = vrot.slane %v11117_v28, 1  ;;  %v16506_v54 = vpack.i.bf16 %v10686_v17, %v10490_v49  ;;  %v11158_v36 = vpack.i.bf16 %v2772_v18, %v2770_v3  ;;  %v11160_v10 = vpack.i.bf16 %v2773_v44, %v2771_v27 }
  0xd1   : > { %8542 = vrot.lane.b32.xlu0 %v16505_v12, %s9755_s28  ;;  %v11142_v21 = vpop.permute.xlu1 %8257  ;;  %v11162_v55 = vpack.i.bf16 %v2774_v57, %v2775_v34  ;;  %v11164_v51 = vpack.i.bf16 %v2988_v2, %v2986_v63  ;;  %v16507_v47 = vpack.i.bf16 %v10512_v59, %v10466_v26  ;;  %v11171_v28 = vsel %vm923_vm3, %v2991_v33, %v2992_v37  ;;  %v2693_v63 = vld [vmem:[#allocation2 + $0x138] sm:$0x1] }
  0xd2   : > { %v11148_v12 = vpop.permute.xlu0 %8262  ;;  %16508 = vst [vmem:[#allocation21_spill] sm:$0xff] %v11171_v28  ;;  %v11174_v43 = vsel %vm923_vm3, %v2992_v37, %v2994_v22  ;;  %v2779_v49 = vrot.slane %v11146_v9, 1  ;;  %v2999_v17 = vrot.slane %v2689_v20, 2  ;;  %v11181_v27 = vsel %vm388_vm0, %v618_v11, %v8134_v48  ;;  %v638_v37 = vld [vmem:[#allocation2 + $0xa0] sm:$0xff]  ;;  %v11203_v20 = vld [vmem:[#allocation2 + $0x148] sm:$0xff]  ;;  %v11205_v11 = vld [vmem:[#allocation2 + $0x150] sm:$0xff] }
  0xd3   : > { %16509 = vst [vmem:[#allocation7_spill] sm:$0xff] %v11174_v43  ;;  %v11185_v26 = vpack.i.bf16 %v2991_v33, %v2990_v41  ;;  %v2778_v59 = vsel %vm714_vm2, %v2776_v24, %v2777_v8  ;;  %v8150_v44 = vunpack.i.h.bf16 %v10865_v50  ;;  %v8149_v0 = vunpack.i.l.bf16 %v10865_v50  ;;  %v622_v41 = vld [vmem:[#allocation2 + $0x20] sm:$0xff] }
  0xd4   : > { %8547 = vrot.lane.b32.xlu1 %v16506_v54, %s9755_s28  ;;  %v9580_v54 = vld [vmem:[#allocation2 + $0x8] sm:$0xff]  ;;  %v2781_v34 = vsel %vm714_vm2, %v2779_v49, %v2780_v46  ;;  %v2998_v2 = vsel %vm923_vm3, %v2996_v39, %v2997_v15  ;;  %v8140_v22 = vunpack.i.h.bf16 %v10867_v23  ;;  %v16511_v33 = vpack.i.bf16 %v10520_v16, %v10707_v4 }
  0xd5   : > { %8552 = vrot.lane.b32.xlu0 %v16507_v47, %s9755_s28  ;;  %v11178_v3 = vsel %vm388_vm0, %v9580_v54, %v8135_v25  ;;  %v11183_v57 = vpop.permute.xlu1 %8267  ;;  %16510 = vst [vmem:[#allocation19_spill] sm:$0xff] %v11185_v26  ;;  %v8139_v25 = vunpack.i.l.bf16 %v10867_v23  ;;  %v3001_v50 = vrot.slane %v11146_v9, 2  ;;  %v16512_v47 = vpack.i.bf16 %v10703_v13, %v10627_v52  ;;  %v11224_v26 = vld [vmem:[#allocation2 + $0x170] sm:$0xff] }
  0xd6   : > { %v11211_v23 = vpack.i.bf16 %v2778_v59, %v2776_v24  ;;  %v3000_v16 = vsel %vm923_vm3, %v2997_v15, %v2999_v17  ;;  %v3002_v4 = vrot.slane %v11131_v35, 2  ;;  %v3004_v54 = vrot.slane %v2693_v63, 2  ;;  %v11229_v13 = vld [vmem:[#allocation2 + $0x90] sm:$0xff]  ;;  %v11239_v15 = vld [vmem:[#allocation2 + $0x168] sm:$0xff] }
  0xd7   : > { %v11190_v18 = vpop.permute.xlu0 %8272  ;;  %v11218_v48 = vpack.i.bf16 %v2779_v49, %v2777_v8  ;;  %v11220_v28 = vpack.i.bf16 %v2780_v46, %v2781_v34  ;;  %v11222_v43 = vpack.i.bf16 %v2998_v2, %v2996_v39  ;;  %v11227_v52 = vsel %vm388_vm0, %v638_v37, %v8150_v44  ;;  %16518 = vst [vmem:[#allocation33_spill] sm:$0xff] %v11229_v13  ;;  %v9582_v49 = vld [vmem:[#allocation2 + $0x10] sm:$0xff]  ;;  %v16522_v34 = vld [vmem:[#allocation32_spill] sm:$0xff] }
  0xd8   : > { %8557 = vrot.lane.b32.xlu1 %v16511_v33, %s9755_s28  ;;  %16513 = vst [vmem:[#allocation17_spill] sm:$0xff] %v11211_v23  ;;  %v8160_v33 = vunpack.i.h.bf16 %v10877_v30  ;;  %16517 = vst [vmem:[#allocation23_spill] sm:$0xff] %v11227_v52  ;;  %v11233_v35 = vsel %vm388_vm0, %v11229_v13, %v8149_v0  ;;  %v2782_v8 = vrot.slane %v11203_v20, 1  ;;  %v2783_v46 = vrot.slane %v11205_v11, 1  ;;  %v11289_v13 = vld [vmem:[#allocation2 + $0x40] sm:$0xff] }
  0xd9   : > { %8562 = vrot.lane.b32.xlu0 %v16512_v47, %s9755_s28  ;;  %v11216_v9 = vpop.permute.xlu1 %8277  ;;  %16514 = vst [vmem:[#allocation11_spill] sm:$0xff] %v11218_v48  ;;  %16515 = vst [vmem:[#allocation22_spill] sm:$0xff] %v11220_v28  ;;  %v11242_v39 = vsel %vm388_vm0, %v622_v41, %v8140_v22  ;;  %v11245_v17 = vsel %vm388_vm0, %v9582_v49, %v8139_v25  ;;  %v8159_v59 = vunpack.i.l.bf16 %v10877_v30  ;;  %v8145_v0 = vunpack.i.h.bf16 %v10879_v56  ;;  %v630_v25 = vld [vmem:[#allocation2 + $0x60] sm:$0xff]  ;;  %v16532_v48 = vld [vmem:[#allocation31_spill] sm:$0xff] }
  0xda   : > { %16516 = vst [vmem:[#allocation24_spill] sm:$0xff] %v11222_v43  ;;  %16519 = vst [vmem:[#allocation26_spill] sm:$0xff] %v11233_v35  ;;  %v16520_v63 = vpack.i.bf16 %v10632_v53, %v10581_v45  ;;  %v11252_v44 = vpack.i.bf16 %v3001_v50, %v3000_v16  ;;  %v16523_v2 = vpack.i.bf16 %v10614_v62, %v16522_v34  ;;  %v2786_v30 = vrot.slane %v11224_v26, 1  ;;  %v11267_v53 = vld [vmem:[#allocation2 + $0x30] sm:$0xff]  ;;  %v11283_v34 = vld [vmem:[#allocation2 + $0x28] sm:$0xff] }
  0xdb   : > { %v11235_v24 = vpop.permute.xlu0 %8282  ;;  %v11260_v37 = vsel %vm923_vm3, %v3001_v50, %v3002_v4  ;;  %v11263_v22 = vsel %vm923_vm3, %v3002_v4, %v3004_v54  ;;  %v8144_v45 = vunpack.i.l.bf16 %v10879_v56  ;;  %16526 = vst [vmem:[#allocation58_spill] sm:$0xff] %v11267_v53  ;;  %v11271_v41 = vsel %vm388_vm0, %v11267_v53, %v8160_v33  ;;  %16528 = vst [vmem:[#allocation55_spill] sm:$0xff] %v11283_v34  ;;  %v16530_v53 = vld [vmem:[#allocation38_spill] sm:$0xff]  ;;  %v16533_v35 = vld [vmem:[#allocation12_spill] sm:$0xff] }
  0xdc   : > { %8567 = vrot.lane.b32.xlu1 %v16520_v63, %s9755_s28  ;;  %16521 = vst [vmem:[#allocation37_spill] sm:$0xff] %v11252_v44  ;;  %16524 = vst [vmem:[#allocation39_spill] sm:$0xff] %v11260_v37  ;;  %v8165_v62 = vunpack.i.h.bf16 %v10889_v31  ;;  %v2785_v50 = vrot.slane %v11239_v15, 1  ;;  %v8155_v16 = vunpack.i.h.bf16 %v10891_v7  ;;  %v8154_v4 = vunpack.i.l.bf16 %v10891_v7  ;;  %v2697_v63 = vld [vmem:[#allocation2 + $0x158] sm:$0x1]  ;;  %v16554_v37 = vld [vmem:[#allocation50_spill] sm:$0xff] }
  0xdd   : > { %8572 = vrot.lane.b32.xlu0 %v16523_v2, %s9755_s28  ;;  %16525 = vst [vmem:[#allocation44_spill] sm:$0xff] %v11263_v22  ;;  %v11274_v47 = vpop.permute.xlu1 %8287  ;;  %v8164_v54 = vunpack.i.l.bf16 %v10889_v31  ;;  %v2784_v56 = vsel %vm714_vm2, %v2782_v8, %v2783_v46  ;;  %v11287_v33 = vsel %vm388_vm0, %v11283_v34, %v8159_v59  ;;  %v646_v2 = vld [vmem:[#allocation2 + $0xe0] sm:$0xff]  ;;  %16529 = vst [vmem:[#allocation47_spill] sm:$0xff] %v11289_v13  ;;  %v3006_v44 = vrot.slane %v11203_v20, 2 }
  0xde   : > { %v16531_v7 = vpack.i.bf16 %v16530_v53, %v10724_v1  ;;  %v3007_v43 = vrot.slane %v11205_v11, 2  ;;  %v11300_v28 = vsel %vm388_vm0, %v630_v25, %v8145_v0  ;;  %v8170_v59 = vunpack.i.h.bf16 %v10901_v40  ;;  %v11309_v53 = vld [vmem:[#allocation2 + $0x50] sm:$0xff]  ;;  %v642_v23 = vld [vmem:[#allocation2 + $0xc0] sm:$0xff] }
  0xdf   : > { %v11280_v49 = vpop.permute.xlu0 %8292  ;;  %v8169_v34 = vunpack.i.l.bf16 %v10901_v40  ;;  %v16534_v52 = vpack.i.bf16 %v16532_v48, %v16533_v35  ;;  %v2787_v1 = vsel %vm714_vm2, %v2785_v50, %v2786_v30  ;;  %16535 = vst [vmem:[#allocation54_spill] sm:$0xff] %v11309_v53  ;;  %v11313_v20 = vsel %vm388_vm0, %v11309_v53, %v8144_v45  ;;  %v11324_v48 = vld [vmem:[#allocation2 + $0xd0] sm:$0xff]  ;;  %v11330_v35 = vld [vmem:[#allocation2 + $0x48] sm:$0xff]  ;;  %v634_v53 = vld [vmem:[#allocation2 + $0x80] sm:$0xff] }
  0xe0   : > { %16527 = vst [vmem:[#allocation46_spill] sm:$0xff] %v11280_v49  ;;  %8577 = vrot.lane.b32.xlu1 %v16531_v7, %s9755_s28  ;;  %v11317_v0 = vpack.i.bf16 %v2784_v56, %v2782_v8  ;;  %v11319_v25 = vpack.i.bf16 %v2785_v50, %v2783_v46  ;;  %v3009_v40 = vrot.slane %v2697_v63, 2  ;;  %v11322_v7 = vsel %vm388_vm0, %v646_v2, %v8155_v16  ;;  %v2701_v50 = vld [vmem:[#allocation2 + $0x178] sm:$0x1]  ;;  %v16544_v16 = vld [vmem:[#allocation40_spill] sm:$0xff]  ;;  %v16564_v49 = vld [vmem:[#allocation53_spill] sm:$0xff] }
  0xe1   : > { %8582 = vrot.lane.b32.xlu0 %v16534_v52, %s9755_s28  ;;  %v11315_v11 = vpop.permute.xlu1 %8297  ;;  %16539 = vst [vmem:[#allocation52_spill] sm:$0xff] %v11322_v7  ;;  %16540 = vst [vmem:[#allocation42_spill] sm:$0xff] %v11324_v48  ;;  %v11328_v52 = vsel %vm388_vm0, %v11324_v48, %v8154_v4  ;;  %v11334_v45 = vsel %vm388_vm0, %v11330_v35, %v8165_v62  ;;  %v11338_v8 = vsel %vm388_vm0, %v11289_v13, %v8164_v54  ;;  %v16545_v4 = vld [vmem:[#allocation27_spill] sm:$0xff]  ;;  %v16546_v2 = vld [vmem:[#allocation4_spill] sm:$0xff] }
  0xe2   : > { %16536 = vst [vmem:[#allocation64_spill] sm:$0xff] %v11315_v11  ;;  %16537 = vst [vmem:[#allocation65_spill] sm:$0xff] %v11317_v0  ;;  %v8175_v56 = vunpack.i.h.bf16 %v16544_v16  ;;  %v8174_v63 = vunpack.i.l.bf16 %v16544_v16  ;;  %v16547_v31 = vpack.i.bf16 %v16545_v4, %v16546_v2  ;;  %v11348_v48 = vpack.i.bf16 %v2786_v30, %v2787_v1  ;;  %v11353_v54 = vld [vmem:[#allocation2 + $0x190] sm:$0xff]  ;;  %v11361_v16 = vld [vmem:[#allocation2 + $0x68] sm:$0xff] }
  0xe3   : > { %16538 = vst [vmem:[#allocation63_spill] sm:$0xff] %v11319_v25  ;;  %16541 = vst [vmem:[#allocation51_spill] sm:$0xff] %v11328_v52  ;;  %v11340_v46 = vpop.permute.xlu0 %8302  ;;  %v3008_v62 = vsel %vm923_vm3, %v3006_v44, %v3007_v43  ;;  %v11355_v13 = vld [vmem:[#allocation2 + $0x70] sm:$0xff]  ;;  %v16551_v30 = vld [vmem:[#allocation45_spill] sm:$0xff]  ;;  %v3011_v2 = vrot.slane %v11239_v15, 2  ;;  %v2789_v15 = vrot.slane %v11353_v54, 1 }
  0xe4   : > { %16542 = vst [vmem:[#allocation57_spill] sm:$0xff] %v11330_v35  ;;  %16543 = vst [vmem:[#allocation29_spill] sm:$0xff] %v11340_v46  ;;  %8587 = vrot.lane.b32.xlu1 %v16547_v31, %s9755_s28  ;;  %v11351_v35 = vld [vmem:[#allocation2 + $0x188] sm:$0xff]  ;;  %v11359_v25 = vsel %vm388_vm0, %v11355_v13, %v8170_v59  ;;  %v11365_v31 = vsel %vm388_vm0, %v11361_v16, %v8169_v34  ;;  %v16552_v1 = vld [vmem:[#allocation36_spill] sm:$0xff]  ;;  %v8185_v59 = vunpack.i.h.bf16 %v16554_v37 }
  0xe5   : > { %16548 = vst [vmem:[#allocation28_spill] sm:$0xff] %v11348_v48  ;;  %16549 = vst [vmem:[#allocation66_spill] sm:$0xff] %v11355_v13  ;;  %v16553_v4 = vpack.i.bf16 %v16551_v30, %v16552_v1  ;;  %v3012_v48 = vrot.slane %v11224_v26, 2  ;;  %v11373_v0 = vld [vmem:[#allocation2 + $0x1b0] sm:$0xff]  ;;  %v8184_v13 = vunpack.i.l.bf16 %v16554_v37  ;;  %v11377_v22 = vpop.permute.xlu1 %8307  ;;  %v3010_v34 = vsel %vm923_vm3, %v3007_v43, %v3009_v40  ;;  %v16556_v7 = vld [vmem:[#allocation41_spill] sm:$0xff] }
  0xe6   : > { %16550 = vst [vmem:[#allocation68_spill] sm:$0xff] %v11361_v16  ;;  %16555 = vst [vmem:[#allocation56_spill] sm:$0xff] %v11377_v22  ;;  %v3014_v16 = vrot.slane %v2701_v50, 2  ;;  %v8180_v52 = vunpack.i.h.bf16 %v16556_v7  ;;  %v11383_v1 = vpack.i.bf16 %v3008_v62, %v3006_v44  ;;  %v2788_v26 = vrot.slane %v11351_v35, 1  ;;  %v11389_v11 = vld [vmem:[#allocation2 + $0x88] sm:$0xff]  ;;  %v16560_v44 = vld [vmem:[#allocation30_spill] sm:$0xff] }
  0xe7   : > { %8592 = vrot.lane.b32.xlu0 %v16553_v4, %s9755_s28  ;;  %v11381_v30 = vpop.permute.xlu0 %8312  ;;  %v11387_v4 = vld [vmem:[#allocation2 + $0x1a8] sm:$0xff]  ;;  %16559 = vst [vmem:[#allocation38_spill] sm:$0xff] %v11389_v11  ;;  %v11393_v37 = vsel %vm388_vm0, %v11389_v11, %v8175_v56  ;;  %v11396_v43 = vsel %vm388_vm0, %v634_v53, %v8174_v63  ;;  %v8179_v40 = vunpack.i.l.bf16 %v16556_v7  ;;  %v16563_v22 = vld [vmem:[#allocation43_spill] sm:$0xff]  ;;  %v11408_v56 = vpack.i.bf16 %v3011_v2, %v3010_v34  ;;  %v11428_v34 = vld [vmem:[#allocation2 + $0xb0] sm:$0xff] }
  0xe8   : > { %16557 = vst [vmem:[#allocation25_spill] sm:$0xff] %v11381_v30  ;;  %16558 = vst [vmem:[#allocation32_spill] sm:$0xff] %v11383_v1  ;;  %v16561_v50 = vld [vmem:[#allocation5_spill] sm:$0xff]  ;;  %v2792_v1 = vrot.slane %v11373_v0, 1  ;;  %v8190_v30 = vunpack.i.h.bf16 %v16563_v22  ;;  %v8189_v46 = vunpack.i.l.bf16 %v16563_v22  ;;  %v11411_v53 = vsel %vm923_vm3, %v3011_v2, %v3012_v48  ;;  %v11452_v11 = vld [vmem:[#allocation2 + $0xf0] sm:$0xff] }
  0xe9   : > { %v16562_v62 = vpack.i.bf16 %v16560_v44, %v16561_v50  ;;  %16565 = vst [vmem:[#allocation31_spill] sm:$0xff] %v11408_v56  ;;  %16566 = vst [vmem:[#allocation12_spill] sm:$0xff] %v11411_v53  ;;  %v11413_v7 = vld [vmem:[#allocation2 + $0xc8] sm:$0xff]  ;;  %v11420_v44 = vsel %vm388_vm0, %v642_v23, %v8184_v13  ;;  %v11422_v50 = vpop.permute.xlu1 %8317  ;;  %v11425_v22 = vsel %vm923_vm3, %v3012_v48, %v3014_v16  ;;  %v650_v16 = vld [vmem:[#allocation2 + $0x100] sm:$0xff] }
  0xea   : > { %16567 = vst [vmem:[#allocation40_spill] sm:$0xff] %v11413_v7  ;;  %v11417_v63 = vsel %vm388_vm0, %v11413_v7, %v8185_v59  ;;  %16569 = vst [vmem:[#allocation4_spill] sm:$0xff] %v11420_v44  ;;  %v11432_v2 = vsel %vm388_vm0, %v11428_v34, %v8180_v52  ;;  %v2790_v23 = vsel %vm714_vm2, %v2788_v26, %v2789_v15  ;;  %v11439_v13 = vld [vmem:[#allocation2 + $0xa8] sm:$0xff] }
  0xeb   : > { %8597 = vrot.lane.b32.xlu1 %v16562_v62, %s9755_s28  ;;  %8602 = vrot.lane.b32.xlu0 %v16564_v49, %s9755_s28  ;;  %16568 = vst [vmem:[#allocation27_spill] sm:$0xff] %v11417_v63  ;;  %16570 = vst [vmem:[#allocation45_spill] sm:$0xff] %v11422_v50  ;;  %v2791_v49 = vrot.slane %v11387_v4, 1  ;;  %v16573_v62 = vld [vmem:[#allocation61_spill] sm:$0xff]  ;;  %v11436_v7 = vpop.permute.xlu0 %8322  ;;  %v11443_v48 = vsel %vm388_vm0, %v11439_v13, %v8179_v40  ;;  %v16576_v52 = vpack.i.bf16 %v11017_v6, %v11014_v58  ;;  %v16581_v58 = vld [vmem:[#allocation60_spill] sm:$0xff] }
  0xec   : > { %16571 = vst [vmem:[#allocation36_spill] sm:$0xff] %v11425_v22  ;;  %16572 = vst [vmem:[#allocation50_spill] sm:$0xff] %v11428_v34  ;;  %v8195_v56 = vunpack.i.h.bf16 %v16573_v62  ;;  %v8194_v59 = vunpack.i.l.bf16 %v16573_v62  ;;  %v3016_v62 = vrot.slane %v11351_v35, 2  ;;  %v11456_v50 = vsel %vm388_vm0, %v11452_v11, %v8190_v30  ;;  %v11458_v40 = vld [vmem:[#allocation2 + $0xe8] sm:$0xff] }
  0xed   : > { %16574 = vst [vmem:[#allocation41_spill] sm:$0xff] %v11436_v7  ;;  %16575 = vst [vmem:[#allocation30_spill] sm:$0xff] %v11439_v13  ;;  %v2793_v34 = vsel %vm714_vm2, %v2791_v49, %v2792_v1  ;;  %v3017_v7 = vrot.slane %v11353_v54, 2  ;;  %v11462_v13 = vsel %vm388_vm0, %v11458_v40, %v8189_v46  ;;  %v8200_v6 = vunpack.i.h.bf16 %v16581_v58  ;;  %v2705_v54 = vld [vmem:[#allocation2 + $0x198] sm:$0x1]  ;;  %v11472_v63 = vpop.permute.xlu1 %8327 }
  0xee   : > { %16577 = vst [vmem:[#allocation5_spill] sm:$0xff] %v11452_v11  ;;  %16578 = vst [vmem:[#allocation43_spill] sm:$0xff] %v11456_v50  ;;  %v654_v11 = vld [vmem:[#allocation2 + $0x120] sm:$0xff]  ;;  %v8199_v50 = vunpack.i.l.bf16 %v16581_v58  ;;  %v11474_v46 = vpack.i.bf16 %v2790_v23, %v2788_v26  ;;  %v11483_v35 = vsel %vm388_vm0, %v650_v16, %v8194_v59  ;;  %v11487_v22 = vpack.i.bf16 %v2791_v49, %v2789_v15  ;;  %v2709_v58 = vld [vmem:[#allocation2 + $0x1b8] sm:$0x1] }
  0xef   : > { %8607 = vrot.lane.b32.xlu1 %v16576_v52, %s9755_s28  ;;  %16579 = vst [vmem:[#allocation53_spill] sm:$0xff] %v11458_v40  ;;  %16580 = vst [vmem:[#allocation61_spill] sm:$0xff] %v11462_v13  ;;  %8612 = vrot.lane.b32.xlu0 %v11046_v60, %s9754_s27  ;;  %v16582_v52 = vld [vmem:[#allocation34_spill] sm:$0xff]  ;;  %v11476_v40 = vld [vmem:[#allocation2 + $0x108] sm:$0xff]  ;;  %v11485_v53 = vpop.permute.xlu0 %8332  ;;  %v3019_v23 = vrot.slane %v2705_v54, 2  ;;  %v11501_v15 = vsel %vm388_vm0, %v654_v11, %v8200_v6 }
  0xf0   : > { %v8205_v44 = vunpack.i.h.bf16 %v16582_v52  ;;  %v8204_v30 = vunpack.i.l.bf16 %v16582_v52  ;;  %16583 = vst [vmem:[#allocation60_spill] sm:$0xff] %v11472_v63  ;;  %16584 = vst [vmem:[#allocation34_spill] sm:$0xff] %v11474_v46  ;;  %v11480_v60 = vsel %vm388_vm0, %v11476_v40, %v8195_v56  ;;  %v11489_v52 = vpack.i.bf16 %v2792_v1, %v2793_v34  ;;  %v16590_v13 = vld [vmem:[#allocation35_spill] sm:$0xff]  ;;  %v11498_v59 = vld [vmem:[#allocation2 + $0x1d0] sm:$0xff] }
  0xf1   : > { %16585 = vst [vmem:[#allocation69_spill] sm:$0xff] %v11476_v40  ;;  %16586 = vst [vmem:[#allocation70_spill] sm:$0xff] %v11480_v60  ;;  %v8210_v63 = vunpack.i.h.bf16 %v16590_v13  ;;  %v8209_v26 = vunpack.i.l.bf16 %v16590_v13  ;;  %v3018_v56 = vsel %vm923_vm3, %v3016_v62, %v3017_v7  ;;  %v11496_v40 = vld [vmem:[#allocation2 + $0x1c8] sm:$0xff]  ;;  %v16592_v1 = vld [vmem:[#allocation48_spill] sm:$0xff]  ;;  %v3021_v13 = vrot.slane %v11387_v4, 2 }
  0xf2   : > { %16587 = vst [vmem:[#allocation71_spill] sm:$0xff] %v11485_v53  ;;  %16588 = vst [vmem:[#allocation72_spill] sm:$0xff] %v11487_v22  ;;  %v8215_v49 = vunpack.i.h.bf16 %v16592_v1  ;;  %v658_v34 = vld [vmem:[#allocation2 + $0x140] sm:$0xff]  ;;  %v11508_v16 = vld [vmem:[#allocation2 + $0x130] sm:$0xff] }
  0xf3   : > { %16589 = vst [vmem:[#allocation73_spill] sm:$0xff] %v11489_v52  ;;  %8617 = vrot.lane.b32.xlu1 %v11050_v32, %s9754_s27  ;;  %16591 = vst [vmem:[#allocation35_spill] sm:$0xff] %v11501_v15  ;;  %8622 = vrot.lane.b32.xlu0 %v11062_v61, %s9754_s27  ;;  %v3022_v32 = vrot.slane %v11373_v0, 2  ;;  %v11512_v54 = vsel %vm388_vm0, %v11508_v16, %v8205_v44  ;;  %v11514_v53 = vld [vmem:[#allocation2 + $0x128] sm:$0xff]  ;;  %v11520_v6 = vld [vmem:[#allocation2 + $0x110] sm:$0xff]  ;;  %v11526_v0 = vpop.permute.xlu1 %8337  ;;  %v3024_v15 = vrot.slane %v2709_v58, 2  ;;  %v8214_v52 = vunpack.i.l.bf16 %v16592_v1  ;;  %v11529_v44 = vpop.permute.xlu0 %8342 }
  0xf4   : > { %16593 = vst [vmem:[#allocation48_spill] sm:$0xff] %v11508_v16  ;;  %16594 = vst [vmem:[#allocation74_spill] sm:$0xff] %v11512_v54  ;;  %v11518_v11 = vsel %vm388_vm0, %v11514_v53, %v8204_v30  ;;  %v11524_v61 = vsel %vm388_vm0, %v11520_v6, %v8199_v50  ;;  %v662_v4 = vld [vmem:[#allocation2 + $0x160] sm:$0xff]  ;;  %v11531_v54 = vpack.i.bf16 %v3018_v56, %v3016_v62  ;;  %v2794_v16 = vrot.slane %v11496_v40, 1  ;;  %v11537_v22 = vld [vmem:[#allocation2 + $0x148] sm:$0xff] }
  0xf5   : > { %16595 = vst [vmem:[#allocation75_spill] sm:$0xff] %v11514_v53  ;;  %16596 = vst [vmem:[#allocation76_spill] sm:$0xff] %v11518_v11  ;;  %v2795_v30 = vrot.slane %v11498_v59, 1  ;;  %v11535_v11 = vld [vmem:[#allocation2 + $0x1e8] sm:$0xff]  ;;  %v11541_v50 = vsel %vm388_vm0, %v11537_v22, %v8210_v63  ;;  %v11544_v58 = vsel %vm388_vm0, %v658_v34, %v8209_v26  ;;  %v16605_v1 = vld [vmem:[#allocation8_spill] sm:$0xff]  ;;  %v11563_v26 = vsel %vm923_vm3, %v3021_v13, %v3022_v32 }
  0xf6   : > { %16597 = vst [vmem:[#allocation77_spill] sm:$0xff] %v11520_v6  ;;  %16598 = vst [vmem:[#allocation78_spill] sm:$0xff] %v11524_v61  ;;  %v16606_v62 = vld [vmem:[#allocation67_spill] sm:$0xff]  ;;  %v11556_v61 = vsel %vm388_vm0, %v662_v4, %v8215_v49  ;;  %v16610_v34 = vld [vmem:[#allocation49_spill] sm:$0xff]  ;;  %v2797_v49 = vrot.slane %v11535_v11, 1  ;;  %v16617_v53 = vpack.i.bf16 %v11073_v5, %v11068_v14 }
  0xf7   : > { %16599 = vst [vmem:[#allocation79_spill] sm:$0xff] %v11526_v0  ;;  %16600 = vst [vmem:[#allocation80_spill] sm:$0xff] %v11529_v44  ;;  %8627 = vrot.lane.b32.xlu1 %v16605_v1, %s9755_s28  ;;  %v11550_v56 = vsel %vm923_vm3, %v16606_v62, 0  ;;  %v3020_v44 = vsel %vm923_vm3, %v3017_v7, %v3019_v23  ;;  %v11553_v0 = vld [vmem:[#allocation2 + $0x1f0] sm:$0xff]  ;;  %8632 = vrot.lane.b32.xlu0 %v11102_v42, %s9755_s28  ;;  %v8225_v1 = vunpack.i.h.bf16 %v16610_v34  ;;  %v8224_v62 = vunpack.i.l.bf16 %v16610_v34  ;;  %v11567_v7 = vpop.permute.xlu1 %8347  ;;  %v666_v4 = vld [vmem:[#allocation2 + $0x180] sm:$0xff]  ;;  %v11575_v42 = vpop.permute.xlu0 %8352 }
  0xf8   : > { %16601 = vst [vmem:[#allocation81_spill] sm:$0xff] %v11531_v54  ;;  %16602 = vst [vmem:[#allocation82_spill] sm:$0xff] %v11537_v22  ;;  %v16609_v54 = vld [vmem:[#allocation62_spill] sm:$0xff]  ;;  %v11570_v23 = vsel %vm923_vm3, %v3022_v32, %v3024_v15  ;;  %v2798_v22 = vrot.slane %v11553_v0, 1  ;;  %v16616_v15 = vld [vmem:[#allocation13_spill] sm:$0xff]  ;;  %v11607_v14 = vpack.i.bf16 %v3021_v13, %v3020_v44 }
  0xf9   : > { %16603 = vst [vmem:[#allocation83_spill] sm:$0xff] %v11541_v50  ;;  %16604 = vst [vmem:[#allocation84_spill] sm:$0xff] %v11544_v58  ;;  %v8220_v63 = vunpack.i.h.bf16 %v16609_v54  ;;  %v8219_v50 = vunpack.i.l.bf16 %v16609_v54  ;;  %v16612_v58 = vld [vmem:[#allocation59_spill] sm:$0xff]  ;;  %v11579_v6 = vld [vmem:[#allocation2 + $0x150] sm:$0xff]  ;;  %v8235_v32 = vunpack.i.h.bf16 %v16616_v15 }
  0xfa   : > { %16607 = vst [vmem:[#allocation8_spill] sm:$0xff] %v11550_v56  ;;  %16608 = vst [vmem:[#allocation67_spill] sm:$0xff] %v11556_v61  ;;  %v8230_v54 = vunpack.i.h.bf16 %v16612_v58  ;;  %v8229_v61 = vunpack.i.l.bf16 %v16612_v58  ;;  %v2796_v56 = vsel %vm714_vm2, %v2794_v16, %v2795_v30  ;;  %v11583_v34 = vsel %vm388_vm0, %v11579_v6, %v8214_v52  ;;  %v11592_v46 = vld [vmem:[#allocation2 + $0x170] sm:$0xff]  ;;  %v11598_v52 = vld [vmem:[#allocation2 + $0x168] sm:$0xff] }
  0xfb   : > { %16611 = vst [vmem:[#allocation62_spill] sm:$0xff] %v11567_v7  ;;  %16613 = vst [vmem:[#allocation49_spill] sm:$0xff] %v11575_v42  ;;  %v670_v7 = vld [vmem:[#allocation2 + $0x1a0] sm:$0xff]  ;;  %8637 = vrot.lane.b32.xlu1 %v16617_v53, %s9755_s28  ;;  %v3026_v58 = vrot.slane %v11496_v40, 2  ;;  %v3027_v42 = vrot.slane %v11498_v59, 2  ;;  %v11596_v60 = vsel %vm388_vm0, %v11592_v46, %v8220_v63  ;;  %8642 = vrot.lane.b32.xlu0 %v11106_v29, %s9754_s27  ;;  %v11609_v5 = vld [vmem:[#allocation2 + $0x188] sm:$0xff]  ;;  %v11618_v59 = vpop.permute.xlu1 %8357 }
  0xfc   : > { %16614 = vst [vmem:[#allocation59_spill] sm:$0xff] %v11579_v6  ;;  %16615 = vst [vmem:[#allocation85_spill] sm:$0xff] %v11583_v34  ;;  %v11602_v34 = vsel %vm388_vm0, %v11598_v52, %v8219_v50  ;;  %v8234_v6 = vunpack.i.l.bf16 %v16616_v15  ;;  %v11613_v53 = vsel %vm388_vm0, %v11609_v5, %v8225_v1  ;;  %v11616_v40 = vsel %vm388_vm0, %v666_v4, %v8224_v62  ;;  %v2713_v15 = vld [vmem:[#allocation2 + $0x1d8] sm:$0x1]  ;;  %v11627_v13 = vld [vmem:[#allocation2 + $0x190] sm:$0xff]  ;;  %v11633_v1 = vpop.permute.xlu0 %8362 }
  0xfd   : > { %16618 = vst [vmem:[#allocation13_spill] sm:$0xff] %v11596_v60  ;;  %16619 = vst [vmem:[#allocation86_spill] sm:$0xff] %v11602_v34  ;;  %v11622_v63 = vpack.i.bf16 %v2796_v56, %v2794_v16  ;;  %v11625_v29 = vsel %vm388_vm0, %v670_v7, %v8230_v54  ;;  %v11631_v44 = vsel %vm388_vm0, %v11627_v13, %v8229_v61  ;;  %v11638_v34 = vld [vmem:[#allocation2 + $0x1b0] sm:$0xff]  ;;  %v2717_v50 = vld [vmem:[#allocation2 + $0x1f8] sm:$0x1] }
  0xfe   : > { %16620 = vst [vmem:[#allocation87_spill] sm:$0xff] %v11613_v53  ;;  %16621 = vst [vmem:[#allocation88_spill] sm:$0xff] %v11616_v40  ;;  %v11635_v62 = vpack.i.bf16 %v2797_v49, %v2795_v30  ;;  %v2799_v4 = vsel %vm714_vm2, %v2797_v49, %v2798_v22  ;;  %v11642_v16 = vsel %vm388_vm0, %v11638_v34, %v8235_v32  ;;  %v16629_v56 = vld [vmem:[#allocation10_spill] sm:$0xff]  ;;  %v11649_v30 = vld [vmem:[#allocation2 + $0x1a8] sm:$0xff]  ;;  %v8260_v53 = vunpack.i.h.bf16 %v11142_v21 }
  0xff   : > { %16622 = vst [vmem:[#allocation89_spill] sm:$0xff] %v11618_v59  ;;  %16623 = vst [vmem:[#allocation90_spill] sm:$0xff] %v11622_v63  ;;  %v8240_v7 = vunpack.i.h.bf16 %v16629_v56  ;;  %v8239_v54 = vunpack.i.l.bf16 %v16629_v56  ;;  %8647 = vrot.lane.b32.xlu1 %v11111_v38, %s9754_s27  ;;  %v3028_v61 = vsel %vm923_vm3, %v3026_v58, %v3027_v42  ;;  %v11653_v49 = vsel %vm388_vm0, %v11649_v30, %v8234_v6  ;;  %v11662_v40 = vpop.permute.xlu1 %8367 }
 0x100   : > { %16624 = vst [vmem:[#allocation91_spill] sm:$0xff] %v11625_v29  ;;  %16625 = vst [vmem:[#allocation92_spill] sm:$0xff] %v11631_v44  ;;  %v16631_v44 = vld [vmem:[#allocation16_spill] sm:$0xff]  ;;  %8652 = vrot.lane.b32.xlu0 %v11113_v19, %s9754_s27  ;;  %v3029_v56 = vrot.slane %v2713_v15, 2  ;;  %v8265_v38 = vunpack.i.h.bf16 %v11148_v12  ;;  %v8264_v59 = vunpack.i.l.bf16 %v11148_v12  ;;  %v11664_v6 = vpack.i.bf16 %v2798_v22, %v2799_v4  ;;  %v16638_v22 = vld [vmem:[#allocation14_spill] sm:$0xff] }
 0x101   : > { %16626 = vst [vmem:[#allocation93_spill] sm:$0xff] %v11633_v1  ;;  %16627 = vst [vmem:[#allocation94_spill] sm:$0xff] %v11635_v62  ;;  %v8245_v29 = vunpack.i.h.bf16 %v16631_v44  ;;  %v8244_v32 = vunpack.i.l.bf16 %v16631_v44  ;;  %v678_v1 = vld [vmem:[#allocation2 + $0x1e0] sm:$0xff]  ;;  %v11668_v60 = vpack.i.bf16 %v3028_v61, %v3026_v58  ;;  %v3031_v44 = vrot.slane %v11535_v11, 2  ;;  %v11672_v62 = vld [vmem:[#allocation2 + $0x1c8] sm:$0xff] }
 0x102   : > { %16628 = vst [vmem:[#allocation95_spill] sm:$0xff] %v11642_v16  ;;  %16630 = vst [vmem:[#allocation10_spill] sm:$0xff] %v11653_v49  ;;  %v674_v16 = vld [vmem:[#allocation2 + $0x1c0] sm:$0xff]  ;;  %v11666_v49 = vpop.permute.xlu0 %8372  ;;  %v3032_v19 = vrot.slane %v11553_v0, 2  ;;  %v3034_v15 = vrot.slane %v2717_v50, 2  ;;  %v11676_v12 = vsel %vm388_vm0, %v11672_v62, %v8240_v7  ;;  %v8255_v4 = vunpack.i.h.bf16 %v16638_v22  ;;  %v16639_v58 = vld [vmem:[#allocation6_spill] sm:$0xff] }
 0x103   : > { %16632 = vst [vmem:[#allocation16_spill] sm:$0xff] %v11662_v40  ;;  %16633 = vst [vmem:[#allocation96_spill] sm:$0xff] %v11664_v6  ;;  %v11679_v63 = vsel %vm388_vm0, %v674_v16, %v8239_v54  ;;  %v8254_v40 = vunpack.i.l.bf16 %v16638_v22  ;;  %8657 = vrot.lane.b32.xlu1 %v16639_v58, %s9755_s28  ;;  %v11685_v11 = vld [vmem:[#allocation2 + $0x208] sm:$0xff]  ;;  %v11687_v0 = vld [vmem:[#allocation2 + $0x210] sm:$0xff]  ;;  %v11690_v50 = vsel %vm388_vm0, %v678_v1, %v8245_v29 }
 0x104   : > { %16634 = vst [vmem:[#allocation97_spill] sm:$0xff] %v11668_v60  ;;  %16635 = vst [vmem:[#allocation98_spill] sm:$0xff] %v11672_v62  ;;  %v11692_v7 = vld [vmem:[#allocation2 + $0x1d0] sm:$0xff]  ;;  %v16642_v54 = vld [vmem:[#allocation15_spill] sm:$0xff]  ;;  %v3030_v58 = vsel %vm923_vm3, %v3027_v42, %v3029_v56  ;;  %v1200_v29 = vsel %vm432_vm4, %v11287_v33, %v8264_v59  ;;  %v1201_v1 = vsel %vm432_vm4, %v11271_v41, %v8265_v38  ;;  %v2800_v33 = vrot.slane %v11685_v11, 1 }
 0x105   : > { %16636 = vst [vmem:[#allocation99_spill] sm:$0xff] %v11676_v12  ;;  %16637 = vst [vmem:[#allocation100_spill] sm:$0xff] %v11679_v63  ;;  %v11696_v16 = vsel %vm388_vm0, %v11692_v7, %v8244_v32  ;;  %v8250_v61 = vunpack.i.h.bf16 %v16642_v54  ;;  %v16643_v22 = vld [vmem:[#allocation20_spill] sm:$0xff]  ;;  %v11702_v63 = vld [vmem:[#allocation2 + $0x228] sm:$0xff]  ;;  %v8249_v12 = vunpack.i.l.bf16 %v16642_v54  ;;  %v1199_v32 = vsel %vm432_vm4, %v11242_v39, %v8260_v53 }
 0x106   : > { %16640 = vst [vmem:[#allocation14_spill] sm:$0xff] %v11690_v50  ;;  %16641 = vst [vmem:[#allocation6_spill] sm:$0xff] %v11696_v16  ;;  %8662 = vrot.lane.b32.xlu0 %v16643_v22, %s9755_s28  ;;  %v11711_v50 = vpop.permute.xlu1 %8377  ;;  %v11713_v16 = vld [vmem:[#allocation2 + $0x230] sm:$0xff]  ;;  %v11715_v22 = vpop.permute.xlu0 %8382  ;;  %v11718_v42 = vsel %vm923_vm3, %v3031_v44, %v3032_v19  ;;  %v11721_v56 = vsel %vm923_vm3, %v3032_v19, %v3034_v15  ;;  %v2801_v59 = vrot.slane %v11687_v0, 1  ;;  %v8259_v53 = vunpack.i.l.bf16 %v11142_v21  ;;  %v16644_v38 = vld [vmem:[#allocation9_spill] sm:$0xff] }
 0x107   : > { %v11727_v41 = vsel %vm432_vm4, %v11178_v3, %v8255_v4  ;;  %v1196_v39 = vsel %vm432_vm4, %v11181_v27, %v8254_v40  ;;  %v16645_v54 = vld [vmem:[#allocation18_spill] sm:$0xff]  ;;  %v2803_v19 = vrot.slane %v11702_v63, 1  ;;  %v1299_v15 = vrot.slane %v1200_v29, 7 }
 0x108   : > { %v16646_v60 = vpack.i.bf16 %v16644_v38, %v16645_v54  ;;  %v1301_v6 = vrot.slane %v1201_v1, 7  ;;  %v1298_v62 = vrot.slane %v1199_v32, 7  ;;  %v2804_v3 = vrot.slane %v11713_v16, 1  ;;  %v11753_v1 = vld [vmem:[#allocation2 + $0x1e8] sm:$0xff] }
 0x109   : > { %v8275_v4 = vunpack.i.h.bf16 %v11190_v18  ;;  %v8274_v27 = vunpack.i.l.bf16 %v11190_v18  ;;  %v8269_v21 = vunpack.i.l.bf16 %v11183_v57  ;;  %v11745_v38 = vpack.i.bf16 %v3031_v44, %v3030_v58  ;;  %16649 = vst [vmem:[#allocation9_spill] sm:$0xff] %v11753_v1 }
 0x10a   : > { %8667 = vrot.lane.b32.xlu1 %v16646_v60, %s9755_s28  ;;  %8672 = vrot.lane.b32.xlu0 %v11158_v36, %s9754_s27  ;;  %v11743_v40 = vpop.permute.xlu1 %8387  ;;  %v11747_v60 = vld [vmem:[#allocation2 + $0x1f0] sm:$0xff]  ;;  %v11757_v36 = vsel %vm388_vm0, %v11753_v1, %v8249_v12  ;;  %v8270_v18 = vunpack.i.h.bf16 %v11183_v57  ;;  %v11760_v32 = vpop.permute.xlu0 %8392  ;;  %v1294_v58 = vrot.slane %v11727_v41, 7  ;;  %v1293_v54 = vrot.slane %v1196_v39, 7 }
 0x10b   : > { %16647 = vst [vmem:[#allocation15_spill] sm:$0xff] %v11747_v60  ;;  %v11751_v29 = vsel %vm388_vm0, %v11747_v60, %v8250_v61  ;;  %16650 = vst [vmem:[#allocation18_spill] sm:$0xff] %v11757_v36  ;;  %v2802_v61 = vsel %vm714_vm2, %v2800_v33, %v2801_v59  ;;  %v11771_v12 = vsel %vm1292_vm5, %v1299_v15, %v1301_v6  ;;  %v8285_v39 = vunpack.i.h.bf16 %v11235_v24  ;;  %v16721_v60 = vld [vmem:[#allocation32_spill] sm:$0xff] }
 0x10c   : > { %16648 = vst [vmem:[#allocation20_spill] sm:$0xff] %v11751_v29  ;;  %v11768_v29 = vpack.i.bf16 %v2803_v19, %v2801_v59  ;;  %16651 = vst [vmem:[#allocation101_spill] sm:$0xff] %v11771_v12  ;;  %v1198_v57 = vsel %vm432_vm4, %v11245_v17, %v8259_v53  ;;  %v11776_v36 = vsel %vm1292_vm5, %v1298_v62, %v1299_v15  ;;  %v8280_v17 = vunpack.i.h.bf16 %v11216_v9  ;;  %v16688_v12 = vld [vmem:[#allocation24_spill] sm:$0xff] }
 0x10d   : > { %16652 = vst [vmem:[#allocation102_spill] sm:$0xff] %v11776_v36  ;;  %v2805_v41 = vsel %vm714_vm2, %v2803_v19, %v2804_v3  ;;  %v11787_v59 = vsel %vm432_vm4, %v11300_v28, %v8275_v4  ;;  %v11791_v6 = vsel %vm432_vm4, %v11338_v8, %v8269_v21  ;;  %v8279_v53 = vunpack.i.l.bf16 %v11216_v9  ;;  %v16654_v21 = vld [vmem:[#allocation19_spill] sm:$0xff] }
 0x10e   : > { %8677 = vrot.lane.b32.xlu1 %v11160_v10, %s9754_s27  ;;  %8682 = vrot.lane.b32.xlu0 %v11162_v55, %s9754_s27  ;;  %v11783_v10 = vsel %vm432_vm4, %v11313_v20, %v8274_v27  ;;  %16653 = vst [vmem:[#allocation103_spill] sm:$0xff] %v11787_v59  ;;  %v11794_v62 = vpop.permute.xlu1 %8397  ;;  %v11798_v55 = vsel %vm432_vm4, %v11334_v45, %v8270_v18  ;;  %v8284_v20 = vunpack.i.l.bf16 %v11235_v24  ;;  %v11803_v28 = vpop.permute.xlu0 %8402  ;;  %v1296_v19 = vrot.slane %v1198_v57, 7  ;;  %v16666_v27 = vld [vmem:[#allocation64_spill] sm:$0xff] }
 0x10f   : > { %v11807_v8 = vpack.i.bf16 %v2802_v61, %v2800_v33  ;;  %v3036_v15 = vrot.slane %v11685_v11, 2  ;;  %v3037_v4 = vrot.slane %v11687_v0, 2  ;;  %v11821_v33 = vsel %vm432_vm4, %v11359_v25, %v8280_v17 }
 0x110   : > { %16655 = vst [vmem:[#allocation19_spill] sm:$0xff] %v11821_v33  ;;  %v11825_v0 = vpack.i.bf16 %v2804_v3, %v2805_v41  ;;  %v11828_v18 = vsel %vm1292_vm5, %v1293_v54, %v1294_v58  ;;  %v11832_v61 = vsel %vm432_vm4, %v11396_v43, %v8284_v20  ;;  %v11836_v57 = vsel %vm432_vm4, %v11393_v37, %v8285_v39  ;;  %v16661_v3 = vld [vmem:[#allocation46_spill] sm:$0xff]  ;;  %v16662_v43 = vld [vmem:[#allocation7_spill] sm:$0xff]  ;;  %v16663_v20 = vld [vmem:[#allocation21_spill] sm:$0xff] }
 0x111   : > { %16657 = vst [vmem:[#allocation105_spill] sm:$0xff] %v11828_v18  ;;  %16658 = vst [vmem:[#allocation106_spill] sm:$0xff] %v11832_v61  ;;  %v8290_v25 = vunpack.i.h.bf16 %v11274_v47  ;;  %v8295_v41 = vunpack.i.h.bf16 %v16661_v3  ;;  %v8294_v54 = vunpack.i.l.bf16 %v16661_v3  ;;  %v8289_v24 = vunpack.i.l.bf16 %v11274_v47  ;;  %v2721_v39 = vld [vmem:[#allocation2 + $0x218] sm:$0x1]  ;;  %v16687_v61 = vld [vmem:[#allocation56_spill] sm:$0xff] }
 0x112   : > { %8687 = vrot.lane.b32.xlu1 %v11164_v51, %s9755_s28  ;;  %8692 = vrot.lane.b32.xlu0 %v16654_v21, %s9755_s28  ;;  %v11823_v11 = vpop.permute.xlu1 %8407  ;;  %16656 = vst [vmem:[#allocation104_spill] sm:$0xff] %v11825_v0  ;;  %16659 = vst [vmem:[#allocation107_spill] sm:$0xff] %v11836_v57  ;;  %v11840_v21 = vsel %vm432_vm4, %v11365_v31, %v8279_v53  ;;  %v11843_v17 = vpop.permute.xlu0 %8412  ;;  %v16664_v45 = vpack.i.bf16 %v16662_v43, %v16663_v20  ;;  %v16665_v53 = vld [vmem:[#allocation29_spill] sm:$0xff]  ;;  %v8300_v9 = vunpack.i.h.bf16 %v16666_v27  ;;  %v16669_v33 = vld [vmem:[#allocation23_spill] sm:$0xff] }
 0x113   : > { %16660 = vst [vmem:[#allocation108_spill] sm:$0xff] %v11840_v21  ;;  %v3038_v37 = vsel %vm923_vm3, %v3036_v15, %v3037_v4  ;;  %v8304_v44 = vunpack.i.l.bf16 %v16665_v53  ;;  %v16667_v51 = vld [vmem:[#allocation17_spill] sm:$0xff]  ;;  %v11859_v3 = vsel %vm1292_vm5, %v1294_v58, %v1296_v19  ;;  %v8299_v20 = vunpack.i.l.bf16 %v16666_v27  ;;  %v16684_v31 = vld [vmem:[#allocation4_spill] sm:$0xff] }
 0x114   : > { %16668 = vst [vmem:[#allocation46_spill] sm:$0xff] %v11859_v3  ;;  %v11870_v36 = vsel %vm432_vm4, %v16669_v33, %v8290_v25  ;;  %v11874_v58 = vpack.i.bf16 %v3038_v37, %v3036_v15  ;;  %v3039_v19 = vrot.slane %v2721_v39, 2  ;;  %v11878_v47 = vsel %vm432_vm4, %v11443_v48, %v8294_v54  ;;  %v16676_v33 = vld [vmem:[#allocation11_spill] sm:$0xff]  ;;  %v16727_v3 = vld [vmem:[#allocation40_spill] sm:$0xff]  ;;  %v16742_v0 = vld [vmem:[#allocation69_spill] sm:$0xff] }
 0x115   : > { %16670 = vst [vmem:[#allocation7_spill] sm:$0xff] %v11870_v36  ;;  %16672 = vst [vmem:[#allocation29_spill] sm:$0xff] %v11878_v47  ;;  %v11882_v27 = vsel %vm432_vm4, %v11432_v2, %v8295_v41  ;;  %v2725_v25 = vld [vmem:[#allocation2 + $0x238] sm:$0x1]  ;;  %v16681_v2 = vld [vmem:[#allocation22_spill] sm:$0xff]  ;;  %v3042_v41 = vrot.slane %v11713_v16, 2  ;;  %v11910_v15 = vsel %vm432_vm4, %v16684_v31, %v8299_v20  ;;  %v8309_v21 = vunpack.i.l.bf16 %v16687_v61 }
 0x116   : > { %8697 = vrot.lane.b32.xlu1 %v16664_v45, %s9755_s28  ;;  %8702 = vrot.lane.b32.xlu0 %v16667_v51, %s9754_s27  ;;  %v8305_v45 = vunpack.i.h.bf16 %v16665_v53  ;;  %v11865_v59 = vpop.permute.xlu1 %8417  ;;  %v11872_v51 = vpop.permute.xlu0 %8422  ;;  %16671 = vst [vmem:[#allocation21_spill] sm:$0xff] %v11874_v58  ;;  %16673 = vst [vmem:[#allocation64_spill] sm:$0xff] %v11882_v27  ;;  %v16674_v53 = vld [vmem:[#allocation26_spill] sm:$0xff]  ;;  %v16677_v37 = vld [vmem:[#allocation51_spill] sm:$0xff]  ;;  %v3040_v16 = vsel %vm923_vm3, %v3037_v4, %v3039_v19  ;;  %v8400_v36 = vunpack.i.h.bf16 %v11794_v62 }
 0x117   : > { %v11886_v43 = vsel %vm432_vm4, %v16674_v53, %v8289_v24  ;;  %v11894_v39 = vsel %vm432_vm4, %v16677_v37, %v8304_v44  ;;  %v16679_v48 = vld [vmem:[#allocation27_spill] sm:$0xff]  ;;  %v3041_v24 = vrot.slane %v11702_v63, 2  ;;  %v16682_v53 = vld [vmem:[#allocation52_spill] sm:$0xff]  ;;  %16685 = vst [vmem:[#allocation51_spill] sm:$0xff] %v11910_v15  ;;  %v16686_v44 = vld [vmem:[#allocation25_spill] sm:$0xff] }
 0x118   : > { %16675 = vst [vmem:[#allocation17_spill] sm:$0xff] %v11886_v43  ;;  %16678 = vst [vmem:[#allocation23_spill] sm:$0xff] %v11894_v39  ;;  %v11898_v54 = vsel %vm432_vm4, %v16679_v48, %v8300_v9  ;;  %v8314_v37 = vunpack.i.l.bf16 %v16686_v44  ;;  %v8310_v9 = vunpack.i.h.bf16 %v16687_v61  ;;  %v8315_v63 = vunpack.i.h.bf16 %v16686_v44  ;;  %v11930_v44 = vld [vmem:[%s16007_s3 + $0x10] sm:$0x3f]   ;;  %v16689_v31 = vld [vmem:[#allocation37_spill] sm:$0xff] }
 0x119   : > { %16680 = vst [vmem:[#allocation26_spill] sm:$0xff] %v11898_v54  ;;  %v11951_v4 = vsel %vm923_vm3, %v3041_v24, %v3042_v41  ;;  %v16695_v19 = vld [vmem:[#allocation70_spill] sm:$0xff]  ;;  %v16701_v39 = vld [vmem:[#allocation39_spill] sm:$0xff]  ;;  %v8379_v54 = vunpack.i.l.bf16 %v11711_v50  ;;  %v1431_v27 = vld [vmem:[#allocation2 + $0x60] sm:$0xff] }
 0x11a   : > { %8707 = vrot.lane.b32.xlu1 %v16676_v33, %s9754_s27  ;;  %8712 = vrot.lane.b32.xlu0 %v16681_v2, %s9754_s27  ;;  %v11906_v33 = vsel %vm432_vm4, %v16682_v53, %v8305_v45  ;;  %v11914_v48 = vpop.permute.xlu1 %8427  ;;  %v11918_v57 = vpop.permute.xlu0 %8432  ;;  %v3044_v45 = vrot.slane %v2725_v25, 2  ;;  %v11940_v61 = vsel %vm432_vm4, %v11483_v35, %v8314_v37  ;;  %v11948_v2 = vpack.i.bf16 %v3041_v24, %v3040_v16  ;;  %v16700_v24 = vld [vmem:[#allocation44_spill] sm:$0xff]  ;;  %v16735_v58 = vld [vmem:[#allocation34_spill] sm:$0xff] }
 0x11b   : > { %16683 = vst [vmem:[#allocation11_spill] sm:$0xff] %v11906_v33  ;;  %16690 = vst [vmem:[#allocation27_spill] sm:$0xff] %v11940_v61  ;;  %v11955_v25 = vsel %vm432_vm4, %v16695_v19, %v8315_v63  ;;  %v8374_v35 = vunpack.i.l.bf16 %v11666_v49  ;;  %v1423_v33 = vld [vmem:[#allocation2 + $0x20] sm:$0xff]  ;;  %v16702_v15 = vpack.i.bf16 %v16700_v24, %v16701_v39  ;;  %v11974_v63 = vsel %vm923_vm3, %v11930_v44, 0 }
 0x11c   : > { %16693 = vst [vmem:[#allocation52_spill] sm:$0xff] %v11948_v2  ;;  %16694 = vst [vmem:[#allocation4_spill] sm:$0xff] %v11951_v4  ;;  %v16705_v19 = vrot.slane %v11791_v6, 7  ;;  %v8380_v24 = vunpack.i.h.bf16 %v11711_v50  ;;  %v16710_v6 = vld [vmem:[#allocation65_spill] sm:$0xff]  ;;  %v16716_v47 = vld [vmem:[#allocation28_spill] sm:$0xff]  ;;  %v8435_v1 = vunpack.i.h.bf16 %v11918_v57  ;;  %v8434_v4 = vunpack.i.l.bf16 %v11918_v57 }
 0x11d   : > { %16696 = vst [vmem:[#allocation25_spill] sm:$0xff] %v11955_v25  ;;  %16703 = vst [vmem:[#allocation37_spill] sm:$0xff] %v11974_v63  ;;  %v12007_v61 = vsel %vm388_vm0, %v1423_v33, %v8374_v35  ;;  %v8390_v25 = vunpack.i.h.bf16 %v11743_v40  ;;  %v16714_v33 = vld [vmem:[#allocation47_spill] sm:$0xff]  ;;  %v1439_v43 = vld [vmem:[#allocation2 + $0xa0] sm:$0xff] }
 0x11e   : > { %8717 = vrot.lane.b32.xlu1 %v16688_v12, %s9755_s28  ;;  %8722 = vrot.lane.b32.xlu0 %v16689_v31, %s9755_s28  ;;  %v16691_v12 = vld [vmem:[#allocation43_spill] sm:$0xff]  ;;  %v11946_v20 = vpop.permute.xlu1 %8437  ;;  %v8375_v31 = vunpack.i.h.bf16 %v11666_v49  ;;  %v11959_v37 = vpop.permute.xlu0 %8442  ;;  %v16704_v49 = vrot.slane %v11798_v55, 7  ;;  %v8385_v55 = vunpack.i.h.bf16 %v11715_v22  ;;  %v12023_v35 = vsel %vm388_vm0, %v16714_v33, %v8380_v24 }
 0x11f   : > { %v11944_v53 = vsel %vm432_vm4, %v16691_v12, %v8310_v9  ;;  %v11962_v9 = vsel %vm923_vm3, %v3042_v41, %v3044_v45  ;;  %v16698_v12 = vld [vmem:[#allocation61_spill] sm:$0xff]  ;;  %v8440_v2 = vunpack.i.h.bf16 %v11946_v20  ;;  %v8439_v57 = vunpack.i.l.bf16 %v11946_v20 }
 0x120   : > { %16692 = vst [vmem:[#allocation22_spill] sm:$0xff] %v11944_v53  ;;  %16697 = vst [vmem:[#allocation56_spill] sm:$0xff] %v11962_v9  ;;  %v11966_v16 = vsel %vm432_vm4, %v16698_v12, %v8309_v21  ;;  %v11981_v41 = vsel %vm1292_vm5, %v16705_v19, %v16704_v49  ;;  %v16707_v21 = vrot.slane %v11783_v10, 7  ;;  %v16708_v45 = vmov %v16704_v49  ;;  %v16715_v53 = vld [vmem:[#allocation58_spill] sm:$0xff]  ;;  %v1435_v49 = vld [vmem:[#allocation2 + $0x80] sm:$0xff] }
 0x121   : > { %16699 = vst [vmem:[#allocation24_spill] sm:$0xff] %v11966_v16  ;;  %16706 = vst [vmem:[#allocation43_spill] sm:$0xff] %v11981_v41  ;;  %v8395_v10 = vunpack.i.h.bf16 %v11760_v32  ;;  %v16718_v16 = vld [vmem:[#allocation57_spill] sm:$0xff]  ;;  %v8414_v41 = vunpack.i.l.bf16 %v11843_v17  ;;  %v1455_v9 = vld [vmem:[#allocation2 + $0x120] sm:$0xff] }
 0x122   : > { %8727 = vrot.lane.b32.xlu1 %v16702_v15, %s9755_s28  ;;  %v11988_v12 = vsel %vm1292_vm5, %v16708_v45, %v16707_v21  ;;  %8732 = vrot.lane.b32.xlu0 %v16710_v6, %s9754_s27  ;;  %v8384_v21 = vunpack.i.l.bf16 %v11715_v22  ;;  %v12000_v45 = vpop.permute.xlu1 %8447  ;;  %v16712_v15 = vld [vmem:[#allocation55_spill] sm:$0xff]  ;;  %v12009_v50 = vpop.permute.xlu0 %8452  ;;  %v8394_v22 = vunpack.i.l.bf16 %v11760_v32  ;;  %v12027_v6 = vsel %vm388_vm0, %v16715_v53, %v8379_v54 }
 0x123   : > { %16709 = vst [vmem:[#allocation70_spill] sm:$0xff] %v11988_v12  ;;  %v12004_v39 = vsel %vm388_vm0, %v16712_v15, %v8375_v31  ;;  %v8389_v31 = vunpack.i.l.bf16 %v11743_v40  ;;  %v16713_v15 = vld [vmem:[#allocation63_spill] sm:$0xff]  ;;  %v8399_v32 = vunpack.i.l.bf16 %v11794_v62  ;;  %v16717_v40 = vld [vmem:[#allocation54_spill] sm:$0xff]  ;;  %v8405_v54 = vunpack.i.h.bf16 %v11803_v28 }
 0x124   : > { %v12039_v24 = vsel %vm388_vm0, %v16718_v16, %v8384_v21  ;;  %v8404_v53 = vunpack.i.l.bf16 %v11803_v28  ;;  %v8415_v62 = vunpack.i.h.bf16 %v11843_v17  ;;  %v12052_v16 = vsel %vm388_vm0, %v1435_v49, %v8395_v10  ;;  %v16719_v21 = vld [vmem:[#allocation66_spill] sm:$0xff]  ;;  %v16720_v28 = vld [vmem:[#allocation68_spill] sm:$0xff] }
 0x125   : > { %v12056_v12 = vsel %vm388_vm0, %v16719_v21, %v8394_v22  ;;  %v12060_v19 = vsel %vm388_vm0, %v16720_v28, %v8390_v25  ;;  %v12063_v63 = vsel %vm388_vm0, %v1431_v27, %v8389_v31  ;;  %v1443_v17 = vld [vmem:[#allocation2 + $0xc0] sm:$0xff]  ;;  %v16723_v49 = vld [vmem:[#allocation38_spill] sm:$0xff]  ;;  %v8420_v22 = vunpack.i.h.bf16 %v11865_v59  ;;  %v16724_v21 = vld [vmem:[#allocation31_spill] sm:$0xff] }
 0x126   : > { %8737 = vrot.lane.b32.xlu1 %v16713_v15, %s9754_s27  ;;  %8742 = vrot.lane.b32.xlu0 %v16716_v47, %s9754_s27  ;;  %v12035_v15 = vsel %vm388_vm0, %v16717_v40, %v8385_v55  ;;  %v12043_v33 = vpop.permute.xlu1 %8457  ;;  %v8410_v47 = vunpack.i.h.bf16 %v11823_v11  ;;  %v8409_v55 = vunpack.i.l.bf16 %v11823_v11  ;;  %v12049_v40 = vpop.permute.xlu0 %8462  ;;  %v16722_v11 = vld [vmem:[#allocation33_spill] sm:$0xff]  ;;  %v12073_v10 = vsel %vm388_vm0, %v16723_v49, %v8399_v32  ;;  %v16725_v27 = vld [vmem:[#allocation30_spill] sm:$0xff]  ;;  %v1447_v32 = vld [vmem:[#allocation2 + $0xe0] sm:$0xff] }
 0x127   : > { %v12069_v18 = vsel %vm388_vm0, %v16722_v11, %v8400_v36  ;;  %v8419_v25 = vunpack.i.l.bf16 %v11865_v59  ;;  %v12081_v31 = vsel %vm388_vm0, %v16725_v27, %v8405_v54  ;;  %v8425_v36 = vunpack.i.h.bf16 %v11872_v51  ;;  %v16726_v49 = vld [vmem:[#allocation42_spill] sm:$0xff]  ;;  %v1451_v27 = vld [vmem:[#allocation2 + $0x100] sm:$0xff] }
 0x128   : > { %v8424_v28 = vunpack.i.l.bf16 %v11872_v51  ;;  %v12092_v59 = vsel %vm388_vm0, %v16726_v49, %v8415_v62  ;;  %v12099_v54 = vsel %vm388_vm0, %v1443_v17, %v8410_v47  ;;  %v8430_v62 = vunpack.i.h.bf16 %v11914_v48  ;;  %v16732_v17 = vld [vmem:[#allocation53_spill] sm:$0xff] }
 0x129   : > { %v8429_v49 = vunpack.i.l.bf16 %v11914_v48  ;;  %v12127_v48 = vsel %vm388_vm0, %v1451_v27, %v8425_v36  ;;  %v8454_v20 = vunpack.i.l.bf16 %v12009_v50  ;;  %v8449_v36 = vunpack.i.l.bf16 %v12000_v45 }
 0x12a   : > { %8747 = vrot.lane.b32.xlu1 %v16721_v60, %s9755_s28  ;;  %8752 = vrot.lane.b32.xlu0 %v16724_v21, %s9755_s28  ;;  %v12084_v60 = vsel %vm388_vm0, %v1439_v43, %v8404_v53  ;;  %v12088_v11 = vpop.permute.xlu1 %8467  ;;  %v12096_v21 = vsel %vm388_vm0, %v16727_v3, %v8414_v41  ;;  %v16728_v43 = vld [vmem:[#allocation50_spill] sm:$0xff]  ;;  %v12105_v51 = vpop.permute.xlu0 %8472  ;;  %v16729_v3 = vld [vmem:[#allocation36_spill] sm:$0xff]  ;;  %16736 = vst [vmem:[#allocation39_spill] sm:$0xff] %v12127_v48  ;;  %v16740_v48 = vld [vmem:[#allocation75_spill] sm:$0xff] }
 0x12b   : > { %v12103_v53 = vsel %vm388_vm0, %v16728_v43, %v8409_v55  ;;  %v16730_v41 = vld [vmem:[#allocation12_spill] sm:$0xff]  ;;  %v12117_v55 = vsel %vm388_vm0, %v16732_v17, %v8420_v22  ;;  %v12120_v43 = vsel %vm388_vm0, %v1447_v32, %v8419_v25  ;;  %v8445_v22 = vunpack.i.h.bf16 %v11959_v37 }
 0x12c   : > { %v16731_v47 = vpack.i.bf16 %v16729_v3, %v16730_v41  ;;  %16733 = vst [vmem:[#allocation61_spill] sm:$0xff] %v12117_v55  ;;  %16734 = vst [vmem:[#allocation44_spill] sm:$0xff] %v12120_v43  ;;  %v16737_v3 = vld [vmem:[#allocation5_spill] sm:$0xff]  ;;  %v8444_v25 = vunpack.i.l.bf16 %v11959_v37  ;;  %v1459_v32 = vld [vmem:[#allocation2 + $0x140] sm:$0xff]  ;;  %v8455_v17 = vunpack.i.h.bf16 %v12009_v50  ;;  %v12156_v50 = vsel %vm388_vm0, %v16742_v0, %v8429_v49 }
 0x12d   : > { %v12131_v41 = vsel %vm388_vm0, %v16737_v3, %v8424_v28  ;;  %v12145_v28 = vsel %vm388_vm0, %v16740_v48, %v8435_v1  ;;  %v12148_v3 = vsel %vm388_vm0, %v1455_v9, %v8434_v4  ;;  %v16741_v37 = vld [vmem:[#allocation77_spill] sm:$0xff]  ;;  %v1467_v55 = vld [vmem:[#allocation2 + $0x180] sm:$0xff]  ;;  %v8460_v9 = vunpack.i.h.bf16 %v12043_v33  ;;  %v16746_v0 = vld [vmem:[#allocation59_spill] sm:$0xff] }
 0x12e   : > { %8757 = vrot.lane.b32.xlu1 %v16731_v47, %s9755_s28  ;;  %8762 = vrot.lane.b32.xlu0 %v16735_v58, %s9754_s27  ;;  %16738 = vst [vmem:[#allocation65_spill] sm:$0xff] %v12131_v41  ;;  %v12135_v47 = vpop.permute.xlu1 %8477  ;;  %v8450_v58 = vunpack.i.h.bf16 %v12000_v45  ;;  %v12141_v27 = vpop.permute.xlu0 %8482  ;;  %v12152_v41 = vsel %vm388_vm0, %v16741_v37, %v8430_v62  ;;  %v1463_v43 = vld [vmem:[#allocation2 + $0x160] sm:$0xff]  ;;  %v8459_v62 = vunpack.i.l.bf16 %v12043_v33  ;;  %v16745_v48 = vld [vmem:[#allocation73_spill] sm:$0xff]  ;;  %v12173_v49 = vsel %vm388_vm0, %v16746_v0, %v8445_v22  ;;  %v16747_v37 = vld [vmem:[#allocation82_spill] sm:$0xff] }
 0x12f   : > { %16739 = vst [vmem:[#allocation55_spill] sm:$0xff] %v12141_v27  ;;  %v16743_v45 = vld [vmem:[#allocation72_spill] sm:$0xff]  ;;  %v12161_v27 = vsel %vm388_vm0, %v1459_v32, %v8440_v2  ;;  %v8465_v2 = vunpack.i.h.bf16 %v12049_v40  ;;  %v12188_v33 = vsel %vm388_vm0, %v11592_v46, %v8454_v20  ;;  %v12203_v46 = vsel %vm388_vm0, %v11627_v13, %v8460_v9 }
 0x130   : > { %v16744_v1 = vld [vmem:[#allocation48_spill] sm:$0xff]  ;;  %v12192_v22 = vsel %vm388_vm0, %v11598_v52, %v8450_v58  ;;  %16750 = vst [vmem:[#allocation47_spill] sm:$0xff] %v12203_v46  ;;  %v12207_v52 = vsel %vm388_vm0, %v11609_v5, %v8459_v62  ;;  %v8474_v20 = vunpack.i.l.bf16 %v12105_v51 }
 0x131   : > { %v12165_v4 = vsel %vm388_vm0, %v16744_v1, %v8439_v57  ;;  %v8464_v57 = vunpack.i.l.bf16 %v12049_v40  ;;  %v12184_v1 = vsel %vm388_vm0, %v1467_v55, %v8455_v17  ;;  %v8470_v40 = vunpack.i.h.bf16 %v12088_v11  ;;  %v16749_v17 = vld [vmem:[#allocation81_spill] sm:$0xff]  ;;  %v1475_v58 = vld [vmem:[#allocation2 + $0x1c0] sm:$0xff] }
 0x132   : > { %8767 = vrot.lane.b32.xlu1 %v16743_v45, %s9754_s27  ;;  %8772 = vrot.lane.b32.xlu0 %v16745_v48, %s9754_s27  ;;  %v12177_v45 = vsel %vm388_vm0, %v16747_v37, %v8444_v25  ;;  %v12181_v32 = vpop.permute.xlu1 %8487  ;;  %v12195_v25 = vsel %vm388_vm0, %v1463_v43, %v8449_v36  ;;  %v1471_v48 = vld [vmem:[#allocation2 + $0x1a0] sm:$0xff]  ;;  %v8493_v0 = vpop.permute.xlu0 %8492  ;;  %v8469_v37 = vunpack.i.l.bf16 %v12088_v11  ;;  %v8475_v43 = vunpack.i.h.bf16 %v12105_v51 }
 0x133   : > { %16748 = vst [vmem:[#allocation63_spill] sm:$0xff] %v12181_v32  ;;  %v8495_v32 = vunpack.i.h.bf16 %v8493_v0  ;;  %v8494_v55 = vunpack.i.l.bf16 %v8493_v0  ;;  %v12215_v11 = vsel %vm388_vm0, %v11649_v30, %v8465_v2  ;;  %v12218_v36 = vsel %vm388_vm0, %v1471_v48, %v8464_v57 }
 0x134   : > { %v12229_v30 = vsel %vm388_vm0, %v11638_v34, %v8469_v37  ;;  %v16753_v37 = vld [vmem:[#allocation90_spill] sm:$0xff] }
 0x135   : > { %v1999_v5 = vsel %vm432_vm4, %v12007_v61, %v8494_v55  ;;  %v2000_v9 = vsel %vm432_vm4, %v12004_v39, %v8495_v32  ;;  %v16751_v61 = vpack.i.bf16 %v11570_v23, %v11563_v26  ;;  %v12237_v39 = vsel %vm388_vm0, %v11692_v7, %v8475_v43  ;;  %v16752_v32 = vld [vmem:[#allocation98_spill] sm:$0xff] }
 0x136   : > { %8777 = vrot.lane.b32.xlu1 %v16749_v17, %s9755_s28  ;;  %8782 = vrot.lane.b32.xlu0 %v11607_v14, %s9755_s28  ;;  %v8498_v13 = vpop.permute.xlu1 %8497  ;;  %v8503_v62 = vpop.permute.xlu0 %8502  ;;  %v2095_v17 = vrot.slane %v1999_v5, 7  ;;  %v2096_v46 = vrot.slane %v2000_v9, 7  ;;  %v12225_v14 = vsel %vm388_vm0, %v1475_v58, %v8470_v40  ;;  %v12241_v48 = vsel %vm388_vm0, %v16752_v32, %v8474_v20 }
 0x137   : > { %v8500_v51 = vunpack.i.h.bf16 %v8498_v13  ;;  %v8499_v0 = vunpack.i.l.bf16 %v8498_v13  ;;  %v8505_v2 = vunpack.i.h.bf16 %v8503_v62  ;;  %v8504_v57 = vunpack.i.l.bf16 %v8503_v62 }
 0x139   : > { %v2002_v40 = vsel %vm432_vm4, %v12023_v35, %v8500_v51  ;;  %v2001_v34 = vsel %vm432_vm4, %v12027_v6, %v8499_v0  ;;  %v2003_v26 = vsel %vm432_vm4, %v12039_v24, %v8504_v57  ;;  %v2004_v23 = vsel %vm432_vm4, %v12035_v15, %v8505_v2  ;;  %v16754_v0 = vld [vmem:[#allocation94_spill] sm:$0xff] }
 0x13a   : > { %8787 = vrot.lane.b32.xlu1 %v16751_v61, %s9755_s28  ;;  %8792 = vrot.lane.b32.xlu0 %v16753_v37, %s9754_s27  ;;  %v2100_v7 = vrot.slane %v2002_v40, 7  ;;  %v8508_v55 = vpop.permute.xlu1 %8507  ;;  %v2098_v43 = vrot.slane %v2001_v34, 7  ;;  %v2101_v20 = vrot.slane %v2003_v26, 7  ;;  %v8513_v58 = vpop.permute.xlu0 %8512  ;;  %v2097_v35 = vsel %vm1292_vm5, %v2095_v17, %v2096_v46  ;;  %v16755_v61 = vld [vmem:[#allocation96_spill] sm:$0xff] }
 0x13b   : > { %v8510_v13 = vunpack.i.h.bf16 %v8508_v55  ;;  %v8509_v5 = vunpack.i.l.bf16 %v8508_v55  ;;  %v2103_v9 = vrot.slane %v2004_v23, 7  ;;  %v8515_v6 = vunpack.i.h.bf16 %v8513_v58 }
 0x13c   : > { %v8514_v62 = vunpack.i.l.bf16 %v8513_v58  ;;  %v2099_v51 = vsel %vm1292_vm5, %v2096_v46, %v2098_v43  ;;  %v2102_v57 = vsel %vm1292_vm5, %v2100_v7, %v2101_v20 }
 0x13d   : > { %v2005_v15 = vsel %vm432_vm4, %v12063_v63, %v8509_v5  ;;  %v2006_v24 = vsel %vm432_vm4, %v12060_v19, %v8510_v13  ;;  %v2207_v2 = vpack.c.bf16 %v2099_v51, %v2097_v35  ;;  %v2008_v46 = vsel %vm432_vm4, %v12052_v16, %v8515_v6 }
 0x13e   : > { %8797 = vrot.lane.b32.xlu1 %v16754_v0, %s9754_s27  ;;  %8802 = vrot.lane.b32.xlu0 %v16755_v61, %s9754_s27  ;;  %v2007_v17 = vsel %vm432_vm4, %v12056_v12, %v8514_v62  ;;  %v2105_v32 = vrot.slane %v2005_v15, 7  ;;  %v2106_v40 = vrot.slane %v2006_v24, 7  ;;  %v8518_v34 = vpop.permute.xlu1 %8517  ;;  %v2110_v63 = vrot.slane %v2008_v46, 7  ;;  %v8523_v26 = vpop.permute.xlu0 %8522  ;;  %v16756_v12 = vld [vmem:[#allocation97_spill] sm:$0xff] }
 0x13f   : > { %v2108_v37 = vrot.slane %v2007_v17, 7  ;;  %v8520_v23 = vunpack.i.h.bf16 %v8518_v34  ;;  %v8519_v19 = vunpack.i.l.bf16 %v8518_v34  ;;  %7739 = vmatprep.mubr.msk.bf16.mxu0 %vm2231_vm6, %v2207_v2  ;;  %v8525_v7 = vunpack.i.h.bf16 %v8523_v26  ;;  %v16757_v2 = vld [vmem:[#allocation8_spill] sm:$0xff] }
 0x140   : > { %v8524_v55 = vunpack.i.l.bf16 %v8523_v26  ;;  %v2104_v43 = vsel %vm1292_vm5, %v2101_v20, %v2103_v9  ;;  %v2107_v58 = vsel %vm1292_vm5, %v2105_v32, %v2106_v40 }
 0x141   : > { %v2009_v16 = vsel %vm432_vm4, %v12073_v10, %v8519_v19  ;;  %v2010_v13 = vsel %vm432_vm4, %v12069_v18, %v8520_v23  ;;  %v2208_v5 = vpack.c.bf16 %v2104_v43, %v2102_v57  ;;  %v2109_v35 = vsel %vm1292_vm5, %v2106_v40, %v2108_v37  ;;  %v16759_v43 = vld [vmem:[#allocation44_spill] sm:$0xff] }
 0x142   : > { %8807 = vrot.lane.b32.xlu1 %v16756_v12, %s9755_s28  ;;  %8812 = vrot.lane.b32.xlu0 %v11745_v38, %s9755_s28  ;;  %v2011_v20 = vsel %vm432_vm4, %v12084_v60, %v8524_v55  ;;  %v2012_v9 = vsel %vm432_vm4, %v12081_v31, %v8525_v7  ;;  %v2111_v6 = vrot.slane %v2009_v16, 7  ;;  %v2113_v62 = vrot.slane %v2010_v13, 7  ;;  %v8528_v51 = vpop.permute.xlu1 %8527  ;;  %v8533_v18 = vpop.permute.xlu0 %8532  ;;  %v16760_v12 = vld [vmem:[#allocation61_spill] sm:$0xff]  ;;  %v16761_v13 = vld [vmem:[#allocation104_spill] sm:$0xff] }
 0x143   : > { %v2115_v0 = vrot.slane %v2011_v20, 7  ;;  %v2116_v10 = vrot.slane %v2012_v9, 7  ;;  %7740 = vmatmul.mubr.msk.bf16.vlgmr.msra.gmra.mrb[0].mxu0 %vm2231_vm6, %v2208_v5  ;;  %v8530_v15 = vunpack.i.h.bf16 %v8528_v51  ;;  %v8529_v24 = vunpack.i.l.bf16 %v8528_v51 }
 0x144   : > { %7772 = vmatpush3.bf16.msra.mxu0 %v16757_v2  ;;  %v8535_v57 = vunpack.i.h.bf16 %v8533_v18  ;;  %v8534_v38 = vunpack.i.l.bf16 %v8533_v18  ;;  %v2209_v61 = vpack.c.bf16 %v2109_v35, %v2107_v58  ;;  %v2112_v60 = vsel %vm1292_vm5, %v2110_v63, %v2111_v6  ;;  %v16762_v35 = vld [vmem:[#allocation65_spill] sm:$0xff] }
 0x145   : > { %v16758_v31 = vpack.i.bf16 %v11721_v56, %v11718_v42  ;;  %v2013_v17 = vsel %vm432_vm4, %v12103_v53, %v8529_v24  ;;  %v2014_v46 = vsel %vm432_vm4, %v12099_v54, %v8530_v15  ;;  %v2114_v32 = vsel %vm1292_vm5, %v2111_v6, %v2113_v62  ;;  %8114 = vmatprep.subr.msk.bf16.mxu0 %vm923_vm3, %v11930_v44  ;;  %v16763_v62 = vld [vmem:[#allocation39_spill] sm:$0xff] }
 0x146   : > { %v2117_v40 = vsel %vm1292_vm5, %v2115_v0, %v2116_v10  ;;  %8822 = vrot.lane.b32.xlu0 %v11807_v8, %s9754_s27  ;;  %v2015_v34 = vsel %vm432_vm4, %v12096_v21, %v8534_v38  ;;  %v2016_v42 = vsel %vm432_vm4, %v12092_v59, %v8535_v57  ;;  %v2118_v56 = vrot.slane %v2013_v17, 7  ;;  %7743 = vmatprep.mubr.msk.bf16.mxu0 %vm2231_vm6, %v2209_v61  ;;  %v8538_v53 = vpop.permute.xlu1 %8537  ;;  %v8543_v26 = vpop.permute.xlu0 %8542  ;;  %v16764_v61 = vld [vmem:[#allocation21_spill] sm:$0xff] }
 0x147   : > { %8817 = vrot.lane.b32.xlu1 %v16758_v31, %s9755_s28  ;;  %v2120_v37 = vrot.slane %v2014_v46, 7  ;;  %v2121_v54 = vrot.slane %v2015_v34, 7  ;;  %v2123_v63 = vrot.slane %v2016_v42, 7  ;;  %v8540_v23 = vunpack.i.h.bf16 %v8538_v53 }
 0x148   : > { %v8539_v19 = vunpack.i.l.bf16 %v8538_v53  ;;  %v8545_v8 = vunpack.i.h.bf16 %v8543_v26  ;;  %v8544_v7 = vunpack.i.l.bf16 %v8543_v26  ;;  %v2210_v55 = vpack.c.bf16 %v2114_v32, %v2112_v60  ;;  %v16765_v32 = vld [vmem:[#allocation52_spill] sm:$0xff] }
 0x149   : > { %v2119_v21 = vsel %vm1292_vm5, %v2116_v10, %v2118_v56  ;;  %v8480_v59 = vunpack.i.h.bf16 %v12135_v47  ;;  %v2018_v44 = vsel %vm432_vm4, %v16760_v12, %v8540_v23  ;;  %v8479_v5 = vunpack.i.l.bf16 %v12135_v47  ;;  %v16775_v47 = vld [vmem:[#allocation15_spill] sm:$0xff] }
 0x14a   : > { %v2017_v58 = vsel %vm432_vm4, %v16759_v43, %v8539_v19  ;;  %v2211_v16 = vpack.c.bf16 %v2119_v21, %v2117_v40  ;;  %8832 = vrot.lane.b32.xlu0 %v16761_v13, %s9754_s27  ;;  %v2019_v20 = vsel %vm432_vm4, %v16762_v35, %v8544_v7  ;;  %v2126_v6 = vrot.slane %v2018_v44, 7  ;;  %v8553_v10 = vpop.permute.xlu0 %8552  ;;  %v16766_v40 = vld [vmem:[#allocation55_spill] sm:$0xff]  ;;  %v16768_v21 = vld [vmem:[#allocation4_spill] sm:$0xff] }
 0x14b   : > { %8827 = vrot.lane.b32.xlu1 %v11768_v29, %s9754_s27  ;;  %v2125_v9 = vrot.slane %v2017_v58, 7  ;;  %v8548_v29 = vpop.permute.xlu1 %8547  ;;  %v2020_v51 = vsel %vm432_vm4, %v16763_v62, %v8545_v8  ;;  %v2128_v0 = vrot.slane %v2019_v20, 7  ;;  %7744 = vmatmul.mubr.msk.bf16.gmra.mrb[4].mxu0 %vm2231_vm6, %v2210_v55  ;;  %v8555_v24 = vunpack.i.h.bf16 %v8553_v10  ;;  %v16767_v55 = vld [vmem:[#allocation56_spill] sm:$0xff] }
 0x14c   : > { %v8550_v18 = vunpack.i.h.bf16 %v8548_v29  ;;  %v8549_v15 = vunpack.i.l.bf16 %v8548_v29  ;;  %v8554_v2 = vunpack.i.l.bf16 %v8553_v10  ;;  %7747 = vmatprep.mubr.msk.bf16.mxu0 %vm2231_vm6, %v2211_v16  ;;  %v2122_v57 = vsel %vm1292_vm5, %v2120_v37, %v2121_v54 }
 0x14d   : > { %v2124_v38 = vsel %vm1292_vm5, %v2121_v54, %v2123_v63  ;;  %v2127_v17 = vsel %vm1292_vm5, %v2125_v9, %v2126_v6  ;;  %v2129_v46 = vsel %vm1292_vm5, %v2126_v6, %v2128_v0  ;;  %v8484_v34 = vunpack.i.l.bf16 %v16766_v40 }
 0x14e   : > { %v2021_v60 = vsel %vm432_vm4, %v12156_v50, %v8549_v15  ;;  %v2022_v31 = vsel %vm432_vm4, %v12152_v41, %v8550_v18  ;;  %8842 = vrot.lane.b32.xlu0 %v16765_v32, %s9755_s28  ;;  %v2130_v42 = vrot.slane %v2020_v51, 7  ;;  %v2023_v53 = vsel %vm432_vm4, %v12148_v3, %v8554_v2  ;;  %v8563_v54 = vpop.permute.xlu0 %8562 }
 0x14f   : > { %8837 = vrot.lane.b32.xlu1 %v16764_v61, %s9755_s28  ;;  %v2131_v56 = vrot.slane %v2021_v60, 7  ;;  %v8558_v37 = vpop.permute.xlu1 %8557  ;;  %v2212_v26 = vpack.c.bf16 %v2124_v38, %v2122_v57  ;;  %v2024_v41 = vsel %vm432_vm4, %v12145_v28, %v8555_v24  ;;  %v2133_v23 = vrot.slane %v2022_v31, 7 }
 0x150   : > { %v8560_v50 = vunpack.i.h.bf16 %v8558_v37  ;;  %v8559_v63 = vunpack.i.l.bf16 %v8558_v37  ;;  %v8565_v19 = vunpack.i.h.bf16 %v8563_v54  ;;  %v8564_v8 = vunpack.i.l.bf16 %v8563_v54  ;;  %v16770_v37 = vld [vmem:[#allocation47_spill] sm:$0xff] }
 0x151   : > { %v2213_v7 = vpack.c.bf16 %v2129_v46, %v2127_v17  ;;  %v16769_v43 = vpack.i.bf16 %v16767_v55, %v16768_v21  ;;  %v2135_v12 = vrot.slane %v2023_v53, 7  ;;  %v2136_v44 = vrot.slane %v2024_v41, 7 }
 0x152   : > { %v2026_v58 = vsel %vm432_vm4, %v12161_v27, %v8560_v50  ;;  %v2025_v3 = vsel %vm432_vm4, %v12165_v4, %v8559_v63  ;;  %v2027_v28 = vsel %vm432_vm4, %v12177_v45, %v8564_v8  ;;  %v2028_v16 = vsel %vm432_vm4, %v12173_v49, %v8565_v19  ;;  %v8573_v27 = vpop.permute.xlu0 %8572  ;;  %v1479_v19 = vld [vmem:[#allocation2 + $0x1e0] sm:$0xff] }
 0x153   : > { %8847 = vrot.lane.b32.xlu1 %v16769_v43, %s9755_s28  ;;  %v2140_v13 = vrot.slane %v2026_v58, 7  ;;  %v8568_v35 = vpop.permute.xlu1 %8567  ;;  %v2132_v20 = vsel %vm1292_vm5, %v2130_v42, %v2131_v56  ;;  %v2141_v9 = vrot.slane %v2027_v28, 7  ;;  %v2143_v6 = vrot.slane %v2028_v16, 7  ;;  %7748 = vmatmul.mubr.msk.bf16.gmra.mrb[8].mxu0 %vm2231_vm6, %v2212_v26  ;;  %v16771_v43 = vld [vmem:[#allocation9_spill] sm:$0xff] }
 0x154   : > { %v8570_v29 = vunpack.i.h.bf16 %v8568_v35  ;;  %v8569_v62 = vunpack.i.l.bf16 %v8568_v35  ;;  %7751 = vmatprep.mubr.msk.bf16.mxu0 %vm2231_vm6, %v2213_v7  ;;  %v8575_v4 = vunpack.i.h.bf16 %v8573_v27  ;;  %v8574_v51 = vunpack.i.l.bf16 %v8573_v27 }
 0x155   : > { %v2138_v0 = vrot.slane %v2025_v3, 7  ;;  %v2134_v45 = vsel %vm1292_vm5, %v2131_v56, %v2133_v23  ;;  %v2142_v18 = vsel %vm1292_vm5, %v2140_v13, %v2141_v9  ;;  %v2144_v15 = vsel %vm1292_vm5, %v2141_v9, %v2143_v6  ;;  %v16772_v3 = vld [vmem:[#allocation46_spill] sm:$0xff] }
 0x156   : > { %v2029_v49 = vsel %vm432_vm4, %v12195_v25, %v8569_v62  ;;  %v2030_v10 = vsel %vm432_vm4, %v12192_v22, %v8570_v29  ;;  %v2031_v24 = vsel %vm432_vm4, %v12188_v33, %v8574_v51  ;;  %v2137_v61 = vsel %vm1292_vm5, %v2135_v12, %v2136_v44  ;;  %v8583_v25 = vpop.permute.xlu0 %8582  ;;  %v16773_v12 = vld [vmem:[#allocation105_spill] sm:$0xff] }
 0x157   : > { %v2145_v2 = vrot.slane %v2029_v49, 7  ;;  %v2146_v57 = vrot.slane %v2030_v10, 7  ;;  %v8578_v38 = vpop.permute.xlu1 %8577  ;;  %v2032_v60 = vsel %vm432_vm4, %v12184_v1, %v8575_v4  ;;  %v2148_v31 = vrot.slane %v2031_v24, 7 }
 0x158   : > { %v8580_v17 = vunpack.i.h.bf16 %v8578_v38  ;;  %v8579_v46 = vunpack.i.l.bf16 %v8578_v38  ;;  %v8585_v22 = vunpack.i.h.bf16 %v8583_v25  ;;  %v8584_v32 = vunpack.i.l.bf16 %v8583_v25  ;;  %v16777_v25 = vld [vmem:[#allocation101_spill] sm:$0xff] }
 0x159   : > { %v2139_v42 = vsel %vm1292_vm5, %v2136_v44, %v2138_v0  ;;  %v2216_v56 = vpack.c.bf16 %v2144_v15, %v2142_v18  ;;  %v2214_v50 = vpack.c.bf16 %v2134_v45, %v2132_v20  ;;  %v2150_v63 = vrot.slane %v2032_v60, 7  ;;  %v16776_v18 = vld [vmem:[#allocation63_spill] sm:$0xff] }
 0x15a   : > { %v2033_v33 = vsel %vm432_vm4, %v12207_v52, %v8579_v46  ;;  %v2034_v53 = vsel %vm432_vm4, %v16770_v37, %v8580_v17  ;;  %v2215_v54 = vpack.c.bf16 %v2139_v42, %v2137_v61  ;;  %v2147_v23 = vsel %vm1292_vm5, %v2145_v2, %v2146_v57  ;;  %v8593_v52 = vpop.permute.xlu0 %8592  ;;  %v16778_v17 = vld [vmem:[#allocation102_spill] sm:$0xff] }
 0x15b   : > { %v2151_v26 = vrot.slane %v2033_v33, 7  ;;  %v2153_v1 = vrot.slane %v2034_v53, 7  ;;  %v8588_v41 = vpop.permute.xlu1 %8587  ;;  %v2035_v8 = vsel %vm432_vm4, %v12218_v36, %v8584_v32  ;;  %v2036_v7 = vsel %vm432_vm4, %v12215_v11, %v8585_v22  ;;  %7752 = vmatmul.mubr.msk.bf16.gmra.mrb[12].mxu0 %vm2231_vm6, %v2214_v50 }
 0x15c   : > { %7755 = vmatprep.mubr.msk.bf16.mxu1 %vm2231_vm6, %v2215_v54  ;;  %v8590_v55 = vunpack.i.h.bf16 %v8588_v41  ;;  %v8589_v21 = vunpack.i.l.bf16 %v8588_v41  ;;  %v1994_v58 = vsel %vm388_vm0, %v16771_v43, %v8480_v59  ;;  %v16774_v36 = vpack.c.bf16 %v16772_v3, %v16773_v12  ;;  %v16781_v54 = vld [vmem:[#allocation41_spill] sm:$0xff]  ;;  %v16788_v43 = vld [vmem:[#allocation103_spill] sm:$0xff] }
 0x15d   : > { %7756 = vmatmul.mubr.msk.bf16.vlgmr.msra.gmra.mrb[0].mxu1 %vm2231_vm6, %v2216_v56  ;;  %v8595_v11 = vunpack.i.h.bf16 %v8593_v52  ;;  %v8594_v44 = vunpack.i.l.bf16 %v8593_v52  ;;  %v2149_v28 = vsel %vm1292_vm5, %v2146_v57, %v2148_v31  ;;  %v2152_v35 = vsel %vm1292_vm5, %v2150_v63, %v2151_v26  ;;  %v16780_v56 = vld [vmem:[#allocation37_spill] sm:$0xff]  ;;  %v16790_v12 = vld [vmem:[#allocation19_spill] sm:$0xff] }
 0x15e   : > { %7773 = vmatprep.mubr.msk.bf16.mxu0 %vm2231_vm6, %v16774_v36  ;;  %v2037_v16 = vsel %vm432_vm4, %v12229_v30, %v8589_v21  ;;  %v2217_v13 = vpack.c.bf16 %v2149_v28, %v2147_v23  ;;  %v2154_v20 = vsel %vm1292_vm5, %v2151_v26, %v2153_v1  ;;  %v1993_v59 = vsel %vm388_vm0, %v1479_v19, %v8479_v5  ;;  %v8603_v30 = vpop.permute.xlu0 %8602  ;;  %v16782_v26 = vld [vmem:[#allocation45_spill] sm:$0xff]  ;;  %v16783_v23 = vld [vmem:[#allocation70_spill] sm:$0xff]  ;;  %v16784_v19 = vld [vmem:[#allocation43_spill] sm:$0xff] }
 0x15f   : > { %v2155_v9 = vrot.slane %v2035_v8, 7  ;;  %v2156_v6 = vrot.slane %v2036_v7, 7  ;;  %v2158_v27 = vrot.slane %v2037_v16, 7  ;;  %v8598_v29 = vpop.permute.xlu1 %8597  ;;  %v2039_v62 = vsel %vm432_vm4, %v12241_v48, %v8594_v44  ;;  %v1483_v7 = vld [vmem:[#allocation2 + $0x200] sm:$0xff]  ;;  %v16793_v44 = vld [vmem:[#allocation17_spill] sm:$0xff]  ;;  %v16795_v16 = vld [vmem:[#allocation107_spill] sm:$0xff] }
 0x160   : > { %v2038_v4 = vsel %vm432_vm4, %v12225_v14, %v8590_v55  ;;  %7759 = vmatprep.mubr.msk.bf16.mxu1 %vm2231_vm6, %v2217_v13  ;;  %v8600_v51 = vunpack.i.h.bf16 %v8598_v29  ;;  %v8599_v0 = vunpack.i.l.bf16 %v8598_v29  ;;  %v1995_v5 = vsel %vm388_vm0, %v16775_v47, %v8484_v34  ;;  %v16786_v55 = vld [vmem:[#allocation108_spill] sm:$0xff] }
 0x161   : > { %v2040_v45 = vsel %vm432_vm4, %v12237_v39, %v8595_v11  ;;  %v8604_v49 = vunpack.i.l.bf16 %v8603_v30  ;;  %v2218_v10 = vpack.c.bf16 %v2154_v20, %v2152_v35  ;;  %v8490_v48 = vunpack.i.h.bf16 %v16776_v18 }
 0x162   : > { %v2041_v15 = vsel %vm432_vm4, %v1993_v59, %v8599_v0  ;;  %v2042_v14 = vsel %vm432_vm4, %v1994_v58, %v8600_v51  ;;  %v2159_v24 = vsel %vm1292_vm5, %v2156_v6, %v2158_v27  ;;  %v8489_v2 = vunpack.i.l.bf16 %v16776_v18  ;;  %v12418_v32 = vpop.permute.xlu0 %8612  ;;  %v9612_v59 = vld [vmem:[#allocation2 + $0x210] sm:$0xff] }
 0x163   : > { %v2161_v57 = vrot.slane %v2039_v62, 7  ;;  %v2160_v38 = vrot.slane %v2038_v4, 7  ;;  %v2043_v61 = vsel %vm432_vm4, %v1995_v5, %v8604_v49  ;;  %v8608_v34 = vpop.permute.xlu1 %8607  ;;  %v2163_v60 = vrot.slane %v2040_v45, 7  ;;  %v16798_v45 = vld [vmem:[#allocation35_spill] sm:$0xff] }
 0x164   : > { %v2165_v31 = vrot.slane %v2041_v15, 7  ;;  %v2166_v39 = vrot.slane %v2042_v14, 7  ;;  %v16779_v46 = vpack.c.bf16 %v16777_v25, %v16778_v17  ;;  %v2157_v22 = vsel %vm1292_vm5, %v2155_v9, %v2156_v6  ;;  %v9613_v6 = vld [vmem:[#allocation2 + $0x208] sm:$0xff]  ;;  %v16800_v15 = vld [vmem:[#allocation106_spill] sm:$0xff] }
 0x165   : > { %v2168_v42 = vrot.slane %v2043_v61, 7  ;;  %7760 = vmatmul.mubr.msk.bf16.gmra.mrb[4].mxu1 %vm2231_vm6, %v2218_v10  ;;  %v8610_v33 = vunpack.i.h.bf16 %v8608_v34  ;;  %v8609_v37 = vunpack.i.l.bf16 %v8608_v34  ;;  %v2219_v53 = vpack.c.bf16 %v2159_v24, %v2157_v22 }
 0x166   : > { %7774 = vmatmul.mubr.msk.bf16.vlgmr.msra.gmra.mrb[0].mxu0 %vm2231_vm6, %v16779_v46  ;;  %v8325_v50 = vunpack.i.h.bf16 %v16781_v54  ;;  %v8324_v63 = vunpack.i.l.bf16 %v16781_v54  ;;  %v8319_v1 = vunpack.i.l.bf16 %v16782_v26  ;;  %v8485_v41 = vunpack.i.h.bf16 %v16766_v40  ;;  %v12452_v4 = vpop.permute.xlu0 %8622  ;;  %v16806_v54 = vld [vmem:[#allocation60_spill] sm:$0xff] }
 0x167   : > { %7806 = vmatpush3.bf16.msra.mxu0 %v16780_v56  ;;  %v16785_v8 = vpack.c.bf16 %v16783_v23, %v16784_v19  ;;  %v8605_v52 = vunpack.i.h.bf16 %v8603_v30  ;;  %7763 = vmatprep.mubr.msk.bf16.mxu1 %vm2231_vm6, %v2219_v53  ;;  %v16787_v21 = vrot.slane %v16786_v55, 7  ;;  %v16789_v58 = vrot.slane %v16788_v43, 7  ;;  %v12446_v20 = vpop.permute.xlu1 %8617  ;;  %v16809_v55 = vld [vmem:[#allocation29_spill] sm:$0xff]  ;;  %v16811_v43 = vld [vmem:[#allocation7_spill] sm:$0xff] }
 0x168   : > { %v16791_v36 = vrot.slane %v16790_v12, 7  ;;  %v16794_v28 = vrot.slane %v16793_v44, 7  ;;  %v16796_v13 = vrot.slane %v16795_v16, 7  ;;  %v1998_v9 = vsel %vm388_vm0, %v9612_v59, %v8490_v48  ;;  %v16813_v12 = vld [vmem:[#allocation64_spill] sm:$0xff]  ;;  %v16816_v16 = vld [vmem:[#allocation26_spill] sm:$0xff] }
 0x169   : > { %7777 = vmatprep.mubr.msk.bf16.mxu0 %vm2231_vm6, %v16785_v8  ;;  %v1310_v3 = vsel %vm1292_vm5, %v16789_v58, %v16787_v21  ;;  %v16792_v11 = vmov %v16787_v21  ;;  %v1997_v27 = vsel %vm388_vm0, %v9613_v6, %v8489_v2  ;;  %v2162_v29 = vsel %vm1292_vm5, %v2160_v38, %v2161_v57  ;;  %v16802_v2 = vld [vmem:[#allocation76_spill] sm:$0xff]  ;;  %v16820_v6 = vld [vmem:[#allocation23_spill] sm:$0xff] }
 0x16a   : > { %v1312_v40 = vsel %vm1292_vm5, %v16792_v11, %v16791_v36  ;;  %v1317_v35 = vsel %vm1292_vm5, %v16796_v13, %v16794_v28  ;;  %v2164_v62 = vsel %vm1292_vm5, %v2161_v57, %v2163_v60  ;;  %v2045_v30 = vsel %vm432_vm4, %v1997_v27, %v8609_v37  ;;  %v12479_v22 = vpop.permute.xlu0 %8632 }
 0x16b   : > { %v2046_v51 = vsel %vm432_vm4, %v1998_v9, %v8610_v33  ;;  %v2167_v0 = vsel %vm1292_vm5, %v2165_v31, %v2166_v39  ;;  %v2169_v47 = vsel %vm1292_vm5, %v2166_v39, %v2168_v42  ;;  %v16797_v5 = vunpack.i.h.bf16 %v16782_v26  ;;  %v12475_v60 = vpop.permute.xlu1 %8627  ;;  %v16803_v31 = vld [vmem:[#allocation24_spill] sm:$0xff]  ;;  %v16804_v42 = vld [vmem:[#allocation74_spill] sm:$0xff]  ;;  %v16805_v33 = vld [vmem:[#allocation71_spill] sm:$0xff] }
 0x16c   : > { %v1996_v10 = vsel %vm388_vm0, %v1483_v7, %v8485_v41  ;;  %v1408_v18 = vpack.c.bf16 %v1312_v40, %v1310_v3  ;;  %v16799_v48 = vmov %v16796_v13  ;;  %v16801_v14 = vrot.slane %v16800_v15, 7  ;;  %v16807_v41 = vld [vmem:[#allocation78_spill] sm:$0xff]  ;;  %v16808_v7 = vld [vmem:[#allocation79_spill] sm:$0xff] }
 0x16d   : > { %v12462_v49 = vsel %vm432_vm4, %v16798_v45, %v16797_v5  ;;  %v12472_v57 = vsel %vm432_vm4, %v16802_v2, %v8324_v63  ;;  %v2044_v38 = vsel %vm432_vm4, %v1996_v10, %v8605_v52  ;;  %v2220_v61 = vpack.c.bf16 %v2164_v62, %v2162_v29  ;;  %v16825_v45 = vld [vmem:[#allocation83_spill] sm:$0xff] }
 0x16e   : > { %v1315_v24 = vsel %vm1292_vm5, %v16801_v14, %v16799_v48  ;;  %v1329_v39 = vrot.slane %v16803_v31, 7  ;;  %v2171_v25 = vrot.slane %v2045_v30, 7  ;;  %v2173_v17 = vrot.slane %v2046_v51, 7  ;;  %7778 = vmatmul.mubr.msk.bf16.gmra.mrb[4].mxu0 %vm2231_vm6, %v1408_v18  ;;  %v12521_v30 = vpop.permute.xlu0 %8642  ;;  %v16823_v51 = vld [vmem:[#allocation85_spill] sm:$0xff]  ;;  %v16826_v18 = vld [vmem:[#allocation80_spill] sm:$0xff] }
 0x16f   : > { %v1409_v34 = vpack.c.bf16 %v1317_v35, %v1315_v24  ;;  %v2221_v46 = vpack.c.bf16 %v2169_v47, %v2167_v0  ;;  %v12483_v56 = vsel %vm432_vm4, %v16804_v42, %v8325_v50  ;;  %v8335_v37 = vunpack.i.h.bf16 %v16805_v33  ;;  %7764 = vmatmul.mubr.msk.bf16.gmra.mrb[8].mxu1 %vm2231_vm6, %v2220_v61  ;;  %v12507_v40 = vpop.permute.xlu1 %8637  ;;  %v16818_v35 = vld [vmem:[#allocation51_spill] sm:$0xff] }
 0x170   : > { %v8334_v53 = vunpack.i.l.bf16 %v16805_v33  ;;  %v8330_v63 = vunpack.i.h.bf16 %v16806_v54  ;;  %v1339_v26 = vrot.slane %v12472_v57, 7  ;;  %v1222_v23 = vsel %vm432_vm4, %v16807_v41, %v8319_v1  ;;  %v16824_v47 = vld [vmem:[#allocation67_spill] sm:$0xff] }
 0x171   : > { %7781 = vmatprep.mubr.msk.bf16.mxu0 %vm2231_vm6, %v1409_v34  ;;  %v1338_v19 = vrot.slane %v12462_v49, 7  ;;  %v2170_v8 = vrot.slane %v2044_v38, 7  ;;  %7767 = vmatprep.mubr.msk.bf16.mxu1 %vm2231_vm6, %v2221_v46  ;;  %v8329_v50 = vunpack.i.l.bf16 %v16806_v54  ;;  %v8340_v52 = vunpack.i.h.bf16 %v16808_v7  ;;  %v16827_v38 = vld [vmem:[#allocation84_spill] sm:$0xff] }
 0x172   : > { %v16810_v21 = vrot.slane %v16809_v55, 7  ;;  %v16812_v58 = vrot.slane %v16811_v43, 7  ;;  %v16814_v36 = vrot.slane %v16813_v12, 7  ;;  %v2174_v28 = vsel %vm1292_vm5, %v2171_v25, %v2173_v17  ;;  %v12553_v54 = vpop.permute.xlu0 %8652 }
 0x173   : > { %v2172_v44 = vsel %vm1292_vm5, %v2170_v8, %v2171_v25  ;;  %v16817_v13 = vrot.slane %v16816_v16, 7  ;;  %v16819_v59 = vrot.slane %v16818_v35, 7  ;;  %v16821_v27 = vrot.slane %v16820_v6, 7  ;;  %v12543_v17 = vpop.permute.xlu1 %8647  ;;  %v16838_v35 = vld [vmem:[#allocation22_spill] sm:$0xff] }
 0x174   : > { %v1320_v3 = vsel %vm1292_vm5, %v16812_v58, %v16810_v21  ;;  %v16815_v11 = vmov %v16810_v21  ;;  %v12525_v0 = vsel %vm432_vm4, %v16823_v51, %v8334_v53  ;;  %v12529_v5 = vsel %vm432_vm4, %v16824_v47, %v8335_v37  ;;  %v16828_v37 = vld [vmem:[#allocation13_spill] sm:$0xff]  ;;  %v16832_v21 = vld [vmem:[#allocation87_spill] sm:$0xff] }
 0x175   : > { %v1322_v1 = vsel %vm1292_vm5, %v16815_v11, %v16814_v36  ;;  %v1325_v9 = vsel %vm1292_vm5, %v16819_v59, %v16817_v13  ;;  %v16822_v29 = vmov %v16817_v13  ;;  %v12533_v10 = vsel %vm432_vm4, %v16825_v45, %v8330_v63  ;;  %v16829_v63 = vld [vmem:[#allocation88_spill] sm:$0xff]  ;;  %v16834_v36 = vld [vmem:[#allocation86_spill] sm:$0xff]  ;;  %v16840_v51 = vld [vmem:[#allocation25_spill] sm:$0xff] }
 0x176   : > { %v1327_v62 = vsel %vm1292_vm5, %v16822_v29, %v16821_v27  ;;  %v8344_v48 = vunpack.i.l.bf16 %v16826_v18  ;;  %v1341_v15 = vrot.slane %v12483_v56, 7  ;;  %v1336_v14 = vrot.slane %v1222_v23, 7  ;;  %v16830_v23 = vld [vmem:[#allocation49_spill] sm:$0xff] }
 0x177   : > { %v8345_v24 = vunpack.i.h.bf16 %v16826_v18  ;;  %v1410_v2 = vpack.c.bf16 %v1322_v1, %v1320_v3  ;;  %v12540_v61 = vsel %vm432_vm4, %v16827_v38, %v8329_v50  ;;  %v8339_v34 = vunpack.i.l.bf16 %v16808_v7  ;;  %v16831_v7 = vld [vmem:[#allocation62_spill] sm:$0xff]  ;;  %v16833_v3 = vld [vmem:[#allocation89_spill] sm:$0xff]  ;;  %v12582_v6 = vpop.permute.xlu1 %8657 }
 0x178   : > { %v2222_v31 = vpack.c.bf16 %v2174_v28, %v2172_v44  ;;  %v1411_v25 = vpack.c.bf16 %v1327_v62, %v1325_v9  ;;  %v1346_v46 = vrot.slane %v12525_v0, 7  ;;  %v1348_v42 = vrot.slane %v12529_v5, 7  ;;  %v16835_v1 = vld [vmem:[#allocation93_spill] sm:$0xff]  ;;  %v16836_v28 = vld [vmem:[#allocation11_spill] sm:$0xff]  ;;  %v16842_v18 = vld [vmem:[#allocation10_spill] sm:$0xff] }
 0x179   : > { %v1344_v33 = vrot.slane %v12533_v10, 7  ;;  %v12550_v53 = vsel %vm432_vm4, %v16828_v37, %v8340_v52  ;;  %7782 = vmatmul.mubr.msk.bf16.gmra.mrb[8].mxu0 %vm2231_vm6, %v1410_v2  ;;  %v12557_v41 = vsel %vm432_vm4, %v16829_v63, %v8344_v48  ;;  %v8355_v8 = vunpack.i.h.bf16 %v16830_v23  ;;  %v12590_v10 = vpop.permute.xlu0 %8662  ;;  %v16844_v2 = vld [vmem:[#allocation91_spill] sm:$0xff] }
 0x17a   : > { %v8354_v50 = vunpack.i.l.bf16 %v16830_v23  ;;  %v8350_v55 = vunpack.i.h.bf16 %v16831_v7  ;;  %7768 = vmatmul.mubr.msk.bf16.gmra.mrb[12].mxu1 %vm2231_vm6, %v2222_v31  ;;  %7785 = vmatprep.mubr.msk.bf16.mxu0 %vm2231_vm6, %v1411_v25  ;;  %v1343_v52 = vrot.slane %v12540_v61, 7  ;;  %v12567_v43 = vsel %vm432_vm4, %v16832_v21, %v8345_v24  ;;  %v16843_v24 = vld [vmem:[#allocation95_spill] sm:$0xff]  ;;  %v16850_v21 = vld [vmem:[#allocation6_spill] sm:$0xff] }
 0x17b   : > { %v8349_v58 = vunpack.i.l.bf16 %v16831_v7  ;;  %v8360_v12 = vunpack.i.h.bf16 %v16833_v3  ;;  %v12573_v11 = vsel %vm432_vm4, %v16834_v36, %v8339_v34  ;;  %v8364_v44 = vunpack.i.l.bf16 %v16835_v1  ;;  %v16845_v34 = vld [vmem:[#allocation92_spill] sm:$0xff]  ;;  %v16848_v23 = vld [vmem:[#allocation27_spill] sm:$0xff] }
 0x17c   : > { %v16837_v16 = vrot.slane %v16836_v28, 7  ;;  %v16839_v59 = vrot.slane %v16838_v35, 7  ;;  %v1353_v27 = vrot.slane %v12557_v41, 7  ;;  %v1351_v29 = vrot.slane %v12550_v53, 7  ;;  %v12624_v36 = vpop.permute.xlu1 %8667  ;;  %v16851_v28 = vld [vmem:[#allocation14_spill] sm:$0xff] }
 0x17d   : > { %v8365_v62 = vunpack.i.h.bf16 %v16835_v1  ;;  %v16841_v47 = vrot.slane %v16840_v51, 7  ;;  %v12594_v48 = vsel %vm432_vm4, %v16842_v18, %v8354_v50  ;;  %v12602_v38 = vsel %vm432_vm4, %v16844_v2, %v8350_v55 }
 0x17e   : > { %v1330_v13 = vsel %vm1292_vm5, %v16837_v16, %v1329_v39  ;;  %v1332_v9 = vsel %vm1292_vm5, %v1329_v39, %v16839_v59  ;;  %v12598_v39 = vsel %vm432_vm4, %v16843_v24, %v8355_v8  ;;  %v8359_v61 = vunpack.i.l.bf16 %v16833_v3  ;;  %v16853_v59 = vld [vmem:[#allocation100_spill] sm:$0xff] }
 0x17f   : > { %v1337_v45 = vsel %vm1292_vm5, %v16841_v47, %v1336_v14  ;;  %v12607_v31 = vsel %vm432_vm4, %v16845_v34, %v8349_v58  ;;  %v16846_v14 = vld [vmem:[#allocation99_spill] sm:$0xff]  ;;  %v1412_v37 = vpack.c.bf16 %v1332_v9, %v1330_v13  ;;  %v16847_v63 = vmov %v16841_v47  ;;  %v16852_v13 = vld [vmem:[#allocation16_spill] sm:$0xff] }
 0x180   : > { %v12611_v25 = vsel %vm432_vm4, %v16846_v14, %v8360_v12  ;;  %v16849_v8 = vrot.slane %v16848_v23, 7  ;;  %v1354_v7 = vrot.slane %v12567_v43, 7  ;;  %v1349_v55 = vrot.slane %v12573_v11, 7  ;;  %v12634_v43 = vpop.permute.xlu0 %8672  ;;  %v2662_v34 = vld [vmem:[#allocation2 + $0x40] sm:$0xff] }
 0x181   : > { %v12622_v3 = vsel %vm432_vm4, %v16850_v21, %v8364_v44  ;;  %v1359_v12 = vrot.slane %v12594_v48, 7  ;;  %v1358_v1 = vrot.slane %v12602_v38, 7  ;;  %v12630_v16 = vsel %vm432_vm4, %v16851_v28, %v8365_v62  ;;  %7786 = vmatmul.mubr.msk.bf16.gmra.mrb[12].mxu0 %vm2231_vm6, %v1412_v37  ;;  %v16854_v37 = vld [vmem:[#allocation20_spill] sm:$0xff] }
 0x182   : > { %v1335_v50 = vsel %vm1292_vm5, %v16849_v8, %v16847_v63  ;;  %v8370_v35 = vunpack.i.h.bf16 %v16852_v13  ;;  %v1361_v11 = vrot.slane %v12598_v39, 7  ;;  %v1356_v44 = vrot.slane %v12607_v31, 7  ;;  %v9614_v8 = vld [vmem:[#allocation2 + $0x48] sm:$0xff] }
 0x183   : > { %v1413_v58 = vpack.c.bf16 %v1337_v45, %v1335_v50  ;;  %v12640_v9 = vsel %vm432_vm4, %v16853_v59, %v8359_v61  ;;  %v1364_v51 = vrot.slane %v12611_v25, 7  ;;  %v1366_v62 = vrot.slane %v12622_v3, 7 }
 0x184   : > { %v8615_v47 = vunpack.i.h.bf16 %v12418_v32  ;;  %v8614_v45 = vunpack.i.l.bf16 %v12418_v32  ;;  %v8619_v18 = vunpack.i.l.bf16 %v12446_v20  ;;  %v1368_v24 = vrot.slane %v12630_v16, 7  ;;  %v12660_v32 = vpop.permute.xlu1 %8677 }
 0x185   : > { %7789 = vmatprep.mubr.msk.bf16.mxu0 %vm2231_vm6, %v1413_v58  ;;  %v8369_v2 = vunpack.i.l.bf16 %v16852_v13  ;;  %v1340_v61 = vsel %vm1292_vm5, %v1338_v19, %v1339_v26  ;;  %v1342_v31 = vsel %vm1292_vm5, %v1339_v26, %v1341_v15  ;;  %v1363_v14 = vrot.slane %v12640_v9, 7  ;;  %v12669_v19 = vpop.permute.xlu0 %8682  ;;  %v9615_v58 = vld [vmem:[#allocation2 + $0x50] sm:$0xff] }
 0x186   : > { %v1243_v63 = vsel %vm432_vm4, %v16854_v37, %v8370_v35  ;;  %v1345_v23 = vsel %vm1292_vm5, %v1343_v52, %v1344_v33  ;;  %v1347_v49 = vsel %vm1292_vm5, %v1344_v33, %v1346_v46  ;;  %v8620_v56 = vunpack.i.h.bf16 %v12446_v20  ;;  %v2666_v52 = vld [vmem:[#allocation2 + $0x60] sm:$0xff]  ;;  %v16855_v33 = vld [vmem:[#allocation18_spill] sm:$0xff] }
 0x187   : > { %v8630_v57 = vunpack.i.h.bf16 %v12475_v60  ;;  %v8629_v26 = vunpack.i.l.bf16 %v12475_v60  ;;  %v8634_v15 = vunpack.i.l.bf16 %v12479_v22  ;;  %v3191_v50 = vsel %vm388_vm0, %v9614_v8, %v8615_v47 }
 0x188   : > { %v3190_v21 = vsel %vm388_vm0, %v2662_v34, %v8614_v45  ;;  %v3192_v0 = vsel %vm388_vm0, %v9615_v58, %v8619_v18  ;;  %v1414_v46 = vpack.c.bf16 %v1342_v31, %v1340_v61  ;;  %v1242_v28 = vsel %vm432_vm4, %v16855_v33, %v8369_v2  ;;  %v12682_v35 = vpop.permute.xlu1 %8687  ;;  %v9617_v31 = vld [vmem:[#allocation2 + $0x68] sm:$0xff] }
 0x189   : > { %v8625_v20 = vunpack.i.h.bf16 %v12452_v4  ;;  %v8624_v13 = vunpack.i.l.bf16 %v12452_v4  ;;  %v1415_v60 = vpack.c.bf16 %v1347_v49, %v1345_v23  ;;  %v1371_v59 = vrot.slane %v1243_v63, 7  ;;  %v12692_v18 = vpop.permute.xlu0 %8692 }
 0x18a   : > { %v8635_v9 = vunpack.i.h.bf16 %v12479_v22  ;;  %7790 = vmatmul.mubr.msk.bf16.gmra.mrb[16].mxu0 %vm2231_vm6, %v1414_v46  ;;  %v1350_v47 = vsel %vm1292_vm5, %v1348_v42, %v1349_v55  ;;  %v1352_v45 = vsel %vm1292_vm5, %v1349_v55, %v1351_v29  ;;  %v3193_v4 = vsel %vm388_vm0, %v2666_v52, %v8620_v56  ;;  %v9616_v29 = vld [vmem:[#allocation2 + $0x70] sm:$0xff] }
 0x18b   : > { %v3239_v2 = vsel %vm432_vm4, %v3191_v50, %v8630_v57  ;;  %v3238_v34 = vsel %vm432_vm4, %v3190_v21, %v8629_v26  ;;  %v3240_v22 = vsel %vm432_vm4, %v3192_v0, %v8634_v15  ;;  %7793 = vmatprep.mubr.msk.bf16.mxu0 %vm2231_vm6, %v1415_v60  ;;  %v1369_v61 = vrot.slane %v1242_v28, 7  ;;  %v2674_v28 = vld [vmem:[#allocation2 + $0xa0] sm:$0xff] }
 0x18c   : > { %v8639_v5 = vunpack.i.l.bf16 %v12507_v40  ;;  %v1355_v42 = vsel %vm1292_vm5, %v1353_v27, %v1354_v7  ;;  %v1357_v53 = vsel %vm1292_vm5, %v1354_v7, %v1356_v44  ;;  %v3195_v55 = vsel %vm388_vm0, %v9616_v29, %v8625_v20  ;;  %v12707_v49 = vpop.permute.xlu1 %8697  ;;  %v9621_v29 = vld [vmem:[#allocation2 + $0xa8] sm:$0xff] }
 0x18d   : > { %v3194_v37 = vsel %vm388_vm0, %v9617_v31, %v8624_v13  ;;  %v8640_v63 = vunpack.i.h.bf16 %v12507_v40  ;;  %v1416_v23 = vpack.c.bf16 %v1352_v45, %v1350_v47  ;;  %v3335_v56 = vrot.slane %v3239_v2, 7  ;;  %v12710_v15 = vpop.permute.xlu0 %8702 }
 0x18e   : > { %v3334_v57 = vrot.slane %v3238_v34, 7  ;;  %v3241_v26 = vsel %vm432_vm4, %v3193_v4, %v8635_v9  ;;  %v3337_v41 = vrot.slane %v3240_v22, 7  ;;  %v8645_v27 = vunpack.i.h.bf16 %v12521_v30 }
 0x18f   : > { %v1417_v7 = vpack.c.bf16 %v1357_v53, %v1355_v42  ;;  %v1360_v44 = vsel %vm1292_vm5, %v1358_v1, %v1359_v12  ;;  %v1362_v40 = vsel %vm1292_vm5, %v1359_v12, %v1361_v11  ;;  %v3242_v8 = vsel %vm432_vm4, %v3194_v37, %v8639_v5  ;;  %v2670_v1 = vld [vmem:[#allocation2 + $0x80] sm:$0xff]  ;;  %v9620_v53 = vld [vmem:[#allocation2 + $0xb0] sm:$0xff] }
 0x190   : > { %v8644_v50 = vunpack.i.l.bf16 %v12521_v30  ;;  %v12728_v21 = vsel %vm1292_vm5, %v1363_v14, %v1364_v51  ;;  %v1367_v38 = vsel %vm1292_vm5, %v1364_v51, %v1366_v62  ;;  %v3339_v39 = vrot.slane %v3241_v26, 7  ;;  %v12736_v12 = vpop.permute.xlu1 %8707 }
 0x191   : > { %v3243_v48 = vsel %vm432_vm4, %v3195_v55, %v8640_v63  ;;  %v12741_v30 = vsel %vm1292_vm5, %v1368_v24, %v1369_v61  ;;  %v12744_v11 = vsel %vm1292_vm5, %v1369_v61, %v1371_v59  ;;  %v8649_v3 = vunpack.i.l.bf16 %v12543_v17  ;;  %v12755_v14 = vpop.permute.xlu0 %8712  ;;  %v9618_v24 = vld [vmem:[#allocation2 + $0x88] sm:$0xff] }
 0x192   : > { %v8660_v25 = vunpack.i.h.bf16 %v12582_v6  ;;  %7794 = vmatmul.mubr.msk.bf16.gmra.mrb[20].mxu0 %vm2231_vm6, %v1416_v23  ;;  %v12750_v51 = vsel %vm1292_vm5, %v3334_v57, %v3335_v56  ;;  %v12753_v62 = vsel %vm1292_vm5, %v3335_v56, %v3337_v41  ;;  %v3340_v16 = vrot.slane %v3242_v8, 7 }
 0x193   : > { %v3197_v52 = vsel %vm388_vm0, %v9618_v24, %v8645_v27  ;;  %v8650_v58 = vunpack.i.h.bf16 %v12543_v17  ;;  %v8659_v0 = vunpack.i.l.bf16 %v12582_v6  ;;  %7797 = vmatprep.mubr.msk.bf16.mxu0 %vm2231_vm6, %v1417_v7  ;;  %v3342_v46 = vrot.slane %v3243_v48, 7  ;;  %v9619_v17 = vld [vmem:[#allocation2 + $0x90] sm:$0xff]  ;;  %v2678_v27 = vld [vmem:[#allocation2 + $0xc0] sm:$0xff]  ;;  %v9622_v48 = vld [vmem:[#allocation2 + $0xc8] sm:$0xff] }
 0x194   : > { %v3196_v33 = vsel %vm388_vm0, %v2670_v1, %v8644_v50  ;;  %v8655_v20 = vunpack.i.h.bf16 %v12553_v54  ;;  %v8654_v13 = vunpack.i.l.bf16 %v12553_v54  ;;  %v8664_v60 = vunpack.i.l.bf16 %v12590_v10  ;;  %v12766_v47 = vpop.permute.xlu1 %8717  ;;  %v2682_v50 = vld [vmem:[#allocation2 + $0xe0] sm:$0xff] }
 0x195   : > { %v1418_v59 = vpack.c.bf16 %v1362_v40, %v1360_v44  ;;  %v1419_v9 = vpack.c.bf16 %v1367_v38, %v12728_v21  ;;  %v3198_v6 = vsel %vm388_vm0, %v9619_v17, %v8649_v3  ;;  %v3245_v45 = vsel %vm432_vm4, %v3197_v52, %v8660_v25  ;;  %v12773_v34 = vpop.permute.xlu0 %8722 }
 0x196   : > { %v8665_v4 = vunpack.i.h.bf16 %v12590_v10  ;;  %v1420_v2 = vpack.c.bf16 %v12744_v11, %v12741_v30  ;;  %v12776_v54 = vsel %vm1292_vm5, %v3339_v39, %v3340_v16  ;;  %v3199_v22 = vsel %vm388_vm0, %v2674_v28, %v8650_v58 }
 0x197   : > { %v3244_v61 = vsel %vm432_vm4, %v3196_v33, %v8659_v0  ;;  %v3446_v5 = vpack.c.bf16 %v12753_v62, %v12750_v51  ;;  %v12783_v42 = vsel %vm1292_vm5, %v3340_v16, %v3342_v46  ;;  %v3201_v10 = vsel %vm388_vm0, %v9620_v53, %v8655_v20  ;;  %v9623_v16 = vld [vmem:[#allocation2 + $0xd0] sm:$0xff] }
 0x198   : > { %v3200_v55 = vsel %vm388_vm0, %v9621_v29, %v8654_v13  ;;  %v8675_v31 = vunpack.i.h.bf16 %v12634_v43  ;;  %v3345_v37 = vrot.slane %v3245_v45, 7  ;;  %v3246_v63 = vsel %vm432_vm4, %v3198_v6, %v8664_v60  ;;  %v12791_v57 = vpop.permute.xlu1 %8727  ;;  %v9624_v46 = vld [vmem:[#allocation2 + $0xf0] sm:$0xff] }
 0x199   : > { %v8674_v23 = vunpack.i.l.bf16 %v12634_v43  ;;  %v8679_v56 = vunpack.i.l.bf16 %v12660_v32  ;;  %v3344_v26 = vrot.slane %v3244_v61, 7  ;;  %v12794_v41 = vsel %vm432_vm4, %v3199_v22, %v8665_v4  ;;  %v12799_v40 = vpop.permute.xlu0 %8732 }
 0x19a   : > { %v8680_v7 = vunpack.i.h.bf16 %v12660_v32  ;;  %v8685_v44 = vunpack.i.h.bf16 %v12669_v19  ;;  %7798 = vmatmul.mubr.msk.bf16.gmra.mrb[24].mxu0 %vm2231_vm6, %v1418_v59  ;;  %v8670_v8 = vunpack.i.h.bf16 %v12624_v36  ;;  %v8669_v43 = vunpack.i.l.bf16 %v12624_v36 }
 0x19b   : > { %v8684_v21 = vunpack.i.l.bf16 %v12669_v19  ;;  %v8690_v38 = vunpack.i.h.bf16 %v12682_v35  ;;  %7801 = vmatprep.mubr.msk.bf16.mxu0 %vm2231_vm6, %v1419_v9  ;;  %v3347_v39 = vrot.slane %v3246_v63, 7  ;;  %v3203_v32 = vsel %vm388_vm0, %v9622_v48, %v8675_v31  ;;  %v2686_v63 = vld [vmem:[#allocation2 + $0x100] sm:$0xff] }
 0x19c   : > { %v8689_v1 = vunpack.i.l.bf16 %v12682_v35  ;;  %v8694_v3 = vunpack.i.l.bf16 %v12692_v18  ;;  %v3202_v25 = vsel %vm388_vm0, %v2678_v27, %v8674_v23  ;;  %v3204_v36 = vsel %vm388_vm0, %v9623_v16, %v8679_v56  ;;  %v12813_v52 = vpop.permute.xlu1 %8737 }
 0x19d   : > { %v8695_v24 = vunpack.i.h.bf16 %v12692_v18  ;;  %v8700_v19 = vunpack.i.h.bf16 %v12707_v49  ;;  %v3349_v58 = vrot.slane %v12794_v41, 7  ;;  %v3205_v0 = vsel %vm388_vm0, %v2682_v50, %v8680_v7  ;;  %v12819_v28 = vpop.permute.xlu0 %8742  ;;  %v9625_v18 = vld [vmem:[#allocation2 + $0xe8] sm:$0xff]  ;;  %v2690_v7 = vld [vmem:[#allocation2 + $0x120] sm:$0xff] }
 0x19e   : > { %v3207_v35 = vsel %vm388_vm0, %v9624_v46, %v8685_v44  ;;  %v8699_v33 = vunpack.i.l.bf16 %v12707_v49  ;;  %v3249_v20 = vsel %vm432_vm4, %v3201_v10, %v8670_v8  ;;  %v3248_v13 = vsel %vm432_vm4, %v3200_v55, %v8669_v43  ;;  %v9626_v44 = vld [vmem:[#allocation2 + $0x108] sm:$0xff] }
 0x19f   : > { %v3206_v60 = vsel %vm388_vm0, %v9625_v18, %v8684_v21  ;;  %v3251_v59 = vsel %vm432_vm4, %v3203_v32, %v8690_v38  ;;  %v3250_v9 = vsel %vm432_vm4, %v3202_v25, %v8689_v1  ;;  %v3252_v17 = vsel %vm432_vm4, %v3204_v36, %v8694_v3  ;;  %v9628_v25 = vld [vmem:[#allocation2 + $0x130] sm:$0xff] }
 0x1a0   : > { %v3346_v6 = vsel %vm1292_vm5, %v3344_v26, %v3345_v37  ;;  %v3348_v45 = vsel %vm1292_vm5, %v3345_v37, %v3347_v39  ;;  %v3253_v49 = vsel %vm432_vm4, %v3205_v0, %v8695_v24  ;;  %v3255_v4 = vsel %vm432_vm4, %v3207_v35, %v8700_v19  ;;  %v12833_v53 = vpop.permute.xlu1 %8747  ;;  %v9627_v39 = vld [vmem:[#allocation2 + $0x110] sm:$0xff] }
 0x1a1   : > { %v8705_v22 = vunpack.i.h.bf16 %v12710_v15  ;;  %v8704_v61 = vunpack.i.l.bf16 %v12710_v15  ;;  %v3352_v10 = vrot.slane %v3249_v20, 7  ;;  %v3350_v29 = vrot.slane %v3248_v13, 7  ;;  %v12840_v37 = vpop.permute.xlu0 %8752  ;;  %v9629_v20 = vld [vmem:[#allocation2 + $0x128] sm:$0xff] }
 0x1a2   : > { %v3355_v55 = vrot.slane %v3251_v59, 7  ;;  %v3254_v31 = vsel %vm432_vm4, %v3206_v60, %v8699_v33  ;;  %7802 = vmatmul.mubr.msk.bf16.gmra.mrb[28].mxu0 %vm2231_vm6, %v1420_v2  ;;  %v3354_v23 = vrot.slane %v3250_v9, 7  ;;  %v3357_v56 = vrot.slane %v3252_v17, 7 }
 0x1a3   : > { %v8710_v26 = vunpack.i.h.bf16 %v12736_v12  ;;  %v8709_v15 = vunpack.i.l.bf16 %v12736_v12  ;;  %7807 = vmatprep.mubr.msk.bf16.mxu0 %vm2231_vm6, %v3446_v5  ;;  %v3359_v41 = vrot.slane %v3253_v49, 7  ;;  %v3362_v27 = vrot.slane %v3255_v4, 7  ;;  %v2694_v49 = vld [vmem:[#allocation2 + $0x140] sm:$0xff] }
 0x1a4   : > { %v8720_v30 = vunpack.i.h.bf16 %v12766_v47  ;;  %v8719_v11 = vunpack.i.l.bf16 %v12766_v47  ;;  %v3360_v2 = vrot.slane %v3254_v31, 7  ;;  %v3209_v8 = vsel %vm388_vm0, %v9626_v44, %v8705_v22  ;;  %v12853_v50 = vpop.permute.xlu1 %8757 }
 0x1a5   : > { %v3208_v43 = vsel %vm388_vm0, %v2686_v63, %v8704_v61  ;;  %v8715_v12 = vunpack.i.h.bf16 %v12755_v14  ;;  %v3447_v51 = vpack.c.bf16 %v12783_v42, %v12776_v54  ;;  %v8725_v62 = vunpack.i.h.bf16 %v12773_v34  ;;  %v12859_v38 = vpop.permute.xlu0 %8762  ;;  %v9630_v63 = vld [vmem:[#allocation2 + $0x148] sm:$0xff] }
 0x1a6   : > { %v8724_v5 = vunpack.i.l.bf16 %v12773_v34  ;;  %v3448_v21 = vpack.c.bf16 %v3348_v45, %v3346_v6  ;;  %v3211_v47 = vsel %vm388_vm0, %v2690_v7, %v8710_v26  ;;  %v3210_v48 = vsel %vm388_vm0, %v9627_v39, %v8709_v15  ;;  %v9631_v7 = vld [vmem:[#allocation2 + $0x150] sm:$0xff] }
 0x1a7   : > { %v8714_v32 = vunpack.i.l.bf16 %v12755_v14  ;;  %v3351_v1 = vsel %vm1292_vm5, %v3349_v58, %v3350_v29  ;;  %v3257_v3 = vsel %vm432_vm4, %v3209_v8, %v8720_v30  ;;  %v3256_v54 = vsel %vm432_vm4, %v3208_v43, %v8719_v11 }
 0x1a8   : > { %v3353_v42 = vsel %vm1292_vm5, %v3350_v29, %v3352_v10  ;;  %v3356_v34 = vsel %vm1292_vm5, %v3354_v23, %v3355_v55  ;;  %v3213_v16 = vsel %vm388_vm0, %v9628_v25, %v8715_v12  ;;  %v12870_v36 = vpop.permute.xlu1 %8767  ;;  %v3358_v24 = vsel %vm1292_vm5, %v3355_v55, %v3357_v56  ;;  %v2698_v56 = vld [vmem:[#allocation2 + $0x160] sm:$0xff] }
 0x1a9   : > { %v12874_v19 = vsel %vm1292_vm5, %v3359_v41, %v3360_v2  ;;  %v12877_v14 = vsel %vm1292_vm5, %v3360_v2, %v3362_v27  ;;  %v3258_v58 = vsel %vm432_vm4, %v3210_v48, %v8724_v5  ;;  %v12881_v0 = vsel %vm432_vm4, %v3211_v47, %v8725_v62  ;;  %v12886_v33 = vpop.permute.xlu0 %8772 }
 0x1aa   : > { %v8730_v46 = vunpack.i.h.bf16 %v12791_v57  ;;  %v8729_v35 = vunpack.i.l.bf16 %v12791_v57  ;;  %7808 = vmatmul.mubr.msk.bf16.vlgmr.msra.gmra.mrb[0].mxu0 %vm2231_vm6, %v3447_v51  ;;  %v3212_v13 = vsel %vm388_vm0, %v9629_v20, %v8714_v32  ;;  %v3365_v18 = vrot.slane %v3257_v3, 7  ;;  %v2702_v32 = vld [vmem:[#allocation2 + $0x180] sm:$0xff] }
 0x1ab   : > { %v3364_v60 = vrot.slane %v3256_v54, 7  ;;  %v8735_v59 = vunpack.i.h.bf16 %v12799_v40  ;;  %7811 = vmatprep.mubr.msk.bf16.mxu0 %vm2231_vm6, %v3448_v21  ;;  %v8734_v9 = vunpack.i.l.bf16 %v12799_v40  ;;  %v8739_v17 = vunpack.i.l.bf16 %v12813_v52  ;;  %v9633_v54 = vld [vmem:[#allocation2 + $0x168] sm:$0xff] }
 0x1ac   : > { %v3449_v6 = vpack.c.bf16 %v3353_v42, %v3351_v1  ;;  %v3367_v45 = vrot.slane %v3258_v58, 7  ;;  %v3369_v57 = vrot.slane %v12881_v0, 7  ;;  %v3450_v4 = vpack.c.bf16 %v3358_v24, %v3356_v34  ;;  %v12896_v61 = vpop.permute.xlu1 %8777  ;;  %v9632_v1 = vld [vmem:[#allocation2 + $0x170] sm:$0xff] }
 0x1ad   : > { %v3451_v22 = vpack.c.bf16 %v12877_v14, %v12874_v19  ;;  %v3261_v10 = vsel %vm432_vm4, %v3213_v16, %v8730_v46  ;;  %v3260_v29 = vsel %vm432_vm4, %v3212_v13, %v8729_v35  ;;  %v8740_v55 = vunpack.i.h.bf16 %v12813_v52  ;;  %v12902_v31 = vpop.permute.xlu0 %8782  ;;  %v9634_v16 = vld [vmem:[#allocation2 + $0x188] sm:$0xff] }
 0x1ae   : > { %v8750_v40 = vunpack.i.h.bf16 %v12833_v53  ;;  %v3215_v23 = vsel %vm388_vm0, %v9630_v63, %v8735_v59  ;;  %v8749_v26 = vunpack.i.l.bf16 %v12833_v53  ;;  %v8754_v15 = vunpack.i.l.bf16 %v12840_v37 }
 0x1af   : > { %v12908_v41 = vsel %vm1292_vm5, %v3364_v60, %v3365_v18  ;;  %v3214_v27 = vsel %vm388_vm0, %v2694_v49, %v8734_v9  ;;  %v3216_v52 = vsel %vm388_vm0, %v9631_v7, %v8739_v17  ;;  %v8745_v30 = vunpack.i.h.bf16 %v12819_v28  ;;  %v2706_v49 = vld [vmem:[#allocation2 + $0x1a0] sm:$0xff] }
 0x1b0   : > { %v8744_v11 = vunpack.i.l.bf16 %v12819_v28  ;;  %v3372_v2 = vrot.slane %v3261_v10, 7  ;;  %v3370_v44 = vrot.slane %v3260_v29, 7  ;;  %v8765_v8 = vunpack.i.h.bf16 %v12859_v38  ;;  %v12915_v43 = vpop.permute.xlu1 %8787 }
 0x1b1   : > { %v3368_v53 = vsel %vm1292_vm5, %v3365_v18, %v3367_v45  ;;  %v3217_v12 = vsel %vm388_vm0, %v2698_v56, %v8740_v55  ;;  %v3263_v51 = vsel %vm432_vm4, %v3215_v23, %v8750_v40  ;;  %v8764_v62 = vunpack.i.l.bf16 %v12859_v38  ;;  %v12923_v21 = vpop.permute.xlu0 %8792  ;;  %v9635_v18 = vld [vmem:[#allocation2 + $0x190] sm:$0xff] }
 0x1b2   : > { %7812 = vmatmul.mubr.msk.bf16.gmra.mrb[4].mxu0 %vm2231_vm6, %v3449_v6  ;;  %v8769_v5 = vunpack.i.l.bf16 %v12870_v36  ;;  %v3262_v28 = vsel %vm432_vm4, %v3214_v27, %v8749_v26  ;;  %v8755_v47 = vunpack.i.h.bf16 %v12840_v37  ;;  %v3264_v39 = vsel %vm432_vm4, %v3216_v52, %v8754_v15 }
 0x1b3   : > { %v8760_v48 = vunpack.i.h.bf16 %v12853_v50  ;;  %7815 = vmatprep.mubr.msk.bf16.mxu0 %vm2231_vm6, %v3450_v4  ;;  %v3219_v3 = vsel %vm388_vm0, %v9632_v1, %v8745_v30  ;;  %v3218_v38 = vsel %vm388_vm0, %v9633_v54, %v8744_v11  ;;  %v8759_v42 = vunpack.i.l.bf16 %v12853_v50  ;;  %v9637_v11 = vld [vmem:[#allocation2 + $0x1a8] sm:$0xff] }
 0x1b4   : > { %v8780_v34 = vunpack.i.h.bf16 %v12896_v61  ;;  %v3375_v25 = vrot.slane %v3263_v51, 7  ;;  %v3221_v37 = vsel %vm388_vm0, %v9634_v16, %v8765_v8  ;;  %v8779_v24 = vunpack.i.l.bf16 %v12896_v61  ;;  %v12937_v46 = vpop.permute.xlu1 %8797 }
 0x1b5   : > { %v8784_v58 = vunpack.i.l.bf16 %v12902_v31  ;;  %v3374_v35 = vrot.slane %v3262_v28, 7  ;;  %v3377_v20 = vrot.slane %v3264_v39, 7  ;;  %v3220_v13 = vsel %vm388_vm0, %v2702_v32, %v8764_v62  ;;  %v12941_v50 = vpop.permute.xlu0 %8802 }
 0x1b6   : > { %v3222_v60 = vsel %vm388_vm0, %v9635_v18, %v8769_v5  ;;  %v3265_v59 = vsel %vm432_vm4, %v3217_v12, %v8755_v47  ;;  %v3267_v9 = vsel %vm432_vm4, %v3219_v3, %v8760_v48  ;;  %v8770_v17 = vunpack.i.h.bf16 %v12870_v36  ;;  %v2710_v5 = vld [vmem:[#allocation2 + $0x1c0] sm:$0xff] }
 0x1b7   : > { %v3452_v6 = vpack.c.bf16 %v3368_v53, %v12908_v41  ;;  %v3266_v45 = vsel %vm432_vm4, %v3218_v38, %v8759_v42  ;;  %v3269_v4 = vsel %vm432_vm4, %v3221_v37, %v8780_v34  ;;  %v3371_v61 = vsel %vm1292_vm5, %v3369_v57, %v3370_v44  ;;  %v9639_v37 = vld [vmem:[#allocation2 + $0x1d0] sm:$0xff] }
 0x1b8   : > { %v3373_v10 = vsel %vm1292_vm5, %v3370_v44, %v3372_v2  ;;  %v8775_v29 = vunpack.i.h.bf16 %v12886_v33  ;;  %v8774_v55 = vunpack.i.l.bf16 %v12886_v33  ;;  %v3268_v40 = vsel %vm432_vm4, %v3220_v13, %v8779_v24  ;;  %v8808_v63 = vpop.permute.xlu1 %8807 }
 0x1b9   : > { %v3270_v36 = vsel %vm432_vm4, %v3222_v60, %v8784_v58  ;;  %v3379_v23 = vrot.slane %v3265_v59, 7  ;;  %v3382_v56 = vrot.slane %v3267_v9, 7  ;;  %v3376_v0 = vsel %vm1292_vm5, %v3374_v35, %v3375_v25  ;;  %v12963_v26 = vpop.permute.xlu0 %8812 }
 0x1ba   : > { %7816 = vmatmul.mubr.msk.bf16.gmra.mrb[8].mxu0 %vm2231_vm6, %v3451_v22  ;;  %v3378_v57 = vsel %vm1292_vm5, %v3375_v25, %v3377_v20  ;;  %v3380_v15 = vrot.slane %v3266_v45, 7  ;;  %v3223_v33 = vsel %vm388_vm0, %v2706_v49, %v8770_v17  ;;  %v3385_v41 = vrot.slane %v3269_v4, 7  ;;  %v9636_v22 = vld [vmem:[#allocation2 + $0x1b0] sm:$0xff]  ;;  %v2714_v20 = vld [vmem:[#allocation2 + $0x1e0] sm:$0xff] }
 0x1bb   : > { %v8785_v27 = vunpack.i.h.bf16 %v12902_v31  ;;  %7819 = vmatprep.mubr.msk.bf16.mxu0 %vm2231_vm6, %v3452_v6  ;;  %v3384_v7 = vrot.slane %v3268_v40, 7  ;;  %v3387_v52 = vrot.slane %v3270_v36, 7  ;;  %v8790_v19 = vunpack.i.h.bf16 %v12915_v43  ;;  %v9641_v40 = vld [vmem:[#allocation2 + $0x1e8] sm:$0xff] }
 0x1bc   : > { %v8789_v14 = vunpack.i.l.bf16 %v12915_v43  ;;  %v3225_v30 = vsel %vm388_vm0, %v9636_v22, %v8775_v29  ;;  %v3224_v2 = vsel %vm388_vm0, %v9637_v11, %v8774_v55  ;;  %v8795_v44 = vunpack.i.h.bf16 %v12923_v21  ;;  %v12973_v8 = vpop.permute.xlu1 %8817 }
 0x1bd   : > { %v3453_v53 = vpack.c.bf16 %v3373_v10, %v3371_v61  ;;  %v8794_v31 = vunpack.i.l.bf16 %v12923_v21  ;;  %v8799_v12 = vunpack.i.l.bf16 %v12937_v46  ;;  %v8823_v51 = vpop.permute.xlu0 %8822  ;;  %v3271_v62 = vsel %vm432_vm4, %v3223_v33, %v8785_v27  ;;  %v9638_v21 = vld [vmem:[#allocation2 + $0x1c8] sm:$0xff]  ;;  %v9640_v61 = vld [vmem:[#allocation2 + $0x1f0] sm:$0xff] }
 0x1be   : > { %v3454_v43 = vpack.c.bf16 %v3378_v57, %v3376_v0  ;;  %v3381_v28 = vsel %vm1292_vm5, %v3379_v23, %v3380_v15  ;;  %v3383_v47 = vsel %vm1292_vm5, %v3380_v15, %v3382_v56  ;;  %v3273_v39 = vsel %vm432_vm4, %v3225_v30, %v8790_v19  ;;  %v2718_v0 = vld [vmem:[#allocation2 + $0x200] sm:$0xff] }
 0x1bf   : > { %v3272_v48 = vsel %vm432_vm4, %v3224_v2, %v8789_v14  ;;  %v3386_v32 = vsel %vm1292_vm5, %v3384_v7, %v3385_v41  ;;  %v3388_v1 = vsel %vm1292_vm5, %v3385_v41, %v3387_v52  ;;  %v3227_v3 = vsel %vm388_vm0, %v9638_v21, %v8795_v44  ;;  %v9642_v7 = vld [vmem:[#allocation2 + $0x208] sm:$0xff] }
 0x1c0   : > { %v8810_v54 = vunpack.i.h.bf16 %v8808_v63  ;;  %v8809_v38 = vunpack.i.l.bf16 %v8808_v63  ;;  %v8814_v42 = vunpack.i.l.bf16 %v12963_v26  ;;  %v12986_v34 = vpop.permute.xlu1 %8827  ;;  %v3226_v25 = vsel %vm388_vm0, %v2710_v5, %v8794_v31 }
 0x1c1   : > { %v8800_v16 = vunpack.i.h.bf16 %v12937_v46  ;;  %v3228_v24 = vsel %vm388_vm0, %v9639_v37, %v8799_v12  ;;  %v8805_v58 = vunpack.i.h.bf16 %v12941_v50  ;;  %v12993_v35 = vpop.permute.xlu0 %8832  ;;  %v8804_v13 = vunpack.i.l.bf16 %v12941_v50  ;;  %v2722_v12 = vld [vmem:[#allocation2 + $0x220] sm:$0xff] }
 0x1c2   : > { %7820 = vmatmul.mubr.msk.bf16.gmra.mrb[12].mxu0 %vm2231_vm6, %v3453_v53  ;;  %v3455_v18 = vpack.c.bf16 %v3383_v47, %v3381_v28  ;;  %v3389_v60 = vrot.slane %v3271_v62, 7  ;;  %v3392_v59 = vrot.slane %v3273_v39, 7  ;;  %v3390_v9 = vrot.slane %v3272_v48, 7 }
 0x1c3   : > { %7823 = vmatprep.mubr.msk.bf16.mxu0 %vm2231_vm6, %v3454_v43  ;;  %v3456_v17 = vpack.c.bf16 %v3388_v1, %v3386_v32  ;;  %v3275_v6 = vsel %vm432_vm4, %v3227_v3, %v8810_v54  ;;  %v3274_v46 = vsel %vm432_vm4, %v3226_v25, %v8809_v38  ;;  %v3276_v45 = vsel %vm432_vm4, %v3228_v24, %v8814_v42 }
 0x1c4   : > { %v8825_v49 = vunpack.i.h.bf16 %v8823_v51  ;;  %v3229_v4 = vsel %vm388_vm0, %v2714_v20, %v8800_v16  ;;  %v3231_v10 = vsel %vm388_vm0, %v9640_v61, %v8805_v58  ;;  %v8824_v50 = vunpack.i.l.bf16 %v8823_v51  ;;  %v8838_v57 = vpop.permute.xlu1 %8837  ;;  %v9644_v58 = vld [vmem:[#allocation2 + $0x230] sm:$0xff]  ;;  %v9645_v20 = vld [vmem:[#allocation2 + $0x228] sm:$0xff] }
 0x1c5   : > { %v8829_v29 = vunpack.i.l.bf16 %v12986_v34  ;;  %v8843_v55 = vpop.permute.xlu0 %8842  ;;  %v3230_v36 = vsel %vm388_vm0, %v9641_v40, %v8804_v13  ;;  %v8815_v63 = vunpack.i.h.bf16 %v12963_v26  ;;  %v8820_v23 = vunpack.i.h.bf16 %v12973_v8  ;;  %v9643_v26 = vld [vmem:[#allocation2 + $0x210] sm:$0xff]  ;;  %v3850_v40 = vld [vmem:[#allocation3 + $0x8] sm:$0xff] }
 0x1c6   : > { %v8819_v56 = vunpack.i.l.bf16 %v12973_v8  ;;  %v3395_v15 = vrot.slane %v3275_v6, 7  ;;  %v3394_v33 = vrot.slane %v3274_v46, 7  ;;  %v3397_v41 = vrot.slane %v3276_v45, 7 }
 0x1c7   : > { %v8840_v27 = vunpack.i.h.bf16 %v8838_v57  ;;  %v3233_v52 = vsel %vm388_vm0, %v9642_v7, %v8825_v49  ;;  %v8839_v19 = vunpack.i.l.bf16 %v8838_v57  ;;  %v8844_v14 = vunpack.i.l.bf16 %v8843_v55 }
 0x1c8   : > { %v3232_v22 = vsel %vm388_vm0, %v2718_v0, %v8824_v50  ;;  %v3234_v30 = vsel %vm388_vm0, %v9643_v26, %v8829_v29  ;;  %v3391_v11 = vsel %vm1292_vm5, %v3389_v60, %v3390_v9  ;;  %v3393_v2 = vsel %vm1292_vm5, %v3390_v9, %v3392_v59  ;;  %v8848_v48 = vpop.permute.xlu1 %8847 }
 0x1c9   : > { %v3277_v44 = vsel %vm432_vm4, %v3229_v4, %v8815_v63  ;;  %v3279_v8 = vsel %vm432_vm4, %v3231_v10, %v8820_v23  ;;  %v3278_v53 = vsel %vm432_vm4, %v3230_v36, %v8819_v56  ;;  %v8830_v31 = vunpack.i.h.bf16 %v12986_v34  ;;  %v13042_v36 = vld [vmem:[#allocation3 + $0x10] sm:$0xff] }
 0x1ca   : > { %7824 = vmatmul.mubr.msk.bf16.gmra.mrb[16].mxu0 %vm2231_vm6, %v3455_v18  ;;  %v3281_v51 = vsel %vm432_vm4, %v3233_v52, %v8840_v27  ;;  %v3396_v62 = vsel %vm1292_vm5, %v3394_v33, %v3395_v15  ;;  %v3398_v5 = vsel %vm1292_vm5, %v3395_v15, %v3397_v41  ;;  %v8835_v43 = vunpack.i.h.bf16 %v12993_v35 }
 0x1cb   : > { %7827 = vmatprep.mubr.msk.bf16.mxu0 %vm2231_vm6, %v3456_v17  ;;  %v8834_v28 = vunpack.i.l.bf16 %v12993_v35  ;;  %v3280_v47 = vsel %vm432_vm4, %v3232_v22, %v8839_v19  ;;  %v3282_v39 = vsel %vm432_vm4, %v3234_v30, %v8844_v14  ;;  %v3399_v32 = vrot.slane %v3277_v44, 7 }
 0x1cc   : > { %v3402_v1 = vrot.slane %v3279_v8, 7  ;;  %v3400_v21 = vrot.slane %v3278_v53, 7  ;;  %v3457_v3 = vpack.c.bf16 %v3393_v2, %v3391_v11  ;;  %v3235_v54 = vsel %vm388_vm0, %v2722_v12, %v8830_v31 }
 0x1cd   : > { %v3405_v38 = vrot.slane %v3281_v51, 7  ;;  %v8845_v42 = vunpack.i.h.bf16 %v8843_v55  ;;  %v3458_v34 = vpack.c.bf16 %v3398_v5, %v3396_v62  ;;  %v3404_v25 = vrot.slane %v3280_v47, 7  ;;  %v13157_v5 = vld [vmem:[%s16008_s4] ss:$0 sm:$0xff] }
 0x1ce   : > { %v3407_v16 = vrot.slane %v3282_v39, 7  ;;  %v8850_v37 = vunpack.i.h.bf16 %v8848_v48  ;;  %v8849_v24 = vunpack.i.l.bf16 %v8848_v48  ;;  %v3237_v35 = vsel %vm388_vm0, %v9644_v58, %v8835_v43 }
 0x1cf   : > { %v3236_v13 = vsel %vm388_vm0, %v9645_v20, %v8834_v28  ;;  %v3283_v18 = vsel %vm432_vm4, %v3235_v54, %v8845_v42  ;;  %v3401_v60 = vsel %vm1292_vm5, %v3399_v32, %v3400_v21  ;;  %v3403_v59 = vsel %vm1292_vm5, %v3400_v21, %v3402_v1 }
 0x1d0   : > { %v3285_v9 = vsel %vm432_vm4, %v3237_v35, %v8850_v37  ;;  %v3284_v17 = vsel %vm432_vm4, %v3236_v13, %v8849_v24  ;;  %v3406_v6 = vsel %vm1292_vm5, %v3404_v25, %v3405_v38  ;;  %v3408_v46 = vsel %vm1292_vm5, %v3405_v38, %v3407_v16 }
 0x1d1   : > { %v3459_v45 = vpack.c.bf16 %v3403_v59, %v3401_v60  ;;  %v3409_v49 = vrot.slane %v3283_v18, 7  ;;  %v3412_v4 = vrot.slane %v3285_v9, 7  ;;  %v3410_v61 = vrot.slane %v3284_v17, 7 }
 0x1d2   : > { %7828 = vmatmul.mubr.msk.bf16.gmra.mrb[20].mxu0 %vm2231_vm6, %v3457_v3  ;;  %v3460_v10 = vpack.c.bf16 %v3408_v46, %v3406_v6  ;;  %v3945_v63 = vrot.slane %v3850_v40, 1  ;;  %v3946_v23 = vrot.slane %v13042_v36, 1  ;;  %v4153_v56 = vrot.slane %v3850_v40, 2 }
 0x1d3   : > { %7831 = vmatprep.mubr.msk.bf16.mxu0 %vm2231_vm6, %v3458_v34  ;;  %v3411_v50 = vsel %vm1292_vm5, %v3409_v49, %v3410_v61  ;;  %v3413_v29 = vsel %vm1292_vm5, %v3410_v61, %v3412_v4  ;;  %v4154_v0 = vrot.slane %v13042_v36, 2  ;;  %v16856_v27 = vmov 0.0  }
 0x1d4   : > { %v3461_v55 = vpack.c.bf16 %v3413_v29, %v3411_v50  ;;  %v3947_v57 = vsel %vm714_vm2, %v3945_v63, %v3946_v23  ;;  %437 = vst.msk [vmem:[#allocation3 + $0x18] sm:$0x1] %vm436_vm7, %v16856_v27  ;;  %442 = vst.msk [vmem:[#allocation3 + $0x238] sm:$0x1] %vm436_vm7, %v16856_v27 }
 0x1d5   : > { %v4155_v15 = vsel %vm923_vm3, %v4153_v56, %v4154_v0  ;;  %v8851_v33 = vpack.i.bf16 %v3947_v57, %v3945_v63  ;;  %444 = vst.msk [vmem:[#allocation3 + $0x27] sm:$0x1] %vm436_vm7, %v16856_v27  ;;  %445 = vst.msk [vmem:[#allocation3 + $0x47] sm:$0x1] %vm436_vm7, %v16856_v27 }
 0x1d6   : > { %v8856_v41 = vpack.i.bf16 %v4155_v15, %v4153_v56  ;;  %446 = vst.msk [vmem:[#allocation3 + $0x67] sm:$0x1] %vm436_vm7, %v16856_v27  ;;  %447 = vst.msk [vmem:[#allocation3 + $0x87] sm:$0x1] %vm436_vm7, %v16856_v27 }
 0x1d7   : > { %8852 = vrot.lane.b32.xlu0 %v8851_v33, %s9755_s28  ;;  %448 = vst.msk [vmem:[#allocation3 + $0xa7] sm:$0x1] %vm436_vm7, %v16856_v27  ;;  %449 = vst.msk [vmem:[#allocation3 + $0xc7] sm:$0x1] %vm436_vm7, %v16856_v27 }
 0x1d8   : > { %450 = vst.msk [vmem:[#allocation3 + $0xe7] sm:$0x1] %vm436_vm7, %v16856_v27  ;;  %451 = vst.msk [vmem:[#allocation3 + $0x107] sm:$0x1] %vm436_vm7, %v16856_v27 }
 0x1d9   : > { %452 = vst.msk [vmem:[#allocation3 + $0x127] sm:$0x1] %vm436_vm7, %v16856_v27  ;;  %453 = vst.msk [vmem:[#allocation3 + $0x147] sm:$0x1] %vm436_vm7, %v16856_v27 }
 0x1da   : > { %7832 = vmatmul.mubr.msk.bf16.gmra.mrb[24].mxu0 %vm2231_vm6, %v3459_v45  ;;  %454 = vst.msk [vmem:[#allocation3 + $0x167] sm:$0x1] %vm436_vm7, %v16856_v27  ;;  %455 = vst.msk [vmem:[#allocation3 + $0x187] sm:$0x1] %vm436_vm7, %v16856_v27 }
 0x1db   : > { %7835 = vmatprep.mubr.msk.bf16.mxu0 %vm2231_vm6, %v3460_v10  ;;  %456 = vst.msk [vmem:[#allocation3 + $0x1a7] sm:$0x1] %vm436_vm7, %v16856_v27  ;;  %457 = vst.msk [vmem:[#allocation3 + $0x1c7] sm:$0x1] %vm436_vm7, %v16856_v27  ;;  %8857 = vrot.lane.b32.xlu0 %v8856_v41, %s9756_s16  ;;  %v3852_v37 = vld [vmem:[#allocation3 + $0x18] sm:$0x1] }
 0x1dc   : > { %458 = vst.msk [vmem:[#allocation3 + $0x1e7] sm:$0x1] %vm436_vm7, %v16856_v27  ;;  %459 = vst.msk [vmem:[#allocation3 + $0x207] sm:$0x1] %vm436_vm7, %v16856_v27  ;;  %v4156_v17 = vrot.slane %v3852_v37, 2 }
 0x1dd   : > { %460 = vst.msk [vmem:[#allocation3 + $0x38] sm:$0x1] %vm436_vm7, %v16856_v27  ;;  %461 = vst.msk [vmem:[#allocation3 + $0x58] sm:$0x1] %vm436_vm7, %v16856_v27 }
 0x1de   : > { %462 = vst.msk [vmem:[#allocation3 + $0x78] sm:$0x1] %vm436_vm7, %v16856_v27  ;;  %463 = vst.msk [vmem:[#allocation3 + $0x98] sm:$0x1] %vm436_vm7, %v16856_v27  ;;  %v4157_v40 = vsel %vm923_vm3, %v4154_v0, %v4156_v17 }
 0x1df   : > { %464 = vst.msk [vmem:[#allocation3 + $0xb8] sm:$0x1] %vm436_vm7, %v16856_v27  ;;  %465 = vst.msk [vmem:[#allocation3 + $0xd8] sm:$0x1] %vm436_vm7, %v16856_v27 }
 0x1e0   : > { %466 = vst.msk [vmem:[#allocation3 + $0xf8] sm:$0x1] %vm436_vm7, %v16856_v27  ;;  %467 = vst.msk [vmem:[#allocation3 + $0x118] sm:$0x1] %vm436_vm7, %v16856_v27 }
 0x1e1   : > { %468 = vst.msk [vmem:[#allocation3 + $0x138] sm:$0x1] %vm436_vm7, %v16856_v27  ;;  %469 = vst.msk [vmem:[#allocation3 + $0x158] sm:$0x1] %vm436_vm7, %v16856_v27 }
 0x1e2   : > { %7836 = vmatmul.mubr.msk.bf16.gmra.mrb[28].mxu0 %vm2231_vm6, %v3461_v55  ;;  %470 = vst.msk [vmem:[#allocation3 + $0x178] sm:$0x1] %vm436_vm7, %v16856_v27  ;;  %471 = vst.msk [vmem:[#allocation3 + $0x198] sm:$0x1] %vm436_vm7, %v16856_v27 }
 0x1e3   : > { %472 = vst.msk [vmem:[#allocation3 + $0x1b8] sm:$0x1] %vm436_vm7, %v16856_v27  ;;  %473 = vst.msk [vmem:[#allocation3 + $0x1d8] sm:$0x1] %vm436_vm7, %v16856_v27 }
 0x1e4   : > { %474 = vst.msk [vmem:[#allocation3 + $0x1f8] sm:$0x1] %vm436_vm7, %v16856_v27  ;;  %475 = vst.msk [vmem:[#allocation3 + $0x218] sm:$0x1] %vm436_vm7, %v16856_v27 }
 0x230   : > { %v13122_v7 = vpop.f32.mrb[0].mxu1 }
 0x231   : > { %v13124_v52 = vpop.f32.mrb[1].mxu1 }
 0x232   : > { %v13126_v19 = vpop.f32.mrb[2].mxu1 }
 0x233   : > { %v13128_v14 = vpop.f32.mrb[3].mxu1 }
 0x238   : > { %v13130_v22 = vpop.f32.mrb[4].mxu1 }
 0x239   : > { %v13132_v26 = vpop.f32.mrb[5].mxu1 }
 0x23a   : > { %v13134_v30 = vpop.f32.mrb[6].mxu1 }
 0x23b   : > { %v13136_v11 = vpop.f32.mrb[7].mxu1 }
 0x242   : > { %v13138_v2 = vpop.f32.mrb[8].mxu1 }
 0x243   : > { %v13140_v44 = vpop.f32.mrb[9].mxu1 }
 0x244   : > { %v13142_v8 = vpop.f32.mrb[10].mxu1 }
 0x245   : > { %v13144_v53 = vpop.f32.mrb[11].mxu1 }
 0x24d   : > { %v13146_v31 = vpop.f32.mrb[12].mxu1 }
 0x24e   : > { %v13148_v12 = vpop.f32.mrb[13].mxu1 }
 0x24f   : > { %v13150_v51 = vpop.f32.mrb[14].mxu1 }
 0x250   : > { %v13152_v62 = vpop.f32.mrb[15].mxu1 }
 0x27d   : > { %v7809_v43 = vpop.f32.mrb[0].mxu0 }
 0x27e   : > { %vm3716_vm8 = vcmp.gt.f32.partialorder %v7809_v43, 0.0  ;;  %v3755_v28 = vmul.f32 %v7809_v43, %v13157_v5  ;;  %v3555_v47 = vpop.f32.mrb[1].mxu0 }
 0x27f   : > { %vm3714_vm9 = vcmp.gt.f32.partialorder %v3555_v47, 0.0  ;;  %v3753_v39 = vmul.f32 %v13157_v5, %v3555_v47  ;;  %v7810_v48 = vpop.f32.mrb[2].mxu0 }
 0x280   : > { %v3787_v32 = vsel %vm3716_vm8, %v7809_v43, %v3755_v28  ;;  %vm3717_vm10 = vcmp.gt.f32.partialorder %v7810_v48, 0.0  ;;  %v3756_v1 = vmul.f32 %v7810_v48, %v13157_v5  ;;  %v3558_v21 = vpop.f32.mrb[3].mxu0 }
 0x281   : > { %3819 = vst.msk [vmem:[#allocation3 + $0x48] sm:$0xff] %vm432_vm4, %v3787_v32  ;;  %v3785_v3 = vsel %vm3714_vm9, %v3555_v47, %v3753_v39  ;;  %vm3715_vm11 = vcmp.gt.f32.partialorder %v3558_v21, 0.0  ;;  %v3754_v54 = vmul.f32 %v13157_v5, %v3558_v21  ;;  %v4656_v47 = vld [vmem:[#allocation3 + $0x38] sm:$0x1] }
 0x282   : > { %3817 = vst.msk [vmem:[#allocation3 + $0x28] sm:$0xff] %vm432_vm4, %v3785_v3  ;;  %v3788_v38 = vsel %vm3717_vm10, %v7810_v48, %v3756_v1 }
 0x283   : > { %3820 = vst.msk [vmem:[#allocation3 + $0x50] sm:$0xff] %vm432_vm4, %v3788_v38  ;;  %v3786_v42 = vsel %vm3715_vm11, %v3558_v21, %v3754_v54  ;;  %v4960_v38 = vrot.slane %v4656_v47, 2 }
 0x284   : > { %3818 = vst.msk [vmem:[#allocation3 + $0x30] sm:$0xff] %vm432_vm4, %v3786_v42 }
 0x285   : > { %v7813_v34 = vpop.f32.mrb[4].mxu0 }
 0x286   : > { %vm3720_vm12 = vcmp.gt.f32.partialorder %v7813_v34, 0.0  ;;  %v3759_v25 = vmul.f32 %v7813_v34, %v13157_v5  ;;  %v3571_v16 = vpop.f32.mrb[5].mxu0 }
 0x287   : > { %vm3718_vm13 = vcmp.gt.f32.partialorder %v3571_v16, 0.0  ;;  %v3757_v24 = vmul.f32 %v13157_v5, %v3571_v16  ;;  %v7814_v58 = vpop.f32.mrb[6].mxu0 }
 0x288   : > { %v3791_v35 = vsel %vm3720_vm12, %v7813_v34, %v3759_v25  ;;  %vm3721_vm14 = vcmp.gt.f32.partialorder %v7814_v58, 0.0  ;;  %v3760_v20 = vmul.f32 %v7814_v58, %v13157_v5  ;;  %v3574_v13 = vpop.f32.mrb[7].mxu0  ;;  %v13172_v9 = vld [vmem:[#allocation3 + $0x48] sm:$0xff] }
 0x289   : > { %3823 = vst.msk [vmem:[#allocation3 + $0x88] sm:$0xff] %vm432_vm4, %v3791_v35  ;;  %v3789_v18 = vsel %vm3718_vm13, %v3571_v16, %v3757_v24  ;;  %vm3719_vm15 = vcmp.gt.f32.partialorder %v3574_v13, 0.0  ;;  %v3758_v60 = vmul.f32 %v13157_v5, %v3574_v13  ;;  %v3854_v59 = vld [vmem:[#allocation3 + $0x28] sm:$0xff]  ;;  %v4752_v50 = vrot.slane %v13172_v9, 1 }
 0x28a   : > { %3821 = vst.msk [vmem:[#allocation3 + $0x68] sm:$0xff] %vm432_vm4, %v3789_v18  ;;  %v3792_v6 = vsel %vm3721_vm14, %v7814_v58, %v3760_v20  ;;  %v13175_v46 = vrot.slane %v3854_v59, 1  ;;  %v3859_v45 = vld [vmem:[#allocation3 + $0x50] sm:$0xff]  ;;  %v4158_v29 = vrot.slane %v3854_v59, 2 }
 0x28b   : > { %3824 = vst.msk [vmem:[#allocation3 + $0x90] sm:$0xff] %vm432_vm4, %v3792_v6  ;;  %v3790_v49 = vsel %vm3719_vm15, %v3574_v13, %v3758_v60  ;;  %v4655_v4 = vld [vmem:[#allocation3 + $0x30] sm:$0xff]  ;;  %v13186_v63 = vrot.slane %v3859_v45, 1  ;;  %v13211_v25 = vrot.slane %v3859_v45, 2  ;;  %v4962_v13 = vrot.slane %v13172_v9, 2 }
 0x28c   : > { %3822 = vst.msk [vmem:[#allocation3 + $0x70] sm:$0xff] %vm432_vm4, %v3790_v49  ;;  %v8861_v61 = vpack.i.bf16 %v13175_v46, %v3946_v23  ;;  %v4750_v10 = vrot.slane %v4655_v4, 1  ;;  %v13195_v36 = vrot.slane %v4655_v4, 2  ;;  %v8866_v28 = vpack.i.bf16 %v4158_v29, %v4157_v40  ;;  %v4660_v9 = vld [vmem:[#allocation3 + $0x58] sm:$0x1] }
 0x28d   : > { %v7817_v55 = vpop.f32.mrb[8].mxu0  ;;  %v3953_v32 = vsel %vm714_vm2, %v4752_v50, %v13186_v63  ;;  %v4964_v4 = vsel %vm923_vm3, %v4962_v13, %v13211_v25  ;;  %v4965_v40 = vrot.slane %v4660_v9, 2 }
 0x28e   : > { %vm3724_vm1 = vcmp.gt.f32.partialorder %v7817_v55, 0.0  ;;  %v3763_v56 = vmul.f32 %v7817_v55, %v13157_v5  ;;  %8862 = vrot.lane.b32.xlu1 %v8861_v61, %s9755_s28  ;;  %v3587_v57 = vpop.f32.mrb[9].mxu0  ;;  %v8876_v15 = vpack.i.bf16 %v4752_v50, %v4750_v10  ;;  %v13193_v41 = vsel %vm714_vm2, %v13175_v46, %v4750_v10 }
 0x28f   : > { %vm3722_vm6 = vcmp.gt.f32.partialorder %v3587_v57, 0.0  ;;  %v3761_v23 = vmul.f32 %v13157_v5, %v3587_v57  ;;  %v7818_v33 = vpop.f32.mrb[10].mxu0  ;;  %v8896_v21 = vpack.i.bf16 %v4750_v10, %v13193_v41  ;;  %v4160_v54 = vsel %vm923_vm3, %v4158_v29, %v13195_v36 }
 0x290   : > { %v3795_v0 = vsel %vm3724_vm1, %v7817_v55, %v3763_v56  ;;  %vm3725_vm7 = vcmp.gt.f32.partialorder %v7818_v33, 0.0  ;;  %v3764_v27 = vmul.f32 %v7818_v33, %v13157_v5  ;;  %8877 = vrot.lane.b32.xlu0 %v8876_v15, %s9755_s28  ;;  %v3590_v43 = vpop.f32.mrb[11].mxu0  ;;  %v8871_v42 = vpack.i.bf16 %v3953_v32, %v4752_v50  ;;  %v3860_v56 = vld [vmem:[#allocation3 + $0x58] sm:$0x1] }
 0x291   : > { %3827 = vst.msk [vmem:[#allocation3 + $0xc8] sm:$0xff] %vm432_vm4, %v3795_v0  ;;  %v3793_v39 = vsel %vm3722_vm6, %v3587_v57, %v3761_v23  ;;  %vm3723_vm8 = vcmp.gt.f32.partialorder %v3590_v43, 0.0  ;;  %v3762_v48 = vmul.f32 %v13157_v5, %v3590_v43  ;;  %v8901_v24 = vpack.i.bf16 %v4158_v29, %v4160_v54  ;;  %v3862_v18 = vld [vmem:[#allocation3 + $0x68] sm:$0xff] }
 0x292   : > { %3825 = vst.msk [vmem:[#allocation3 + $0xa8] sm:$0xff] %vm432_vm4, %v3793_v39  ;;  %v3796_v1 = vsel %vm3725_vm7, %v7818_v33, %v3764_v27  ;;  %8867 = vrot.lane.b32.xlu1 %v8866_v28, %s9756_s16  ;;  %v4961_v20 = vsel %vm923_vm3, %v13195_v36, %v4960_v38  ;;  %v8881_v6 = vpack.i.bf16 %v13186_v63, %v3953_v32  ;;  %v13228_v50 = vrot.slane %v3862_v18, 1  ;;  %v4667_v27 = vld [vmem:[#allocation3 + $0x90] sm:$0xff] }
 0x293   : > { %3828 = vst.msk [vmem:[#allocation3 + $0xd0] sm:$0xff] %vm432_vm4, %v3796_v1  ;;  %v3794_v3 = vsel %vm3723_vm8, %v3590_v43, %v3762_v48  ;;  %v8911_v10 = vpack.i.bf16 %v4961_v20, %v4160_v54  ;;  %v8886_v55 = vpack.i.bf16 %v4964_v4, %v4962_v13  ;;  %v13237_v0 = vrot.slane %v3862_v18, 2  ;;  %v9574_v39 = vld [vmem:[%s16009_s5 + $0xc] sm:$0xff]  }
 0x294   : > { %3826 = vst.msk [vmem:[#allocation3 + $0xb0] sm:$0xff] %vm432_vm4, %v3794_v3  ;;  %8897 = vrot.lane.b32.xlu0 %v8896_v21, %s9755_s28  ;;  %v8916_v33 = vpack.i.bf16 %v13228_v50, %v13186_v63  ;;  %v4166_v47 = vrot.slane %v3860_v56, 2  ;;  %v4966_v63 = vsel %vm923_vm3, %v13211_v25, %v4965_v40  ;;  %v4666_v1 = vld [vmem:[#allocation3 + $0x88] sm:$0xff]  ;;  %v13250_v3 = vrot.slane %v4667_v27, 1  ;;  %7839 = vmatprep.subr.bf16.mxu1 %v9574_v39 }
 0x295   : > { %v7821_v34 = vpop.f32.mrb[12].mxu0  ;;  %7840 = vmatpush3.bf16.msra.mxu1 %v9574_v39  ;;  %v13269_v18 = vrot.slane %v4667_v27, 2 }
 0x296   : > { %vm3728_vm9 = vcmp.gt.f32.partialorder %v7821_v34, 0.0  ;;  %v3767_v16 = vmul.f32 %v7821_v34, %v13157_v5  ;;  %8872 = vrot.lane.b32.xlu1 %v8871_v42, %s9755_s28  ;;  %v3603_v37 = vpop.f32.mrb[13].mxu0  ;;  %v4167_v20 = vsel %vm923_vm3, %v13211_v25, %v4166_v47 }
 0x297   : > { %vm3726_vm10 = vcmp.gt.f32.partialorder %v3603_v37, 0.0  ;;  %v3765_v58 = vmul.f32 %v13157_v5, %v3603_v37  ;;  %v7822_v35 = vpop.f32.mrb[14].mxu0 }
 0x298   : > { %v3799_v60 = vsel %vm3728_vm9, %v7821_v34, %v3767_v16  ;;  %vm3729_vm11 = vcmp.gt.f32.partialorder %v7822_v35, 0.0  ;;  %v3768_v59 = vmul.f32 %v7822_v35, %v13157_v5  ;;  %8902 = vrot.lane.b32.xlu0 %v8901_v24, %s9756_s16  ;;  %v3606_v17 = vpop.f32.mrb[15].mxu0  ;;  %v13257_v16 = vrot.slane %v4666_v1, 1  ;;  %v4663_v24 = vld [vmem:[#allocation3 + $0x70] sm:$0xff] }
 0x299   : > { %3831 = vst.msk [vmem:[#allocation3 + $0x108] sm:$0xff] %vm432_vm4, %v3799_v60  ;;  %v3797_v45 = vsel %vm3726_vm10, %v3603_v37, %v3765_v58  ;;  %vm3727_vm12 = vcmp.gt.f32.partialorder %v3606_v17, 0.0  ;;  %v3766_v49 = vmul.f32 %v13157_v5, %v3606_v17  ;;  %v8906_v37 = vpack.i.bf16 %v13193_v41, %v13175_v46 }
 0x29a   : > { %3829 = vst.msk [vmem:[#allocation3 + $0xe8] sm:$0xff] %vm432_vm4, %v3797_v45  ;;  %v3800_v61 = vsel %vm3729_vm11, %v7822_v35, %v3768_v59  ;;  %8882 = vrot.lane.b32.xlu1 %v8881_v6, %s9755_s28  ;;  %v4760_v13 = vsel %vm714_vm2, %v13257_v16, %v13250_v3  ;;  %v8926_v41 = vpack.i.bf16 %v13237_v0, %v4167_v20  ;;  %v4972_v6 = vrot.slane %v4666_v1, 2 }
 0x29b   : > { %3832 = vst.msk [vmem:[#allocation3 + $0x110] sm:$0xff] %vm432_vm4, %v3800_v61  ;;  %v3798_v29 = vsel %vm3727_vm12, %v3606_v17, %v3766_v49  ;;  %v4756_v25 = vrot.slane %v4663_v24, 1  ;;  %v4968_v39 = vrot.slane %v4663_v24, 2  ;;  %v4670_v24 = vld [vmem:[#allocation3 + $0xa8] sm:$0xff] }
 0x29c   : > { %3830 = vst.msk [vmem:[#allocation3 + $0xf0] sm:$0xff] %vm432_vm4, %v3798_v29  ;;  %8912 = vrot.lane.b32.xlu0 %v8911_v10, %s9756_s16 }
 0x29d   : > { %v7825_v57 = vpop.f32.mrb[16].mxu0  ;;  %v3956_v27 = vsel %vm714_vm2, %v13228_v50, %v4756_v25  ;;  %v8936_v47 = vpack.i.bf16 %v13257_v16, %v4756_v25 }
 0x29e   : > { %v7983_v15 = vadd.f32 %v7825_v57, %v13122_v7  ;;  %8887 = vrot.lane.b32.xlu1 %v8886_v55, %s9756_s16  ;;  %v3619_v23 = vpop.f32.mrb[17].mxu0  ;;  %v4664_v57 = vld [vmem:[#allocation3 + $0x78] sm:$0x1] }
 0x29f   : > { %v7984_v43 = vadd.f32 %v3619_v23, %v13124_v52  ;;  %v7826_v28 = vpop.f32.mrb[18].mxu0 }
 0x2a0   : > { %vm3732_vm13 = vcmp.gt.f32.partialorder %v7983_v15, 0.0  ;;  %v3771_v7 = vmul.f32 %v7983_v15, %v13157_v5  ;;  %v7985_v48 = vadd.f32 %v7826_v28, %v13126_v19  ;;  %8917 = vrot.lane.b32.xlu0 %v8916_v33, %s9755_s28  ;;  %v3622_v32 = vpop.f32.mrb[19].mxu0  ;;  %v8921_v19 = vpack.i.bf16 %v13237_v0, %v4966_v63 }
 0x2a1   : > { %vm3730_vm14 = vcmp.gt.f32.partialorder %v7984_v43, 0.0  ;;  %v3769_v52 = vmul.f32 %v7984_v43, %v13157_v5  ;;  %v7986_v21 = vadd.f32 %v3622_v32, %v13128_v14  ;;  %v4970_v63 = vrot.slane %v4664_v57, 2  ;;  %v4672_v57 = vld [vmem:[#allocation3 + $0xb8] sm:$0x1] }
 0x2a2   : > { %v3803_v54 = vsel %vm3732_vm13, %v7983_v15, %v3771_v7  ;;  %vm3733_vm15 = vcmp.gt.f32.partialorder %v7985_v48, 0.0  ;;  %v3772_v38 = vmul.f32 %v7985_v48, %v13157_v5  ;;  %8892 = vrot.lane.b32.xlu1 %v8886_v55, %s9756_s16  ;;  %v3864_v15 = vld [vmem:[#allocation3 + $0x78] sm:$0x1] }
 0x2a3   : > { %3835 = vst.msk [vmem:[#allocation3 + $0x148] sm:$0xff] %vm432_vm4, %v3803_v54  ;;  %v3801_v42 = vsel %vm3730_vm14, %v7984_v43, %v3769_v52  ;;  %vm3731_vm1 = vcmp.gt.f32.partialorder %v7986_v21, 0.0  ;;  %v3770_v34 = vmul.f32 %v7986_v21, %v13157_v5  ;;  %v4668_v7 = vld [vmem:[#allocation3 + $0x98] sm:$0x1]  ;;  %v4171_v1 = vrot.slane %v3864_v15, 2 }
 0x2a4   : > { %3833 = vst.msk [vmem:[#allocation3 + $0x128] sm:$0xff] %vm432_vm4, %v3801_v42  ;;  %v3804_v14 = vsel %vm3733_vm15, %v7985_v48, %v3772_v38  ;;  %8922 = vrot.lane.b32.xlu0 %v8921_v19, %s9756_s16  ;;  %v8956_v54 = vpack.i.bf16 %v4756_v25, %v3956_v27  ;;  %v4975_v42 = vrot.slane %v4668_v7, 2 }
 0x2a5   : > { %3836 = vst.msk [vmem:[#allocation3 + $0x150] sm:$0xff] %vm432_vm4, %v3804_v14  ;;  %v3802_v58 = vsel %vm3731_vm1, %v7986_v21, %v3770_v34  ;;  %v7829_v35 = vpop.f32.mrb[20].mxu0 }
 0x2a6   : > { %3834 = vst.msk [vmem:[#allocation3 + $0x130] sm:$0xff] %vm432_vm4, %v3802_v58  ;;  %v7987_v60 = vadd.f32 %v7829_v35, %v13130_v22  ;;  %8907 = vrot.lane.b32.xlu1 %v8906_v37, %s9755_s28  ;;  %v3635_v46 = vpop.f32.mrb[21].mxu0  ;;  %v8941_v22 = vpack.i.bf16 %v13250_v3, %v4760_v13  ;;  %v4971_v37 = vsel %vm923_vm3, %v4968_v39, %v4970_v63 }
 0x2a7   : > { %v7988_v59 = vadd.f32 %v3635_v46, %v13132_v26  ;;  %v7830_v17 = vpop.f32.mrb[22].mxu0  ;;  %v4974_v26 = vsel %vm923_vm3, %v4972_v6, %v13269_v18  ;;  %v8961_v58 = vpack.i.bf16 %v3956_v27, %v13228_v50  ;;  %v4172_v35 = vsel %vm923_vm3, %v4968_v39, %v4171_v1 }
 0x2a8   : > { %vm3736_vm6 = vcmp.gt.f32.partialorder %v7987_v60, 0.0  ;;  %v3775_v45 = vmul.f32 %v7987_v60, %v13157_v5  ;;  %v7989_v49 = vadd.f32 %v7830_v17, %v13134_v30  ;;  %8927 = vrot.lane.b32.xlu0 %v8926_v41, %s9756_s16  ;;  %v3638_v4 = vpop.f32.mrb[23].mxu0  ;;  %v8931_v30 = vpack.i.bf16 %v4760_v13, %v13257_v16  ;;  %v4671_v13 = vld [vmem:[#allocation3 + $0xb0] sm:$0xff] }
 0x2a9   : > { %vm3734_vm7 = vcmp.gt.f32.partialorder %v7988_v59, 0.0  ;;  %v3773_v9 = vmul.f32 %v7988_v59, %v13157_v5  ;;  %v7990_v61 = vadd.f32 %v3638_v4, %v13136_v11  ;;  %v8946_v56 = vpack.i.bf16 %v4974_v26, %v4972_v6  ;;  %v3875_v17 = vld [vmem:[#allocation3 + $0xd0] sm:$0xff] }
 0x2aa   : > { %v3807_v10 = vsel %vm3736_vm6, %v7987_v60, %v3775_v45  ;;  %vm3737_vm8 = vcmp.gt.f32.partialorder %v7989_v49, 0.0  ;;  %v3776_v29 = vmul.f32 %v7989_v49, %v13157_v5  ;;  %8942 = vrot.lane.b32.xlu1 %v8941_v22, %s9755_s28  ;;  %v4969_v16 = vsel %vm923_vm3, %v13237_v0, %v4968_v39 }
 0x2ab   : > { %3839 = vst.msk [vmem:[#allocation3 + $0x188] sm:$0xff] %vm432_vm4, %v3807_v10  ;;  %v3805_v55 = vsel %vm3734_vm7, %v7988_v59, %v3773_v9  ;;  %vm3735_vm9 = vcmp.gt.f32.partialorder %v7990_v61, 0.0  ;;  %v3774_v40 = vmul.f32 %v7990_v61, %v13157_v5  ;;  %v8966_v41 = vpack.i.bf16 %v4971_v37, %v4969_v16  ;;  %v4674_v9 = vld [vmem:[#allocation3 + $0xc8] sm:$0xff] }
 0x2ac   : > { %3837 = vst.msk [vmem:[#allocation3 + $0x168] sm:$0xff] %vm432_vm4, %v3805_v55  ;;  %v3808_v11 = vsel %vm3737_vm8, %v7989_v49, %v3776_v29  ;;  %8932 = vrot.lane.b32.xlu0 %v8931_v30, %s9755_s28  ;;  %v13319_v59 = vrot.slane %v4670_v24, 2  ;;  %v8971_v25 = vpack.i.bf16 %v4172_v35, %v4969_v16  ;;  %v4976_v45 = vsel %vm923_vm3, %v13269_v18, %v4975_v42  ;;  %v3876_v16 = vld [vmem:[#allocation3 + $0xd8] sm:$0x1] }
 0x2ad   : > { %3840 = vst.msk [vmem:[#allocation3 + $0x190] sm:$0xff] %vm432_vm4, %v3808_v11  ;;  %v3806_v23 = vsel %vm3735_vm9, %v7990_v61, %v3774_v40  ;;  %v7833_v33 = vpop.f32.mrb[24].mxu0  ;;  %v13324_v49 = vrot.slane %v4670_v24, 1  ;;  %v4762_v61 = vrot.slane %v4671_v13, 1  ;;  %v13331_v10 = vrot.slane %v3875_v17, 1  ;;  %v13377_v37 = vld [vmem:[#allocation3 + $0x130] sm:$0xff] }
 0x2ae   : > { %3838 = vst.msk [vmem:[#allocation3 + $0x170] sm:$0xff] %vm432_vm4, %v3806_v23  ;;  %v7991_v43 = vadd.f32 %v7833_v33, %v13138_v2  ;;  %8947 = vrot.lane.b32.xlu1 %v8946_v56, %s9756_s16  ;;  %v3651_v28 = vpop.f32.mrb[25].mxu0  ;;  %v4764_v11 = vrot.slane %v4674_v9, 1  ;;  %v13349_v27 = vrot.slane %v4671_v13, 2  ;;  %v3884_v24 = vld [vmem:[#allocation3 + $0x118] sm:$0x1] }
 0x2af   : > { %v7992_v48 = vadd.f32 %v3651_v28, %v13140_v44  ;;  %v7834_v32 = vpop.f32.mrb[26].mxu0  ;;  %v3962_v33 = vsel %vm714_vm2, %v13324_v49, %v4762_v61  ;;  %v13352_v28 = vrot.slane %v3875_v17, 2  ;;  %v4186_v17 = vrot.slane %v3876_v16, 2 }
 0x2b0   : > { %vm3740_vm10 = vcmp.gt.f32.partialorder %v7991_v43, 0.0  ;;  %v3779_v52 = vmul.f32 %v7991_v43, %v13157_v5  ;;  %v7993_v21 = vadd.f32 %v7834_v32, %v13142_v8  ;;  %8937 = vrot.lane.b32.xlu0 %v8936_v47, %s9755_s28  ;;  %v3654_v2 = vpop.f32.mrb[27].mxu0  ;;  %v3965_v23 = vsel %vm714_vm2, %v4764_v11, %v13331_v10  ;;  %v3878_v32 = vld [vmem:[#allocation3 + $0xe8] sm:$0xff] }
 0x2b1   : > { %vm3738_vm11 = vcmp.gt.f32.partialorder %v7992_v48, 0.0  ;;  %v3777_v38 = vmul.f32 %v7992_v48, %v13157_v5  ;;  %v7994_v19 = vadd.f32 %v3654_v2, %v13144_v53  ;;  %v9006_v47 = vpack.i.bf16 %v4762_v61, %v3962_v33 }
 0x2b2   : > { %v3811_v34 = vsel %vm3740_vm10, %v7991_v43, %v3779_v52  ;;  %vm3741_vm12 = vcmp.gt.f32.partialorder %v7993_v21, 0.0  ;;  %v3780_v44 = vmul.f32 %v7993_v21, %v13157_v5  ;;  %8957 = vrot.lane.b32.xlu1 %v8956_v54, %s9755_s28  ;;  %v4980_v43 = vrot.slane %v4672_v57, 2  ;;  %v4683_v52 = vld [vmem:[#allocation3 + $0x110] sm:$0xff]  ;;  %v4676_v54 = vld [vmem:[#allocation3 + $0xd8] sm:$0x1] }
 0x2b3   : > { %3843 = vst.msk [vmem:[#allocation3 + $0x1c8] sm:$0xff] %vm432_vm4, %v3811_v34  ;;  %v3809_v8 = vsel %vm3738_vm11, %v7992_v48, %v3777_v38  ;;  %vm3739_vm13 = vcmp.gt.f32.partialorder %v7994_v19, 0.0  ;;  %v3778_v14 = vmul.f32 %v7994_v19, %v13157_v5  ;;  %v13358_v39 = vsel %vm923_vm3, %v13319_v59, %v13349_v27  ;;  %v13370_v38 = vld [vmem:[#allocation3 + $0x108] sm:$0xff] }
 0x2b4   : > { %3841 = vst.msk [vmem:[#allocation3 + $0x1a8] sm:$0xff] %vm432_vm4, %v3809_v8  ;;  %v3812_v53 = vsel %vm3741_vm12, %v7993_v21, %v3780_v44  ;;  %8952 = vrot.lane.b32.xlu0 %v8946_v56, %s9756_s16  ;;  %v8976_v56 = vpack.i.bf16 %v13324_v49, %v13250_v3  ;;  %v8986_v3 = vpack.i.bf16 %v3965_v23, %v4764_v11  ;;  %v4982_v48 = vrot.slane %v4674_v9, 2  ;;  %v3872_v44 = vld [vmem:[#allocation3 + $0xb8] sm:$0x1] }
 0x2b5   : > { %3844 = vst.msk [vmem:[#allocation3 + $0x1d0] sm:$0xff] %vm432_vm4, %v3812_v53  ;;  %v3810_v0 = vsel %vm3739_vm13, %v7994_v19, %v3778_v14  ;;  %v7837_v20 = vpop.f32.mrb[28].mxu0  ;;  %v4981_v7 = vsel %vm923_vm3, %v13349_v27, %v4980_v43  ;;  %v8996_v63 = vpack.i.bf16 %v13331_v10, %v3965_v23  ;;  %v13368_v2 = vrot.slane %v3878_v32, 1  ;;  %v3868_v19 = vld [vmem:[#allocation3 + $0x98] sm:$0x1]  ;;  %v4679_v14 = vld [vmem:[#allocation3 + $0xf0] sm:$0xff] }
 0x2b6   : > { %3842 = vst.msk [vmem:[#allocation3 + $0x1b0] sm:$0xff] %vm432_vm4, %v3810_v0  ;;  %v7995_v60 = vadd.f32 %v7837_v20, %v13146_v31  ;;  %8962 = vrot.lane.b32.xlu1 %v8961_v58, %s9755_s28  ;;  %v3667_v46 = vpop.f32.mrb[29].mxu0  ;;  %v4984_v1 = vsel %vm923_vm3, %v4982_v48, %v13352_v28  ;;  %v9016_v21 = vpack.i.bf16 %v4981_v7, %v13358_v39  ;;  %v13375_v34 = vrot.slane %v4683_v52, 1  ;;  %v9575_v0 = vld [vmem:[%s16009_s5 + $0x14] ss:$0 sps:$4 sm:$0xff]  }
 0x2b7   : > { %v7996_v50 = vadd.f32 %v3667_v46, %v13148_v12  ;;  %v7838_v6 = vpop.f32.mrb[30].mxu0  ;;  %v13373_v42 = vpack.i.bf16 %v4984_v1, %v4982_v48  ;;  %v4985_v8 = vrot.slane %v4676_v54, 2  ;;  %v9021_v53 = vpack.i.bf16 %v13368_v2, %v13331_v10  ;;  %v3880_v20 = vld [vmem:[#allocation3 + $0xf8] sm:$0x1]  ;;  %v4695_v7 = vld [vmem:[#allocation3 + $0x170] sm:$0xff] }
 0x2b8   : > { %vm3744_vm14 = vcmp.gt.f32.partialorder %v7995_v60, 0.0  ;;  %v3783_v4 = vmul.f32 %v7995_v60, %v13157_v5  ;;  %v7997_v31 = vadd.f32 %v7838_v6, %v13150_v51  ;;  %8967 = vrot.lane.b32.xlu0 %v8966_v41, %s9756_s16  ;;  %v3670_v22 = vpop.f32.mrb[31].mxu0  ;;  %v8981_v51 = vpack.i.bf16 %v13319_v59, %v4976_v45 }
 0x2b9   : > { %vm3742_vm15 = vcmp.gt.f32.partialorder %v7996_v50, 0.0  ;;  %v3781_v12 = vmul.f32 %v7996_v50, %v13157_v5  ;;  %v7998_v26 = vadd.f32 %v3670_v22, %v13152_v62  ;;  %16857 = vst [vmem:[#allocation58_spill] sm:$0xff] %v13373_v42  ;;  %v13383_v58 = vrot.slane %v3878_v32, 2  ;;  %v3891_v22 = vld [vmem:[#allocation3 + $0x150] sm:$0xff] }
 0x2ba   : > { %v3815_v29 = vsel %vm3744_vm14, %v7995_v60, %v3783_v4  ;;  %vm3745_vm1 = vcmp.gt.f32.partialorder %v7997_v31, 0.0  ;;  %v3784_v30 = vmul.f32 %v7997_v31, %v13157_v5  ;;  %8972 = vrot.lane.b32.xlu1 %v8971_v25, %s9756_s16  ;;  %v13386_v35 = vrot.slane %v13370_v38, 1  ;;  %v13392_v60 = vld [vmem:[#allocation3 + $0x128] sm:$0xff] }
 0x2bb   : > { %3847 = vst.msk [vmem:[#allocation3 + $0x208] sm:$0xff] %vm432_vm4, %v3815_v29  ;;  %v3813_v55 = vsel %vm3742_vm15, %v7996_v50, %v3781_v12  ;;  %vm3743_vm6 = vcmp.gt.f32.partialorder %v7998_v26, 0.0  ;;  %v3782_v40 = vmul.f32 %v7998_v26, %v13157_v5  ;;  %v8991_v5 = vpack.i.bf16 %v4764_v11, %v4762_v61  ;;  %16858 = vst [vmem:[#allocation28_spill] sm:$0xff] %v13383_v58  ;;  %v3892_v50 = vld [vmem:[#allocation3 + $0x158] sm:$0x1]  ;;  %v13411_v29 = vld [vmem:[#allocation3 + $0x168] sm:$0xff] }
 0x2bc   : > { %3845 = vst.msk [vmem:[#allocation3 + $0x1e8] sm:$0xff] %vm432_vm4, %v3813_v55  ;;  %v3816_v62 = vsel %vm3745_vm1, %v7997_v31, %v3784_v30  ;;  %8982 = vrot.lane.b32.xlu0 %v8981_v51, %s9756_s16  ;;  %v9011_v13 = vpack.i.bf16 %v3962_v33, %v13324_v49  ;;  %v4181_v46 = vrot.slane %v3872_v44, 2  ;;  %v4176_v41 = vrot.slane %v3868_v19, 2  ;;  %v3888_v31 = vld [vmem:[#allocation3 + $0x138] sm:$0x1] }
 0x2bd   : > { %3848 = vst.msk [vmem:[#allocation3 + $0x210] sm:$0xff] %vm432_vm4, %v3816_v62  ;;  %v3814_v15 = vsel %vm3743_vm6, %v7998_v26, %v3782_v40  ;;  %v4772_v6 = vsel %vm714_vm2, %v13386_v35, %v13375_v34  ;;  %v13398_v25 = vrot.slane %v4683_v52, 2  ;;  %v4988_v45 = vrot.slane %v4679_v14, 2  ;;  %v13597_v44 = vld [vmem:[#allocation3 + $0x198] sm:$0x1] }
 0x2be   : > { %3846 = vst.msk [vmem:[#allocation3 + $0x1f0] sm:$0xff] %vm432_vm4, %v3814_v15  ;;  %8977 = vrot.lane.b32.xlu1 %v8976_v56, %s9755_s28  ;;  %v13401_v4 = vrot.slane %v13377_v37, 2  ;;  %v4986_v49 = vsel %vm923_vm3, %v13352_v28, %v4985_v8  ;;  %vm5515_vm7 = vcmask 1043456   ;;  %v4191_v9 = vrot.slane %v3880_v20, 2  ;;  %v4680_v56 = vld [vmem:[#allocation3 + $0xf8] sm:$0x1] }
 0x2bf   : > { %v4196_v61 = vrot.slane %v3884_v24, 2  ;;  %v9026_v12 = vpack.i.bf16 %v13383_v58, %v4986_v49  ;;  %v4992_v26 = vrot.slane %v13370_v38, 2  ;;  %v13409_v10 = vrot.slane %v13392_v60, 2  ;;  %8115 = vmatprep.subr.msk.bf16.mxu1 %vm5515_vm7, %v9575_v0  ;;  %v4684_v8 = vld [vmem:[#allocation3 + $0x118] sm:$0x1] }
 0x2c0   : > { %8992 = vrot.lane.b32.xlu0 %v8991_v5, %s9755_s28  ;;  %v5517_v30 = vsel %vm5515_vm7, %v9575_v0, 0  ;;  %v9041_v51 = vpack.i.bf16 %v13375_v34, %v4772_v6  ;;  %v4768_v55 = vrot.slane %v4679_v14, 1  ;;  %v4201_v40 = vrot.slane %v3888_v31, 2  ;;  %v3912_v49 = vld [vmem:[#allocation3 + $0x1f8] sm:$0x1] }
 0x2c1   : > { %16859 = vst [vmem:[#allocation54_spill] sm:$0xff] %v13409_v10  ;;  %7842 = vmatpush3.bf16.msra.mxu1 %v5517_v30  ;;  %v4206_v11 = vrot.slane %v3892_v50, 2  ;;  %v4994_v62 = vsel %vm923_vm3, %v4992_v26, %v13398_v25  ;;  %v13421_v57 = vsel %vm923_vm3, %v13383_v58, %v4988_v45  ;;  %v13426_v15 = vsel %vm923_vm3, %v13409_v10, %v13401_v4  ;;  %v13616_v19 = vld [vmem:[#allocation3 + $0x1d8] sm:$0x1] }
 0x2c2   : > { %8987 = vrot.lane.b32.xlu1 %v8986_v3, %s9755_s28  ;;  %16860 = vst [vmem:[#allocation57_spill] sm:$0xff] %v13421_v57  ;;  %16861 = vst [vmem:[#allocation66_spill] sm:$0xff] %v13426_v15  ;;  %v13428_v23 = vrot.slane %v3891_v22, 2  ;;  %v13431_v5 = vrot.slane %v13411_v29, 2  ;;  %v13435_v33 = vsel %vm923_vm3, %v13349_v27, %v4181_v46  ;;  %v13439_v43 = vsel %vm923_vm3, %v13269_v18, %v4176_v41  ;;  %v4690_v46 = vld [vmem:[#allocation3 + $0x148] sm:$0xff] }
 0x2c3   : > { %v13442_v3 = vsel %vm923_vm3, %v4988_v45, %v4191_v9  ;;  %v13452_v27 = vsel %vm923_vm3, %v13352_v28, %v4186_v17  ;;  %v4990_v32 = vrot.slane %v4680_v56, 2  ;;  %v13460_v1 = vsel %vm923_vm3, %v13401_v4, %v4201_v40  ;;  %v13533_v56 = vld [vmem:[#allocation3 + $0x38] sm:$0x1] }
 0x2c4   : > { %9007 = vrot.lane.b32.xlu0 %v9006_v47, %s9755_s28  ;;  %16862 = vst [vmem:[#allocation68_spill] sm:$0xff] %v13431_v5  ;;  %16863 = vst [vmem:[#allocation32_spill] sm:$0xff] %v13442_v3  ;;  %v9031_v47 = vpack.i.bf16 %v4772_v6, %v13386_v35  ;;  %v13463_v52 = vpack.i.bf16 %v4994_v62, %v4992_v26  ;;  %v13469_v28 = vsel %vm923_vm3, %v13398_v25, %v4196_v61  ;;  %v13595_v40 = vld [vmem:[#allocation3 + $0x178] sm:$0x1]  ;;  %vm4425_vm8 = vcmask 130048  }
 0x2c5   : > { %16864 = vst [vmem:[#allocation33_spill] sm:$0xff] %v13452_v27  ;;  %16865 = vst [vmem:[#allocation38_spill] sm:$0xff] %v13460_v1  ;;  %v13473_v54 = vsel %vm923_vm3, %v13428_v23, %v4206_v11  ;;  %v3968_v38 = vsel %vm714_vm2, %v13368_v2, %v4768_v55  ;;  %v9036_v16 = vpack.i.bf16 %v13386_v35, %v4768_v55  ;;  %v13493_v35 = vld [vmem:[#allocation3 + $0x1f0] sm:$0xff]  ;;  %v13497_v17 = vrot.slane %v3891_v22, 1 }
 0x2c6   : > { %8997 = vrot.lane.b32.xlu1 %v8996_v63, %s9755_s28  ;;  %16866 = vst [vmem:[#allocation31_spill] sm:$0xff] %v13463_v52  ;;  %16867 = vst [vmem:[#allocation30_spill] sm:$0xff] %v13469_v28  ;;  %v4991_v14 = vsel %vm923_vm3, %v4988_v45, %v4990_v32  ;;  %v9051_v24 = vpack.i.bf16 %v4768_v55, %v3968_v38  ;;  %v9056_v20 = vpack.i.bf16 %v3968_v38, %v13368_v2  ;;  %v13502_v45 = vld [vmem:[#allocation3 + $0x1e8] sm:$0xff]  ;;  %v4692_v38 = vld [vmem:[#allocation3 + $0x158] sm:$0x1]  ;;  %vm5466_vm9 = vcmask 195584  }
 0x2c7   : > { %16868 = vst [vmem:[#allocation42_spill] sm:$0xff] %v13473_v54  ;;  %v9061_v0 = vpack.i.bf16 %v4991_v14, %v13421_v57  ;;  %v4774_v6 = vrot.slane %v13377_v37, 1  ;;  %v4776_v2 = vrot.slane %v4690_v46, 1  ;;  %v13513_v9 = vrot.slane %v13502_v45, 2  ;;  %v4702_v54 = vld [vmem:[#allocation3 + $0x1a8] sm:$0xff]  ;;  %v4703_v28 = vld [vmem:[#allocation3 + $0x1b0] sm:$0xff] }
 0x2c8   : > { %9017 = vrot.lane.b32.xlu0 %v9016_v21, %s9756_s16  ;;  %v5002_v62 = vrot.slane %v4690_v46, 2  ;;  %v13553_v46 = vld [vmem:[#allocation3 + $0x58] sm:$0x1]  ;;  %vm7102_vm10 = vcmask 1041408  }
 0x2c9   : > { %v3977_v22 = vsel %vm714_vm2, %v4776_v2, %v13497_v17  ;;  %v9081_v37 = vpack.i.bf16 %v4776_v2, %v4774_v6  ;;  %v13624_v21 = vld [vmem:[#allocation3 + $0x158] sm:$0x1] }
 0x2ca   : > { %9002 = vrot.lane.b32.xlu1 %v13373_v42, %s9756_s16  ;;  %v9076_v30 = vpack.i.bf16 %v3977_v22, %v4776_v2  ;;  %v5004_v32 = vsel %vm923_vm3, %v5002_v62, %v13428_v23  ;;  %16871 = vst [vmem:[#allocation36_spill] sm:$0xff] %v13624_v21  ;;  %v13637_v2 = vld [vmem:[#allocation3 + $0x1f8] sm:$0x1] }
 0x2cb   : > { %v5030_v1 = vrot.slane %v13637_v2, 2 }
 0x2cc   : > { %9022 = vrot.lane.b32.xlu0 %v9021_v53, %s9755_s28  ;;  %v4995_v53 = vrot.slane %v4684_v8, 2  ;;  %v13541_v8 = vld [vmem:[#allocation3 + $0x198] sm:$0x1] }
 0x2ce   : > { %9012 = vrot.lane.b32.xlu1 %v9011_v13, %s9755_s28  ;;  %v13491_v13 = vrot.slane %v13392_v60, 1  ;;  %v4996_v41 = vsel %vm923_vm3, %v13398_v25, %v4995_v53  ;;  %v13505_v60 = vrot.slane %v13493_v35, 2  ;;  %v4688_v25 = vld [vmem:[#allocation3 + $0x138] sm:$0x1] }
 0x2cf   : > { %v9071_v50 = vpack.i.bf16 %v13409_v10, %v4996_v41  ;;  %v13556_v41 = vpack.i.bf16 %v5004_v32, %v5002_v62  ;;  %v13582_v62 = vld [vmem:[#allocation3 + $0xb8] sm:$0x1] }
 0x2d0   : > { %9027 = vrot.lane.b32.xlu0 %v9026_v12, %s9756_s16  ;;  %v9066_v31 = vpack.i.bf16 %v13491_v13, %v13375_v34  ;;  %v3974_v61 = vsel %vm714_vm2, %v13491_v13, %v4774_v6  ;;  %v5000_v12 = vrot.slane %v4688_v25, 2  ;;  %v13521_v26 = vsel %vm923_vm3, %v13513_v9, %v13505_v60  ;;  %v13620_v53 = vld [vmem:[#allocation3 + $0x1b8] sm:$0x1] }
 0x2d1   : > { %v4231_v34 = vrot.slane %v3912_v49, 2  ;;  %v9096_v55 = vpack.i.bf16 %v4774_v6, %v3974_v61  ;;  %16870 = vst [vmem:[#allocation50_spill] sm:$0xff] %v13556_v41  ;;  %v13558_v6 = vld [vmem:[#allocation3 + $0x188] sm:$0xff]  ;;  %v13566_v49 = vld [vmem:[#allocation3 + $0x78] sm:$0x1] }
 0x2d2   : > { %9042 = vrot.lane.b32.xlu1 %v9041_v51, %s9755_s28  ;;  %v5001_v11 = vsel %vm923_vm3, %v13401_v4, %v5000_v12  ;;  %v13546_v4 = vrot.slane %v13411_v29, 1  ;;  %v13622_v32 = vld [vmem:[#allocation3 + $0x138] sm:$0x1]  ;;  %v13635_v29 = vrot.slane %v4695_v7, 2 }
 0x2d3   : > { %v13526_v51 = vsel %vm923_vm3, %v13505_v60, %v4231_v34  ;;  %v9106_v14 = vpack.i.bf16 %v5001_v11, %v13426_v15  ;;  %v8853_v34 = vpop.permute.xlu0 %8852  ;;  %v3849_v11 = vld [vmem:[#allocation3] sm:$0xff] }
 0x2d4   : > { %9032 = vrot.lane.b32.xlu0 %v9031_v47, %s9755_s28  ;;  %16869 = vst [vmem:[#allocation40_spill] sm:$0xff] %v13526_v51  ;;  %v9086_v47 = vpack.i.bf16 %v13497_v17, %v3977_v22  ;;  %v13568_v22 = vld [vmem:[#allocation3 + $0xd8] sm:$0x1]  ;;  %v9111_v12 = vpack.i.bf16 %v13546_v4, %v13497_v17  ;;  %v9101_v17 = vpack.i.bf16 %v3974_v61, %v13491_v13  ;;  %v8854_v61 = vunpack.i.l.bf16 %v8853_v34 }
 0x2d5   : > { %v13648_v51 = vld [vmem:[#allocation3 + $0x178] sm:$0x1] }
 0x2d6   : > { %9047 = vrot.lane.b32.xlu1 %v13463_v52, %s9756_s16  ;;  %16874 = vst [vmem:[#allocation34_spill] sm:$0xff] %v13648_v51  ;;  %v13752_v52 = vld [vmem:[#allocation3 + $0x50] sm:$0xff] }
 0x2d8   : > { %9037 = vrot.lane.b32.xlu0 %v9036_v16, %s9755_s28  ;;  %v13539_v16 = vld [vmem:[#allocation3 + $0x178] sm:$0x1] }
 0x2da   : > { %9052 = vrot.lane.b32.xlu1 %v9051_v24, %s9755_s28  ;;  %v4699_v24 = vld [vmem:[#allocation3 + $0x190] sm:$0xff] }
 0x2db   : > { %v13564_v25 = vrot.slane %v4699_v24, 1  ;;  %v13606_v48 = vrot.slane %v4699_v24, 2 }
 0x2dc   : > { %9062 = vrot.lane.b32.xlu0 %v9061_v0, %s9756_s16  ;;  %v13549_v0 = vld [vmem:[#allocation3 + $0x1b8] sm:$0x1] }
 0x2de   : > { %9057 = vrot.lane.b32.xlu1 %v9056_v20, %s9755_s28  ;;  %v13551_v20 = vld [vmem:[#allocation3 + $0x1d8] sm:$0x1] }
 0x2e0   : > { %9072 = vrot.lane.b32.xlu0 %v9071_v50, %s9756_s16  ;;  %v5005_v50 = vrot.slane %v4692_v38, 2  ;;  %v13589_v38 = vld [vmem:[#allocation3 + $0xf8] sm:$0x1] }
 0x2e2   : > { %9067 = vrot.lane.b32.xlu1 %v9066_v31, %s9755_s28  ;;  %v13562_v31 = vld [vmem:[#allocation3 + $0x98] sm:$0x1]  ;;  %v5006_v63 = vsel %vm923_vm3, %v13428_v23, %v5005_v50  ;;  %v5012_v23 = vrot.slane %v13558_v6, 2  ;;  %v4780_v50 = vrot.slane %v4695_v7, 1 }
 0x2e3   : > { %v9116_v13 = vpack.i.bf16 %v13431_v5, %v5006_v63  ;;  %v8855_v63 = vunpack.i.h.bf16 %v8853_v34 }
 0x2e4   : > { %9082 = vrot.lane.b32.xlu0 %v9081_v37, %s9755_s28  ;;  %v13573_v37 = vld [vmem:[%s16009_s5] sm:$0xff]  }
 0x2e5   : > { %7875 = vmatprep.subr.bf16.mxu1 %v13573_v37 }
 0x2e6   : > { %9077 = vrot.lane.b32.xlu1 %v9076_v30, %s9755_s28  ;;  %v13630_v30 = vld [vmem:[#allocation3 + $0x198] sm:$0x1] }
 0x2e7   : > { %16872 = vst [vmem:[#allocation12_spill] sm:$0xff] %v13630_v30 }
 0x2e8   : > { %9097 = vrot.lane.b32.xlu0 %v9096_v55, %s9755_s28  ;;  %v13628_v55 = vld [vmem:[#allocation3 + $0x218] sm:$0x1] }
 0x2ea   : > { %9087 = vrot.lane.b32.xlu1 %v9086_v47, %s9755_s28  ;;  %v13585_v47 = vrot.slane %v13558_v6, 1  ;;  %v5014_v6 = vsel %vm923_vm3, %v5012_v23, %v13606_v48 }
 0x2eb   : > { %v13645_v7 = vpack.i.bf16 %v5014_v6, %v5012_v23  ;;  %v16877_v23 = vrot.slane %v13539_v16, 2  ;;  %v13671_v6 = vrot.slane %v4703_v28, 1 }
 0x2ec   : > { %9107 = vrot.lane.b32.xlu0 %v9106_v14, %s9756_s16  ;;  %v13591_v14 = vld [vmem:[#allocation3 + $0x118] sm:$0x1]  ;;  %v4784_v18 = vsel %vm714_vm2, %v13585_v47, %v13564_v25  ;;  %v9126_v10 = vpack.i.bf16 %v13585_v47, %v4780_v50 }
 0x2ed   : > { %v9121_v34 = vpack.i.bf16 %v4784_v18, %v13585_v47  ;;  %16873 = vst [vmem:[#allocation53_spill] sm:$0xff] %v13645_v7  ;;  %v5011_v47 = vsel %vm923_vm3, %v13635_v29, %v16877_v23  ;;  %v13681_v23 = vrot.slane %v4702_v54, 1 }
 0x2ee   : > { %9092 = vrot.lane.b32.xlu1 %v13556_v41, %s9756_s16 }
 0x2f0   : > { %9112 = vrot.lane.b32.xlu0 %v9111_v12, %s9755_s28  ;;  %v8858_v12 = vpop.permute.xlu0 %8857 }
 0x2f1   : > { %v8859_v24 = vunpack.i.l.bf16 %v8858_v12  ;;  %v8860_v41 = vunpack.i.h.bf16 %v8858_v12  ;;  %v4715_v12 = vld [vmem:[#allocation3 + $0x210] sm:$0xff] }
 0x2f2   : > { %9102 = vrot.lane.b32.xlu1 %v9101_v17, %s9755_s28  ;;  %v9131_v17 = vpack.i.bf16 %v13564_v25, %v4784_v18  ;;  %v9646_v18 = vld [vmem:[#allocation3 + $0x8] sm:$0xff] }
 0x2f4   : > { %9117 = vrot.lane.b32.xlu0 %v9116_v13, %s9756_s16  ;;  %v4377_v13 = vsel %vm432_vm4, %v3849_v11, %v8854_v61  ;;  %v4378_v11 = vsel %vm432_vm4, %v9646_v18, %v8855_v63  ;;  %v3907_v61 = vld [vmem:[#allocation3 + $0x1d0] sm:$0xff]  ;;  %v4706_v63 = vld [vmem:[#allocation3 + $0x1c8] sm:$0xff]  ;;  %v5018_v18 = vrot.slane %v4703_v28, 2 }
 0x2f5   : > { %v13653_v15 = vsel %vm4425_vm8, %v4377_v13, %v8859_v24  ;;  %v13669_v24 = vrot.slane %v4702_v54, 2  ;;  %v13674_v2 = vsel %vm4425_vm8, %v4378_v11, %v8860_v41  ;;  %v13676_v13 = vrot.slane %v3907_v61, 1 }
 0x2f6   : > { %9132 = vrot.lane.b32.xlu1 %v9131_v17, %s9755_s28  ;;  %v5035_v17 = vrot.slane %v13628_v55, 2  ;;  %16875 = vst [vmem:[#allocation5_spill] sm:$0xff] %v13653_v15  ;;  %v13663_v55 = vsel %vm923_vm3, %v13431_v5, %v13635_v29  ;;  %16879 = vst [vmem:[#allocation69_spill] sm:$0xff] %v13674_v2  ;;  %v13683_v5 = vrot.slane %v3907_v61, 2  ;;  %v16880_v11 = vrot.slane %v13541_v8, 2 }
 0x2f7   : > { %16876 = vst [vmem:[#allocation75_spill] sm:$0xff] %v13663_v55  ;;  %16878 = vst [vmem:[#allocation77_spill] sm:$0xff] %v13669_v24  ;;  %v9151_v57 = vpack.i.bf16 %v5011_v47, %v13663_v55  ;;  %v13691_v2 = vrot.slane %v4706_v63, 1  ;;  %v13698_v54 = vsel %vm714_vm2, %v13681_v23, %v13671_v6  ;;  %v4795_v61 = vrot.slane %v4715_v12, 1  ;;  %v5915_v55 = vld [vmem:[#allocation3 + $0xa8] sm:$0xff] }
 0x2f8   : > { %9122 = vrot.lane.b32.xlu0 %v9121_v34, %s9755_s28  ;;  %v3980_v34 = vsel %vm714_vm2, %v13546_v4, %v4780_v50  ;;  %v5016_v28 = vsel %vm923_vm3, %v13606_v48, %v16880_v11  ;;  %v5033_v47 = vrot.slane %v4715_v12, 2  ;;  %v13723_v15 = vrot.slane %v13493_v35, 1 }
 0x2f9   : > { %v9141_v30 = vpack.i.bf16 %v4780_v50, %v3980_v34  ;;  %v9146_v41 = vpack.i.bf16 %v3980_v34, %v13546_v4  ;;  %v5022_v50 = vrot.slane %v4706_v63, 2  ;;  %v13703_v8 = vsel %vm714_vm2, %v13691_v2, %v13676_v13 }
 0x2fa   : > { %9137 = vrot.lane.b32.xlu1 %v13645_v7, %s9756_s16  ;;  %v4714_v7 = vld [vmem:[#allocation3 + $0x208] sm:$0xff]  ;;  %v13707_v4 = vsel %vm923_vm3, %v13669_v24, %v5018_v18  ;;  %v9171_v12 = vpack.i.bf16 %v13691_v2, %v13671_v6  ;;  %v6221_v58 = vrot.slane %v5915_v55, 2 }
 0x2fb   : > { %v5024_v63 = vsel %vm923_vm3, %v5022_v50, %v13683_v5  ;;  %v4794_v16 = vrot.slane %v4714_v7, 1 }
 0x2fc   : > { %9127 = vrot.lane.b32.xlu0 %v9126_v10, %s9755_s28  ;;  %v9161_v10 = vpack.i.bf16 %v13669_v24, %v5016_v28  ;;  %v13720_v28 = vrot.slane %v13502_v45, 1  ;;  %v9166_v45 = vpack.i.bf16 %v13703_v8, %v13691_v2  ;;  %v13741_v3 = vpack.i.bf16 %v5024_v63, %v5022_v50 }
 0x2fd   : > { %v4796_v51 = vsel %vm714_vm2, %v4794_v16, %v4795_v61  ;;  %v13760_v63 = vsel %vm923_vm3, %v5033_v47, %v5035_v17 }
 0x2fe   : > { %9142 = vrot.lane.b32.xlu1 %v9141_v30, %s9755_s28  ;;  %v16881_v30 = vrot.slane %v13549_v0, 2  ;;  %v9156_v0 = vpack.i.bf16 %v13681_v23, %v13564_v25  ;;  %v13773_v25 = vpack.i.bf16 %v4795_v61, %v4796_v51  ;;  %v13791_v51 = vpack.i.bf16 %v4794_v16, %v13723_v15 }
 0x2ff   : > { %v16892_v16 = vrot.slane %v13597_v44, 2 }
 0x300   : > { %v13712_v34 = vsel %vm923_vm3, %v5018_v18, %v16881_v30  ;;  %v13714_v11 = vpop.permute.xlu1 %8862  ;;  %9152 = vrot.lane.b32.xlu0 %v9151_v57, %s9756_s16  ;;  %v9186_v30 = vpack.i.bf16 %v13671_v6, %v13698_v54  ;;  %v5032_v57 = vrot.slane %v4714_v7, 2  ;;  %v16883_v6 = vrot.slane %v13551_v20, 2  ;;  %v5911_v7 = vld [vmem:[#allocation3 + $0x88] sm:$0xff] }
 0x301   : > { %16882 = vst [vmem:[#allocation72_spill] sm:$0xff] %v13714_v11  ;;  %v13765_v20 = vsel %vm714_vm2, %v13720_v28, %v13723_v15 }
 0x302   : > { %v13731_v11 = vpop.permute.xlu0 %8877  ;;  %9147 = vrot.lane.b32.xlu1 %v9146_v41, %s9755_s28  ;;  %v13749_v41 = vsel %vm923_vm3, %v13683_v5, %v16883_v6  ;;  %v5034_v2 = vsel %vm923_vm3, %v5032_v57, %v5033_v47  ;;  %v13769_v6 = vsel %vm923_vm3, %v13505_v60, %v5030_v1  ;;  %v16886_v47 = vrot.slane %v13595_v40, 2  ;;  %v5908_v1 = vld [vmem:[#allocation3 + $0x70] sm:$0xff] }
 0x303   : > { %v5999_v40 = vrot.slane %v13752_v52, 1 }
 0x304   : > { %v13754_v35 = vpop.permute.xlu1 %8867  ;;  %9162 = vrot.lane.b32.xlu0 %v9161_v10, %s9756_s16  ;;  %v16885_v10 = vrot.slane %v13533_v56, 2  ;;  %v13785_v50 = vsel %vm923_vm3, %v13635_v29, %v16886_v47  ;;  %v13793_v56 = vpack.i.bf16 %v5034_v2, %v5032_v57  ;;  %v5907_v29 = vld [vmem:[#allocation3 + $0x68] sm:$0xff]  ;;  %v5912_v57 = vld [vmem:[#allocation3 + $0x90] sm:$0xff] }
 0x305   : > { %16884 = vst [vmem:[#allocation48_spill] sm:$0xff] %v13754_v35  ;;  %16887 = vst [vmem:[#allocation73_spill] sm:$0xff] %v13785_v50  ;;  %v5903_v35 = vld [vmem:[#allocation3 + $0x48] sm:$0xff]  ;;  %v6004_v50 = vrot.slane %v5911_v7, 1 }
 0x306   : > { %v13779_v17 = vsel %vm923_vm3, %v13195_v36, %v16885_v10  ;;  %v13787_v60 = vpop.permute.xlu0 %8897  ;;  %9157 = vrot.lane.b32.xlu1 %v9156_v0, %s9755_s28  ;;  %v16889_v36 = vrot.slane %v13620_v53, 2  ;;  %v5998_v2 = vrot.slane %v5903_v35, 1  ;;  %v6207_v10 = vrot.slane %v13752_v52, 2 }
 0x307   : > { %16888 = vst [vmem:[#allocation59_spill] sm:$0xff] %v13787_v60  ;;  %v13821_v0 = vsel %vm923_vm3, %v13606_v48, %v16892_v16  ;;  %v6212_v60 = vrot.slane %v5908_v1, 2  ;;  %v6206_v44 = vrot.slane %v5903_v35, 2  ;;  %v6211_v16 = vrot.slane %v5907_v29, 2 }
 0x308   : > { %v13798_v61 = vsel %vm923_vm3, %v5018_v18, %v16889_v36  ;;  %v13809_v53 = vpop.permute.xlu1 %8872  ;;  %9172 = vrot.lane.b32.xlu0 %v9171_v12, %s9755_s28  ;;  %v6002_v36 = vrot.slane %v5908_v1, 1  ;;  %16893 = vst [vmem:[#allocation98_spill] sm:$0xff] %v13821_v0  ;;  %v5916_v12 = vld [vmem:[#allocation3 + $0xb0] sm:$0xff]  ;;  %v16894_v18 = vrot.slane %v13616_v19, 2  ;;  %v6000_v47 = vsel %vm714_vm2, %v5998_v2, %v5999_v40 }
 0x309   : > { %16890 = vst [vmem:[#allocation82_spill] sm:$0xff] %v13798_v61  ;;  %16891 = vst [vmem:[#allocation81_spill] sm:$0xff] %v13809_v53  ;;  %v6001_v53 = vrot.slane %v5907_v29, 1  ;;  %v6005_v61 = vrot.slane %v5912_v57, 1  ;;  %v6208_v19 = vsel %vm923_vm3, %v6206_v44, %v6207_v10  ;;  %v6217_v35 = vrot.slane %v5912_v57, 2  ;;  %v13849_v29 = vld [vmem:[#allocation3 + $0xd0] sm:$0xff] }
 0x30a   : > { %v13823_v42 = vpop.permute.xlu0 %8902  ;;  %9167 = vrot.lane.b32.xlu1 %v9166_v45, %s9755_s28  ;;  %v13830_v52 = vsel %vm923_vm3, %v13683_v5, %v16894_v18  ;;  %v6008_v18 = vrot.slane %v5916_v12, 1  ;;  %v13842_v21 = vpack.i.bf16 %v6000_v47, %v5998_v2  ;;  %v13847_v48 = vsel %vm923_vm3, %v6211_v16, %v6212_v60 }
 0x30b   : > { %16895 = vst [vmem:[#allocation90_spill] sm:$0xff] %v13830_v52  ;;  %v6003_v5 = vsel %vm714_vm2, %v6001_v53, %v6002_v36  ;;  %v13844_v27 = vpack.i.bf16 %v6001_v53, %v5999_v40  ;;  %v6007_v1 = vrot.slane %v5915_v55, 1  ;;  %v16899_v0 = vrot.slane %v13566_v49, 2  ;;  %v13885_v55 = vld [vmem:[#allocation3 + $0xf0] sm:$0xff] }
 0x30c   : > { %v13837_v45 = vpop.permute.xlu1 %8882  ;;  %9187 = vrot.lane.b32.xlu0 %v9186_v30, %s9755_s28  ;;  %16896 = vst [vmem:[#allocation94_spill] sm:$0xff] %v13842_v21  ;;  %v16898_v30 = vpack.i.bf16 %v13676_v13, %v13703_v8  ;;  %v6006_v40 = vsel %vm714_vm2, %v6004_v50, %v6005_v61  ;;  %v6216_v57 = vrot.slane %v5911_v7, 2  ;;  %v6222_v53 = vrot.slane %v5916_v12, 2  ;;  %v13870_v8 = vld [vmem:[#allocation3 + $0xc8] sm:$0xff] }
 0x30d   : > { %16897 = vst [vmem:[#allocation96_spill] sm:$0xff] %v13844_v27  ;;  %v13860_v47 = vsel %vm923_vm3, %v6212_v60, %v16899_v0  ;;  %v13863_v2 = vpack.i.bf16 %v6002_v36, %v6003_v5  ;;  %v13865_v27 = vpack.i.bf16 %v6208_v19, %v6206_v44  ;;  %v16900_v21 = vrot.slane %v13553_v46, 2 }
 0x30e   : > { %v13851_v52 = vpop.permute.xlu0 %8912  ;;  %9177 = vrot.lane.b32.xlu1 %v16898_v30, %s9755_s28  ;;  %v13872_v30 = vld [vmem:[#allocation3 + $0xe8] sm:$0xff]  ;;  %v16901_v7 = vpack.i.bf16 %v13712_v34, %v13707_v4  ;;  %v6009_v0 = vsel %vm714_vm2, %v6007_v1, %v6008_v18  ;;  %v6218_v46 = vsel %vm923_vm3, %v6216_v57, %v6217_v35  ;;  %v13889_v36 = vpack.i.bf16 %v6006_v40, %v6004_v50 }
 0x30f   : > { %v6210_v24 = vsel %vm923_vm3, %v6207_v10, %v16900_v21  ;;  %v6011_v21 = vrot.slane %v13849_v29, 1  ;;  %v13891_v12 = vpack.i.bf16 %v6007_v1, %v6005_v61  ;;  %v16902_v34 = vrot.slane %v13562_v31, 2 }
 0x310   : > { %v13874_v49 = vpop.permute.xlu1 %8887  ;;  %9197 = vrot.lane.b32.xlu0 %v16901_v7, %s9756_s16  ;;  %v13880_v60 = vpack.i.bf16 %v6211_v16, %v6210_v24  ;;  %v13901_v16 = vsel %vm923_vm3, %v6221_v58, %v6222_v53  ;;  %v16904_v5 = vrot.slane %v13582_v62, 2  ;;  %v6010_v50 = vrot.slane %v13870_v8, 1  ;;  %v13917_v7 = vld [vmem:[#allocation3 + $0x108] sm:$0xff] }
 0x311   : > { %v6220_v24 = vsel %vm923_vm3, %v6217_v35, %v16902_v34  ;;  %16903 = vst [vmem:[#allocation97_spill] sm:$0xff] %v13901_v16  ;;  %v6013_v61 = vrot.slane %v13872_v30, 1  ;;  %v13910_v31 = vpack.i.bf16 %v6008_v18, %v6009_v0  ;;  %v13912_v1 = vpack.i.bf16 %v6218_v46, %v6216_v57  ;;  %v13929_v57 = vld [vmem:[#allocation3 + $0x40] sm:$0xff] }
 0x312   : > { %v13896_v44 = vpop.permute.xlu0 %8917  ;;  %9182 = vrot.lane.b32.xlu1 %v13741_v3, %s9756_s16  ;;  %v13906_v19 = vsel %vm923_vm3, %v6222_v53, %v16904_v5  ;;  %v13914_v35 = vpack.i.bf16 %v6221_v58, %v6220_v24  ;;  %v8880_v34 = vunpack.i.h.bf16 %v13731_v11  ;;  %v8885_v62 = vunpack.i.h.bf16 %v13837_v45  ;;  %16911 = vst [vmem:[#allocation39_spill] sm:$0xff] %v13929_v57 }
 0x313   : > { %16905 = vst [vmem:[#allocation8_spill] sm:$0xff] %v13906_v19  ;;  %16906 = vst [vmem:[#allocation44_spill] sm:$0xff] %v13910_v31  ;;  %v16910_v5 = vpack.i.bf16 %v13720_v28, %v13676_v13  ;;  %v6012_v18 = vsel %vm714_vm2, %v6010_v50, %v6011_v21  ;;  %v6227_v58 = vrot.slane %v13849_v29, 2  ;;  %v8879_v0 = vunpack.i.l.bf16 %v13731_v11  ;;  %v13954_v19 = vld [vmem:[#allocation3 + $0x50] sm:$0xff] }
 0x314   : > { %16907 = vst [vmem:[#allocation61_spill] sm:$0xff] %v13912_v1  ;;  %16908 = vst [vmem:[#allocation104_spill] sm:$0xff] %v13914_v35  ;;  %v13921_v53 = vpop.permute.xlu1 %8892  ;;  %v8884_v40 = vunpack.i.l.bf16 %v13837_v45  ;;  %v8915_v13 = vunpack.i.h.bf16 %v13851_v52  ;;  %v16912_v29 = vpack.i.bf16 %v13698_v54, %v13681_v23  ;;  %v13944_v35 = vpack.i.bf16 %v6013_v61, %v6011_v21  ;;  %v13994_v1 = vld [vmem:[#allocation3 + $0x28] sm:$0xff] }
 0x315   : > { %16909 = vst [vmem:[#allocation65_spill] sm:$0xff] %v13921_v53  ;;  %9202 = vrot.lane.b32.xlu0 %v16910_v5, %s9755_s28  ;;  %v8890_v46 = vunpack.i.h.bf16 %v13874_v49  ;;  %v8889_v24 = vunpack.i.l.bf16 %v13874_v49  ;;  %v13950_v45 = vpack.i.bf16 %v6012_v18, %v6010_v50  ;;  %v5184_v16 = vsel %vm432_vm4, %v13929_v57, %v8880_v34  ;;  %16915 = vst [vmem:[#allocation55_spill] sm:$0xff] %v13954_v19  ;;  %v13970_v34 = vld [vmem:[#allocation3 + $0x30] sm:$0xff] }
 0x316   : > { %v13938_v5 = vpop.permute.xlu0 %8922  ;;  %9192 = vrot.lane.b32.xlu1 %v16912_v29, %s9755_s28  ;;  %16913 = vst [vmem:[#allocation21_spill] sm:$0xff] %v13944_v35  ;;  %v5186_v23 = vsel %vm432_vm4, %v13954_v19, %v8885_v62  ;;  %v16916_v21 = vpack.i.bf16 %v13513_v9, %v13749_v41  ;;  %v16917_v49 = vrot.slane %v13885_v55, 1  ;;  %v16918_v50 = vrot.slane %v13870_v8, 2  ;;  %16919 = vst [vmem:[#allocation56_spill] sm:$0xff] %v13970_v34  ;;  %v13975_v41 = vld [vmem:[#allocation3 + $0x110] sm:$0xff] }
 0x317   : > { %v8924_v10 = vunpack.i.l.bf16 %v13938_v5  ;;  %16914 = vst [vmem:[#allocation52_spill] sm:$0xff] %v13950_v45  ;;  %v5183_v62 = vsel %vm432_vm4, %v13970_v34, %v8879_v0  ;;  %v8914_v0 = vunpack.i.l.bf16 %v13851_v52  ;;  %v16932_v53 = vrot.slane %v13872_v30, 2 }
 0x318   : > { %v8908_v54 = vpop.permute.xlu1 %8907  ;;  %v6015_v29 = vsel %vm714_vm2, %v6013_v61, %v16917_v49  ;;  %v13968_v18 = vsel %vm923_vm3, %v16918_v50, %v6227_v58  ;;  %v8905_v61 = vunpack.i.h.bf16 %v13823_v42  ;;  %v13980_v49 = vld [vmem:[#allocation3 + $0x48] sm:$0xff]  ;;  %v5231_v57 = vsel %vm4425_vm8, %v5183_v62, %v8915_v13 }
 0x319   : > { %9207 = vrot.lane.b32.xlu0 %v16916_v21, %s9756_s16  ;;  %v5234_v11 = vsel %vm4425_vm8, %v5186_v23, %v8924_v10  ;;  %v8910_v35 = vunpack.i.h.bf16 %v8908_v54  ;;  %v8909_v45 = vunpack.i.l.bf16 %v8908_v54  ;;  %v13977_v21 = vld [vmem:[#allocation3 + $0x20] sm:$0xff]  ;;  %16920 = vst [vmem:[#allocation4_spill] sm:$0xff] %v13980_v49  ;;  %v5185_v50 = vsel %vm432_vm4, %v13980_v49, %v8884_v40  ;;  %v13990_v10 = vld [vmem:[#allocation3 + $0x130] sm:$0xff] }
 0x31a   : > { %v13986_v34 = vpop.permute.xlu0 %8927  ;;  %9217 = vrot.lane.b32.xlu1 %v13773_v25, %s9755_s28  ;;  %v5232_v23 = vsel %vm4425_vm8, %v5184_v16, %v8889_v24  ;;  %v5233_v54 = vsel %vm4425_vm8, %v5185_v50, %v8890_v46  ;;  %v5333_v52 = vrot.slane %v5234_v11, 7  ;;  %v6017_v16 = vrot.slane %v13975_v41, 1  ;;  %v5931_v46 = vld [vmem:[#allocation3 + $0x128] sm:$0xff] }
 0x31b   : > { %v5182_v40 = vsel %vm432_vm4, %v13994_v1, %v8910_v35  ;;  %v5181_v13 = vsel %vm432_vm4, %v13977_v21, %v8909_v45  ;;  %v6232_v35 = vrot.slane %v13885_v55, 2  ;;  %v6020_v31 = vrot.slane %v13990_v10, 1 }
 0x31c   : > { %v5229_v62 = vsel %vm4425_vm8, %v5181_v13, %v8905_v61  ;;  %v5230_v49 = vsel %vm4425_vm8, %v5182_v40, %v8914_v0  ;;  %v14002_v25 = vpop.permute.xlu1 %8942  ;;  %v5328_v45 = vrot.slane %v5231_v57, 7  ;;  %v5330_v11 = vrot.slane %v5232_v23, 7  ;;  %v14022_v23 = vld [vmem:[#allocation3 + $0x150] sm:$0xff] }
 0x31d   : > { %9212 = vrot.lane.b32.xlu0 %v13791_v51, %s9755_s28  ;;  %v5325_v24 = vrot.slane %v5229_v62, 7  ;;  %v5326_v50 = vrot.slane %v5230_v49, 7  ;;  %v5331_v19 = vrot.slane %v5233_v54, 7  ;;  %v16922_v0 = vrot.slane %v13568_v22, 2 }
 0x31e   : > { %v14009_v61 = vpop.permute.xlu0 %8932  ;;  %9222 = vrot.lane.b32.xlu1 %v13793_v56, %s9756_s16  ;;  %v16923_v49 = vrot.slane %v13885_v55, 1  ;;  %v6019_v62 = vrot.slane %v5931_v46, 1  ;;  %v6237_v57 = vrot.slane %v13975_v41, 2  ;;  %v16925_v22 = vpack.i.bf16 %v13779_v17, %v13760_v63  ;;  %v14047_v17 = vld [vmem:[#allocation3 + $0x148] sm:$0xff] }
 0x31f   : > { %16921 = vst [vmem:[#allocation47_spill] sm:$0xff] %v14009_v61  ;;  %v6230_v51 = vsel %vm923_vm3, %v6227_v58, %v16922_v0  ;;  %v5327_v40 = vsel %vm1292_vm5, %v5325_v24, %v5326_v50  ;;  %v5334_v54 = vsel %vm1292_vm5, %v5331_v19, %v5333_v52  ;;  %v5329_v56 = vsel %vm1292_vm5, %v5326_v50, %v5328_v45 }
 0x320   : > { %v14019_v13 = vpack.i.bf16 %v16923_v49, %v6015_v29  ;;  %v14025_v61 = vpop.permute.xlu1 %8947  ;;  %v6241_v58 = vrot.slane %v5931_v46, 2  ;;  %v6236_v55 = vrot.slane %v13917_v7, 2  ;;  %v16926_v29 = vrot.slane %v13917_v7, 1  ;;  %v14049_v46 = vld [vmem:[#allocation3 + $0x168] sm:$0xff] }
 0x321   : > { %9227 = vrot.lane.b32.xlu0 %v16925_v22, %s9756_s16  ;;  %v16927_v24 = vrot.slane %v13872_v30, 2  ;;  %v16929_v0 = vrot.slane %v13589_v38, 2  ;;  %v6021_v63 = vsel %vm714_vm2, %v6019_v62, %v6020_v31  ;;  %v5332_v50 = vsel %vm1292_vm5, %v5330_v11, %v5331_v19 }
 0x322   : > { %16924 = vst [vmem:[#allocation9_spill] sm:$0xff] %v14019_v13  ;;  %v6018_v41 = vsel %vm714_vm2, %v16926_v29, %v6017_v16  ;;  %v5437_v45 = vpack.c.bf16 %v5329_v56, %v5327_v40  ;;  %v8938_v22 = vpop.permute.xlu0 %8937  ;;  %v16930_v29 = vpack.i.bf16 %v13723_v15, %v13765_v20  ;;  %v6023_v38 = vrot.slane %v14022_v23, 1  ;;  %v14069_v40 = vld [vmem:[#allocation3 + $0x170] sm:$0xff]  ;;  %v9577_v15 = vld [vmem:[%s16009_s5 + $0x8] ss:$0 sps:$4 sm:$0xff]  }
 0x323   : > { %v14039_v52 = vsel %vm923_vm3, %v16927_v24, %v6232_v35  ;;  %v14044_v49 = vsel %vm923_vm3, %v6232_v35, %v16929_v0  ;;  %v6242_v35 = vrot.slane %v13990_v10, 2  ;;  %v5438_v24 = vpack.c.bf16 %v5334_v54, %v5332_v50 }
 0x324   : > { %16928 = vst [vmem:[#allocation46_spill] sm:$0xff] %v14039_v52  ;;  %9232 = vrot.lane.b32.xlu1 %v16930_v29, %s9755_s28  ;;  %v16931_v0 = vrot.slane %v13870_v8, 2  ;;  %v14065_v19 = vpack.i.bf16 %v16932_v53, %v6230_v51  ;;  %v14067_v11 = vpack.i.bf16 %v6019_v62, %v6017_v16  ;;  %7843 = vmatprep.mubr.msk.bf16.mxu1 %vm5466_vm9, %v5437_v45  ;;  %v14075_v10 = vpop.permute.xlu1 %8957  ;;  %v16935_v30 = vrot.slane %v13591_v14, 2 }
 0x325   : > { %v16934_v8 = vpack.i.bf16 %v13769_v6, %v13521_v26  ;;  %v6022_v16 = vrot.slane %v14047_v17, 1  ;;  %v6025_v51 = vrot.slane %v14049_v46, 1  ;;  %7844 = vmatmul.mubr.msk.bf16.vlgmr.msra.gmra.mrb[16].mxu1 %vm5466_vm9, %v5438_v24  ;;  %v16936_v62 = vrot.slane %v13917_v7, 1 }
 0x326   : > { %v14061_v13 = vpack.i.bf16 %v13968_v18, %v16931_v0  ;;  %16933 = vst [vmem:[#allocation105_spill] sm:$0xff] %v14067_v11  ;;  %v6240_v53 = vsel %vm923_vm3, %v6237_v57, %v16935_v30  ;;  %v6238_v18 = vsel %vm923_vm3, %v6236_v55, %v6237_v57  ;;  %v14094_v56 = vpack.i.bf16 %v6020_v31, %v6021_v63  ;;  %v14098_v50 = vpop.permute.xlu0 %8952 }
 0x327   : > { %9247 = vrot.lane.b32.xlu0 %v16934_v8, %s9756_s16  ;;  %v14090_v54 = vpack.i.bf16 %v6018_v41, %v16936_v62  ;;  %v14096_v14 = vpack.i.bf16 %v6241_v58, %v6240_v53  ;;  %v16939_v57 = vpack.i.bf16 %v13765_v20, %v13720_v28  ;;  %7876 = vmatpush3.bf16.msra.mxu1 %v13573_v37  ;;  %v16941_v45 = vrot.slane %v13622_v32, 2 }
 0x328   : > { %16937 = vst [vmem:[#allocation15_spill] sm:$0xff] %v14094_v56  ;;  %v6024_v7 = vsel %vm714_vm2, %v6022_v16, %v6023_v38  ;;  %v14107_v41 = vsel %vm923_vm3, %v6241_v58, %v6242_v35  ;;  %v6026_v63 = vrot.slane %v14069_v40, 1  ;;  %v8940_v29 = vunpack.i.h.bf16 %v8938_v22  ;;  %8116 = vmatprep.subr.msk.bf16.mxu1 %vm5515_vm7, %v9577_v15  ;;  %v8963_v0 = vpop.permute.xlu1 %8962 }
 0x329   : > { %16938 = vst [vmem:[#allocation63_spill] sm:$0xff] %v14096_v14  ;;  %9237 = vrot.lane.b32.xlu1 %v16939_v57, %s9755_s28  ;;  %16940 = vst [vmem:[#allocation101_spill] sm:$0xff] %v14107_v41  ;;  %v14112_v31 = vsel %vm923_vm3, %v6242_v35, %v16941_v45  ;;  %v14115_v24 = vpack.i.bf16 %v6238_v18, %v6236_v55  ;;  %v6247_v28 = vrot.slane %v14022_v23, 2  ;;  %v5738_v37 = vsel %vm5515_vm7, %v9577_v15, 0  ;;  %v14153_v15 = vld [vmem:[#allocation3 + $0x70] sm:$0xff]  ;;  %v16951_v55 = vld [vmem:[#allocation36_spill] sm:$0xff] }
 0x32a   : > { %16942 = vst [vmem:[#allocation102_spill] sm:$0xff] %v14112_v31  ;;  %v8939_v20 = vunpack.i.l.bf16 %v8938_v22  ;;  %v16944_v32 = vpack.i.bf16 %v13435_v33, %v13358_v39  ;;  %v14124_v58 = vpack.i.bf16 %v6025_v51, %v6023_v38  ;;  %v8965_v8 = vunpack.i.h.bf16 %v8963_v0  ;;  %v14132_v22 = vld [vmem:[#allocation3 + $0x60] sm:$0xff]  ;;  %v8968_v18 = vpop.permute.xlu0 %8967  ;;  %v14243_v14 = vld [vmem:[#allocation3 + $0x1e8] sm:$0xff] }
 0x32b   : > { %16943 = vst [vmem:[#allocation37_spill] sm:$0xff] %v14115_v24  ;;  %v8964_v30 = vunpack.i.l.bf16 %v8963_v0  ;;  %v14128_v23 = vpack.i.bf16 %v6024_v7, %v6022_v16  ;;  %v8925_v53 = vunpack.i.h.bf16 %v13938_v5  ;;  %v8944_v39 = vunpack.i.l.bf16 %v14002_v25  ;;  %v14136_v33 = vld [vmem:[#allocation3 + $0x80] sm:$0xff]  ;;  %7878 = vmatpush3.bf16.msra.mxu1 %v5738_v37  ;;  %v14146_v7 = vld [vmem:[#allocation3 + $0x68] sm:$0xff] }
 0x32c   : > { %9252 = vrot.lane.b32.xlu0 %v16944_v32, %s9756_s16  ;;  %16945 = vst [vmem:[#allocation41_spill] sm:$0xff] %v14124_v58  ;;  %v8950_v38 = vunpack.i.h.bf16 %v14025_v61  ;;  %v16947_v62 = vpack.i.bf16 %v13319_v59, %v13439_v43  ;;  %v6027_v16 = vsel %vm714_vm2, %v6025_v51, %v6026_v63  ;;  %v5190_v57 = vsel %vm432_vm4, %v14136_v33, %v8940_v29  ;;  %v14158_v29 = vpop.permute.xlu1 %8972  ;;  %v16948_v37 = vld [vmem:[#allocation28_spill] sm:$0xff] }
 0x32d   : > { %16946 = vst [vmem:[#allocation45_spill] sm:$0xff] %v14128_v23  ;;  %v5188_v5 = vsel %vm432_vm4, %v14146_v7, %v8965_v8  ;;  %v5187_v45 = vsel %vm432_vm4, %v14132_v22, %v8964_v30  ;;  %v8970_v0 = vunpack.i.h.bf16 %v8968_v18  ;;  %v8949_v32 = vunpack.i.l.bf16 %v14025_v61 }
 0x32e   : > { %9242 = vrot.lane.b32.xlu1 %v16947_v62, %s9756_s16  ;;  %v5189_v59 = vsel %vm432_vm4, %v14153_v15, %v8939_v20  ;;  %v5235_v43 = vsel %vm4425_vm8, %v5187_v45, %v8925_v53  ;;  %v8969_v51 = vunpack.i.l.bf16 %v8968_v18  ;;  %v16949_v62 = vld [vmem:[#allocation33_spill] sm:$0xff]  ;;  %v8945_v30 = vunpack.i.h.bf16 %v14002_v25  ;;  %v14169_v20 = vld [vmem:[#allocation3 + $0x190] sm:$0xff]  ;;  %v14173_v41 = vpop.permute.xlu0 %8982  ;;  %v9578_v25 = vld [vmem:[%s16009_s5 + $0x18] sm:$0xff]  }
 0x32f   : > { %v16950_v8 = vpack.i.bf16 %v16948_v37, %v16949_v62  ;;  %v5335_v6 = vrot.slane %v5235_v43, 7  ;;  %v5237_v61 = vsel %vm4425_vm8, %v5189_v59, %v8970_v0  ;;  %v16952_v35 = vrot.slane %v16951_v55, 2  ;;  %v16953_v37 = vld [vmem:[#allocation58_spill] sm:$0xff]  ;;  %v14180_v55 = vld [vmem:[#allocation3 + $0x88] sm:$0xff]  ;;  %v7053_v43 = vld [vmem:[%s16012_s8] sm:$0x3]  ;;  %7911 = vmatprep.subr.bf16.mxu1 %v9578_v25 }
 0x330   : > { %v5238_v53 = vsel %vm4425_vm8, %v5190_v57, %v8949_v32  ;;  %v5236_v18 = vsel %vm4425_vm8, %v5188_v5, %v8969_v51  ;;  %v5338_v45 = vrot.slane %v5237_v61, 7  ;;  %v14184_v57 = vpack.i.bf16 %v6026_v63, %v6027_v16  ;;  %v14190_v59 = vld [vmem:[#allocation3 + $0x188] sm:$0xff]  ;;  %8118 = vmatprep.subr.msk.bf16.mxu0 %vm7102_vm10, %v7053_v43  ;;  %v16961_v25 = vld [vmem:[#allocation32_spill] sm:$0xff] }
 0x331   : > { %9262 = vrot.lane.b32.xlu0 %v16950_v8, %s9756_s16  ;;  %v6250_v58 = vsel %vm923_vm3, %v6247_v28, %v16952_v35  ;;  %v5191_v35 = vsel %vm432_vm4, %v14180_v55, %v8944_v39  ;;  %v5336_v0 = vrot.slane %v5236_v18, 7  ;;  %v16955_v5 = vrot.slane %v14049_v46, 2  ;;  %v14197_v8 = vpop.permute.xlu1 %8977  ;;  %v16958_v39 = vld [vmem:[#allocation31_spill] sm:$0xff]  ;;  %v14205_v61 = vld [vmem:[#allocation3 + $0x1a8] sm:$0xff]  ;;  %v14207_v18 = vld [vmem:[#allocation3 + $0x90] sm:$0xff] }
 0x332   : > { %9257 = vrot.lane.b32.xlu1 %v16953_v37, %s9756_s16  ;;  %16954 = vst [vmem:[#allocation70_spill] sm:$0xff] %v14184_v57  ;;  %v5239_v51 = vsel %vm4425_vm8, %v5191_v35, %v8950_v38  ;;  %v8984_v62 = vunpack.i.l.bf16 %v14173_v41  ;;  %16957 = vst [vmem:[#allocation108_spill] sm:$0xff] %v14197_v8  ;;  %v16959_v63 = vrot.slane %v14047_v17, 2  ;;  %v6029_v16 = vrot.slane %v14169_v20, 1  ;;  %v16962_v57 = vld [vmem:[#allocation57_spill] sm:$0xff] }
 0x333   : > { %v14188_v32 = vpack.i.bf16 %v16955_v5, %v6250_v58  ;;  %16960 = vst [vmem:[#allocation103_spill] sm:$0xff] %v14207_v18  ;;  %v5192_v38 = vsel %vm432_vm4, %v14207_v18, %v8945_v30  ;;  %v5340_v37 = vrot.slane %v5238_v53, 7  ;;  %v5337_v35 = vsel %vm1292_vm5, %v5335_v6, %v5336_v0  ;;  %v5949_v6 = vld [vmem:[#allocation3 + $0x1b8] sm:$0x1] }
 0x334   : > { %v6248_v58 = vsel %vm923_vm3, %v16959_v63, %v6247_v28  ;;  %v5339_v5 = vsel %vm1292_vm5, %v5336_v0, %v5338_v45  ;;  %v5240_v28 = vsel %vm4425_vm8, %v5192_v38, %v8984_v62  ;;  %v14217_v63 = vpop.permute.xlu0 %8992  ;;  %v16963_v31 = vpack.i.bf16 %v16961_v25, %v16962_v57  ;;  %v14227_v62 = vld [vmem:[#allocation3 + $0x1f0] sm:$0xff] }
 0x335   : > { %16956 = vst [vmem:[#allocation43_spill] sm:$0xff] %v14188_v32  ;;  %9272 = vrot.lane.b32.xlu0 %v16958_v39, %s9756_s16  ;;  %v5948_v39 = vld [vmem:[#allocation3 + $0x1b0] sm:$0xff]  ;;  %v5439_v30 = vpack.c.bf16 %v5339_v5, %v5337_v35  ;;  %v6028_v53 = vrot.slane %v14190_v59, 1  ;;  %v7104_v45 = vsel %vm7102_vm10, %v7053_v43, 0  ;;  %v5341_v0 = vrot.slane %v5239_v51, 7  ;;  %v14230_v38 = vpop.permute.xlu1 %8987 }
 0x336   : > { %v14213_v32 = vld [vmem:[#allocation3 + $0x1d0] sm:$0xff]  ;;  %9267 = vrot.lane.b32.xlu1 %v16963_v31, %s9756_s16  ;;  %v5343_v18 = vrot.slane %v5240_v28, 7  ;;  %v6252_v23 = vrot.slane %v14069_v40, 2  ;;  %v6031_v24 = vrot.slane %v14205_v61, 1  ;;  %7948 = vmatpush3.bf16.msra.mxu0 %v7104_v45  ;;  %16964 = vst [vmem:[#allocation19_spill] sm:$0xff] %v14230_v38  ;;  %v6032_v51 = vrot.slane %v5948_v39, 1 }
 0x337   : > { %7847 = vmatprep.mubr.msk.bf16.mxu1 %vm5466_vm9, %v5439_v30  ;;  %v16965_v31 = vld [vmem:[#allocation38_spill] sm:$0xff]  ;;  %v6030_v43 = vsel %vm714_vm2, %v6028_v53, %v6029_v16  ;;  %v6257_v5 = vrot.slane %v14169_v20, 2  ;;  %v14238_v40 = vld [vmem:[#allocation3 + $0x1c8] sm:$0xff]  ;;  %v6035_v28 = vrot.slane %v14213_v32, 1  ;;  %v5342_v25 = vsel %vm1292_vm5, %v5340_v37, %v5341_v0 }
 0x338   : > { %v16966_v57 = vld [vmem:[#allocation66_spill] sm:$0xff]  ;;  %v5344_v30 = vsel %vm1292_vm5, %v5341_v0, %v5343_v18  ;;  %v6262_v45 = vrot.slane %v5948_v39, 2  ;;  %v6264_v38 = vrot.slane %v5949_v6, 2  ;;  %v14245_v11 = vpop.permute.xlu0 %9007  ;;  %v16972_v56 = vrot.slane %v14047_v17, 2 }
 0x339   : > { %v16967_v35 = vpack.i.bf16 %v16965_v31, %v16966_v57  ;;  %16968 = vst [vmem:[#allocation17_spill] sm:$0xff] %v14245_v11  ;;  %v16969_v31 = vld [vmem:[#allocation54_spill] sm:$0xff]  ;;  %v5440_v20 = vpack.c.bf16 %v5344_v30, %v5342_v25  ;;  %v6261_v37 = vrot.slane %v14205_v61, 2  ;;  %v6038_v18 = vrot.slane %v14227_v62, 1  ;;  %v16979_v61 = vld [vmem:[#allocation68_spill] sm:$0xff] }
 0x33a   : > { %v16970_v57 = vld [vmem:[#allocation30_spill] sm:$0xff]  ;;  %v14253_v8 = vpack.i.bf16 %v6248_v58, %v16972_v56  ;;  %v16974_v39 = vrot.slane %v14049_v46, 2  ;;  %v6256_v25 = vrot.slane %v14190_v59, 2  ;;  %v6034_v17 = vrot.slane %v14238_v40, 1  ;;  %v5953_v56 = vld [vmem:[#allocation3 + $0x1d8] sm:$0x1]  ;;  %v14270_v58 = vpop.permute.xlu1 %8997 }
 0x33b   : > { %9282 = vrot.lane.b32.xlu0 %v16967_v35, %s9756_s16  ;;  %v16971_v35 = vpack.i.bf16 %v16969_v31, %v16970_v57  ;;  %v16976_v0 = vld [vmem:[#allocation34_spill] sm:$0xff]  ;;  %7848 = vmatmul.mubr.msk.bf16.gmra.mrb[20].mxu1 %vm5466_vm9, %v5440_v20  ;;  %v14276_v31 = vpack.i.bf16 %v6030_v43, %v6028_v53  ;;  %v6033_v57 = vsel %vm714_vm2, %v6031_v24, %v6032_v51  ;;  %v16987_v43 = vld [vmem:[#allocation12_spill] sm:$0xff] }
 0x33c   : > { %16973 = vst [vmem:[#allocation107_spill] sm:$0xff] %v14253_v8  ;;  %v14260_v6 = vsel %vm923_vm3, %v16974_v39, %v6252_v23  ;;  %v16977_v11 = vrot.slane %v16976_v0, 2  ;;  %v16980_v46 = vld [vmem:[#allocation42_spill] sm:$0xff]  ;;  %v6258_v59 = vsel %vm923_vm3, %v6256_v25, %v6257_v5  ;;  %v14285_v20 = vsel %vm923_vm3, %v6261_v37, %v6262_v45  ;;  %v14290_v0 = vpop.permute.xlu0 %9017 }
 0x33d   : > { %9277 = vrot.lane.b32.xlu1 %v16971_v35, %s9756_s16  ;;  %16975 = vst [vmem:[#allocation35_spill] sm:$0xff] %v14260_v6  ;;  %v16981_v30 = vpack.i.bf16 %v16979_v61, %v16980_v46  ;;  %16982 = vst [vmem:[#allocation76_spill] sm:$0xff] %v14276_v31  ;;  %v6036_v35 = vsel %vm714_vm2, %v6034_v17, %v6035_v28  ;;  %v14288_v39 = vsel %vm923_vm3, %v6262_v45, %v6264_v38  ;;  %v16986_v53 = vld [vmem:[#allocation50_spill] sm:$0xff] }
 0x33e   : > { %v14265_v52 = vsel %vm923_vm3, %v6252_v23, %v16977_v11  ;;  %v14279_v11 = vpack.i.bf16 %v6031_v24, %v6029_v16  ;;  %v6037_v23 = vrot.slane %v14243_v14, 1  ;;  %16984 = vst [vmem:[#allocation74_spill] sm:$0xff] %v14285_v20  ;;  %16985 = vst [vmem:[#allocation71_spill] sm:$0xff] %v14288_v39  ;;  %v16988_v24 = vrot.slane %v16987_v43, 2  ;;  %v9003_v8 = vpop.permute.xlu1 %9002  ;;  %v16991_v43 = vld [vmem:[#allocation53_spill] sm:$0xff] }
 0x33f   : > { %16978 = vst [vmem:[#allocation106_spill] sm:$0xff] %v14265_v52  ;;  %9292 = vrot.lane.b32.xlu0 %v16981_v30, %s9756_s16  ;;  %v6269_v30 = vrot.slane %v5953_v56, 2  ;;  %v14301_v31 = vpack.i.bf16 %v6032_v51, %v6033_v57  ;;  %v14317_v51 = vld [vmem:[#allocation3 + $0x210] sm:$0xff]  ;;  %v8999_v57 = vunpack.i.l.bf16 %v14270_v58  ;;  %v16998_v56 = vld [vmem:[#allocation75_spill] sm:$0xff]  ;;  %v17000_v39 = vrot.slane %v14213_v32, 2 }
 0x340   : > { %16983 = vst [vmem:[#allocation24_spill] sm:$0xff] %v14279_v11  ;;  %v6260_v16 = vsel %vm923_vm3, %v6257_v5, %v16988_v24  ;;  %v6039_v61 = vsel %vm714_vm2, %v6037_v23, %v6038_v18  ;;  %v14309_v5 = vpack.i.bf16 %v6258_v59, %v6256_v25  ;;  %v14311_v24 = vpack.i.bf16 %v6036_v35, %v6034_v17  ;;  %v14315_v11 = vld [vmem:[#allocation3 + $0x208] sm:$0xff]  ;;  %v14326_v25 = vld [vmem:[#allocation3 + $0x1f8] sm:$0x1]  ;;  %v14329_v35 = vpop.permute.xlu0 %9022 }
 0x341   : > { %9287 = vrot.lane.b32.xlu1 %v16986_v53, %s9756_s16  ;;  %16989 = vst [vmem:[#allocation60_spill] sm:$0xff] %v14301_v31  ;;  %v14303_v38 = vpack.i.bf16 %v6261_v37, %v6260_v16  ;;  %v8995_v53 = vunpack.i.h.bf16 %v14217_v63  ;;  %v14319_v37 = vld [vmem:[#allocation3 + $0xc0] sm:$0xff]  ;;  %v9004_v16 = vunpack.i.l.bf16 %v9003_v8  ;;  %v14322_v45 = vpack.i.bf16 %v6038_v18, %v6039_v61  ;;  %v5961_v52 = vld [vmem:[#allocation3 + $0x218] sm:$0x1] }
 0x342   : > { %16992 = vst [vmem:[#allocation79_spill] sm:$0xff] %v14309_v5  ;;  %16993 = vst [vmem:[#allocation29_spill] sm:$0xff] %v14311_v24  ;;  %v14324_v46 = vpack.i.bf16 %v6037_v23, %v6035_v28  ;;  %v8994_v17 = vunpack.i.l.bf16 %v14217_v63  ;;  %v9005_v59 = vunpack.i.h.bf16 %v9003_v8  ;;  %v6270_v24 = vsel %vm923_vm3, %v17000_v39, %v6269_v30  ;;  %v17003_v39 = vld [vmem:[#allocation82_spill] sm:$0xff] }
 0x343   : > { %16990 = vst [vmem:[#allocation78_spill] sm:$0xff] %v14303_v38  ;;  %9302 = vrot.lane.b32.xlu0 %v16991_v43, %s9756_s16  ;;  %16994 = vst [vmem:[#allocation7_spill] sm:$0xff] %v14319_v37  ;;  %v16997_v43 = vld [vmem:[#allocation73_spill] sm:$0xff]  ;;  %v6266_v18 = vrot.slane %v14238_v40, 2  ;;  %v9020_v28 = vunpack.i.h.bf16 %v14290_v0  ;;  %v17001_v23 = vrot.slane %v14243_v14, 2  ;;  %v17004_v40 = vpack.i.bf16 %v17003_v39, %v13707_v4 }
 0x344   : > { %16995 = vst [vmem:[#allocation64_spill] sm:$0xff] %v14322_v45  ;;  %16996 = vst [vmem:[#allocation26_spill] sm:$0xff] %v14324_v46  ;;  %v16999_v20 = vpack.i.bf16 %v16997_v43, %v16998_v56  ;;  %v5196_v56 = vsel %vm432_vm4, %v14319_v37, %v8995_v53  ;;  %v9013_v43 = vpop.permute.xlu1 %9012  ;;  %v6272_v30 = vrot.slane %v14227_v62, 2  ;;  %v14361_v46 = vld [vmem:[#allocation3 + $0xa0] sm:$0xff]  ;;  %v14363_v45 = vld [vmem:[#allocation3 + $0xb0] sm:$0xff]  ;;  %v9019_v62 = vunpack.i.l.bf16 %v14290_v0  ;;  %v14369_v39 = vpop.permute.xlu0 %9027 }
 0x345   : > { %v14342_v61 = vpack.i.bf16 %v17001_v23, %v6270_v24  ;;  %v6274_v24 = vrot.slane %v14326_v25, 2  ;;  %v14355_v23 = vld [vmem:[#allocation3 + $0xc8] sm:$0xff]  ;;  %v5244_v63 = vsel %vm4425_vm8, %v5196_v56, %v9004_v16  ;;  %v9015_v53 = vunpack.i.h.bf16 %v9013_v43  ;;  %17005 = vst [vmem:[#allocation23_spill] sm:$0xff] %v14363_v45  ;;  %v17007_v16 = vld [vmem:[#allocation98_spill] sm:$0xff] }
 0x346   : > { %9297 = vrot.lane.b32.xlu1 %v16999_v20, %s9756_s16  ;;  %v9000_v20 = vunpack.i.h.bf16 %v14270_v58  ;;  %v5197_v8 = vsel %vm432_vm4, %v14355_v23, %v8999_v57  ;;  %v8985_v58 = vunpack.i.h.bf16 %v14173_v41  ;;  %v5195_v4 = vsel %vm432_vm4, %v14363_v45, %v8994_v17  ;;  %v17006_v57 = vld [vmem:[#allocation77_spill] sm:$0xff] }
 0x347   : > { %17002 = vst [vmem:[#allocation51_spill] sm:$0xff] %v14342_v61  ;;  %9312 = vrot.lane.b32.xlu0 %v17004_v40, %s9756_s16  ;;  %v9014_v61 = vunpack.i.l.bf16 %v9013_v43  ;;  %v5245_v25 = vsel %vm4425_vm8, %v5197_v8, %v9005_v59  ;;  %v17008_v56 = vpack.i.bf16 %v17006_v57, %v17007_v16  ;;  %v5243_v41 = vsel %vm4425_vm8, %v5195_v4, %v9020_v28  ;;  %v14376_v43 = vld [vmem:[#allocation3 + $0xa8] sm:$0xff]  ;;  %v14385_v8 = vld [vmem:[#allocation3 + $0xd0] sm:$0xff] }
 0x348   : > { %17009 = vst [vmem:[#allocation85_spill] sm:$0xff] %v14376_v43  ;;  %v5194_v40 = vsel %vm432_vm4, %v14376_v43, %v9015_v53  ;;  %v9029_v0 = vunpack.i.l.bf16 %v14369_v39  ;;  %v14383_v59 = vld [vmem:[#allocation3 + $0x228] sm:$0xff]  ;;  %17010 = vst [vmem:[#allocation67_spill] sm:$0xff] %v14385_v8  ;;  %v5198_v57 = vsel %vm432_vm4, %v14385_v8, %v9000_v20  ;;  %v5350_v16 = vrot.slane %v5244_v63, 7  ;;  %v17011_v53 = vld [vmem:[#allocation90_spill] sm:$0xff]  ;;  %v14398_v63 = vpop.permute.xlu0 %9032 }
 0x349   : > { %v5193_v17 = vsel %vm432_vm4, %v14361_v46, %v9014_v61  ;;  %v5242_v4 = vsel %vm4425_vm8, %v5194_v40, %v9019_v62  ;;  %v17012_v61 = vpack.i.bf16 %v13513_v9, %v17011_v53  ;;  %v5351_v5 = vrot.slane %v5245_v25, 7  ;;  %v17014_v40 = vld [vmem:[#allocation72_spill] sm:$0xff] }
 0x34a   : > { %9307 = vrot.lane.b32.xlu1 %v17008_v56, %s9756_s16  ;;  %v5241_v28 = vsel %vm4425_vm8, %v5193_v17, %v8985_v58  ;;  %v14391_v56 = vpop.permute.xlu1 %9042  ;;  %v5346_v31 = vrot.slane %v5242_v4, 7  ;;  %v5246_v6 = vsel %vm4425_vm8, %v5198_v57, %v9029_v0  ;;  %v5348_v43 = vrot.slane %v5243_v41, 7 }
 0x34b   : > { %9322 = vrot.lane.b32.xlu0 %v17012_v61, %s9756_s16  ;;  %v5345_v38 = vrot.slane %v5241_v28, 7  ;;  %v5353_v20 = vrot.slane %v5246_v6, 7  ;;  %v17013_v58 = vrot.slane %v14213_v32, 2  ;;  %v8864_v25 = vunpack.i.l.bf16 %v17014_v40  ;;  %v17017_v28 = vld [vmem:[#allocation48_spill] sm:$0xff]  ;;  %v17018_v32 = vld [vmem:[#allocation94_spill] sm:$0xff] }
 0x34c   : > { %v17015_v0 = vrot.slane %v14317_v51, 1  ;;  %v17016_v41 = vrot.slane %v14315_v11, 1  ;;  %v6277_v57 = vrot.slane %v14317_v51, 2  ;;  %v5349_v53 = vsel %vm1292_vm5, %v5346_v31, %v5348_v43  ;;  %v9038_v37 = vpop.permute.xlu0 %9037  ;;  %v9659_v43 = vld [vmem:[#allocation3 + $0x10] sm:$0xff] }
 0x34d   : > { %v6268_v62 = vsel %vm923_vm3, %v6266_v18, %v17013_v58  ;;  %v5347_v17 = vsel %vm1292_vm5, %v5345_v38, %v5346_v31  ;;  %v5354_v61 = vsel %vm1292_vm5, %v5351_v5, %v5353_v20  ;;  %v6279_v58 = vrot.slane %v5961_v52, 2  ;;  %v17023_v31 = vld [vmem:[#allocation96_spill] sm:$0xff] }
 0x34e   : > { %9317 = vrot.lane.b32.xlu1 %v13741_v3, %s9756_s16  ;;  %v6042_v6 = vsel %vm714_vm2, %v17016_v41, %v17015_v0  ;;  %v8869_v3 = vunpack.i.l.bf16 %v17017_v28  ;;  %v9048_v4 = vpop.permute.xlu1 %9047  ;;  %v5352_v38 = vsel %vm1292_vm5, %v5350_v16, %v5351_v5  ;;  %v14420_v9 = vpack.i.bf16 %v6268_v62, %v6266_v18 }
 0x34f   : > { %9327 = vrot.lane.b32.xlu0 %v17018_v32, %s9755_s28  ;;  %v17020_v8 = vrot.slane %v14243_v14, 2  ;;  %v14428_v41 = vsel %vm923_vm3, %v6272_v30, %v6274_v24  ;;  %v8865_v45 = vunpack.i.h.bf16 %v17014_v40  ;;  %v5441_v32 = vpack.c.bf16 %v5349_v53, %v5347_v17  ;;  %v17027_v24 = vld [vmem:[#allocation69_spill] sm:$0xff] }
 0x350   : > { %17019 = vst [vmem:[#allocation83_spill] sm:$0xff] %v14420_v9  ;;  %17022 = vst [vmem:[#allocation84_spill] sm:$0xff] %v14428_v41  ;;  %v5442_v52 = vpack.c.bf16 %v5354_v61, %v5352_v38  ;;  %v17024_v5 = vrot.slane %v14315_v11, 1  ;;  %v4379_v14 = vsel %vm432_vm4, %v9659_v43, %v8864_v25  ;;  %v9040_v20 = vunpack.i.h.bf16 %v9038_v37 }
 0x351   : > { %v14425_v0 = vsel %vm923_vm3, %v17020_v8, %v6272_v30  ;;  %v17026_v8 = vld [vmem:[#allocation59_spill] sm:$0xff]  ;;  %v16270_v30 = vrot.slane %v14315_v11, 2  ;;  %v14442_v40 = vsel %vm4425_vm8, %v4379_v14, %v8869_v3  ;;  %7851 = vmatprep.mubr.msk.bf16.mxu1 %vm5466_vm9, %v5441_v32  ;;  %v17029_v53 = vrot.slane %v14383_v59, 1  ;;  %v9063_v14 = vpop.permute.xlu0 %9062  ;;  %v14492_v32 = vld [vmem:[#allocation3 + $0xe0] sm:$0xff] }
 0x352   : > { %17021 = vst [vmem:[#allocation80_spill] sm:$0xff] %v14425_v0  ;;  %9332 = vrot.lane.b32.xlu1 %v17023_v31, %s9755_s28  ;;  %v14435_v18 = vpack.i.bf16 %v6042_v6, %v17024_v5  ;;  %v8899_v16 = vunpack.i.l.bf16 %v17026_v8  ;;  %v14445_v17 = vpop.permute.xlu1 %9052  ;;  %v17028_v6 = vrot.slane %v14317_v51, 1  ;;  %v9044_v38 = vunpack.i.l.bf16 %v14391_v56  ;;  %7852 = vmatmul.mubr.msk.bf16.gmra.mrb[24].mxu1 %vm5466_vm9, %v5442_v52  ;;  %v14473_v5 = vld [vmem:[#allocation3 + $0x100] sm:$0xff] }
 0x353   : > { %9337 = vrot.lane.b32.xlu0 %v13863_v2, %s9755_s28  ;;  %v14460_v3 = vsel %vm923_vm3, %v6277_v57, %v6279_v58  ;;  %v14466_v2 = vsel %vm923_vm3, %v16270_v30, %v6277_v57  ;;  %v14470_v51 = vsel %vm432_vm4, %v13977_v21, %v8865_v45  ;;  %v8870_v31 = vunpack.i.h.bf16 %v17017_v28  ;;  %v14488_v30 = vld [vmem:[#allocation3 + $0x108] sm:$0xff] }
 0x354   : > { %17025 = vst [vmem:[#allocation13_spill] sm:$0xff] %v14435_v18  ;;  %v14455_v61 = vpack.i.bf16 %v17029_v53, %v17028_v6  ;;  %v9050_v43 = vunpack.i.h.bf16 %v9048_v4  ;;  %v9039_v52 = vunpack.i.l.bf16 %v9038_v37  ;;  %v4381_v57 = vsel %vm432_vm4, %v13994_v1, %v8899_v16  ;;  %v14507_v58 = vld [vmem:[#allocation3 + $0xe8] sm:$0xff] }
 0x355   : > { %v5202_v6 = vsel %vm432_vm4, %v14473_v5, %v9040_v20  ;;  %v9065_v21 = vunpack.i.h.bf16 %v9063_v14  ;;  %v8904_v45 = vunpack.i.l.bf16 %v13823_v42  ;;  %v8919_v28 = vunpack.i.l.bf16 %v13896_v44 }
 0x356   : > { %17030 = vst [vmem:[#allocation88_spill] sm:$0xff] %v14455_v61  ;;  %9342 = vrot.lane.b32.xlu1 %v13865_v27, %s9756_s16  ;;  %v9045_v53 = vunpack.i.h.bf16 %v14391_v56  ;;  %v9049_v37 = vunpack.i.l.bf16 %v9048_v4  ;;  %v9058_v25 = vpop.permute.xlu1 %9057  ;;  %v9030_v27 = vunpack.i.h.bf16 %v14369_v39  ;;  %v5203_v1 = vsel %vm432_vm4, %v14488_v30, %v9044_v38  ;;  %v14496_v4 = vld [vmem:[#allocation3 + $0xf0] sm:$0xff]  ;;  %v14500_v39 = vpop.permute.xlu0 %9072  ;;  %v17032_v61 = vld [vmem:[#allocation81_spill] sm:$0xff] }
 0x357   : > { %9347 = vrot.lane.b32.xlu0 %v13880_v60, %s9756_s16  ;;  %v9060_v16 = vunpack.i.h.bf16 %v9058_v25  ;;  %v9059_v20 = vunpack.i.l.bf16 %v9058_v25  ;;  %v5251_v42 = vsel %vm4425_vm8, %v5203_v1, %v9050_v43  ;;  %v5201_v60 = vsel %vm432_vm4, %v14496_v4, %v9039_v52 }
 0x358   : > { %v5250_v56 = vsel %vm4425_vm8, %v5202_v6, %v9049_v37  ;;  %v9064_v62 = vunpack.i.l.bf16 %v9063_v14  ;;  %v17031_v38 = vpack.i.bf16 %v13860_v47, %v13847_v48  ;;  %v5249_v25 = vsel %vm4425_vm8, %v5201_v60, %v9065_v21  ;;  %v14515_v37 = vld [vmem:[#allocation3 + $0x110] sm:$0xff] }
 0x359   : > { %v5200_v43 = vsel %vm432_vm4, %v14507_v58, %v9060_v16  ;;  %v5199_v6 = vsel %vm432_vm4, %v14492_v32, %v9059_v20  ;;  %v9074_v52 = vunpack.i.l.bf16 %v14500_v39  ;;  %v8929_v14 = vunpack.i.l.bf16 %v13986_v34 }
 0x35a   : > { %9352 = vrot.lane.b32.xlu1 %v17031_v38, %s9756_s16  ;;  %v5204_v48 = vsel %vm432_vm4, %v14515_v37, %v9045_v53  ;;  %v5248_v47 = vsel %vm4425_vm8, %v5200_v43, %v9064_v62  ;;  %v5247_v21 = vsel %vm4425_vm8, %v5199_v6, %v9030_v27  ;;  %v14521_v1 = vpop.permute.xlu1 %9067  ;;  %v5360_v16 = vrot.slane %v5250_v56, 7  ;;  %v14527_v53 = vpop.permute.xlu0 %9082  ;;  %v17035_v6 = vld [vmem:[#allocation55_spill] sm:$0xff] }
 0x35b   : > { %9357 = vrot.lane.b32.xlu0 %v13889_v36, %s9755_s28  ;;  %v5356_v20 = vrot.slane %v5248_v47, 7  ;;  %v5355_v60 = vrot.slane %v5247_v21, 7  ;;  %v5252_v38 = vsel %vm4425_vm8, %v5204_v48, %v9074_v52  ;;  %v8875_v0 = vunpack.i.h.bf16 %v17032_v61  ;;  %v17034_v36 = vld [vmem:[#allocation65_spill] sm:$0xff]  ;;  %v17036_v48 = vld [vmem:[#allocation44_spill] sm:$0xff] }
 0x35c   : > { %v5361_v41 = vrot.slane %v5251_v42, 7  ;;  %v5358_v18 = vrot.slane %v5249_v25, 7  ;;  %v5363_v9 = vrot.slane %v5252_v38, 7  ;;  %v8874_v62 = vunpack.i.l.bf16 %v17032_v61  ;;  %v17037_v21 = vld [vmem:[#allocation4_spill] sm:$0xff] }
 0x35d   : > { %v14533_v27 = vsel %vm4425_vm8, %v4381_v57, %v8904_v45  ;;  %v8895_v56 = vunpack.i.h.bf16 %v17034_v36  ;;  %v5357_v43 = vsel %vm1292_vm5, %v5355_v60, %v5356_v20  ;;  %v4385_v52 = vsel %vm432_vm4, %v17035_v6, %v8919_v28 }
 0x35e   : > { %9362 = vrot.lane.b32.xlu1 %v13891_v12, %s9755_s28  ;;  %17033 = vst [vmem:[#allocation49_spill] sm:$0xff] %v14533_v27  ;;  %v8894_v42 = vunpack.i.l.bf16 %v17034_v36  ;;  %v14540_v25 = vpop.permute.xlu1 %9077  ;;  %v5359_v12 = vsel %vm1292_vm5, %v5356_v20, %v5358_v18  ;;  %v5364_v61 = vsel %vm1292_vm5, %v5361_v41, %v5363_v9  ;;  %v4429_v57 = vsel %vm4425_vm8, %v14470_v51, %v8870_v31  ;;  %v14554_v6 = vpop.permute.xlu0 %9097  ;;  %v17038_v18 = vld [vmem:[#allocation61_spill] sm:$0xff]  ;;  %v17039_v20 = vld [vmem:[#allocation39_spill] sm:$0xff] }
 0x35f   : > { %9367 = vrot.lane.b32.xlu0 %v17036_v48, %s9755_s28  ;;  %v8900_v45 = vunpack.i.h.bf16 %v17026_v8  ;;  %v4434_v47 = vsel %vm4425_vm8, %v4385_v52, %v8929_v14  ;;  %v5362_v28 = vsel %vm1292_vm5, %v5360_v16, %v5361_v41  ;;  %v4384_v60 = vsel %vm432_vm4, %v17037_v21, %v8875_v0  ;;  %v17040_v14 = vld [vmem:[#allocation47_spill] sm:$0xff]  ;;  %v17041_v52 = vld [vmem:[#allocation104_spill] sm:$0xff] }
 0x360   : > { %v8920_v38 = vunpack.i.h.bf16 %v13896_v44  ;;  %v5443_v36 = vpack.c.bf16 %v5359_v12, %v5357_v43  ;;  %v5444_v9 = vpack.c.bf16 %v5364_v61, %v5362_v28  ;;  %v4383_v51 = vsel %vm432_vm4, %v17039_v20, %v8874_v62  ;;  %v17048_v28 = vld [vmem:[#allocation5_spill] sm:$0xff] }
 0x361   : > { %v16273_v8 = vrot.slane %v14533_v27, 7  ;;  %v14562_v31 = vsel %vm4425_vm8, %v4384_v60, %v8895_v56  ;;  %v8930_v41 = vunpack.i.h.bf16 %v13986_v34  ;;  %v14566_v0 = vsel %vm4425_vm8, %v4383_v51, %v8894_v42  ;;  %v17051_v60 = vld [vmem:[#allocation56_spill] sm:$0xff]  ;;  %v17053_v20 = vld [vmem:[#allocation97_spill] sm:$0xff] }
 0x362   : > { %9372 = vrot.lane.b32.xlu1 %v17038_v18, %s9756_s16  ;;  %v4535_v44 = vrot.slane %v4434_v47, 7  ;;  %v8935_v16 = vunpack.i.h.bf16 %v17040_v14  ;;  %7855 = vmatprep.mubr.msk.bf16.mxu1 %vm5466_vm9, %v5443_v36  ;;  %v14570_v43 = vpop.permute.xlu1 %9087  ;;  %v17042_v62 = vrot.slane %v14442_v40, 7  ;;  %v17043_v56 = vrot.slane %v17027_v24, 7  ;;  %v14606_v24 = vld [vmem:[#allocation3 + $0x230] sm:$0xff] }
 0x363   : > { %9377 = vrot.lane.b32.xlu0 %v17041_v52, %s9756_s16  ;;  %v4527_v34 = vrot.slane %v4429_v57, 7  ;;  %v8934_v42 = vunpack.i.l.bf16 %v17040_v14  ;;  %7856 = vmatmul.mubr.msk.bf16.gmra.mrb[28].mxu1 %vm5466_vm9, %v5444_v9  ;;  %v17045_v12 = vrot.slane %v14383_v59, 2  ;;  %v17049_v21 = vrot.slane %v17048_v28, 7  ;;  %v9108_v9 = vpop.permute.xlu0 %9107 }
 0x364   : > { %v14579_v48 = vsel %vm1292_vm5, %v17043_v56, %v17042_v62  ;;  %v17047_v47 = vmov %v17043_v56  ;;  %v14597_v36 = vsel %vm432_vm4, %v17051_v60, %v8900_v45  ;;  %v4386_v57 = vsel %vm432_vm4, %v14132_v22, %v8920_v38 }
 0x365   : > { %17044 = vst [vmem:[#allocation62_spill] sm:$0xff] %v14579_v48  ;;  %v14586_v61 = vpack.i.bf16 %v17045_v12, %v14460_v3  ;;  %v14593_v40 = vsel %vm1292_vm5, %v17049_v21, %v17047_v47  ;;  %v16274_v18 = vrot.slane %v14562_v31, 7  ;;  %v17052_v3 = vld [vmem:[#allocation8_spill] sm:$0xff]  ;;  %v17055_v14 = vrot.slane %v14315_v11, 2 }
 0x366   : > { %17050 = vst [vmem:[#allocation89_spill] sm:$0xff] %v14593_v40  ;;  %v17054_v51 = vpack.i.bf16 %v17052_v3, %v17053_v20  ;;  %v14616_v45 = vsel %vm1292_vm5, %v4527_v34, %v16273_v8  ;;  %v14620_v38 = vsel %vm4425_vm8, %v4386_v57, %v8930_v41  ;;  %v14626_v56 = vsel %vm432_vm4, %v14180_v55, %v8935_v16  ;;  %v9093_v12 = vpop.permute.xlu1 %9092  ;;  %v17058_v34 = vld [vmem:[#allocation52_spill] sm:$0xff]  ;;  %v14661_v8 = vld [vmem:[#allocation3 + $0x148] sm:$0xff] }
 0x367   : > { %17046 = vst [vmem:[#allocation87_spill] sm:$0xff] %v14586_v61  ;;  %v14611_v52 = vpack.i.bf16 %v14466_v2, %v17055_v14  ;;  %17057 = vst [vmem:[#allocation93_spill] sm:$0xff] %v14616_v45  ;;  %v9085_v11 = vunpack.i.h.bf16 %v14527_v53  ;;  %v9089_v2 = vunpack.i.l.bf16 %v14570_v43  ;;  %9387 = vrot.lane.b32.xlu0 %v17058_v34, %s9755_s28  ;;  %v14635_v41 = vsel %vm1292_vm5, %v16274_v18, %v4535_v44  ;;  %v14642_v16 = vld [vmem:[#allocation3 + $0x140] sm:$0xff]  ;;  %v14675_v45 = vld [vmem:[#allocation3 + $0x130] sm:$0xff] }
 0x368   : > { %9382 = vrot.lane.b32.xlu1 %v17054_v51, %s9756_s16  ;;  %17059 = vst [vmem:[#allocation11_spill] sm:$0xff] %v14635_v41  ;;  %v14639_v47 = vsel %vm432_vm4, %v14136_v33, %v8934_v42  ;;  %v8960_v55 = vunpack.i.h.bf16 %v14075_v10  ;;  %v9094_v28 = vunpack.i.l.bf16 %v9093_v12  ;;  %v8959_v60 = vunpack.i.l.bf16 %v14075_v10  ;;  %v14648_v44 = vld [vmem:[#allocation3 + $0x160] sm:$0xff]  ;;  %v14650_v51 = vpop.permute.xlu0 %9112  ;;  %v17060_v33 = vld [vmem:[#allocation21_spill] sm:$0xff] }
 0x369   : > { %17056 = vst [vmem:[#allocation86_spill] sm:$0xff] %v14611_v52  ;;  %v8955_v57 = vunpack.i.h.bf16 %v14098_v50  ;;  %v9084_v3 = vunpack.i.l.bf16 %v14527_v53  ;;  %v9095_v20 = vunpack.i.h.bf16 %v9093_v12  ;;  %v8954_v42 = vunpack.i.l.bf16 %v14098_v50  ;;  %v17061_v50 = vld [vmem:[#allocation9_spill] sm:$0xff] }
 0x36a   : > { %v8975_v14 = vunpack.i.h.bf16 %v14158_v29  ;;  %v9110_v34 = vunpack.i.h.bf16 %v9108_v9  ;;  %v9115_v62 = vunpack.i.h.bf16 %v14650_v51  ;;  %v8974_v10 = vunpack.i.l.bf16 %v14158_v29 }
 0x36b   : > { %v5208_v53 = vsel %vm432_vm4, %v14642_v16, %v9085_v11  ;;  %v9090_v12 = vunpack.i.h.bf16 %v14570_v43  ;;  %v5209_v22 = vsel %vm432_vm4, %v14661_v8, %v9089_v2  ;;  %9397 = vrot.lane.b32.xlu0 %v17061_v50, %s9755_s28  ;;  %v9075_v11 = vunpack.i.h.bf16 %v14500_v39  ;;  %v14673_v43 = vld [vmem:[#allocation3 + $0x120] sm:$0xff] }
 0x36c   : > { %9392 = vrot.lane.b32.xlu1 %v17060_v33, %s9755_s28  ;;  %v9103_v33 = vpop.permute.xlu1 %9102  ;;  %v5256_v18 = vsel %vm4425_vm8, %v5208_v53, %v9094_v28  ;;  %v14670_v21 = vsel %vm432_vm4, %v14648_v44, %v9115_v62  ;;  %v5207_v2 = vsel %vm432_vm4, %v14675_v45, %v9084_v3  ;;  %v9109_v40 = vunpack.i.l.bf16 %v9108_v9  ;;  %v14680_v48 = vpop.permute.xlu0 %9117  ;;  %v14685_v28 = vld [vmem:[#allocation3 + $0x128] sm:$0xff]  ;;  %v14692_v9 = vld [vmem:[#allocation3 + $0x150] sm:$0xff] }
 0x36d   : > { %17062 = vst [vmem:[#allocation22_spill] sm:$0xff] %v14670_v21  ;;  %v9105_v29 = vunpack.i.h.bf16 %v9103_v33  ;;  %v9104_v52 = vunpack.i.l.bf16 %v9103_v33  ;;  %v5257_v50 = vsel %vm4425_vm8, %v5209_v22, %v9095_v20  ;;  %v5255_v62 = vsel %vm4425_vm8, %v5207_v2, %v9110_v34 }
 0x36e   : > { %v9119_v3 = vunpack.i.l.bf16 %v14680_v48  ;;  %v5210_v22 = vsel %vm432_vm4, %v14692_v9, %v9090_v12  ;;  %v5370_v20 = vrot.slane %v5256_v18, 7  ;;  %v4388_v61 = vsel %vm432_vm4, %v14153_v15, %v8960_v55 }
 0x36f   : > { %v5206_v39 = vsel %vm432_vm4, %v14685_v28, %v9105_v29  ;;  %v5205_v53 = vsel %vm432_vm4, %v14673_v43, %v9104_v52  ;;  %9407 = vrot.lane.b32.xlu0 %v14065_v19, %s9756_s16  ;;  %v5371_v29 = vrot.slane %v5257_v50, 7  ;;  %v5368_v12 = vrot.slane %v5255_v62, 7 }
 0x370   : > { %9402 = vrot.lane.b32.xlu1 %v14061_v13, %s9756_s16  ;;  %v5253_v13 = vsel %vm4425_vm8, %v5205_v53, %v9075_v11  ;;  %v5254_v34 = vsel %vm4425_vm8, %v5206_v39, %v9109_v40  ;;  %v14698_v33 = vpop.permute.xlu1 %9132  ;;  %v5258_v21 = vsel %vm4425_vm8, %v5210_v22, %v9119_v3  ;;  %v3897_v11 = vld [vmem:[#allocation3 + $0x180] sm:$0xff]  ;;  %v14705_v53 = vpop.permute.xlu0 %9122  ;;  %v17065_v19 = vrot.slane %v14606_v24, 1 }
 0x371   : > { %v5365_v2 = vrot.slane %v5253_v13, 7  ;;  %v5366_v52 = vrot.slane %v5254_v34, 7  ;;  %v5373_v18 = vrot.slane %v5258_v21, 7  ;;  %v17063_v40 = vld [vmem:[#allocation40_spill] sm:$0xff]  ;;  %v17066_v50 = vrot.slane %v14383_v59, 1 }
 0x372   : > { %v17064_v39 = vpack.i.bf16 %v17063_v40, %v13521_v26  ;;  %v4387_v15 = vsel %vm432_vm4, %v14146_v7, %v8959_v60  ;;  %v14720_v55 = vsel %vm4425_vm8, %v14626_v56, %v8955_v57  ;;  %v9124_v21 = vunpack.i.l.bf16 %v14705_v53  ;;  %v9668_v56 = vld [vmem:[%s9923_s26] sm:$0xff]  ;;  %v9669_v60 = vld [vmem:[%s9923_s26 + $0x8] sm:$0xff] }
 0x373   : > { %v6045_v3 = vsel %vm714_vm2, %v17066_v50, %v17065_v19  ;;  %v5367_v62 = vsel %vm1292_vm5, %v5365_v2, %v5366_v52  ;;  %v14726_v26 = vsel %vm4425_vm8, %v14639_v47, %v8954_v42  ;;  %9422 = vrot.lane.b32.xlu0 %v14090_v54, %s9755_s28  ;;  %v5369_v13 = vsel %vm1292_vm5, %v5366_v52, %v5368_v12  ;;  %v5965_v2 = vld [vmem:[#allocation3 + $0x238] sm:$0x1] }
 0x374   : > { %9412 = vrot.lane.b32.xlu1 %v17064_v39, %s9756_s16  ;;  %v14728_v22 = vpop.permute.xlu1 %9137  ;;  %v5374_v7 = vsel %vm1292_vm5, %v5371_v29, %v5373_v18  ;;  %v7037_v57 = vpack.c.bf16 %v9669_v60, %v9668_v56  ;;  %v14737_v34 = vsel %vm4425_vm8, %v4387_v15, %v8974_v10  ;;  %v14740_v47 = vsel %vm4425_vm8, %v4388_v61, %v8975_v14  ;;  %v9128_v12 = vpop.permute.xlu0 %9127  ;;  %v17068_v18 = vld [vmem:[#allocation46_spill] sm:$0xff]  ;;  %v9670_v61 = vld [vmem:[%s9923_s26 + $0x18] sm:$0xff]  ;;  %v17070_v15 = vld [vmem:[#allocation108_spill] sm:$0xff] }
 0x375   : > { %v14743_v42 = vsel %vm432_vm4, %v3897_v11, %v9124_v21  ;;  %v5372_v54 = vsel %vm1292_vm5, %v5370_v20, %v5371_v29  ;;  %v5445_v52 = vpack.c.bf16 %v5369_v13, %v5367_v62  ;;  %v17069_v40 = vpack.i.bf16 %v14044_v49, %v17068_v18  ;;  %v9671_v14 = vld [vmem:[%s9923_s26 + $0x10] sm:$0xff]  ;;  %v17074_v56 = vld [vmem:[#allocation15_spill] sm:$0xff] }
 0x376   : > { %17067 = vst [vmem:[#allocation25_spill] sm:$0xff] %v14743_v42  ;;  %v5446_v39 = vpack.c.bf16 %v5374_v7, %v5372_v54  ;;  %v6282_v10 = vrot.slane %v14606_v24, 2  ;;  %7949 = vmatprep.mubr.msk.bf16.mxu0 %vm388_vm0, %v7037_v57  ;;  %v7038_v19 = vpack.c.bf16 %v9670_v61, %v9671_v14  ;;  %v8980_v20 = vunpack.i.h.bf16 %v17070_v15  ;;  %v17076_v14 = vld [vmem:[#allocation105_spill] sm:$0xff] }
 0x377   : > { %v9130_v29 = vunpack.i.h.bf16 %v9128_v12  ;;  %v17071_v21 = vrot.slane %v14562_v31, 7  ;;  %v17072_v62 = vrot.slane %v14566_v0, 7  ;;  %v9134_v13 = vunpack.i.l.bf16 %v14698_v33  ;;  %7859 = vmatprep.mubr.msk.bf16.mxu1 %vm5466_vm9, %v5445_v52  ;;  %9432 = vrot.lane.b32.xlu0 %v17074_v56, %s9755_s28  ;;  %v14797_v56 = vld [vmem:[#allocation3 + $0x188] sm:$0xff] }
 0x378   : > { %9417 = vrot.lane.b32.xlu1 %v17069_v40, %s9756_s16  ;;  %v14765_v7 = vpop.permute.xlu1 %9142  ;;  %v17075_v60 = vrot.slane %v14606_v24, 1  ;;  %v6284_v54 = vrot.slane %v5965_v2, 2  ;;  %7860 = vmatmul.mubr.msk.bf16.gmra.mrb[32].mxu1 %vm5466_vm9, %v5446_v39  ;;  %v9140_v24 = vunpack.i.h.bf16 %v14728_v22  ;;  %v9129_v2 = vunpack.i.l.bf16 %v9128_v12  ;;  %v9153_v61 = vpop.permute.xlu0 %9152  ;;  %v14813_v40 = vld [vmem:[#allocation3 + $0x170] sm:$0xff] }
 0x379   : > { %v14761_v49 = vsel %vm1292_vm5, %v17072_v62, %v17071_v21  ;;  %7950 = vmatmul.mubr.msk.bf16.vlgmr.msra.gmra.mrb[32].mxu0 %vm388_vm0, %v7038_v19  ;;  %v17077_v21 = vrot.slane %v14383_v59, 2  ;;  %v14792_v39 = vsel %vm432_vm4, %v14361_v46, %v8980_v20  ;;  %v9155_v12 = vunpack.i.h.bf16 %v9153_v61  ;;  %v9673_v20 = vld [vmem:[%s9923_s26 + $0x20] sm:$0xff]  ;;  %v9676_v19 = vld [vmem:[%s9923_s26 + $0x30] sm:$0xff] }
 0x37a   : > { %17073 = vst [vmem:[#allocation10_spill] sm:$0xff] %v14761_v49  ;;  %v14771_v57 = vpack.i.bf16 %v17075_v60, %v6045_v3  ;;  %v5214_v3 = vsel %vm432_vm4, %v3897_v11, %v9130_v29  ;;  %v9139_v11 = vunpack.i.l.bf16 %v14728_v22  ;;  %v9135_v29 = vunpack.i.h.bf16 %v14698_v33  ;;  %v9675_v33 = vld [vmem:[%s9923_s26 + $0x38] sm:$0xff] }
 0x37b   : > { %v14788_v62 = vsel %vm923_vm3, %v17077_v21, %v6282_v10  ;;  %v5215_v59 = vsel %vm432_vm4, %v14797_v56, %v9134_v13  ;;  %v14804_v46 = vsel %vm923_vm3, %v6282_v10, %v6284_v54  ;;  %v9674_v21 = vld [vmem:[%s9923_s26 + $0x28] sm:$0xff]  ;;  %v7040_v52 = vpack.c.bf16 %v9675_v33, %v9676_v19 }
 0x37c   : > { %9427 = vrot.lane.b32.xlu1 %v17076_v14, %s9755_s28  ;;  %17078 = vst [vmem:[#allocation95_spill] sm:$0xff] %v14788_v62  ;;  %v9148_v60 = vpop.permute.xlu1 %9147  ;;  %v17079_v14 = vld [vmem:[#allocation63_spill] sm:$0xff]  ;;  %17080 = vst [vmem:[#allocation91_spill] sm:$0xff] %v14804_v46  ;;  %v7039_v31 = vpack.c.bf16 %v9674_v21, %v9673_v20  ;;  %v5262_v22 = vsel %vm4425_vm8, %v5214_v3, %v9139_v11  ;;  %v9120_v50 = vunpack.i.h.bf16 %v14680_v48  ;;  %v9154_v54 = vunpack.i.l.bf16 %v9153_v61  ;;  %v17081_v20 = vld [vmem:[#allocation37_spill] sm:$0xff] }
 0x37d   : > { %9442 = vrot.lane.b32.xlu0 %v17079_v14, %s9756_s16  ;;  %v9150_v18 = vunpack.i.h.bf16 %v9148_v60  ;;  %v9149_v0 = vunpack.i.l.bf16 %v9148_v60  ;;  %v5263_v13 = vsel %vm4425_vm8, %v5215_v59, %v9140_v24  ;;  %v5213_v10 = vsel %vm432_vm4, %v14813_v40, %v9129_v2  ;;  %v14817_v14 = vpop.permute.xlu0 %9162  ;;  %v14823_v19 = vld [vmem:[#allocation3 + $0x168] sm:$0xff]  ;;  %v14830_v61 = vld [vmem:[#allocation3 + $0x190] sm:$0xff]  ;;  %v14836_v60 = vld [vmem:[#allocation3 + $0x1a0] sm:$0xff] }
 0x37e   : > { %7953 = vmatprep.mubr.msk.bf16.mxu0 %vm388_vm0, %v7039_v31  ;;  %v5261_v3 = vsel %vm4425_vm8, %v5213_v10, %v9155_v12  ;;  %v9164_v2 = vunpack.i.l.bf16 %v14817_v14  ;;  %v5216_v11 = vsel %vm432_vm4, %v14830_v61, %v9135_v29  ;;  %v5380_v59 = vrot.slane %v5262_v22, 7 }
 0x37f   : > { %v5212_v48 = vsel %vm432_vm4, %v14823_v19, %v9150_v18  ;;  %v5211_v24 = vsel %vm432_vm4, %v14648_v44, %v9149_v0  ;;  %v17082_v18 = vld [vmem:[#allocation45_spill] sm:$0xff]  ;;  %v5381_v29 = vrot.slane %v5263_v13, 7  ;;  %v5378_v22 = vrot.slane %v5261_v3, 7 }
 0x380   : > { %9437 = vrot.lane.b32.xlu1 %v17081_v20, %s9756_s16  ;;  %v5260_v31 = vsel %vm4425_vm8, %v5212_v48, %v9154_v54  ;;  %v5259_v12 = vsel %vm4425_vm8, %v5211_v24, %v9120_v50  ;;  %v14838_v21 = vpop.permute.xlu1 %9157  ;;  %v5264_v33 = vsel %vm4425_vm8, %v5216_v11, %v9164_v2  ;;  %v17083_v20 = vld [vmem:[#allocation102_spill] sm:$0xff]  ;;  %v17084_v48 = vld [vmem:[#allocation101_spill] sm:$0xff]  ;;  %v17087_v2 = vrot.slane %v14620_v38, 7 }
 0x381   : > { %9452 = vrot.lane.b32.xlu0 %v17082_v18, %s9755_s28  ;;  %v5376_v44 = vrot.slane %v5260_v31, 7  ;;  %v5375_v0 = vrot.slane %v5259_v12, 7  ;;  %v9160_v10 = vunpack.i.h.bf16 %v14838_v21  ;;  %7954 = vmatmul.mubr.msk.bf16.gmra.mrb[36].mxu0 %vm388_vm0, %v7040_v52  ;;  %v5383_v50 = vrot.slane %v5264_v33, 7  ;;  %v14845_v54 = vpop.permute.xlu0 %9172  ;;  %v17089_v52 = vld [vmem:[#allocation19_spill] sm:$0xff] }
 0x382   : > { %v17085_v24 = vpack.i.bf16 %v17083_v20, %v17084_v48  ;;  %v17086_v31 = vrot.slane %v14737_v34, 7  ;;  %v8990_v12 = vunpack.i.h.bf16 %v17089_v52  ;;  %v17091_v18 = vrot.slane %v14740_v47, 7  ;;  %v9681_v47 = vld [vmem:[%s9923_s26 + $0x48] sm:$0xff] }
 0x383   : > { %v14861_v13 = vsel %vm432_vm4, %v14836_v60, %v9160_v10  ;;  %v5377_v3 = vsel %vm1292_vm5, %v5375_v0, %v5376_v44  ;;  %v8989_v38 = vunpack.i.l.bf16 %v17089_v52  ;;  %v5384_v10 = vsel %vm1292_vm5, %v5381_v29, %v5383_v50  ;;  %v9680_v0 = vld [vmem:[%s9923_s26 + $0x40] sm:$0xff]  ;;  %v17095_v34 = vld [vmem:[#allocation17_spill] sm:$0xff] }
 0x384   : > { %9447 = vrot.lane.b32.xlu1 %v17085_v24, %s9756_s16  ;;  %v14856_v11 = vsel %vm1292_vm5, %v17087_v2, %v17086_v31  ;;  %17090 = vst [vmem:[#allocation99_spill] sm:$0xff] %v14861_v13  ;;  %v17092_v33 = vmov %v17086_v31  ;;  %v14872_v48 = vpop.permute.xlu1 %9167  ;;  %v17094_v24 = vld [vmem:[#allocation70_spill] sm:$0xff]  ;;  %v5379_v31 = vsel %vm1292_vm5, %v5376_v44, %v5378_v22  ;;  %v7041_v2 = vpack.c.bf16 %v9681_v47, %v9680_v0  ;;  %v17096_v22 = vld [vmem:[#allocation41_spill] sm:$0xff]  ;;  %v9682_v0 = vld [vmem:[%s9923_s26 + $0x58] sm:$0xff] }
 0x385   : > { %17088 = vst [vmem:[#allocation92_spill] sm:$0xff] %v14856_v11  ;;  %v14869_v20 = vsel %vm1292_vm5, %v17092_v33, %v17091_v18  ;;  %9462 = vrot.lane.b32.xlu0 %v17094_v24, %s9755_s28  ;;  %v9010_v13 = vunpack.i.h.bf16 %v17095_v34  ;;  %v9009_v18 = vunpack.i.l.bf16 %v17095_v34  ;;  %v9169_v52 = vunpack.i.l.bf16 %v14872_v48  ;;  %v4705_v24 = vld [vmem:[#allocation3 + $0x1c0] sm:$0xff]  ;;  %v14885_v44 = vpop.permute.xlu0 %9187  ;;  %v9683_v47 = vld [vmem:[%s9923_s26 + $0x50] sm:$0xff] }
 0x386   : > { %17093 = vst [vmem:[#allocation27_spill] sm:$0xff] %v14869_v20  ;;  %v5382_v33 = vsel %vm1292_vm5, %v5380_v59, %v5381_v29  ;;  %v9025_v42 = vunpack.i.h.bf16 %v14329_v35  ;;  %v5447_v49 = vpack.c.bf16 %v5379_v31, %v5377_v3  ;;  %7957 = vmatprep.mubr.msk.bf16.mxu0 %vm388_vm0, %v7041_v2  ;;  %v7042_v41 = vpack.c.bf16 %v9682_v0, %v9683_v47  ;;  %v17099_v31 = vld [vmem:[#allocation103_spill] sm:$0xff]  ;;  %v14982_v11 = vld [vmem:[#allocation3 + $0x1e0] sm:$0xff]  ;;  %v15000_v20 = vld [vmem:[#allocation3 + $0x1c8] sm:$0xff] }
 0x387   : > { %v5448_v50 = vpack.c.bf16 %v5384_v10, %v5382_v33  ;;  %v9024_v34 = vunpack.i.l.bf16 %v14329_v35  ;;  %v9035_v27 = vunpack.i.h.bf16 %v14398_v63  ;;  %v9034_v59 = vunpack.i.l.bf16 %v14398_v63  ;;  %v17100_v35 = vld [vmem:[#allocation43_spill] sm:$0xff] }
 0x388   : > { %9457 = vrot.lane.b32.xlu1 %v17096_v22, %s9755_s28  ;;  %v14896_v29 = vsel %vm432_vm4, %v4705_v24, %v9169_v52  ;;  %v17098_v3 = vunpack.i.l.bf16 %v17070_v15  ;;  %v9055_v10 = vunpack.i.h.bf16 %v14445_v17  ;;  %7863 = vmatprep.mubr.msk.bf16.mxu1 %vm5466_vm9, %v5447_v49  ;;  %v14906_v2 = vpop.permute.xlu1 %9177  ;;  %v14916_v15 = vsel %vm432_vm4, %v14355_v23, %v8990_v12  ;;  %v17101_v33 = vld [vmem:[#allocation7_spill] sm:$0xff]  ;;  %v17106_v12 = vld [vmem:[#allocation85_spill] sm:$0xff]  ;;  %v9686_v52 = vld [vmem:[%s9923_s26 + $0x70] sm:$0xff] }
 0x389   : > { %17097 = vst [vmem:[#allocation6_spill] sm:$0xff] %v14896_v29  ;;  %9472 = vrot.lane.b32.xlu0 %v17100_v35, %s9756_s16  ;;  %v14920_v0 = vsel %vm432_vm4, %v17101_v33, %v8989_v38  ;;  %v9054_v49 = vunpack.i.l.bf16 %v14445_v17  ;;  %7864 = vmatmul.mubr.msk.bf16.gmra.mrb[36].mxu1 %vm5466_vm9, %v5448_v50  ;;  %v17102_v47 = vrot.slane %v14720_v55, 7  ;;  %v17105_v35 = vld [vmem:[#allocation23_spill] sm:$0xff]  ;;  %v14938_v17 = vsel %vm432_vm4, %v17106_v12, %v9009_v18  ;;  %v9198_v50 = vpop.permute.xlu0 %9197  ;;  %v17110_v12 = vld [vmem:[#allocation76_spill] sm:$0xff] }
 0x38a   : > { %v14902_v22 = vsel %vm432_vm4, %v17099_v31, %v17098_v3  ;;  %v17103_v3 = vrot.slane %v14726_v26, 7  ;;  %7958 = vmatmul.mubr.msk.bf16.gmra.mrb[40].mxu0 %vm388_vm0, %v7042_v41  ;;  %v14934_v23 = vsel %vm432_vm4, %v17105_v35, %v9010_v13  ;;  %v14942_v38 = vsel %vm432_vm4, %v14492_v32, %v9025_v42  ;;  %v17107_v33 = vld [vmem:[#allocation107_spill] sm:$0xff] }
 0x38b   : > { %v9070_v26 = vunpack.i.h.bf16 %v14521_v1  ;;  %v17108_v41 = vld [vmem:[#allocation67_spill] sm:$0xff]  ;;  %v14953_v18 = vsel %vm432_vm4, %v14488_v30, %v9035_v27  ;;  %v14957_v32 = vsel %vm432_vm4, %v14473_v5, %v9034_v59  ;;  %v9175_v42 = vunpack.i.h.bf16 %v14845_v54  ;;  %v9684_v30 = vld [vmem:[%s9923_s26 + $0x60] sm:$0xff]  ;;  %v9685_v27 = vld [vmem:[%s9923_s26 + $0x68] sm:$0xff] }
 0x38c   : > { %v14929_v31 = vsel %vm1292_vm5, %v17103_v3, %v17102_v47  ;;  %9467 = vrot.lane.b32.xlu1 %v17107_v33, %s9756_s16  ;;  %v14949_v13 = vsel %vm432_vm4, %v17108_v41, %v9024_v34  ;;  %v14962_v47 = vsel %vm432_vm4, %v14496_v4, %v9055_v10  ;;  %v9174_v3 = vunpack.i.l.bf16 %v14845_v54  ;;  %v9183_v35 = vpop.permute.xlu1 %9182  ;;  %v9687_v4 = vld [vmem:[%s9923_s26 + $0x78] sm:$0xff] }
 0x38d   : > { %17104 = vst [vmem:[#allocation14_spill] sm:$0xff] %v14929_v31  ;;  %17109 = vst [vmem:[#allocation16_spill] sm:$0xff] %v14962_v47  ;;  %v9179_v34 = vunpack.i.l.bf16 %v14906_v2  ;;  %9482 = vrot.lane.b32.xlu0 %v17110_v12, %s9755_s28  ;;  %v7043_v33 = vpack.c.bf16 %v9685_v27, %v9684_v30  ;;  %v14972_v5 = vsel %vm432_vm4, %v14507_v58, %v9054_v49  ;;  %v9185_v59 = vunpack.i.h.bf16 %v9183_v35  ;;  %v14984_v30 = vpop.permute.xlu0 %9202  ;;  %v17113_v58 = vld [vmem:[#allocation106_spill] sm:$0xff]  ;;  %v17114_v49 = vld [vmem:[#allocation35_spill] sm:$0xff] }
 0x38e   : > { %17111 = vst [vmem:[#allocation100_spill] sm:$0xff] %v14972_v5  ;;  %v9184_v41 = vunpack.i.l.bf16 %v9183_v35  ;;  %v7044_v10 = vpack.c.bf16 %v9687_v4, %v9686_v52  ;;  %v14978_v54 = vsel %vm432_vm4, %v14673_v43, %v9070_v26  ;;  %v9069_v63 = vunpack.i.l.bf16 %v14521_v1  ;;  %v14996_v27 = vld [vmem:[#allocation3 + $0x1b0] sm:$0xff] }
 0x38f   : > { %17112 = vst [vmem:[#allocation20_spill] sm:$0xff] %v14978_v54  ;;  %v9180_v12 = vunpack.i.h.bf16 %v14906_v2  ;;  %v9200_v29 = vunpack.i.h.bf16 %v9198_v50  ;;  %v17115_v35 = vpack.i.bf16 %v17113_v58, %v17114_v49  ;;  %7961 = vmatprep.mubr.msk.bf16.mxu0 %vm388_vm0, %v7043_v33  ;;  %v9080_v52 = vunpack.i.h.bf16 %v14540_v25  ;;  %v15014_v54 = vld [vmem:[#allocation3 + $0x1d0] sm:$0xff] }
 0x390   : > { %v9079_v43 = vunpack.i.l.bf16 %v14540_v25  ;;  %v5220_v1 = vsel %vm432_vm4, %v4705_v24, %v9175_v42  ;;  %v9205_v2 = vunpack.i.h.bf16 %v14984_v30  ;;  %v9100_v26 = vunpack.i.h.bf16 %v14554_v6  ;;  %v9193_v49 = vpop.permute.xlu1 %9192  ;;  %v17116_v25 = vld [vmem:[#allocation60_spill] sm:$0xff] }
 0x391   : > { %9477 = vrot.lane.b32.xlu1 %v17115_v35, %s9756_s16  ;;  %v5219_v4 = vsel %vm432_vm4, %v14996_v27, %v9174_v3  ;;  %v5221_v33 = vsel %vm432_vm4, %v15000_v20, %v9179_v34  ;;  %v5268_v58 = vsel %vm4425_vm8, %v5220_v1, %v9184_v41  ;;  %9492 = vrot.lane.b32.xlu0 %v17116_v25, %s9755_s28  ;;  %v9195_v35 = vunpack.i.h.bf16 %v9193_v49  ;;  %v15019_v1 = vpop.permute.xlu0 %9207 }
 0x392   : > { %v5269_v24 = vsel %vm4425_vm8, %v5221_v33, %v9185_v59  ;;  %v15010_v42 = vsel %vm432_vm4, %v14982_v11, %v9205_v2  ;;  %v9194_v5 = vunpack.i.l.bf16 %v9193_v49  ;;  %7962 = vmatmul.mubr.msk.bf16.gmra.mrb[44].mxu0 %vm388_vm0, %v7044_v10  ;;  %v9165_v3 = vunpack.i.h.bf16 %v14817_v14  ;;  %v17118_v2 = vld [vmem:[#allocation24_spill] sm:$0xff]  ;;  %v15023_v10 = vld [vmem:[#allocation3 + $0x1a8] sm:$0xff] }
 0x393   : > { %17117 = vst [vmem:[#allocation18_spill] sm:$0xff] %v15010_v42  ;;  %v5222_v34 = vsel %vm432_vm4, %v15014_v54, %v9180_v12  ;;  %v5267_v41 = vsel %vm4425_vm8, %v5219_v4, %v9200_v29  ;;  %v9199_v59 = vunpack.i.l.bf16 %v9198_v50  ;;  %v5390_v33 = vrot.slane %v5268_v58, 7  ;;  %v17119_v58 = vld [vmem:[#allocation78_spill] sm:$0xff]  ;;  %v9693_v42 = vld [vmem:[%s9923_s26 + $0x88] sm:$0xff] }
 0x394   : > { %v5218_v14 = vsel %vm432_vm4, %v15023_v10, %v9195_v35  ;;  %v5217_v12 = vsel %vm432_vm4, %v14836_v60, %v9194_v5  ;;  %v9209_v49 = vunpack.i.l.bf16 %v15019_v1  ;;  %v5391_v29 = vrot.slane %v5269_v24, 7  ;;  %v15032_v25 = vpop.permute.xlu1 %9217  ;;  %v9694_v60 = vld [vmem:[%s9923_s26 + $0x98] sm:$0xff]  ;;  %v9695_v5 = vld [vmem:[%s9923_s26 + $0x90] sm:$0xff] }
 0x395   : > { %9487 = vrot.lane.b32.xlu1 %v17118_v2, %s9755_s28  ;;  %v5265_v50 = vsel %vm4425_vm8, %v5217_v12, %v9165_v3  ;;  %v5266_v4 = vsel %vm4425_vm8, %v5218_v14, %v9199_v59  ;;  %9502 = vrot.lane.b32.xlu0 %v17119_v58, %s9756_s16  ;;  %v9692_v2 = vld [vmem:[%s9923_s26 + $0x80] sm:$0xff]  ;;  %v7046_v46 = vpack.c.bf16 %v9694_v60, %v9695_v5  ;;  %v5388_v59 = vrot.slane %v5267_v41, 7  ;;  %v15049_v12 = vpop.permute.xlu0 %9212 }
 0x396   : > { %v7045_v47 = vpack.c.bf16 %v9693_v42, %v9692_v2  ;;  %v5385_v31 = vrot.slane %v5265_v50, 7  ;;  %v5386_v35 = vrot.slane %v5266_v4, 7  ;;  %v5270_v62 = vsel %vm4425_vm8, %v5222_v34, %v9209_v49  ;;  %v17120_v42 = vld [vmem:[#allocation79_spill] sm:$0xff]  ;;  %v4713_v41 = vld [vmem:[#allocation3 + $0x200] sm:$0xff] }
 0x397   : > { %v15043_v24 = vsel %vm432_vm4, %v14515_v37, %v9069_v63  ;;  %v15047_v3 = vsel %vm432_vm4, %v14661_v8, %v9080_v52  ;;  %v5393_v14 = vrot.slane %v5270_v62, 7  ;;  %v15056_v34 = vsel %vm432_vm4, %v14642_v16, %v9079_v43  ;;  %v17122_v2 = vld [vmem:[#allocation71_spill] sm:$0xff]  ;;  %v15083_v5 = vld [vmem:[%s16009_s5 + $0x20] ss:$0 sps:$4 sm:$0xff]  }
 0x398   : > { %7965 = vmatprep.mubr.msk.bf16.mxu0 %vm388_vm0, %v7045_v47  ;;  %v9099_v37 = vunpack.i.l.bf16 %v14554_v6  ;;  %v9215_v63 = vunpack.i.h.bf16 %v15049_v12  ;;  %v5387_v8 = vsel %vm1292_vm5, %v5385_v31, %v5386_v35  ;;  %v15063_v62 = vsel %vm432_vm4, %v14675_v45, %v9100_v26  ;;  %v9223_v49 = vpop.permute.xlu1 %9222  ;;  %v17121_v47 = vld [vmem:[#allocation29_spill] sm:$0xff] }
 0x399   : > { %9497 = vrot.lane.b32.xlu1 %v17120_v42, %s9756_s16  ;;  %v9114_v52 = vunpack.i.l.bf16 %v14650_v51  ;;  %9512 = vrot.lane.b32.xlu0 %v17121_v47, %s9755_s28  ;;  %v5389_v16 = vsel %vm1292_vm5, %v5386_v35, %v5388_v59  ;;  %v5394_v43 = vsel %vm1292_vm5, %v5391_v29, %v5393_v14  ;;  %v9125_v6 = vunpack.i.h.bf16 %v14705_v53  ;;  %v9228_v58 = vpop.permute.xlu0 %9227  ;;  %v17123_v35 = vld [vmem:[#allocation74_spill] sm:$0xff] }
 0x39a   : > { %v9145_v50 = vunpack.i.h.bf16 %v14765_v7  ;;  %v9220_v31 = vunpack.i.h.bf16 %v15032_v25  ;;  %v5392_v45 = vsel %vm1292_vm5, %v5390_v33, %v5391_v29  ;;  %7966 = vmatmul.mubr.msk.bf16.gmra.mrb[48].mxu0 %vm388_vm0, %v7046_v46  ;;  %v9219_v51 = vunpack.i.l.bf16 %v15032_v25 }
 0x39b   : > { %v9224_v26 = vunpack.i.l.bf16 %v9223_v49  ;;  %v5449_v4 = vpack.c.bf16 %v5389_v16, %v5387_v8  ;;  %v17124_v60 = vpack.i.bf16 %v17122_v2, %v17123_v35  ;;  %v5450_v53 = vpack.c.bf16 %v5394_v43, %v5392_v45  ;;  %v17125_v8 = vld [vmem:[#allocation64_spill] sm:$0xff]  ;;  %v9700_v43 = vld [vmem:[#allocation3 + $0x210] sm:$0xff] }
 0x39c   : > { %v15087_v46 = vsel %vm432_vm4, %v14685_v28, %v9099_v37  ;;  %v5226_v33 = vsel %vm432_vm4, %v4713_v41, %v9215_v63  ;;  %v9225_v29 = vunpack.i.h.bf16 %v9223_v49  ;;  %v9229_v25 = vunpack.i.l.bf16 %v9228_v58  ;;  %v15096_v47 = vpop.permute.xlu1 %9232  ;;  %v9696_v28 = vld [vmem:[%s9923_s26 + $0xa0] sm:$0xff]  ;;  %v9697_v37 = vld [vmem:[%s9923_s26 + $0xa8] sm:$0xff]  ;;  %v9699_v49 = vld [vmem:[%s9923_s26 + $0xb8] sm:$0xff] }
 0x39d   : > { %9507 = vrot.lane.b32.xlu1 %v17124_v60, %s9756_s16  ;;  %v9144_v59 = vunpack.i.l.bf16 %v14765_v7  ;;  %v9159_v14 = vunpack.i.l.bf16 %v14838_v21  ;;  %v9214_v42 = vunpack.i.l.bf16 %v15049_v12  ;;  %7867 = vmatprep.mubr.msk.bf16.mxu1 %vm5466_vm9, %v5449_v4  ;;  %v7047_v63 = vpack.c.bf16 %v9697_v37, %v9696_v28  ;;  %v9698_v12 = vld [vmem:[%s9923_s26 + $0xb0] sm:$0xff]  ;;  %v9701_v4 = vld [vmem:[#allocation3 + $0x208] sm:$0xff] }
 0x39e   : > { %9522 = vrot.lane.b32.xlu0 %v17125_v8, %s9755_s28  ;;  %v15102_v41 = vsel %vm432_vm4, %v14692_v9, %v9114_v52  ;;  %v15106_v7 = vsel %vm432_vm4, %v14797_v56, %v9125_v6  ;;  %v15110_v21 = vsel %vm432_vm4, %v14813_v40, %v9145_v50  ;;  %7868 = vmatmul.mubr.msk.bf16.gmra.mrb[40].mxu1 %vm5466_vm9, %v5450_v53  ;;  %v9248_v56 = vpop.permute.xlu0 %9247  ;;  %v17126_v6 = vld [vmem:[#allocation26_spill] sm:$0xff]  ;;  %v15124_v40 = vsel %vm5515_vm7, %v15083_v5, 0 }
 0x39f   : > { %v7048_v16 = vpack.c.bf16 %v9699_v49, %v9698_v12  ;;  %v5228_v45 = vsel %vm432_vm4, %v9700_v43, %v9220_v31  ;;  %v5227_v9 = vsel %vm432_vm4, %v9701_v4, %v9219_v51  ;;  %v15118_v52 = vsel %vm4425_vm8, %v5226_v33, %v9224_v26  ;;  %7969 = vmatprep.mubr.msk.bf16.mxu0 %vm388_vm0, %v7047_v63  ;;  %v15138_v53 = vld [vmem:[#allocation3 + $0x1f0] sm:$0xff]  ;;  %v17128_v63 = vld [vmem:[#allocation83_spill] sm:$0xff]  ;;  %v15152_v49 = vld [vmem:[#allocation3 + $0x1e8] sm:$0xff] }
 0x3a0   : > { %v5275_v50 = vsel %vm4425_vm8, %v5227_v9, %v9225_v29  ;;  %v9230_v2 = vunpack.i.h.bf16 %v9228_v58  ;;  %v5276_v31 = vsel %vm4425_vm8, %v5228_v45, %v9229_v25  ;;  %v9250_v35 = vunpack.i.h.bf16 %v9248_v56  ;;  %v17127_v58 = vld [vmem:[#allocation51_spill] sm:$0xff]  ;;  %v9238_v29 = vpop.permute.xlu1 %9237 }
 0x3a1   : > { %9517 = vrot.lane.b32.xlu1 %v17126_v6, %s9755_s28  ;;  %v15131_v51 = vsel %vm432_vm4, %v14823_v19, %v9144_v59  ;;  %v15135_v26 = vsel %vm432_vm4, %v14830_v61, %v9159_v14  ;;  %v9170_v60 = vunpack.i.h.bf16 %v14872_v48  ;;  %v5225_v33 = vsel %vm432_vm4, %v15138_v53, %v9214_v42  ;;  %v9705_v6 = vld [vmem:[%s9923_s26 + $0xc8] sm:$0xff] }
 0x3a2   : > { %9532 = vrot.lane.b32.xlu0 %v17127_v58, %s9756_s16  ;;  %v9210_v25 = vunpack.i.h.bf16 %v15019_v1  ;;  %v5273_v19 = vsel %vm4425_vm8, %v5225_v33, %v9250_v35  ;;  %v9240_v59 = vunpack.i.h.bf16 %v9238_v29  ;;  %v9239_v8 = vunpack.i.l.bf16 %v9238_v29  ;;  %7970 = vmatmul.mubr.msk.bf16.gmra.mrb[52].mxu0 %vm388_vm0, %v7048_v16  ;;  %v9253_v42 = vpop.permute.xlu0 %9252  ;;  %v9706_v33 = vld [vmem:[%s9923_s26 + $0xd8] sm:$0xff]  ;;  %v9707_v58 = vld [vmem:[%s9923_s26 + $0xd0] sm:$0xff] }
 0x3a3   : > { %v5400_v61 = vrot.slane %v15118_v52, 7  ;;  %v5401_v14 = vrot.slane %v5275_v50, 7  ;;  %v5403_v28 = vrot.slane %v5276_v31, 7  ;;  %v9249_v37 = vunpack.i.l.bf16 %v9248_v56  ;;  %v17129_v52 = vld [vmem:[#allocation13_spill] sm:$0xff]  ;;  %v9704_v56 = vld [vmem:[%s9923_s26 + $0xc0] sm:$0xff] }
 0x3a4   : > { %v4431_v1 = vsel %vm4425_vm8, %v14597_v36, %v9230_v2  ;;  %v5398_v12 = vrot.slane %v5273_v19, 7  ;;  %v5224_v16 = vsel %vm432_vm4, %v15152_v49, %v9240_v59  ;;  %v5223_v43 = vsel %vm432_vm4, %v14982_v11, %v9239_v8  ;;  %v9243_v36 = vpop.permute.xlu1 %9242 }
 0x3a5   : > { %9527 = vrot.lane.b32.xlu1 %v17128_v63, %s9756_s16  ;;  %v5272_v45 = vsel %vm4425_vm8, %v5224_v16, %v9249_v37  ;;  %v5271_v4 = vsel %vm4425_vm8, %v5223_v43, %v9210_v25  ;;  %v9255_v9 = vunpack.i.h.bf16 %v9253_v42  ;;  %v7049_v50 = vpack.c.bf16 %v9705_v6, %v9704_v56  ;;  %v17130_v25 = vld [vmem:[#allocation84_spill] sm:$0xff] }
 0x3a6   : > { %9542 = vrot.lane.b32.xlu0 %v17129_v52, %s9755_s28  ;;  %v5396_v2 = vrot.slane %v5272_v45, 7  ;;  %v5395_v31 = vrot.slane %v5271_v4, 7  ;;  %v9254_v35 = vunpack.i.l.bf16 %v9253_v42  ;;  %v7050_v29 = vpack.c.bf16 %v9706_v33, %v9707_v58  ;;  %v9263_v8 = vpop.permute.xlu0 %9262  ;;  %v17131_v37 = vld [vmem:[#allocation80_spill] sm:$0xff] }
 0x3a7   : > { %v9190_v11 = vunpack.i.h.bf16 %v14885_v44  ;;  %v9245_v19 = vunpack.i.h.bf16 %v9243_v36  ;;  %v9244_v59 = vunpack.i.l.bf16 %v9243_v36  ;;  %v17132_v63 = vpack.i.bf16 %v17130_v25, %v17131_v37  ;;  %7973 = vmatprep.mubr.msk.bf16.mxu0 %vm388_vm0, %v7049_v50  ;;  %v17133_v33 = vld [vmem:[#allocation88_spill] sm:$0xff]  ;;  %v17140_v37 = vld [vmem:[#allocation93_spill] sm:$0xff] }
 0x3a8   : > { %v5404_v16 = vsel %vm1292_vm5, %v5401_v14, %v5403_v28  ;;  %v9189_v43 = vunpack.i.l.bf16 %v14885_v44  ;;  %v4530_v42 = vrot.slane %v4431_v1, 7  ;;  %v5397_v45 = vsel %vm1292_vm5, %v5395_v31, %v5396_v2  ;;  %v9258_v56 = vpop.permute.xlu1 %9257 }
 0x3a9   : > { %9537 = vrot.lane.b32.xlu1 %v17132_v63, %s9756_s16  ;;  %v5399_v4 = vsel %vm1292_vm5, %v5396_v2, %v5398_v12  ;;  %v4441_v52 = vsel %vm4425_vm8, %v14792_v39, %v9245_v19  ;;  %v4440_v36 = vsel %vm4425_vm8, %v14902_v22, %v9244_v59  ;;  %v5402_v6 = vsel %vm1292_vm5, %v5400_v61, %v5401_v14  ;;  %v17137_v19 = vld [vmem:[#allocation62_spill] sm:$0xff]  ;;  %v17138_v59 = vld [vmem:[#allocation89_spill] sm:$0xff] }
 0x3aa   : > { %9552 = vrot.lane.b32.xlu0 %v14771_v57, %s9755_s28  ;;  %v5451_v28 = vpack.c.bf16 %v5399_v4, %v5397_v45  ;;  %v9204_v44 = vunpack.i.l.bf16 %v14984_v30  ;;  %v4443_v1 = vsel %vm4425_vm8, %v14934_v23, %v9255_v9  ;;  %v4442_v12 = vsel %vm4425_vm8, %v14938_v17, %v9254_v35  ;;  %7974 = vmatmul.mubr.msk.bf16.gmra.mrb[56].mxu0 %vm388_vm0, %v7050_v29  ;;  %v9273_v57 = vpop.permute.xlu0 %9272  ;;  %v17134_v17 = vld [vmem:[#allocation49_spill] sm:$0xff] }
 0x3ab   : > { %v5452_v50 = vpack.c.bf16 %v5404_v16, %v5402_v6  ;;  %v9265_v39 = vunpack.i.h.bf16 %v9263_v8  ;;  %v9264_v22 = vunpack.i.l.bf16 %v9263_v8  ;;  %v9260_v2 = vunpack.i.h.bf16 %v9258_v56 }
 0x3ac   : > { %v9259_v31 = vunpack.i.l.bf16 %v9258_v56  ;;  %7871 = vmatprep.mubr.msk.bf16.mxu1 %vm5466_vm9, %v5451_v28  ;;  %v15196_v23 = vsel %vm432_vm4, %v15000_v20, %v9170_v60  ;;  %v17135_v30 = vrot.slane %v17134_v17, 7  ;;  %v4547_v14 = vrot.slane %v4441_v52, 7  ;;  %v17136_v20 = vld [vmem:[#allocation87_spill] sm:$0xff]  ;;  %v9268_v60 = vpop.permute.xlu1 %9267 }
 0x3ad   : > { %9547 = vrot.lane.b32.xlu1 %v17133_v33, %s9755_s28  ;;  %v4545_v9 = vrot.slane %v4440_v36, 7  ;;  %7872 = vmatmul.mubr.msk.bf16.gmra.mrb[44].mxu1 %vm5466_vm9, %v5452_v50  ;;  %v15204_v35 = vsel %vm432_vm4, %v14996_v27, %v9190_v11  ;;  %v15208_v58 = vsel %vm432_vm4, %v15023_v10, %v9189_v43  ;;  %v4550_v48 = vrot.slane %v4443_v1, 7  ;;  %v17146_v33 = vld [vmem:[#allocation14_spill] sm:$0xff] }
 0x3ae   : > { %v4531_v61 = vsel %vm1292_vm5, %v17135_v30, %v4530_v42  ;;  %v4548_v29 = vrot.slane %v4442_v12, 7  ;;  %9562 = vrot.lane.b32.xlu0 %v17136_v20, %s9756_s16  ;;  %v17139_v8 = vpack.c.bf16 %v17137_v19, %v17138_v59  ;;  %v15218_v25 = vsel %vm432_vm4, %v15014_v54, %v9204_v44  ;;  %v9283_v45 = vpop.permute.xlu0 %9282  ;;  %v17141_v54 = vld [vmem:[#allocation86_spill] sm:$0xff]  ;;  %v17148_v20 = vld [vmem:[#allocation20_spill] sm:$0xff]  ;;  %v17149_v59 = vld [vmem:[#allocation11_spill] sm:$0xff] }
 0x3af   : > { %v4445_v27 = vsel %vm4425_vm8, %v14916_v15, %v9260_v2  ;;  %v4444_v10 = vsel %vm4425_vm8, %v14920_v0, %v9259_v31  ;;  %v9275_v11 = vunpack.i.h.bf16 %v9273_v57  ;;  %v4635_v63 = vpack.c.bf16 %v4531_v61, %v17140_v37  ;;  %v17143_v2 = vld [vmem:[#allocation91_spill] sm:$0xff] }
 0x3b0   : > { %7879 = vmatprep.mubr.msk.bf16.mxu1 %vm5466_vm9, %v17139_v8  ;;  %v15227_v16 = vsel %vm4425_vm8, %v14942_v38, %v9265_v39  ;;  %v4446_v43 = vsel %vm4425_vm8, %v14949_v13, %v9264_v22  ;;  %v9274_v42 = vunpack.i.l.bf16 %v9273_v57  ;;  %v9285_v4 = vunpack.i.h.bf16 %v9283_v45  ;;  %v15241_v6 = vpop.permute.xlu1 %9277  ;;  %v17144_v31 = vld [vmem:[#allocation95_spill] sm:$0xff]  ;;  %v17150_v8 = vld [vmem:[#allocation10_spill] sm:$0xff] }
 0x3b1   : > { %9557 = vrot.lane.b32.xlu1 %v17141_v54, %s9756_s16  ;;  %v9284_v15 = vunpack.i.l.bf16 %v9283_v45  ;;  %v17142_v52 = vrot.slane %v14720_v55, 7  ;;  %v15239_v36 = vsel %vm1292_vm5, %v4547_v14, %v4548_v29  ;;  %v4553_v38 = vrot.slane %v4445_v27, 7 }
 0x3b2   : > { %v4552_v56 = vrot.slane %v4444_v10, 7  ;;  %v9270_v28 = vunpack.i.h.bf16 %v9268_v60  ;;  %v15244_v13 = vsel %vm1292_vm5, %v4548_v29, %v4550_v48  ;;  %v4557_v44 = vrot.slane %v15227_v16, 7  ;;  %v9293_v22 = vpop.permute.xlu0 %9292  ;;  %v17147_v48 = vld [vmem:[#allocation16_spill] sm:$0xff] }
 0x3b3   : > { %v15236_v0 = vsel %vm1292_vm5, %v17142_v52, %v4545_v9  ;;  %v4555_v1 = vrot.slane %v4446_v43, 7  ;;  %v15249_v55 = vsel %vm4425_vm8, %v14953_v18, %v9275_v11  ;;  %v9269_v12 = vunpack.i.l.bf16 %v9268_v60  ;;  %v17152_v10 = vld [vmem:[#allocation100_spill] sm:$0xff] }
 0x3b4   : > { %v15253_v50 = vsel %vm4425_vm8, %v14957_v32, %v9274_v42  ;;  %v9280_v39 = vunpack.i.h.bf16 %v15241_v6  ;;  %v17145_v57 = vpack.i.bf16 %v17143_v2, %v17144_v31  ;;  %v4638_v17 = vpack.c.bf16 %v15236_v0, %v17146_v33  ;;  %v9288_v19 = vpop.permute.xlu1 %9287  ;;  %v17153_v0 = vld [vmem:[#allocation22_spill] sm:$0xff]  ;;  %v17154_v31 = vld [vmem:[#allocation25_spill] sm:$0xff] }
 0x3b5   : > { %v4639_v18 = vpack.c.bf16 %v15244_v13, %v15239_v36  ;;  %v4455_v30 = vsel %vm4425_vm8, %v15063_v62, %v9285_v4  ;;  %v4454_v32 = vsel %vm4425_vm8, %v15087_v46, %v9284_v15  ;;  %v9295_v61 = vunpack.i.h.bf16 %v9293_v22  ;;  %7880 = vmatmul.mubr.msk.bf16.vlgmr.msra.gmra.mrb[16].mxu1 %vm5466_vm9, %v4635_v63  ;;  %v9708_v46 = vld [vmem:[%s16009_s5 + $0x18] sm:$0xff]  }
 0x3b6   : > { %9567 = vrot.lane.b32.xlu1 %v17145_v57, %s9756_s16  ;;  %v9294_v14 = vunpack.i.l.bf16 %v9293_v22  ;;  %v4563_v9 = vrot.slane %v15249_v55, 7  ;;  %v15272_v29 = vsel %vm4425_vm8, %v17147_v48, %v9270_v28  ;;  %v4453_v60 = vsel %vm4425_vm8, %v17148_v20, %v9280_v39  ;;  %7912 = vmatpush3.bf16.msra.mxu1 %v9708_v46  ;;  %v9303_v15 = vpop.permute.xlu0 %9302  ;;  %v17155_v48 = vld [vmem:[#allocation27_spill] sm:$0xff]  ;;  %v17156_v20 = vld [vmem:[#allocation92_spill] sm:$0xff] }
 0x3b7   : > { %v17151_v62 = vpack.c.bf16 %v17149_v59, %v17150_v8  ;;  %v15284_v27 = vsel %vm1292_vm5, %v4552_v56, %v4553_v38  ;;  %v15288_v11 = vsel %vm4425_vm8, %v17152_v10, %v9269_v12  ;;  %v4567_v37 = vrot.slane %v4453_v60, 7  ;;  %8117 = vmatprep.subr.msk.bf16.mxu1 %vm5515_vm7, %v15083_v5 }
 0x3b8   : > { %v4458_v63 = vsel %vm4425_vm8, %v15102_v41, %v9294_v14  ;;  %v15293_v43 = vsel %vm1292_vm5, %v4553_v38, %v4555_v1  ;;  %v4570_v42 = vrot.slane %v4455_v30, 7  ;;  %v4568_v45 = vrot.slane %v4454_v32, 7  ;;  %v9298_v5 = vpop.permute.xlu1 %9297 }
 0x3b9   : > { %7883 = vmatprep.mubr.msk.bf16.mxu1 %vm5466_vm9, %v17151_v62  ;;  %v9290_v54 = vunpack.i.h.bf16 %v9288_v19  ;;  %v9289_v4 = vunpack.i.l.bf16 %v9288_v19  ;;  %v9279_v52 = vunpack.i.l.bf16 %v15241_v6  ;;  %v4459_v56 = vsel %vm4425_vm8, %v17153_v0, %v9295_v61 }
 0x3ba   : > { %v9305_v28 = vunpack.i.h.bf16 %v9303_v15  ;;  %v9304_v12 = vunpack.i.l.bf16 %v9303_v15  ;;  %v4575_v39 = vrot.slane %v4458_v63, 7  ;;  %v15305_v1 = vsel %vm1292_vm5, %v4567_v37, %v4568_v45  ;;  %7914 = vmatpush3.bf16.msra.mxu1 %v15124_v40  ;;  %v9313_v61 = vpop.permute.xlu0 %9312 }
 0x3bb   : > { %v4457_v41 = vsel %vm4425_vm8, %v15047_v3, %v9290_v54  ;;  %v4456_v38 = vsel %vm4425_vm8, %v15056_v34, %v9289_v4  ;;  %v9300_v3 = vunpack.i.h.bf16 %v9298_v5  ;;  %v9299_v32 = vunpack.i.l.bf16 %v9298_v5 }
 0x3bc   : > { %v4573_v22 = vrot.slane %v4457_v41, 7  ;;  %v4572_v6 = vrot.slane %v4456_v38, 7  ;;  %v4463_v2 = vsel %vm4425_vm8, %v15106_v7, %v9305_v28  ;;  %v4462_v57 = vsel %vm4425_vm8, %v17154_v31, %v9304_v12  ;;  %v9308_v8 = vpop.permute.xlu1 %9307 }
 0x3bd   : > { %v4583_v33 = vrot.slane %v4463_v2, 7  ;;  %v4582_v30 = vrot.slane %v4462_v57, 7  ;;  %v9315_v34 = vunpack.i.h.bf16 %v9313_v61  ;;  %v9314_v14 = vunpack.i.l.bf16 %v9313_v61 }
 0x3be   : > { %v17157_v60 = vpack.c.bf16 %v17155_v48, %v17156_v20  ;;  %v15317_v40 = vsel %vm1292_vm5, %v4568_v45, %v4570_v42  ;;  %v15320_v7 = vsel %vm1292_vm5, %v4572_v6, %v4573_v22  ;;  %v4461_v19 = vsel %vm4425_vm8, %v15110_v21, %v9300_v3  ;;  %v9709_v20 = vld [vmem:[%s9923_s26 + $0xe0] sm:$0xff] }
 0x3bf   : > { %v4460_v59 = vsel %vm4425_vm8, %v15131_v51, %v9299_v32  ;;  %v4643_v62 = vpack.c.bf16 %v15317_v40, %v15305_v1  ;;  %v15330_v46 = vsel %vm1292_vm5, %v4573_v22, %v4575_v39  ;;  %v4560_v10 = vrot.slane %v15272_v29, 7  ;;  %v9713_v40 = vld [vmem:[#allocation3 + $0x48] sm:$0xff] }
 0x3c0   : > { %7884 = vmatmul.mubr.msk.bf16.gmra.mrb[20].mxu1 %vm5466_vm9, %v17157_v60  ;;  %v4577_v37 = vrot.slane %v4459_v56, 7  ;;  %v4580_v63 = vrot.slane %v4461_v19, 7  ;;  %v4578_v42 = vrot.slane %v4460_v59, 7  ;;  %v4452_v21 = vsel %vm4425_vm8, %v15043_v24, %v9279_v52  ;;  %v17158_v56 = vld [vmem:[#allocation99_spill] sm:$0xff]  ;;  %v9318_v52 = vpop.permute.xlu1 %9317  ;;  %v9710_v60 = vld [vmem:[%s9923_s26 + $0xe8] sm:$0xff] }
 0x3c1   : > { %7887 = vmatprep.mubr.msk.bf16.mxu1 %vm5466_vm9, %v4638_v17  ;;  %v4467_v51 = vsel %vm4425_vm8, %v15204_v35, %v9315_v34  ;;  %v9310_v45 = vunpack.i.h.bf16 %v9308_v8  ;;  %v9309_v54 = vunpack.i.l.bf16 %v9308_v8  ;;  %v15337_v17 = vpop.permute.xlu0 %9322  ;;  %v4466_v4 = vsel %vm4425_vm8, %v15208_v58, %v9314_v14  ;;  %v9711_v8 = vld [vmem:[%s9923_s26 + $0xf0] sm:$0xff] }
 0x3c2   : > { %v9324_v15 = vunpack.i.l.bf16 %v15337_v17  ;;  %v4644_v29 = vpack.c.bf16 %v15330_v46, %v15320_v7  ;;  %v15345_v0 = vsel %vm1292_vm5, %v4577_v37, %v4578_v42  ;;  %v15352_v28 = vsel %vm1292_vm5, %v4578_v42, %v4580_v63  ;;  %v9712_v46 = vld [vmem:[%s9923_s26 + $0xf8] sm:$0xff] }
 0x3c3   : > { %v4465_v24 = vsel %vm4425_vm8, %v17158_v56, %v9310_v45  ;;  %v4464_v35 = vsel %vm4425_vm8, %v15135_v26, %v9309_v54  ;;  %v15355_v58 = vsel %vm1292_vm5, %v4582_v30, %v4583_v33  ;;  %v4558_v12 = vrot.slane %v15288_v11, 7  ;;  %v17159_v30 = vld [vmem:[#allocation6_spill] sm:$0xff] }
 0x3c4   : > { %v4587_v39 = vrot.slane %v4465_v24, 7  ;;  %v4585_v41 = vrot.slane %v4464_v35, 7  ;;  %v4640_v38 = vpack.c.bf16 %v15293_v43, %v15284_v27  ;;  %v4590_v5 = vrot.slane %v4467_v51, 7 }
 0x3c5   : > { %v4588_v22 = vrot.slane %v4466_v4, 7  ;;  %v9320_v6 = vunpack.i.h.bf16 %v9318_v52  ;;  %v9319_v2 = vunpack.i.l.bf16 %v9318_v52  ;;  %v9328_v31 = vpop.permute.xlu0 %9327  ;;  %v4565_v26 = vrot.slane %v4452_v21, 7  ;;  %v5902_v52 = vld [vmem:[#allocation3 + $0x40] sm:$0xff] }
 0x3c6   : > { %v4470_v57 = vsel %vm4425_vm8, %v15218_v25, %v9324_v15  ;;  %v4645_v11 = vpack.c.bf16 %v15352_v28, %v15345_v0  ;;  %v15369_v27 = vsel %vm1292_vm5, %v4583_v33, %v4585_v41  ;;  %v15375_v25 = vpop.permute.xlu1 %9332  ;;  %v4561_v14 = vsel %vm1292_vm5, %v4558_v12, %v4560_v10  ;;  %v9715_v28 = vld [vmem:[#allocation3 + $0x70] sm:$0xff] }
 0x3c7   : > { %v4469_v43 = vsel %vm4425_vm8, %v15196_v23, %v9320_v6  ;;  %v4468_v3 = vsel %vm4425_vm8, %v17159_v30, %v9319_v2  ;;  %v4646_v36 = vpack.c.bf16 %v15369_v27, %v15355_v58  ;;  %v15381_v13 = vsel %vm1292_vm5, %v4587_v39, %v4588_v22  ;;  %v9714_v6 = vld [vmem:[#allocation3 + $0x50] sm:$0xff] }
 0x3c8   : > { %7888 = vmatmul.mubr.msk.bf16.gmra.mrb[24].mxu1 %vm5466_vm9, %v4639_v18  ;;  %v4562_v18 = vrot.slane %v15253_v50, 7  ;;  %v4593_v33 = vrot.slane %v4469_v43, 7  ;;  %v4592_v32 = vrot.slane %v4468_v3, 7  ;;  %v4559_v23 = vsel %vm1292_vm5, %v4557_v44, %v4558_v12 }
 0x3c9   : > { %7891 = vmatprep.mubr.msk.bf16.mxu1 %vm5466_vm9, %v4640_v38  ;;  %v4595_v61 = vrot.slane %v4470_v57, 7  ;;  %v15387_v34 = vpop.permute.xlu0 %9337  ;;  %v15391_v48 = vsel %vm1292_vm5, %v4588_v22, %v4590_v5  ;;  %v7051_v7 = vpack.c.bf16 %v9710_v60, %v9709_v20  ;;  %v4566_v50 = vsel %vm1292_vm5, %v4563_v9, %v4565_v26  ;;  %v5906_v22 = vld [vmem:[#allocation3 + $0x60] sm:$0xff] }
 0x3ca   : > { %v4647_v16 = vpack.c.bf16 %v15391_v48, %v15381_v13  ;;  %v15401_v44 = vsel %vm1292_vm5, %v4592_v32, %v4593_v33  ;;  %v9343_v19 = vpop.permute.xlu1 %9342  ;;  %v7052_v10 = vpack.c.bf16 %v9712_v46, %v9711_v8  ;;  %v4641_v37 = vpack.c.bf16 %v4561_v14, %v4559_v23  ;;  %v9716_v14 = vld [vmem:[#allocation3 + $0x68] sm:$0xff] }
 0x3cb   : > { %v15404_v59 = vsel %vm1292_vm5, %v4593_v33, %v4595_v61  ;;  %7977 = vmatprep.mubr.msk.bf16.mxu0 %vm388_vm0, %v7051_v7  ;;  %v4564_v63 = vsel %vm1292_vm5, %v4562_v18, %v4563_v9  ;;  %v9330_v9 = vunpack.i.h.bf16 %v9328_v31  ;;  %v9329_v56 = vunpack.i.l.bf16 %v9328_v31  ;;  %v17160_v61 = vld [vmem:[#allocation18_spill] sm:$0xff] }
 0x3cc   : > { %v4642_v21 = vpack.c.bf16 %v4566_v50, %v4564_v63  ;;  %v4648_v51 = vpack.c.bf16 %v15404_v59, %v15401_v44  ;;  %7978 = vmatmul.mubr.msk.bf16.gmra.mrb[60].mxu0 %vm388_vm0, %v7052_v10  ;;  %v9334_v24 = vunpack.i.l.bf16 %v15375_v25  ;;  %v9345_v12 = vunpack.i.h.bf16 %v9343_v19  ;;  %v5910_v63 = vld [vmem:[#allocation3 + $0x80] sm:$0xff] }
 0x3cd   : > { %v9348_v42 = vpop.permute.xlu0 %9347  ;;  %v9344_v39 = vunpack.i.l.bf16 %v9343_v19  ;;  %v9325_v1 = vunpack.i.h.bf16 %v15337_v17  ;;  %v9335_v5 = vunpack.i.h.bf16 %v15375_v25  ;;  %v9340_v31 = vunpack.i.h.bf16 %v15387_v34 }
 0x3ce   : > { %v9353_v45 = vpop.permute.xlu1 %9352  ;;  %v9349_v41 = vunpack.i.l.bf16 %v9348_v42  ;;  %v6432_v2 = vsel %vm432_vm4, %v9714_v6, %v9334_v24  ;;  %v9339_v26 = vunpack.i.l.bf16 %v15387_v34  ;;  %v9350_v25 = vunpack.i.h.bf16 %v9348_v42 }
 0x3cf   : > { %v9355_v30 = vunpack.i.h.bf16 %v9353_v45  ;;  %v9354_v3 = vunpack.i.l.bf16 %v9353_v45  ;;  %v9235_v32 = vunpack.i.h.bf16 %v15096_v47  ;;  %v9234_v23 = vunpack.i.l.bf16 %v15096_v47 }
 0x3d0   : > { %7892 = vmatmul.mubr.msk.bf16.gmra.mrb[28].mxu1 %vm5466_vm9, %v4641_v37  ;;  %v6480_v18 = vsel %vm4425_vm8, %v6432_v2, %v9349_v41  ;;  %v15461_v34 = vsel %vm4425_vm8, %v17160_v61, %v9325_v1  ;;  %v6433_v0 = vsel %vm432_vm4, %v5906_v22, %v9335_v5  ;;  %v6434_v20 = vsel %vm432_vm4, %v9716_v14, %v9339_v26  ;;  %v9718_v22 = vld [vmem:[#allocation3 + $0x90] sm:$0xff] }
 0x3d1   : > { %7895 = vmatprep.mubr.msk.bf16.mxu1 %vm5466_vm9, %v4642_v21  ;;  %v15417_v54 = vpop.permute.xlu0 %9357  ;;  %v6482_v47 = vsel %vm4425_vm8, %v6434_v20, %v9354_v3  ;;  %v6481_v19 = vsel %vm4425_vm8, %v6433_v0, %v9350_v25  ;;  %v4424_v10 = vsel %vm432_vm4, %v15138_v53, %v9235_v32  ;;  %v4423_v37 = vsel %vm432_vm4, %v15152_v49, %v9234_v23  ;;  %v9719_v25 = vld [vmem:[#allocation3 + $0xb0] sm:$0xff] }
 0x3d2   : > { %v15419_v4 = vpop.permute.xlu1 %9362  ;;  %v9360_v50 = vunpack.i.h.bf16 %v15417_v54  ;;  %v9359_v8 = vunpack.i.l.bf16 %v15417_v54  ;;  %v4597_v42 = vrot.slane %v15461_v34, 7  ;;  %v6580_v45 = vrot.slane %v6482_v47, 7 }
 0x3d3   : > { %v6579_v24 = vrot.slane %v6481_v19, 7  ;;  %v5918_v19 = vld [vmem:[#allocation3 + $0xc0] sm:$0xff] }
 0x3d5   : > { %v15421_v15 = vpop.permute.xlu0 %9367  ;;  %v15505_v5 = vsel %vm1292_vm5, %v6579_v24, %v6580_v45 }
 0x3d6   : > { %v15427_v55 = vpop.permute.xlu1 %9372  ;;  %v9370_v41 = vunpack.i.h.bf16 %v15421_v15  ;;  %v9369_v13 = vunpack.i.l.bf16 %v15421_v15 }
 0x3d7   : > { %v9375_v48 = vunpack.i.h.bf16 %v15427_v55  ;;  %v9374_v44 = vunpack.i.l.bf16 %v15427_v55 }
 0x3d8   : > { %7896 = vmatmul.mubr.msk.bf16.gmra.mrb[32].mxu1 %vm5466_vm9, %v4643_v62  ;;  %v6431_v62 = vsel %vm432_vm4, %v9713_v40, %v9330_v9  ;;  %v9364_v9 = vunpack.i.l.bf16 %v15419_v4 }
 0x3d9   : > { %7899 = vmatprep.mubr.msk.bf16.mxu1 %vm5466_vm9, %v4644_v29  ;;  %v15431_v35 = vpop.permute.xlu0 %9377  ;;  %v6430_v29 = vsel %vm432_vm4, %v5902_v52, %v9329_v56  ;;  %v6479_v43 = vsel %vm4425_vm8, %v6431_v62, %v9345_v12  ;;  %v9717_v52 = vld [vmem:[#allocation3 + $0x88] sm:$0xff]  ;;  %v6436_v12 = vsel %vm432_vm4, %v5910_v63, %v9359_v8 }
 0x3da   : > { %v15433_v38 = vpop.permute.xlu1 %9382  ;;  %v6478_v17 = vsel %vm4425_vm8, %v6430_v29, %v9344_v39  ;;  %v6575_v60 = vrot.slane %v6479_v43, 7  ;;  %v6437_v54 = vsel %vm432_vm4, %v9717_v52, %v9360_v50  ;;  %v9365_v39 = vunpack.i.h.bf16 %v15419_v4  ;;  %v5914_v29 = vld [vmem:[#allocation3 + $0xa0] sm:$0xff] }
 0x3db   : > { %v6574_v58 = vrot.slane %v6478_v17, 7  ;;  %v9379_v1 = vunpack.i.l.bf16 %v15431_v35  ;;  %v6438_v6 = vsel %vm432_vm4, %v9718_v22, %v9364_v9  ;;  %v9385_v15 = vunpack.i.h.bf16 %v15433_v38 }
 0x3dc   : > { %v9384_v43 = vunpack.i.l.bf16 %v15433_v38  ;;  %v6439_v55 = vsel %vm432_vm4, %v5914_v29, %v9365_v39  ;;  %v6485_v23 = vsel %vm4425_vm8, %v6437_v54, %v9375_v48  ;;  %v6484_v61 = vsel %vm4425_vm8, %v6436_v12, %v9374_v44 }
 0x3dd   : > { %v15442_v57 = vpop.permute.xlu0 %9387  ;;  %v15489_v53 = vsel %vm1292_vm5, %v6574_v58, %v6575_v60  ;;  %v6486_v26 = vsel %vm4425_vm8, %v6438_v6, %v9379_v1 }
 0x3de   : > { %v15451_v33 = vpop.permute.xlu1 %9392  ;;  %v6587_v14 = vrot.slane %v6486_v26, 7 }
 0x3df   : > { %v9394_v34 = vunpack.i.l.bf16 %v15451_v33  ;;  %v9395_v39 = vunpack.i.h.bf16 %v15451_v33 }
 0x3e0   : > { %7900 = vmatmul.mubr.msk.bf16.gmra.mrb[36].mxu1 %vm5466_vm9, %v4645_v11  ;;  %v6435_v11 = vsel %vm432_vm4, %v9715_v28, %v9340_v31 }
 0x3e1   : > { %7903 = vmatprep.mubr.msk.bf16.mxu1 %vm5466_vm9, %v4646_v36  ;;  %v15466_v27 = vpop.permute.xlu0 %9397  ;;  %v6577_v36 = vrot.slane %v6480_v18, 7  ;;  %v6483_v7 = vsel %vm4425_vm8, %v6435_v11, %v9355_v30  ;;  %v6441_v18 = vsel %vm432_vm4, %v9719_v25, %v9370_v41  ;;  %v9724_v25 = vld [vmem:[#allocation3 + $0xf0] sm:$0xff] }
 0x3e2   : > { %v15473_v46 = vpop.permute.xlu1 %9402  ;;  %v6582_v21 = vrot.slane %v6483_v7, 7  ;;  %v6489_v20 = vsel %vm4425_vm8, %v6441_v18, %v9385_v15  ;;  %v9389_v7 = vunpack.i.l.bf16 %v15442_v57 }
 0x3e3   : > { %v15492_v49 = vsel %vm1292_vm5, %v6575_v60, %v6577_v36  ;;  %v9390_v36 = vunpack.i.h.bf16 %v15442_v57  ;;  %v9405_v8 = vunpack.i.h.bf16 %v15473_v46  ;;  %v6592_v52 = vrot.slane %v6489_v20, 7  ;;  %v9725_v20 = vld [vmem:[#allocation3 + $0x110] sm:$0xff] }
 0x3e4   : > { %v15508_v4 = vsel %vm1292_vm5, %v6580_v45, %v6582_v21  ;;  %v6584_v21 = vrot.slane %v6484_v61, 7  ;;  %v9721_v45 = vld [vmem:[#allocation3 + $0xd0] sm:$0xff]  ;;  %v6442_v12 = vsel %vm432_vm4, %v5918_v19, %v9389_v7 }
 0x3e5   : > { %v15481_v56 = vpop.permute.xlu0 %9407  ;;  %v6687_v63 = vpack.c.bf16 %v15508_v4, %v15505_v5  ;;  %v6444_v9 = vsel %vm432_vm4, %v9721_v45, %v9394_v34  ;;  %v9400_v5 = vunpack.i.h.bf16 %v15466_v27 }
 0x3e6   : > { %v9413_v40 = vpop.permute.xlu1 %9412  ;;  %v9409_v60 = vunpack.i.l.bf16 %v15481_v56 }
 0x3e7   : > { %v9414_v62 = vunpack.i.l.bf16 %v9413_v40  ;;  %v6447_v18 = vsel %vm432_vm4, %v9724_v25, %v9400_v5 }
 0x3e8   : > { %7904 = vmatmul.mubr.msk.bf16.gmra.mrb[40].mxu1 %vm5466_vm9, %v4647_v16  ;;  %v9415_v16 = vunpack.i.h.bf16 %v9413_v40  ;;  %v5922_v40 = vld [vmem:[#allocation3 + $0xe0] sm:$0xff] }
 0x3e9   : > { %7907 = vmatprep.mubr.msk.bf16.mxu1 %vm5466_vm9, %v4648_v51  ;;  %v15512_v59 = vpop.permute.xlu0 %9422  ;;  %v9380_v51 = vunpack.i.h.bf16 %v15431_v35  ;;  %v4472_v2 = vsel %vm4425_vm8, %v4423_v37, %v9414_v62  ;;  %v9720_v35 = vld [vmem:[#allocation3 + $0xa8] sm:$0xff]  ;;  %v6686_v37 = vpack.c.bf16 %v15492_v49, %v15489_v53  ;;  %v9410_v62 = vunpack.i.h.bf16 %v15481_v56 }
 0x3ea   : > { %v4473_v31 = vsel %vm4425_vm8, %v4424_v10, %v9415_v16  ;;  %v4598_v17 = vrot.slane %v4472_v2, 7  ;;  %v15520_v3 = vpop.permute.xlu1 %9417  ;;  %v6440_v32 = vsel %vm432_vm4, %v9720_v35, %v9369_v13  ;;  %v9404_v10 = vunpack.i.l.bf16 %v15473_v46  ;;  %v9722_v53 = vld [vmem:[#allocation3 + $0xc8] sm:$0xff]  ;;  %v5926_v35 = vld [vmem:[#allocation3 + $0x100] sm:$0xff] }
 0x3eb   : > { %v4600_v30 = vrot.slane %v4473_v31, 7  ;;  %v6487_v11 = vsel %vm4425_vm8, %v6439_v55, %v9380_v51  ;;  %v6488_v58 = vsel %vm4425_vm8, %v6440_v32, %v9384_v43  ;;  %v6492_v46 = vsel %vm4425_vm8, %v6444_v9, %v9409_v60  ;;  %v9723_v43 = vld [vmem:[#allocation3 + $0xe8] sm:$0xff] }
 0x3ec   : > { %v4599_v38 = vsel %vm1292_vm5, %v4597_v42, %v4598_v17  ;;  %v6585_v42 = vrot.slane %v6485_v23, 7  ;;  %v6589_v24 = vrot.slane %v6487_v11, 7  ;;  %v6590_v54 = vrot.slane %v6488_v58, 7 }
 0x3ed   : > { %v15528_v0 = vpop.permute.xlu0 %9432  ;;  %v4601_v28 = vsel %vm1292_vm5, %v4598_v17, %v4600_v30  ;;  %v6443_v49 = vsel %vm432_vm4, %v9722_v53, %v9390_v36  ;;  %v9399_v13 = vunpack.i.l.bf16 %v15466_v27  ;;  %v6490_v16 = vsel %vm4425_vm8, %v6442_v12, %v9404_v10 }
 0x3ee   : > { %v15538_v47 = vpop.permute.xlu1 %9427  ;;  %v4649_v50 = vpack.c.bf16 %v4601_v28, %v4599_v38  ;;  %v6588_v1 = vsel %vm1292_vm5, %v6585_v42, %v6587_v14  ;;  %v6491_v48 = vsel %vm4425_vm8, %v6443_v49, %v9405_v8  ;;  %v6597_v4 = vrot.slane %v6492_v46, 7  ;;  %v5930_v49 = vld [vmem:[#allocation3 + $0x120] sm:$0xff] }
 0x3ef   : > { %v9419_v29 = vunpack.i.l.bf16 %v15520_v3  ;;  %v6586_v33 = vsel %vm1292_vm5, %v6584_v21, %v6585_v42  ;;  %v9420_v6 = vunpack.i.h.bf16 %v15520_v3  ;;  %v6591_v51 = vsel %vm1292_vm5, %v6589_v24, %v6590_v54  ;;  %v9727_v42 = vld [vmem:[#allocation3 + $0x130] sm:$0xff] }
 0x3f0   : > { %7908 = vmatmul.mubr.msk.bf16.gmra.mrb[44].mxu1 %vm5466_vm9, %v4649_v50  ;;  %v6688_v44 = vpack.c.bf16 %v6588_v1, %v6586_v33  ;;  %v6593_v15 = vsel %vm1292_vm5, %v6590_v54, %v6592_v52  ;;  %v6445_v2 = vsel %vm432_vm4, %v5922_v40, %v9395_v39  ;;  %v6595_v31 = vrot.slane %v6491_v48, 7  ;;  %v9726_v50 = vld [vmem:[#allocation3 + $0x108] sm:$0xff] }
 0x3f1   : > { %v15548_v57 = vpop.permute.xlu0 %9442  ;;  %7915 = vmatprep.mubr.msk.bf16.mxu1 %vm5466_vm9, %v6686_v37  ;;  %v6594_v56 = vrot.slane %v6490_v16, 7  ;;  %v9429_v27 = vunpack.i.l.bf16 %v15538_v47  ;;  %v6446_v17 = vsel %vm432_vm4, %v9723_v43, %v9399_v13  ;;  %v6493_v30 = vsel %vm4425_vm8, %v6445_v2, %v9410_v62  ;;  %v9728_v1 = vld [vmem:[#allocation3 + $0x128] sm:$0xff]  ;;  %v5934_v13 = vld [vmem:[#allocation3 + $0x140] sm:$0xff] }
 0x3f2   : > { %v9438_v41 = vpop.permute.xlu1 %9437  ;;  %v9425_v3 = vunpack.i.h.bf16 %v15512_v59  ;;  %v9424_v55 = vunpack.i.l.bf16 %v15512_v59  ;;  %v6494_v32 = vsel %vm4425_vm8, %v6446_v17, %v9419_v29  ;;  %v9435_v23 = vunpack.i.h.bf16 %v15528_v0 }
 0x3f3   : > { %v6598_v34 = vsel %vm1292_vm5, %v6595_v31, %v6597_v4  ;;  %v6495_v38 = vsel %vm4425_vm8, %v6447_v18, %v9420_v6  ;;  %v9444_v28 = vunpack.i.l.bf16 %v15548_v57  ;;  %v9440_v11 = vunpack.i.h.bf16 %v9438_v41 }
 0x3f4   : > { %v9439_v59 = vunpack.i.l.bf16 %v9438_v41  ;;  %v6599_v14 = vrot.slane %v6493_v30, 7  ;;  %v6450_v60 = vsel %vm432_vm4, %v9725_v20, %v9429_v27  ;;  %v6689_v36 = vpack.c.bf16 %v6593_v15, %v6591_v51  ;;  %v9729_v51 = vld [vmem:[#allocation3 + $0x148] sm:$0xff]  ;;  %v9730_v27 = vld [vmem:[#allocation3 + $0x150] sm:$0xff] }
 0x3f5   : > { %v15562_v22 = vpop.permute.xlu0 %9452  ;;  %v6596_v7 = vsel %vm1292_vm5, %v6594_v56, %v6595_v31  ;;  %v6449_v19 = vsel %vm432_vm4, %v9726_v50, %v9425_v3  ;;  %v6448_v8 = vsel %vm432_vm4, %v5926_v35, %v9424_v55  ;;  %v6600_v10 = vrot.slane %v6494_v32, 7  ;;  %v9731_v50 = vld [vmem:[#allocation3 + $0x170] sm:$0xff] }
 0x3f6   : > { %v15570_v26 = vpop.permute.xlu1 %9447  ;;  %v9434_v37 = vunpack.i.l.bf16 %v15528_v0  ;;  %v6453_v21 = vsel %vm432_vm4, %v9727_v42, %v9435_v23  ;;  %v9430_v45 = vunpack.i.h.bf16 %v15538_v47  ;;  %v6690_v24 = vpack.c.bf16 %v6598_v34, %v6596_v7 }
 0x3f7   : > { %v6498_v52 = vsel %vm4425_vm8, %v6450_v60, %v9444_v28  ;;  %v6497_v54 = vsel %vm4425_vm8, %v6449_v19, %v9440_v11  ;;  %v6496_v46 = vsel %vm4425_vm8, %v6448_v8, %v9439_v59  ;;  %v9455_v53 = vunpack.i.h.bf16 %v15562_v22  ;;  %v5938_v59 = vld [vmem:[#allocation3 + $0x160] sm:$0xff] }
 0x3f8   : > { %7916 = vmatmul.mubr.msk.bf16.vlgmr.msra.gmra.mrb[16].mxu1 %vm5466_vm9, %v6687_v63  ;;  %v6602_v63 = vrot.slane %v6495_v38, 7  ;;  %v9454_v0 = vunpack.i.l.bf16 %v15562_v22  ;;  %v9450_v12 = vunpack.i.h.bf16 %v15570_v26  ;;  %v9449_v39 = vunpack.i.l.bf16 %v15570_v26 }
 0x3f9   : > { %v15580_v61 = vpop.permute.xlu0 %9462  ;;  %7919 = vmatprep.mubr.msk.bf16.mxu1 %vm5466_vm9, %v6688_v44  ;;  %v6452_v40 = vsel %vm432_vm4, %v9728_v1, %v9434_v37  ;;  %v6601_v62 = vsel %vm1292_vm5, %v6599_v14, %v6600_v10  ;;  %v9445_v5 = vunpack.i.h.bf16 %v15548_v57  ;;  %v6605_v4 = vrot.slane %v6497_v54, 7  ;;  %v9732_v37 = vld [vmem:[#allocation3 + $0x168] sm:$0xff]  ;;  %v5942_v54 = vld [vmem:[#allocation3 + $0x180] sm:$0xff] }
 0x3fa   : > { %v15587_v58 = vpop.permute.xlu1 %9457  ;;  %v6604_v29 = vrot.slane %v6496_v46, 7  ;;  %v6603_v33 = vsel %vm1292_vm5, %v6600_v10, %v6602_v63  ;;  %v6451_v6 = vsel %vm432_vm4, %v5930_v49, %v9430_v45  ;;  %v6607_v44 = vrot.slane %v6498_v52, 7  ;;  %v9733_v49 = vld [vmem:[#allocation3 + $0x188] sm:$0xff] }
 0x3fb   : > { %v9459_v47 = vunpack.i.l.bf16 %v15587_v58  ;;  %v6455_v15 = vsel %vm432_vm4, %v9729_v51, %v9455_v53  ;;  %v6454_v57 = vsel %vm432_vm4, %v5934_v13, %v9454_v0  ;;  %v6501_v31 = vsel %vm4425_vm8, %v6453_v21, %v9450_v12 }
 0x3fc   : > { %v6500_v56 = vsel %vm4425_vm8, %v6452_v40, %v9449_v39  ;;  %v9465_v17 = vunpack.i.h.bf16 %v15580_v61  ;;  %v6691_v55 = vpack.c.bf16 %v6603_v33, %v6601_v62  ;;  %v6499_v25 = vsel %vm4425_vm8, %v6451_v6, %v9445_v5  ;;  %v9734_v5 = vld [vmem:[#allocation3 + $0x190] sm:$0xff]  ;;  %v5946_v33 = vld [vmem:[#allocation3 + $0x1a0] sm:$0xff] }
 0x3fd   : > { %v15595_v9 = vpop.permute.xlu0 %9472  ;;  %v6456_v26 = vsel %vm432_vm4, %v9730_v27, %v9459_v47  ;;  %v9464_v18 = vunpack.i.l.bf16 %v15580_v61  ;;  %v6606_v32 = vsel %vm1292_vm5, %v6604_v29, %v6605_v4  ;;  %v6608_v23 = vsel %vm1292_vm5, %v6605_v4, %v6607_v44 }
 0x3fe   : > { %v9468_v41 = vpop.permute.xlu1 %9467  ;;  %v9474_v2 = vunpack.i.l.bf16 %v15595_v9  ;;  %v6612_v34 = vrot.slane %v6501_v31, 7  ;;  %v6610_v38 = vrot.slane %v6500_v56, 7  ;;  %v9460_v28 = vunpack.i.h.bf16 %v15587_v58 }
 0x3ff   : > { %v9470_v48 = vunpack.i.h.bf16 %v9468_v41  ;;  %v9469_v16 = vunpack.i.l.bf16 %v9468_v41  ;;  %v6609_v61 = vrot.slane %v6499_v25, 7  ;;  %v6459_v19 = vsel %vm432_vm4, %v9731_v50, %v9465_v17 }
 0x400   : > { %7920 = vmatmul.mubr.msk.bf16.gmra.mrb[20].mxu1 %vm5466_vm9, %v6689_v36  ;;  %v6504_v11 = vsel %vm4425_vm8, %v6456_v26, %v9474_v2  ;;  %v6692_v10 = vpack.c.bf16 %v6608_v23, %v6606_v32  ;;  %v6458_v63 = vsel %vm432_vm4, %v9732_v37, %v9464_v18  ;;  %v9475_v52 = vunpack.i.h.bf16 %v15595_v9  ;;  %v9736_v23 = vld [vmem:[#allocation3 + $0x1b0] sm:$0xff]  ;;  %v5950_v37 = vld [vmem:[#allocation3 + $0x1c0] sm:$0xff] }
 0x401   : > { %v15609_v22 = vpop.permute.xlu0 %9482  ;;  %7923 = vmatprep.mubr.msk.bf16.mxu1 %vm5466_vm9, %v6690_v24  ;;  %v6503_v30 = vsel %vm4425_vm8, %v6455_v15, %v9470_v48  ;;  %v6502_v3 = vsel %vm4425_vm8, %v6454_v57, %v9469_v16  ;;  %v6617_v42 = vrot.slane %v6504_v11, 7  ;;  %v6457_v24 = vsel %vm432_vm4, %v5938_v59, %v9460_v28 }
 0x402   : > { %v6615_v14 = vrot.slane %v6503_v30, 7  ;;  %v6614_v20 = vrot.slane %v6502_v3, 7  ;;  %v9485_v60 = vunpack.i.h.bf16 %v15609_v22  ;;  %v9484_v58 = vunpack.i.l.bf16 %v15609_v22  ;;  %v9735_v30 = vld [vmem:[#allocation3 + $0x1a8] sm:$0xff] }
 0x403   : > { %v9478_v43 = vpop.permute.xlu1 %9477  ;;  %v6611_v46 = vsel %vm1292_vm5, %v6609_v61, %v6610_v38  ;;  %v6613_v53 = vsel %vm1292_vm5, %v6610_v38, %v6612_v34  ;;  %v6505_v15 = vsel %vm4425_vm8, %v6457_v24, %v9475_v52  ;;  %v9738_v24 = vld [vmem:[#allocation3 + $0x1c8] sm:$0xff] }
 0x404   : > { %v9480_v36 = vunpack.i.h.bf16 %v9478_v43  ;;  %v9479_v8 = vunpack.i.l.bf16 %v9478_v43  ;;  %v6461_v0 = vsel %vm432_vm4, %v9733_v49, %v9485_v60  ;;  %v6616_v47 = vsel %vm1292_vm5, %v6614_v20, %v6615_v14  ;;  %v5954_v49 = vld [vmem:[#allocation3 + $0x1e0] sm:$0xff] }
 0x405   : > { %v15625_v35 = vpop.permute.xlu0 %9492  ;;  %v6618_v41 = vsel %vm1292_vm5, %v6615_v14, %v6617_v42  ;;  %v6460_v48 = vsel %vm432_vm4, %v5942_v54, %v9484_v58  ;;  %v6693_v51 = vpack.c.bf16 %v6613_v53, %v6611_v46  ;;  %v6619_v32 = vrot.slane %v6505_v15, 7  ;;  %v9737_v42 = vld [vmem:[#allocation3 + $0x1d0] sm:$0xff] }
 0x406   : > { %v6507_v12 = vsel %vm4425_vm8, %v6459_v19, %v9480_v36  ;;  %v6506_v1 = vsel %vm4425_vm8, %v6458_v63, %v9479_v8  ;;  %v9494_v16 = vunpack.i.l.bf16 %v15625_v35  ;;  %v9495_v22 = vunpack.i.h.bf16 %v15625_v35  ;;  %v9739_v15 = vld [vmem:[#allocation3 + $0x1f0] sm:$0xff] }
 0x407   : > { %v9488_v7 = vpop.permute.xlu1 %9487  ;;  %v6622_v2 = vrot.slane %v6507_v12, 7  ;;  %v6620_v57 = vrot.slane %v6506_v1, 7  ;;  %v6694_v56 = vpack.c.bf16 %v6618_v41, %v6616_v47 }
 0x408   : > { %v9489_v21 = vunpack.i.l.bf16 %v9488_v7  ;;  %7924 = vmatmul.mubr.msk.bf16.gmra.mrb[24].mxu1 %vm5466_vm9, %v6691_v55  ;;  %v9490_v62 = vunpack.i.h.bf16 %v9488_v7  ;;  %v6464_v3 = vsel %vm432_vm4, %v9735_v30, %v9494_v16  ;;  %v6465_v34 = vsel %vm432_vm4, %v9736_v23, %v9495_v22 }
 0x409   : > { %v9503_v45 = vpop.permute.xlu0 %9502  ;;  %7927 = vmatprep.mubr.msk.bf16.mxu1 %vm5466_vm9, %v6692_v10  ;;  %v6621_v36 = vsel %vm1292_vm5, %v6619_v32, %v6620_v57  ;;  %v6623_v7 = vsel %vm1292_vm5, %v6620_v57, %v6622_v2  ;;  %v9740_v57 = vld [vmem:[#allocation3 + $0x1e8] sm:$0xff] }
 0x40a   : > { %v9504_v9 = vunpack.i.l.bf16 %v9503_v45  ;;  %v6462_v4 = vsel %vm432_vm4, %v9734_v5, %v9489_v21  ;;  %v9505_v27 = vunpack.i.h.bf16 %v9503_v45  ;;  %v6463_v55 = vsel %vm432_vm4, %v5946_v33, %v9490_v62 }
 0x40b   : > { %v9498_v39 = vpop.permute.xlu1 %9497  ;;  %v6695_v53 = vpack.c.bf16 %v6623_v7, %v6621_v36  ;;  %v9742_v7 = vld [vmem:[#allocation3 + $0x208] sm:$0xff] }
 0x40c   : > { %v9500_v40 = vunpack.i.h.bf16 %v9498_v39  ;;  %v9499_v13 = vunpack.i.l.bf16 %v9498_v39  ;;  %v6510_v26 = vsel %vm4425_vm8, %v6462_v4, %v9504_v9  ;;  %v6511_v20 = vsel %vm4425_vm8, %v6463_v55, %v9505_v27 }
 0x40d   : > { %v9513_v29 = vpop.permute.xlu0 %9512  ;;  %v6627_v28 = vrot.slane %v6510_v26, 7  ;;  %v6629_v45 = vrot.slane %v6511_v20, 7  ;;  %v9741_v20 = vld [vmem:[#allocation3 + $0x210] sm:$0xff] }
 0x40e   : > { %v6509_v6 = vsel %vm4425_vm8, %v6461_v0, %v9500_v40  ;;  %v6508_v44 = vsel %vm4425_vm8, %v6460_v48, %v9499_v13  ;;  %v9515_v11 = vunpack.i.h.bf16 %v9513_v29  ;;  %v9514_v61 = vunpack.i.l.bf16 %v9513_v29 }
 0x40f   : > { %v9508_v31 = vpop.permute.xlu1 %9507  ;;  %v6625_v25 = vrot.slane %v6509_v6, 7  ;;  %v6624_v18 = vrot.slane %v6508_v44, 7 }
 0x410   : > { %v9510_v43 = vunpack.i.h.bf16 %v9508_v31  ;;  %v9509_v17 = vunpack.i.l.bf16 %v9508_v31  ;;  %7928 = vmatmul.mubr.msk.bf16.gmra.mrb[28].mxu1 %vm5466_vm9, %v6693_v51  ;;  %v6467_v52 = vsel %vm432_vm4, %v9738_v24, %v9515_v11  ;;  %v6466_v41 = vsel %vm432_vm4, %v5950_v37, %v9514_v61 }
 0x411   : > { %v9523_v35 = vpop.permute.xlu0 %9522  ;;  %7931 = vmatprep.mubr.msk.bf16.mxu1 %vm5466_vm9, %v6694_v56  ;;  %v6626_v8 = vsel %vm1292_vm5, %v6624_v18, %v6625_v25  ;;  %v6628_v10 = vsel %vm1292_vm5, %v6625_v25, %v6627_v28 }
 0x412   : > { %v6512_v38 = vsel %vm4425_vm8, %v6464_v3, %v9509_v17  ;;  %v6513_v59 = vsel %vm4425_vm8, %v6465_v34, %v9510_v43  ;;  %v6696_v47 = vpack.c.bf16 %v6628_v10, %v6626_v8  ;;  %v9525_v1 = vunpack.i.h.bf16 %v9523_v35 }
 0x413   : > { %v9518_v14 = vpop.permute.xlu1 %9517  ;;  %v6630_v50 = vrot.slane %v6512_v38, 7  ;;  %v6632_v63 = vrot.slane %v6513_v59, 7  ;;  %v9524_v9 = vunpack.i.l.bf16 %v9523_v35  ;;  %v5958_v59 = vld [vmem:[#allocation3 + $0x200] sm:$0xff] }
 0x414   : > { %v9519_v60 = vunpack.i.l.bf16 %v9518_v14  ;;  %v9520_v54 = vunpack.i.h.bf16 %v9518_v14  ;;  %v6471_v2 = vsel %vm432_vm4, %v9739_v15, %v9525_v1  ;;  %v5962_v14 = vld [vmem:[#allocation3 + $0x220] sm:$0xff]  ;;  %v9743_v1 = vld [vmem:[#allocation3 + $0x230] sm:$0xff] }
 0x415   : > { %v9533_v19 = vpop.permute.xlu0 %9532  ;;  %v6631_v13 = vsel %vm1292_vm5, %v6629_v45, %v6630_v50  ;;  %v6633_v5 = vsel %vm1292_vm5, %v6630_v50, %v6632_v63  ;;  %v6470_v31 = vsel %vm432_vm4, %v9740_v57, %v9524_v9 }
 0x416   : > { %v6468_v58 = vsel %vm432_vm4, %v9737_v42, %v9519_v60  ;;  %v9534_v21 = vunpack.i.l.bf16 %v9533_v19  ;;  %v9535_v48 = vunpack.i.h.bf16 %v9533_v19  ;;  %v6469_v4 = vsel %vm432_vm4, %v5954_v49, %v9520_v54 }
 0x417   : > { %v9528_v46 = vpop.permute.xlu1 %9527  ;;  %v6697_v3 = vpack.c.bf16 %v6633_v5, %v6631_v13 }
 0x418   : > { %v6516_v0 = vsel %vm4425_vm8, %v6468_v58, %v9534_v21  ;;  %v9530_v12 = vunpack.i.h.bf16 %v9528_v46  ;;  %v9529_v39 = vunpack.i.l.bf16 %v9528_v46  ;;  %7932 = vmatmul.mubr.msk.bf16.gmra.mrb[32].mxu1 %vm5466_vm9, %v6695_v53  ;;  %v6517_v43 = vsel %vm4425_vm8, %v6469_v4, %v9535_v48 }
 0x419   : > { %v9543_v40 = vpop.permute.xlu0 %9542  ;;  %7935 = vmatprep.mubr.msk.bf16.mxu1 %vm5466_vm9, %v6696_v47  ;;  %v6637_v29 = vrot.slane %v6516_v0, 7  ;;  %v6639_v34 = vrot.slane %v6517_v43, 7 }
 0x41a   : > { %v6515_v16 = vsel %vm4425_vm8, %v6467_v52, %v9530_v12  ;;  %v6514_v62 = vsel %vm4425_vm8, %v6466_v41, %v9529_v39  ;;  %v9545_v55 = vunpack.i.h.bf16 %v9543_v40  ;;  %v9544_v38 = vunpack.i.l.bf16 %v9543_v40  ;;  %v9744_v40 = vld [vmem:[#allocation3 + $0x228] sm:$0xff] }
 0x41b   : > { %v6635_v22 = vrot.slane %v6515_v16, 7  ;;  %v6634_v33 = vrot.slane %v6514_v62, 7  ;;  %v9538_v6 = vpop.permute.xlu1 %9537 }
 0x41c   : > { %v9540_v44 = vunpack.i.h.bf16 %v9538_v6  ;;  %v9539_v51 = vunpack.i.l.bf16 %v9538_v6  ;;  %v6473_v61 = vsel %vm432_vm4, %v9742_v7, %v9545_v55  ;;  %v6472_v58 = vsel %vm432_vm4, %v5958_v59, %v9544_v38 }
 0x41d   : > { %v9553_v56 = vpop.permute.xlu0 %9552  ;;  %v6636_v27 = vsel %vm1292_vm5, %v6634_v33, %v6635_v22  ;;  %v6638_v26 = vsel %vm1292_vm5, %v6635_v22, %v6637_v29 }
 0x41e   : > { %v6519_v17 = vsel %vm4425_vm8, %v6471_v2, %v9540_v44  ;;  %v6518_v30 = vsel %vm4425_vm8, %v6470_v31, %v9539_v51  ;;  %v6698_v32 = vpack.c.bf16 %v6638_v26, %v6636_v27  ;;  %v9555_v21 = vunpack.i.h.bf16 %v9553_v56 }
 0x41f   : > { %v6642_v25 = vrot.slane %v6519_v17, 7  ;;  %v6640_v18 = vrot.slane %v6518_v30, 7  ;;  %v9548_v35 = vpop.permute.xlu1 %9547  ;;  %v9554_v45 = vunpack.i.l.bf16 %v9553_v56 }
 0x420   : > { %v9549_v23 = vunpack.i.l.bf16 %v9548_v35  ;;  %v9550_v28 = vunpack.i.h.bf16 %v9548_v35  ;;  %7936 = vmatmul.mubr.msk.bf16.gmra.mrb[36].mxu1 %vm5466_vm9, %v6697_v3  ;;  %v6477_v9 = vsel %vm432_vm4, %v9743_v1, %v9555_v21  ;;  %v15772_v21 = vld [vmem:[%s16010_s6] ss:$0 sm:$0xff] }
 0x421   : > { %v9563_v11 = vpop.permute.xlu0 %9562  ;;  %7939 = vmatprep.mubr.msk.bf16.mxu1 %vm5466_vm9, %v6698_v32  ;;  %v6641_v19 = vsel %vm1292_vm5, %v6639_v34, %v6640_v18  ;;  %v6643_v8 = vsel %vm1292_vm5, %v6640_v18, %v6642_v25  ;;  %v6476_v13 = vsel %vm432_vm4, %v9744_v40, %v9554_v45 }
 0x422   : > { %v6474_v60 = vsel %vm432_vm4, %v9741_v20, %v9549_v23  ;;  %v9564_v36 = vunpack.i.l.bf16 %v9563_v11  ;;  %v9565_v10 = vunpack.i.h.bf16 %v9563_v11  ;;  %v6475_v24 = vsel %vm432_vm4, %v5962_v14, %v9550_v28 }
 0x423   : > { %v9558_v50 = vpop.permute.xlu1 %9557  ;;  %v6699_v12 = vpack.c.bf16 %v6643_v8, %v6641_v19 }
 0x424   : > { %v6522_v37 = vsel %vm4425_vm8, %v6474_v60, %v9564_v36  ;;  %v9560_v63 = vunpack.i.h.bf16 %v9558_v50  ;;  %v9559_v42 = vunpack.i.l.bf16 %v9558_v50  ;;  %v6523_v39 = vsel %vm4425_vm8, %v6475_v24, %v9565_v10  ;;  %v15777_v24 = vld [vmem:[%s16011_s7] ss:$0 sm:$0xff] }
 0x425   : > { %v6647_v46 = vrot.slane %v6522_v37, 7  ;;  %v6649_v29 = vrot.slane %v6523_v39, 7  ;;  %v15760_v37 = vld [vmem:[%s16013_s9] ss:$0 sm:$0xff] }
 0x426   : > { %v6521_v52 = vsel %vm4425_vm8, %v6473_v61, %v9560_v63  ;;  %v6520_v54 = vsel %vm4425_vm8, %v6472_v58, %v9559_v42  ;;  %v15766_v42 = vld [vmem:[%s16014_s10] ss:$0 sm:$0xff] }
 0x427   : > { %v6645_v53 = vrot.slane %v6521_v52, 7  ;;  %v6644_v49 = vrot.slane %v6520_v54, 7 }
 0x428   : > { %v9568_v0 = vpop.permute.xlu1 %9567  ;;  %7940 = vmatmul.mubr.msk.bf16.gmra.mrb[40].mxu1 %vm5466_vm9, %v6699_v12 }
 0x429   : > { %v9570_v47 = vunpack.i.h.bf16 %v9568_v0  ;;  %v9569_v41 = vunpack.i.l.bf16 %v9568_v0  ;;  %v6646_v48 = vsel %vm1292_vm5, %v6644_v49, %v6645_v53  ;;  %v6648_v16 = vsel %vm1292_vm5, %v6645_v53, %v6647_v46 }
 0x42a   : > { %v6700_v4 = vpack.c.bf16 %v6648_v16, %v6646_v48 }
 0x42b   : > { %v6525_v62 = vsel %vm4425_vm8, %v6477_v9, %v9570_v47  ;;  %v6524_v5 = vsel %vm4425_vm8, %v6476_v13, %v9569_v41 }
 0x42c   : > { %v6652_v22 = vrot.slane %v6525_v62, 7  ;;  %v6650_v33 = vrot.slane %v6524_v5, 7  ;;  %7943 = vmatprep.mubr.msk.bf16.mxu1 %vm5466_vm9, %v6700_v4 }
 0x42e   : > { %v6651_v6 = vsel %vm1292_vm5, %v6649_v29, %v6650_v33  ;;  %v6653_v44 = vsel %vm1292_vm5, %v6650_v33, %v6652_v22 }
 0x42f   : > { %v6701_v51 = vpack.c.bf16 %v6653_v44, %v6651_v6 }
 0x431   : > { %7944 = vmatmul.mubr.msk.bf16.gmra.mrb[44].mxu1 %vm5466_vm9, %v6701_v51 }
 0x44c   : > { %v7951_v15 = vpop.f32.mrb[32].mxu0 }
 0x44d   : > { %v7140_v2 = vpop.f32.mrb[33].mxu0  ;;  %v7276_v63 = vmul.f32 %v7951_v15, %v15760_v37 }
 0x44e   : > { %v7952_v57 = vpop.f32.mrb[34].mxu0  ;;  %v7274_v58 = vmul.f32 %v15760_v37, %v7140_v2 }
 0x44f   : > { %v7143_v31 = vpop.f32.mrb[35].mxu0  ;;  %v7315_v52 = vadd.f32 %v15766_v42, %v7276_v63  ;;  %v7277_v54 = vmul.f32 %v7952_v57, %v15760_v37 }
 0x450   : > { %v7313_v49 = vadd.f32 %v15766_v42, %v7274_v58  ;;  %v7275_v0 = vmul.f32 %v15760_v37, %v7143_v31 }
 0x451   : > { %v7316_v13 = vadd.f32 %v15766_v42, %v7277_v54 }
 0x452   : > { %v7314_v5 = vadd.f32 %v15766_v42, %v7275_v0 }
 0x454   : > { %v7955_v56 = vpop.f32.mrb[36].mxu0 }
 0x455   : > { %v7156_v27 = vpop.f32.mrb[37].mxu0  ;;  %v7280_v62 = vmul.f32 %v7955_v56, %v15760_v37 }
 0x456   : > { %v7956_v26 = vpop.f32.mrb[38].mxu0  ;;  %v7278_v22 = vmul.f32 %v15760_v37, %v7156_v27 }
 0x457   : > { %v15707_v43 = vpop.f32.mrb[39].mxu0  ;;  %v7319_v51 = vadd.f32 %v15766_v42, %v7280_v62  ;;  %v7281_v15 = vmul.f32 %v7956_v26, %v15760_v37 }
 0x458   : > { %v7317_v31 = vadd.f32 %v15766_v42, %v7278_v22  ;;  %v7279_v56 = vmul.f32 %v15760_v37, %v15707_v43 }
 0x45a   : > { %v7318_v0 = vadd.f32 %v15766_v42, %v7279_v56 }
 0x45d   : > { %v15709_v17 = vpop.f32.mrb[40].mxu0 }
 0x45e   : > { %v15711_v30 = vpop.f32.mrb[41].mxu0 }
 0x45f   : > { %v15713_v3 = vpop.f32.mrb[42].mxu0 }
 0x460   : > { %v15715_v55 = vpop.f32.mrb[43].mxu0 }
 0x465   : > { %v15717_v25 = vpop.f32.mrb[44].mxu0 }
 0x466   : > { %v15719_v18 = vpop.f32.mrb[45].mxu0 }
 0x467   : > { %v15721_v35 = vpop.f32.mrb[46].mxu0 }
 0x468   : > { %v15723_v32 = vpop.f32.mrb[47].mxu0 }
 0x46d   : > { %v15725_v23 = vpop.f32.mrb[48].mxu0 }
 0x46e   : > { %v15727_v34 = vpop.f32.mrb[49].mxu0 }
 0x46f   : > { %v15729_v38 = vpop.f32.mrb[50].mxu0 }
 0x470   : > { %v15731_v28 = vpop.f32.mrb[51].mxu0 }
 0x475   : > { %v15733_v11 = vpop.f32.mrb[52].mxu0 }
 0x476   : > { %v15735_v59 = vpop.f32.mrb[53].mxu0 }
 0x477   : > { %v15737_v14 = vpop.f32.mrb[54].mxu0 }
 0x478   : > { %v15739_v20 = vpop.f32.mrb[55].mxu0 }
 0x47d   : > { %v15741_v60 = vpop.f32.mrb[56].mxu0 }
 0x47e   : > { %v15743_v36 = vpop.f32.mrb[57].mxu0 }
 0x47f   : > { %v15745_v7 = vpop.f32.mrb[58].mxu0 }
 0x480   : > { %v15747_v61 = vpop.f32.mrb[59].mxu0 }
 0x49f   : > { %v15749_v50 = vpop.f32.mrb[60].mxu0 }
 0x4a0   : > { %v15751_v19 = vpop.f32.mrb[61].mxu0 }
 0x4a1   : > { %v15753_v8 = vpop.f32.mrb[62].mxu0 }
 0x4a2   : > { %v15755_v10 = vpop.f32.mrb[63].mxu0 }
 0x4cb   : > { %v7917_v45 = vpop.f32.mrb[16].mxu1 }
 0x4cc   : > { %v6968_v46 = vmul.f32 %v7917_v45, %v15772_v21  ;;  %v6800_v53 = vpop.f32.mrb[17].mxu1 }
 0x4cd   : > { %v6966_v12 = vmul.f32 %v15772_v21, %v6800_v53  ;;  %v7918_v39 = vpop.f32.mrb[18].mxu1 }
 0x4ce   : > { %v7007_v47 = vadd.f32 %v15777_v24, %v6968_v46  ;;  %v6969_v41 = vmul.f32 %v7918_v39, %v15772_v21  ;;  %v6803_v1 = vpop.f32.mrb[19].mxu1  ;;  %v7320_v46 = vadd.f32 %v15766_v42, %v7281_v15 }
 0x4cf   : > { %v7005_v9 = vadd.f32 %v15777_v24, %v6966_v12  ;;  %v6967_v40 = vmul.f32 %v15772_v21, %v6803_v1 }
 0x4d0   : > { %v7347_v48 = vadd.f32 %v7315_v52, %v7007_v47  ;;  %v7008_v16 = vadd.f32 %v15777_v24, %v6969_v41  ;;  %v7282_v47 = vmul.f32 %v15760_v37, %v15711_v30 }
 0x4d1   : > { %v7345_v4 = vadd.f32 %v7313_v49, %v7005_v9  ;;  %v7006_v29 = vadd.f32 %v15777_v24, %v6967_v40  ;;  %v7284_v49 = vmul.f32 %v15709_v17, %v15760_v37  ;;  %v7285_v17 = vmul.f32 %v15713_v3, %v15760_v37 }
 0x4d2   : > { %7379 = vst.msk [vmem:[%s15792_s15 + $0x10] sm:$0xff] %vm432_vm4, %v7347_v48  ;;  %v7348_v33 = vadd.f32 %v7316_v13, %v7008_v16  ;;  %v7321_v30 = vadd.f32 %v15766_v42, %v7282_v47  ;;  %v7283_v16 = vmul.f32 %v15760_v37, %v15715_v55  ;;  %v7292_v47 = vmul.f32 %v15725_v23, %v15760_v37 }
 0x4d3   : > { %7377 = vst.msk [vmem:[%s15792_s15] sm:$0xff] %vm432_vm4, %v7345_v4  ;;  %v7346_v6 = vadd.f32 %v7314_v5, %v7006_v29  ;;  %v7921_v44 = vpop.f32.mrb[20].mxu1  ;;  %v7323_v40 = vadd.f32 %v15766_v42, %v7284_v49  ;;  %v7293_v23 = vmul.f32 %v15729_v38, %v15760_v37 }
 0x4d4   : > { %7380 = vst.msk [vmem:[%s15792_s15 + $0x18] sm:$0xff] %vm432_vm4, %v7348_v33  ;;  %v6972_v2 = vmul.f32 %v7921_v44, %v15772_v21  ;;  %v6816_v57 = vpop.f32.mrb[21].mxu1  ;;  %v7322_v15 = vadd.f32 %v15766_v42, %v7283_v16 }
 0x4d5   : > { %7378 = vst.msk [vmem:[%s15792_s15 + $0x8] sm:$0xff] %vm432_vm4, %v7346_v6  ;;  %v6970_v27 = vmul.f32 %v15772_v21, %v6816_v57  ;;  %v7922_v63 = vpop.f32.mrb[22].mxu1  ;;  %v7324_v6 = vadd.f32 %v15766_v42, %v7285_v17 }
 0x4d6   : > { %v7011_v58 = vadd.f32 %v15777_v24, %v6972_v2  ;;  %v6973_v45 = vmul.f32 %v7922_v63, %v15772_v21  ;;  %v6819_v26 = vpop.f32.mrb[23].mxu1 }
 0x4d7   : > { %v7009_v52 = vadd.f32 %v15777_v24, %v6970_v27  ;;  %v6971_v54 = vmul.f32 %v15772_v21, %v6819_v26 }
 0x4d8   : > { %v7351_v53 = vadd.f32 %v7319_v51, %v7011_v58  ;;  %v7012_v43 = vadd.f32 %v15777_v24, %v6973_v45  ;;  %v7288_v51 = vmul.f32 %v15717_v25, %v15760_v37  ;;  %v7289_v25 = vmul.f32 %v15721_v35, %v15760_v37 }
 0x4d9   : > { %v7349_v12 = vadd.f32 %v7317_v31, %v7009_v52  ;;  %v7010_v39 = vadd.f32 %v15777_v24, %v6971_v54  ;;  %v7286_v31 = vmul.f32 %v15760_v37, %v15719_v18  ;;  %v7287_v52 = vmul.f32 %v15760_v37, %v15723_v32 }
 0x4da   : > { %7383 = vst.msk [vmem:[%s15792_s15 + $0x30] sm:$0xff] %vm432_vm4, %v7351_v53  ;;  %v7352_v41 = vadd.f32 %v7320_v46, %v7012_v43  ;;  %v7327_v58 = vadd.f32 %v15766_v42, %v7288_v51  ;;  %v7296_v51 = vmul.f32 %v15733_v11, %v15760_v37  ;;  %v7297_v11 = vmul.f32 %v15737_v14, %v15760_v37 }
 0x4db   : > { %7381 = vst.msk [vmem:[%s15792_s15 + $0x20] sm:$0xff] %vm432_vm4, %v7349_v12  ;;  %v7350_v1 = vadd.f32 %v7318_v0, %v7010_v39  ;;  %v7925_v9 = vpop.f32.mrb[24].mxu1  ;;  %v7325_v18 = vadd.f32 %v15766_v42, %v7286_v31  ;;  %v7328_v12 = vadd.f32 %v15766_v42, %v7289_v25  ;;  %v7294_v31 = vmul.f32 %v15760_v37, %v15735_v59 }
 0x4dc   : > { %7384 = vst.msk [vmem:[%s15792_s15 + $0x38] sm:$0xff] %vm432_vm4, %v7352_v41  ;;  %v6976_v13 = vmul.f32 %v7925_v9, %v15772_v21  ;;  %v6832_v48 = vpop.f32.mrb[25].mxu1  ;;  %v7326_v41 = vadd.f32 %v15766_v42, %v7287_v52 }
 0x4dd   : > { %7382 = vst.msk [vmem:[%s15792_s15 + $0x28] sm:$0xff] %vm432_vm4, %v7350_v1  ;;  %v6974_v62 = vmul.f32 %v15772_v21, %v6832_v48  ;;  %v7926_v5 = vpop.f32.mrb[26].mxu1  ;;  %v7333_v59 = vadd.f32 %v15766_v42, %v7294_v31 }
 0x4de   : > { %v7015_v4 = vadd.f32 %v15777_v24, %v6976_v13  ;;  %v6977_v29 = vmul.f32 %v7926_v5, %v15772_v21  ;;  %v6835_v3 = vpop.f32.mrb[27].mxu1  ;;  %v7291_v5 = vmul.f32 %v15760_v37, %v15731_v28 }
 0x4df   : > { %v7013_v22 = vadd.f32 %v15777_v24, %v6974_v62  ;;  %v6975_v33 = vmul.f32 %v15772_v21, %v6835_v3 }
 0x4e0   : > { %v7355_v44 = vadd.f32 %v7323_v40, %v7015_v4  ;;  %v7016_v55 = vadd.f32 %v15777_v24, %v6977_v29  ;;  %v7290_v40 = vmul.f32 %v15760_v37, %v15727_v34 }
 0x4e1   : > { %v7353_v2 = vadd.f32 %v7321_v30, %v7013_v22  ;;  %v7014_v57 = vadd.f32 %v15777_v24, %v6975_v33  ;;  %v7331_v30 = vadd.f32 %v15766_v42, %v7292_v47  ;;  %v7298_v47 = vmul.f32 %v15760_v37, %v15743_v36 }
 0x4e2   : > { %7387 = vst.msk [vmem:[%s15792_s15 + $0x50] sm:$0xff] %vm432_vm4, %v7355_v44  ;;  %v7356_v56 = vadd.f32 %v7324_v6, %v7016_v55  ;;  %v7329_v34 = vadd.f32 %v15766_v42, %v7290_v40  ;;  %v7332_v44 = vadd.f32 %v15766_v42, %v7293_v23 }
 0x4e3   : > { %7385 = vst.msk [vmem:[%s15792_s15 + $0x40] sm:$0xff] %vm432_vm4, %v7353_v2  ;;  %v7354_v27 = vadd.f32 %v7322_v15, %v7014_v57  ;;  %v7929_v63 = vpop.f32.mrb[28].mxu1  ;;  %v7330_v15 = vadd.f32 %v15766_v42, %v7291_v5  ;;  %v7337_v36 = vadd.f32 %v15766_v42, %v7298_v47 }
 0x4e4   : > { %7388 = vst.msk [vmem:[%s15792_s15 + $0x58] sm:$0xff] %vm432_vm4, %v7356_v56  ;;  %v6980_v45 = vmul.f32 %v7929_v63, %v15772_v21  ;;  %v6848_v26 = vpop.f32.mrb[29].mxu1 }
 0x4e5   : > { %7386 = vst.msk [vmem:[%s15792_s15 + $0x48] sm:$0xff] %vm432_vm4, %v7354_v27  ;;  %v6978_v54 = vmul.f32 %v15772_v21, %v6848_v26  ;;  %v7930_v46 = vpop.f32.mrb[30].mxu1  ;;  %v7295_v26 = vmul.f32 %v15760_v37, %v15739_v20 }
 0x4e6   : > { %v7019_v53 = vadd.f32 %v15777_v24, %v6980_v45  ;;  %v6981_v43 = vmul.f32 %v7930_v46, %v15772_v21  ;;  %v6851_v35 = vpop.f32.mrb[31].mxu1 }
 0x4e7   : > { %v7017_v49 = vadd.f32 %v15777_v24, %v6978_v54  ;;  %v6979_v0 = vmul.f32 %v15772_v21, %v6851_v35  ;;  %v7336_v35 = vadd.f32 %v15766_v42, %v7297_v11 }
 0x4e8   : > { %v7359_v39 = vadd.f32 %v7327_v58, %v7019_v53  ;;  %v7020_v32 = vadd.f32 %v15777_v24, %v6981_v43  ;;  %v7335_v58 = vadd.f32 %v15766_v42, %v7296_v51 }
 0x4e9   : > { %v7357_v1 = vadd.f32 %v7325_v18, %v7017_v49  ;;  %v7018_v9 = vadd.f32 %v15777_v24, %v6979_v0  ;;  %v7300_v0 = vmul.f32 %v15741_v60, %v15760_v37  ;;  %v7301_v60 = vmul.f32 %v15745_v7, %v15760_v37 }
 0x4ea   : > { %7391 = vst.msk [vmem:[%s15792_s15 + $0x70] sm:$0xff] %vm432_vm4, %v7359_v39  ;;  %v7360_v17 = vadd.f32 %v7328_v12, %v7020_v32  ;;  %v7334_v12 = vadd.f32 %v15766_v42, %v7295_v26 }
 0x4eb   : > { %7389 = vst.msk [vmem:[%s15792_s15 + $0x60] sm:$0xff] %vm432_vm4, %v7357_v1  ;;  %v7358_v13 = vadd.f32 %v7326_v41, %v7018_v9  ;;  %v7933_v48 = vpop.f32.mrb[32].mxu1  ;;  %v7339_v40 = vadd.f32 %v15766_v42, %v7300_v0 }
 0x4ec   : > { %7392 = vst.msk [vmem:[%s15792_s15 + $0x78] sm:$0xff] %vm432_vm4, %v7360_v17  ;;  %v6984_v16 = vmul.f32 %v7933_v48, %v15772_v21  ;;  %v6864_v62 = vpop.f32.mrb[33].mxu1  ;;  %v7299_v48 = vmul.f32 %v15760_v37, %v15747_v61 }
 0x4ed   : > { %7390 = vst.msk [vmem:[%s15792_s15 + $0x68] sm:$0xff] %vm432_vm4, %v7358_v13  ;;  %v6982_v4 = vmul.f32 %v15772_v21, %v6864_v62  ;;  %v7934_v29 = vpop.f32.mrb[34].mxu1 }
 0x4ee   : > { %v7023_v3 = vadd.f32 %v15777_v24, %v6984_v16  ;;  %v6985_v22 = vmul.f32 %v7934_v29, %v15772_v21  ;;  %v6867_v38 = vpop.f32.mrb[35].mxu1 }
 0x4ef   : > { %v7021_v33 = vadd.f32 %v15777_v24, %v6982_v4  ;;  %v6983_v6 = vmul.f32 %v15772_v21, %v6867_v38  ;;  %v7340_v4 = vadd.f32 %v15766_v42, %v7301_v60 }
 0x4f0   : > { %v7363_v55 = vadd.f32 %v7331_v30, %v7023_v3  ;;  %v7024_v28 = vadd.f32 %v15777_v24, %v6985_v22  ;;  %v7304_v3 = vmul.f32 %v15749_v50, %v15760_v37  ;;  %v7338_v22 = vadd.f32 %v15766_v42, %v7299_v48 }
 0x4f1   : > { %v7361_v2 = vadd.f32 %v7329_v34, %v7021_v33  ;;  %v7022_v57 = vadd.f32 %v15777_v24, %v6983_v6  ;;  %v7302_v6 = vmul.f32 %v15760_v37, %v15751_v19  ;;  %v7305_v50 = vmul.f32 %v15753_v8, %v15760_v37 }
 0x4f2   : > { %7395 = vst.msk [vmem:[%s15792_s15 + $0x90] sm:$0xff] %vm432_vm4, %v7363_v55  ;;  %v7364_v56 = vadd.f32 %v7332_v44, %v7024_v28  ;;  %v7343_v51 = vadd.f32 %v15766_v42, %v7304_v3 }
 0x4f3   : > { %7393 = vst.msk [vmem:[%s15792_s15 + $0x80] sm:$0xff] %vm432_vm4, %v7361_v2  ;;  %v7362_v27 = vadd.f32 %v7330_v15, %v7022_v57  ;;  %v7937_v63 = vpop.f32.mrb[36].mxu1  ;;  %v7341_v19 = vadd.f32 %v15766_v42, %v7302_v6  ;;  %v7303_v57 = vmul.f32 %v15760_v37, %v15755_v10 }
 0x4f4   : > { %7396 = vst.msk [vmem:[%s15792_s15 + $0x98] sm:$0xff] %vm432_vm4, %v7364_v56  ;;  %v6988_v25 = vmul.f32 %v7937_v63, %v15772_v21  ;;  %v6880_v45 = vpop.f32.mrb[37].mxu1 }
 0x4f5   : > { %7394 = vst.msk [vmem:[%s15792_s15 + $0x88] sm:$0xff] %vm432_vm4, %v7362_v27  ;;  %v6986_v18 = vmul.f32 %v15772_v21, %v6880_v45  ;;  %v7938_v52 = vpop.f32.mrb[38].mxu1  ;;  %v7342_v37 = vadd.f32 %v15766_v42, %v7303_v57 }
 0x4f6   : > { %v7027_v54 = vadd.f32 %v15777_v24, %v6988_v25  ;;  %v6989_v46 = vmul.f32 %v7938_v52, %v15772_v21  ;;  %v6883_v14 = vpop.f32.mrb[39].mxu1  ;;  %v7344_v25 = vadd.f32 %v15766_v42, %v7305_v50 }
 0x4f7   : > { %v7025_v53 = vadd.f32 %v15777_v24, %v6986_v18  ;;  %v6987_v43 = vmul.f32 %v15772_v21, %v6883_v14 }
 0x4f8   : > { %v7367_v49 = vadd.f32 %v7335_v58, %v7027_v54  ;;  %v7028_v20 = vadd.f32 %v15777_v24, %v6989_v46 }
 0x4f9   : > { %v7365_v39 = vadd.f32 %v7333_v59, %v7025_v53  ;;  %v7026_v32 = vadd.f32 %v15777_v24, %v6987_v43 }
 0x4fa   : > { %7399 = vst.msk [vmem:[%s15792_s15 + $0xb0] sm:$0xff] %vm432_vm4, %v7367_v49  ;;  %v7368_v41 = vadd.f32 %v7336_v35, %v7028_v20 }
 0x4fb   : > { %7397 = vst.msk [vmem:[%s15792_s15 + $0xa0] sm:$0xff] %vm432_vm4, %v7365_v39  ;;  %v7366_v1 = vadd.f32 %v7334_v12, %v7026_v32  ;;  %v7941_v9 = vpop.f32.mrb[40].mxu1 }
 0x4fc   : > { %7400 = vst.msk [vmem:[%s15792_s15 + $0xb8] sm:$0xff] %vm432_vm4, %v7368_v41  ;;  %v6992_v17 = vmul.f32 %v7941_v9, %v15772_v21  ;;  %v6896_v13 = vpop.f32.mrb[41].mxu1 }
 0x4fd   : > { %7398 = vst.msk [vmem:[%s15792_s15 + $0xa8] sm:$0xff] %vm432_vm4, %v7366_v1  ;;  %v6990_v30 = vmul.f32 %v15772_v21, %v6896_v13  ;;  %v7942_v23 = vpop.f32.mrb[42].mxu1 }
 0x4fe   : > { %v7031_v16 = vadd.f32 %v15777_v24, %v6992_v17  ;;  %v6993_v62 = vmul.f32 %v7942_v23, %v15772_v21  ;;  %v6899_v7 = vpop.f32.mrb[43].mxu1 }
 0x4ff   : > { %v7029_v34 = vadd.f32 %v15777_v24, %v6990_v30  ;;  %v6991_v5 = vmul.f32 %v15772_v21, %v6899_v7 }
 0x500   : > { %v7371_v29 = vadd.f32 %v7339_v40, %v7031_v16  ;;  %v7032_v61 = vadd.f32 %v15777_v24, %v6993_v62 }
 0x501   : > { %v7369_v38 = vadd.f32 %v7337_v36, %v7029_v34  ;;  %v7030_v33 = vadd.f32 %v15777_v24, %v6991_v5 }
 0x502   : > { %7403 = vst.msk [vmem:[%s15792_s15 + $0xd0] sm:$0xff] %vm432_vm4, %v7371_v29  ;;  %v7372_v44 = vadd.f32 %v7340_v4, %v7032_v61 }
 0x503   : > { %7401 = vst.msk [vmem:[%s15792_s15 + $0xc0] sm:$0xff] %vm432_vm4, %v7369_v38  ;;  %v7370_v55 = vadd.f32 %v7338_v22, %v7030_v33 }
 0x504   : > { %v7945_v28 = vpop.f32.mrb[44].mxu1  ;;  %7404 = vst.msk [vmem:[%s15792_s15 + $0xd8] sm:$0xff] %vm432_vm4, %v7372_v44 }
 0x505   : > { %v6996_v15 = vmul.f32 %v7945_v28, %v15772_v21  ;;  %v6912_v2 = vpop.f32.mrb[45].mxu1  ;;  %7402 = vst.msk [vmem:[%s15792_s15 + $0xc8] sm:$0xff] %vm432_vm4, %v7370_v55 }
 0x506   : > { %v6994_v31 = vmul.f32 %v15772_v21, %v6912_v2  ;;  %v7946_v56 = vpop.f32.mrb[46].mxu1 }
 0x507   : > { %v7035_v27 = vadd.f32 %v15777_v24, %v6996_v15  ;;  %v6997_v8 = vmul.f32 %v7946_v56, %v15772_v21  ;;  %v6915_v63 = vpop.f32.mrb[47].mxu1 }
 0x508   : > { %v7033_v58 = vadd.f32 %v15777_v24, %v6994_v31  ;;  %v6995_v11 = vmul.f32 %v15772_v21, %v6915_v63 }
 0x509   : > { %v7375_v45 = vadd.f32 %v7343_v51, %v7035_v27  ;;  %v7036_v10 = vadd.f32 %v15777_v24, %v6997_v8 }
 0x50a   : > { %v7373_v59 = vadd.f32 %v7341_v19, %v7033_v58  ;;  %v7034_v26 = vadd.f32 %v15777_v24, %v6995_v11 }
 0x50b   : > { %7407 = vst.msk [vmem:[%s15792_s15 + $0xf0] sm:$0xff] %vm432_vm4, %v7375_v45  ;;  %v7376_v18 = vadd.f32 %v7344_v25, %v7036_v10 }
 0x50c   : > { %7405 = vst.msk [vmem:[%s15792_s15 + $0xe0] sm:$0xff] %vm432_vm4, %v7373_v59  ;;  %v7374_v52 = vadd.f32 %v7342_v37, %v7034_v26 }
 0x50d   : > { %7408 = vst.msk [vmem:[%s15792_s15 + $0xf8] sm:$0xff] %vm432_vm4, %v7376_v18 }
 0x50e   : > { %7406 = vst.msk [vmem:[%s15792_s15 + $0xe8] sm:$0xff] %vm432_vm4, %v7374_v52 }
 0x50f PF: > { %s21_s17 = sadd.s32 1, %s9751_s17  }
 0x510   : > { %p18_p4 = scmp.ge.s32.totalorder %s21_s17, 4  }
 0x512   :  { %20 = sbr.rel (!%p18_p4) target bundleno = 1 (0x1), region = 104 }

</bundles_post_ra>
